<compile_context>
chip_gen: v6e
topology: v6e:2x2x1
jax: 0.10.0
libtpu: 0.0.40
codegen_flags: <defaults>
</compile_context>

<pallas_src>
import jax
import jax.numpy as jnp
from jax import lax
from jax.experimental import pallas as pl
from jax.experimental.pallas import tpu as pltpu

# ---- hyperparameters mirroring gpt.py ----
N_EMBD = 192
N_HEAD = 4
HEAD_SIZE = N_EMBD // N_HEAD          # 48
HEAD_PAD = 128                        # per-head slab padded to one lane tile
QKV_PAD = N_HEAD * HEAD_PAD           # 512
FF_DIM = 4 * N_EMBD                   # 768
N_LAYER = 2
BLOCK_SIZE = 256
VOCAB_SIZE = 40                       # synthetic (original derived from text files)
VOCAB_PAD = 128                       # lane-dense logits store
LN_EPS = 1e-5                         # nn.LayerNorm default


def _layernorm(x, gamma, beta):
    mean = jnp.mean(x, axis=-1, keepdims=True)
    var = jnp.mean((x - mean) ** 2, axis=-1, keepdims=True)
    return (x - mean) * lax.rsqrt(var + LN_EPS) * gamma + beta


def gpt_forward_kernel(mask_ref, x_ref,
                       ln1_g_ref, ln1_b_ref, wqkv_ref, bqkv_ref,
                       wproj_ref, bproj_ref,
                       ln2_g_ref, ln2_b_ref, w1_ref, b1_ref, w2_ref, b2_ref,
                       lnf_g_ref, lnf_b_ref, wlm_ref, blm_ref,
                       logits_ref):
    """Entire GPT forward (all layers + final LN + lm_head) for one batch tile."""
    BT, T, C = x_ref.shape                         # (B_TILE, T, C)
    M = BT * T
    x = x_ref[...].astype(jnp.float32).reshape(M, C)   # f32 residual stream
    mask = mask_ref[...]                           # (T, T) additive causal mask

    for l in range(N_LAYER):                       # static unroll (N_LAYER = 2)
        # ---- multi-head causal self-attention on LN1(x) ----
        xn = _layernorm(x, ln1_g_ref[l], ln1_b_ref[l]).astype(jnp.bfloat16)
        # fused QKV projection: one matmul, one bias add, one bf16 cast
        qkv = (jnp.dot(xn, wqkv_ref[l], preferred_element_type=jnp.float32)
               + bqkv_ref[l]).astype(jnp.bfloat16)          # (M, 3*QKV_PAD)

        head_outs = []
        for h in range(N_HEAD):                    # static unroll, 128-aligned slabs
            lo = h * HEAD_PAD
            qh = qkv[:, lo:lo + HEAD_PAD].reshape(BT, T, HEAD_PAD)
            kh = qkv[:, QKV_PAD + lo:QKV_PAD + lo + HEAD_PAD].reshape(BT, T, HEAD_PAD)
            vh = qkv[:, 2 * QKV_PAD + lo:2 * QKV_PAD + lo + HEAD_PAD].reshape(
                BT, T, HEAD_PAD)
            # contracting dims are the last dim of both operands -> no vxpose
            wei = jnp.einsum('btd,bsd->bts', qh, kh,
                             preferred_element_type=jnp.float32) + mask
            wei = jnp.exp(wei - jnp.max(wei, axis=-1, keepdims=True))
            wei = wei * pl.reciprocal(jnp.sum(wei, axis=-1, keepdims=True),
                                      approx=True)
            # attention dropout -> identity at inference
            oh = jnp.einsum('bts,bsd->btd', wei.astype(jnp.bfloat16), vh,
                            preferred_element_type=jnp.float32)   # (BT, T, 128)
            head_outs.append(oh.astype(jnp.bfloat16))
        # lane-concat of whole 128-lane tiles, single K=512 output projection
        att = jnp.concatenate(head_outs, axis=-1).reshape(M, QKV_PAD)
        sa = (jnp.dot(att, wproj_ref[l], preferred_element_type=jnp.float32)
              + bproj_ref[l])
        x = x + sa                                  # residual 1

        # ---- FeedForward on LN2(x): Linear -> ReLU -> Linear ----
        xn2 = _layernorm(x, ln2_g_ref[l], ln2_b_ref[l]).astype(jnp.bfloat16)
        hdn = jnp.maximum(
            jnp.dot(xn2, w1_ref[l], preferred_element_type=jnp.float32)
            + b1_ref[l], 0.0).astype(jnp.bfloat16)
        ff = jnp.dot(hdn, w2_ref[l], preferred_element_type=jnp.float32) + b2_ref[l]
        x = x + ff                                  # residual 2

    # ---- final LayerNorm + lm_head (vocab padded to 128 lanes) ----
    xf = _layernorm(x, lnf_g_ref[...], lnf_b_ref[...]).astype(jnp.bfloat16)
    logits = (jnp.dot(xf, wlm_ref[...], preferred_element_type=jnp.float32)
              + blm_ref[...])
    logits_ref[...] = logits.reshape(BT, T, VOCAB_PAD).astype(logits_ref.dtype)


_PARAM_KEYS = ('ln1_g', 'ln1_b', 'wqkv', 'bqkv', 'wproj', 'bproj',
               'ln2_g', 'ln2_b', 'w1', 'b1', 'w2', 'b2',
               'lnf_g', 'lnf_b', 'wlm', 'blm')


def _replicated_spec(arr):
    """Full-array block, same block every grid step (stays VMEM-resident)."""
    nd = arr.ndim
    return pl.BlockSpec(arr.shape, lambda b, _nd=nd: (0,) * _nd)


def _pick_b_tile(B, T):
    """Choose a batch tile that fills the MXU M dim (aim >= 256 rows) without
    blowing VMEM; keep >=2 grid steps (v7x megacore) when it does not shrink M
    below 256."""
    divisors = [d for d in range(1, B + 1) if B % d == 0]
    ok = [d for d in divisors if d * T <= 1024]
    if not ok:
        return 1
    for d in sorted(ok, reverse=True):
        if B // d >= 2 and d * T >= 256:
            return d
    return max(ok)


def gpt_forward(idx, params, targets=None):
    """Mirrors GPTLanguageModel.forward: returns (logits, loss)."""
    B, T = idx.shape
    tok_emb = params['tok_emb'][idx]                   # (B, T, C) - gather glue
    pos_emb = params['pos_emb'][:T]                    # (T, C)
    x = (tok_emb + pos_emb[None, :, :]).astype(jnp.bfloat16)   # bf16 activation DMA

    # additive causal mask, built once per call (replicated kernel input)
    row = jnp.arange(T, dtype=jnp.int32)[:, None]
    col = jnp.arange(T, dtype=jnp.int32)[None, :]
    mask = jnp.where(col <= row, 0.0, -1e9).astype(jnp.float32)

    b_tile = _pick_b_tile(B, T)
    grid = (B // b_tile,)

    weights = [params[k] for k in _PARAM_KEYS]
    logits_pad = pl.pallas_call(
        gpt_forward_kernel,
        out_shape=jax.ShapeDtypeStruct((B, T, VOCAB_PAD), jnp.float32),
        grid=grid,
        in_specs=[_replicated_spec(mask),
                  pl.BlockSpec((b_tile, T, N_EMBD), lambda b: (b, 0, 0))]
                 + [_replicated_spec(w) for w in weights],
        out_specs=pl.BlockSpec((b_tile, T, VOCAB_PAD), lambda b: (b, 0, 0)),
        compiler_params=pltpu.CompilerParams(
            dimension_semantics=("parallel",),         # shard batch tiles across TCs
            vmem_limit_bytes=16 * 1024 * 1024),        # footprint is a few MiB
    )(mask, x, *weights)
    logits = logits_pad[:, :, :VOCAB_SIZE]             # drop padded vocab lanes

    loss = None
    if targets is not None:
        # cross-entropy over (B*T, V) - plain JAX glue (not a hot kernel path)
        flat_logits = logits.reshape(B * T, VOCAB_SIZE)
        flat_tgt = targets.reshape(B * T)
        logz = jax.nn.logsumexp(flat_logits, axis=-1)
        nll = logz - jnp.take_along_axis(flat_logits, flat_tgt[:, None], axis=-1)[:, 0]
        loss = jnp.mean(nll)
    return logits, loss
    # TODO(synk): generate() uses torch.multinomial sampling; not implemented here.


def init_params(key):
    """Deterministic init matching _init_weights: Linear/Embedding ~ N(0, 0.02),
    biases 0.  q/k/v/proj are laid out per head and zero-padded to 128 lanes per
    head, q/k/v are fused into one (C, 3*QKV_PAD) weight with 1/sqrt(head_size)
    folded into the q columns/bias; lm_head is zero-padded to 128 vocab lanes.
    Zero padding and the folded scale do not change the computed result."""
    keys = iter(jax.random.split(key, 64))

    def normal(shape):
        return 0.02 * jax.random.normal(next(keys), shape, jnp.float32)

    scale = HEAD_SIZE ** -0.5

    def pad_heads_cols(w):      # (C, C) -> (C, QKV_PAD): per-head 128-lane slabs
        wp = jnp.zeros((N_EMBD, QKV_PAD), jnp.float32)
        for h in range(N_HEAD):
            wp = wp.at[:, h * HEAD_PAD:h * HEAD_PAD + HEAD_SIZE].set(
                w[:, h * HEAD_SIZE:(h + 1) * HEAD_SIZE])
        return wp

    def pad_heads_rows(w):      # (C, C) -> (QKV_PAD, C): per-head 128-row slabs
        wp = jnp.zeros((QKV_PAD, N_EMBD), jnp.float32)
        for h in range(N_HEAD):
            wp = wp.at[h * HEAD_PAD:h * HEAD_PAD + HEAD_SIZE, :].set(
                w[h * HEAD_SIZE:(h + 1) * HEAD_SIZE, :])
        return wp

    layer_keys = ('ln1_g', 'ln1_b', 'wqkv', 'bqkv', 'wproj', 'bproj',
                  'ln2_g', 'ln2_b', 'w1', 'b1', 'w2', 'b2')
    layers = {k: [] for k in layer_keys}
    for _ in range(N_LAYER):
        layers['ln1_g'].append(jnp.ones((1, N_EMBD), jnp.float32))
        layers['ln1_b'].append(jnp.zeros((1, N_EMBD), jnp.float32))
        wq = pad_heads_cols(normal((N_EMBD, N_EMBD))) * scale   # fold 1/sqrt(hs)
        wk = pad_heads_cols(normal((N_EMBD, N_EMBD)))
        wv = pad_heads_cols(normal((N_EMBD, N_EMBD)))
        layers['wqkv'].append(jnp.concatenate([wq, wk, wv], axis=1))
        bq = jnp.zeros((1, QKV_PAD), jnp.float32) * scale       # zero, but fold anyway
        bk = jnp.zeros((1, QKV_PAD), jnp.float32)
        bv = jnp.zeros((1, QKV_PAD), jnp.float32)
        layers['bqkv'].append(jnp.concatenate([bq, bk, bv], axis=1))
        layers['wproj'].append(pad_heads_rows(normal((N_EMBD, N_EMBD))))
        layers['bproj'].append(jnp.zeros((1, N_EMBD), jnp.float32))
        layers['ln2_g'].append(jnp.ones((1, N_EMBD), jnp.float32))
        layers['ln2_b'].append(jnp.zeros((1, N_EMBD), jnp.float32))
        layers['w1'].append(normal((N_EMBD, FF_DIM)))
        layers['b1'].append(jnp.zeros((1, FF_DIM), jnp.float32))
        layers['w2'].append(normal((FF_DIM, N_EMBD)))
        layers['b2'].append(jnp.zeros((1, N_EMBD), jnp.float32))

    matmul_keys = {'wqkv', 'wproj', 'w1', 'w2'}
    params = {'tok_emb': normal((VOCAB_SIZE, N_EMBD)),
              'pos_emb': normal((BLOCK_SIZE, N_EMBD))}
    for k, vals in layers.items():
        stacked = jnp.stack(vals, axis=0)
        params[k] = stacked.astype(jnp.bfloat16) if k in matmul_keys else stacked

    params['lnf_g'] = jnp.ones((1, N_EMBD), jnp.float32)
    params['lnf_b'] = jnp.zeros((1, N_EMBD), jnp.float32)
    wlm = jnp.zeros((N_EMBD, VOCAB_PAD), jnp.float32).at[:, :VOCAB_SIZE].set(
        normal((N_EMBD, VOCAB_SIZE)))
    params['wlm'] = wlm.astype(jnp.bfloat16)
    params['blm'] = jnp.zeros((1, VOCAB_PAD), jnp.float32)
    return params


if __name__ == "__main__":
    key = jax.random.PRNGKey(0)
    pkey, ikey = jax.random.split(key)
    params = init_params(pkey)

    B, T = 2, 16                                       # small shapes, T <= block_size
    idx = jax.random.randint(ikey, (B, T), 0, VOCAB_SIZE, dtype=jnp.int32)

    logits, loss = gpt_forward(idx, params, targets=None)
    logits = jax.block_until_ready(logits)

    assert logits.shape == (B, T, VOCAB_SIZE)
    assert bool(jnp.all(jnp.isfinite(logits)))
    print("KERNEL_OK")
</pallas_src>

<mosaic_0001>
module attributes {stable_mosaic.version = 11 : i64} {
  func.func @gpt_forward_kernel(%arg0: i32, %arg1: memref<16x16xf32, #tpu.memory_space<vmem>>, %arg2: memref<2x16x192xbf16, #tpu.memory_space<vmem>>, %arg3: memref<2x1x192xf32, #tpu.memory_space<vmem>>, %arg4: memref<2x1x192xf32, #tpu.memory_space<vmem>>, %arg5: memref<2x192x1536xbf16, #tpu.memory_space<vmem>>, %arg6: memref<2x1x1536xf32, #tpu.memory_space<vmem>>, %arg7: memref<2x512x192xbf16, #tpu.memory_space<vmem>>, %arg8: memref<2x1x192xf32, #tpu.memory_space<vmem>>, %arg9: memref<2x1x192xf32, #tpu.memory_space<vmem>>, %arg10: memref<2x1x192xf32, #tpu.memory_space<vmem>>, %arg11: memref<2x192x768xbf16, #tpu.memory_space<vmem>>, %arg12: memref<2x1x768xf32, #tpu.memory_space<vmem>>, %arg13: memref<2x768x192xbf16, #tpu.memory_space<vmem>>, %arg14: memref<2x1x192xf32, #tpu.memory_space<vmem>>, %arg15: memref<1x192xf32, #tpu.memory_space<vmem>>, %arg16: memref<1x192xf32, #tpu.memory_space<vmem>>, %arg17: memref<192x128xbf16, #tpu.memory_space<vmem>>, %arg18: memref<1x128xf32, #tpu.memory_space<vmem>>, %arg19: memref<2x16x128xf32, #tpu.memory_space<vmem>>) attributes {dimension_semantics = [#tpu.dimension_semantics<parallel>], iteration_bounds = array<i64: 1>, scalar_prefetch = 0 : i64, scratch_operands = 0 : i64, tpu.core_type = #tpu.core_type<tc>, window_params = [{pipeline_mode = #tpu.pipeline_mode<synchronous>, transform_indices = @transform_0, window_bounds = array<i64: 16, 16>}, {transform_indices = @transform_1, window_bounds = array<i64: 2, 16, 192>}, {pipeline_mode = #tpu.pipeline_mode<synchronous>, transform_indices = @transform_2, window_bounds = array<i64: 2, 1, 192>}, {pipeline_mode = #tpu.pipeline_mode<synchronous>, transform_indices = @transform_3, window_bounds = array<i64: 2, 1, 192>}, {pipeline_mode = #tpu.pipeline_mode<synchronous>, transform_indices = @transform_4, window_bounds = array<i64: 2, 192, 1536>}, {pipeline_mode = #tpu.pipeline_mode<synchronous>, transform_indices = @transform_5, window_bounds = array<i64: 2, 1, 1536>}, {pipeline_mode = #tpu.pipeline_mode<synchronous>, transform_indices = @transform_6, window_bounds = array<i64: 2, 512, 192>}, {pipeline_mode = #tpu.pipeline_mode<synchronous>, transform_indices = @transform_7, window_bounds = array<i64: 2, 1, 192>}, {pipeline_mode = #tpu.pipeline_mode<synchronous>, transform_indices = @transform_8, window_bounds = array<i64: 2, 1, 192>}, {pipeline_mode = #tpu.pipeline_mode<synchronous>, transform_indices = @transform_9, window_bounds = array<i64: 2, 1, 192>}, {pipeline_mode = #tpu.pipeline_mode<synchronous>, transform_indices = @transform_10, window_bounds = array<i64: 2, 192, 768>}, {pipeline_mode = #tpu.pipeline_mode<synchronous>, transform_indices = @transform_11, window_bounds = array<i64: 2, 1, 768>}, {pipeline_mode = #tpu.pipeline_mode<synchronous>, transform_indices = @transform_12, window_bounds = array<i64: 2, 768, 192>}, {pipeline_mode = #tpu.pipeline_mode<synchronous>, transform_indices = @transform_13, window_bounds = array<i64: 2, 1, 192>}, {pipeline_mode = #tpu.pipeline_mode<synchronous>, transform_indices = @transform_14, window_bounds = array<i64: 1, 192>}, {pipeline_mode = #tpu.pipeline_mode<synchronous>, transform_indices = @transform_15, window_bounds = array<i64: 1, 192>}, {pipeline_mode = #tpu.pipeline_mode<synchronous>, transform_indices = @transform_16, window_bounds = array<i64: 192, 128>}, {pipeline_mode = #tpu.pipeline_mode<synchronous>, transform_indices = @transform_17, window_bounds = array<i64: 1, 128>}, {transform_indices = @transform_18, window_bounds = array<i64: 2, 16, 128>}]} {
    %c0 = arith.constant 0 : index
    %c0_0 = arith.constant 0 : index
    %c0_1 = arith.constant 0 : index
    %0 = vector.load %arg2[%c0, %c0_0, %c0_1] : memref<2x16x192xbf16, #tpu.memory_space<vmem>>, vector<2x16x192xbf16>
    %1 = arith.extf %0 : vector<2x16x192xbf16> to vector<2x16x192xf32>
    %2 = vector.shape_cast %1 : vector<2x16x192xf32> to vector<32x192xf32>
    %c0_2 = arith.constant 0 : index
    %c0_3 = arith.constant 0 : index
    %3 = vector.load %arg1[%c0_2, %c0_3] : memref<16x16xf32, #tpu.memory_space<vmem>>, vector<16x16xf32>
    %c0_4 = arith.constant 0 : index
    %c0_5 = arith.constant 0 : index
    %c0_6 = arith.constant 0 : index
    %4 = vector.load %arg3[%c0_4, %c0_5, %c0_6] : memref<2x1x192xf32, #tpu.memory_space<vmem>>, vector<1x1x192xf32>
    %5 = vector.shape_cast %4 : vector<1x1x192xf32> to vector<1x192xf32>
    %c0_7 = arith.constant 0 : index
    %c0_8 = arith.constant 0 : index
    %c0_9 = arith.constant 0 : index
    %6 = vector.load %arg4[%c0_7, %c0_8, %c0_9] : memref<2x1x192xf32, #tpu.memory_space<vmem>>, vector<1x1x192xf32>
    %7 = vector.shape_cast %6 : vector<1x1x192xf32> to vector<1x192xf32>
    %cst = arith.constant dense<0.000000e+00> : vector<32xf32>
    %8 = vector.multi_reduction <add>, %2, %cst [1] : vector<32x192xf32> to vector<32xf32>
    %9 = vector.shape_cast %8 : vector<32xf32> to vector<32x1xf32>
    %cst_10 = arith.constant 1.920000e+02 : f32
    %10 = vector.broadcast %cst_10 : f32 to vector<32x1xf32>
    %11 = arith.divf %9, %10 : vector<32x1xf32>
    %12 = vector.broadcast %11 : vector<32x1xf32> to vector<32x192xf32>
    %13 = arith.subf %2, %12 : vector<32x192xf32>
    %14 = arith.mulf %13, %13 : vector<32x192xf32>
    %cst_11 = arith.constant dense<0.000000e+00> : vector<32xf32>
    %15 = vector.multi_reduction <add>, %14, %cst_11 [1] : vector<32x192xf32> to vector<32xf32>
    %16 = vector.shape_cast %15 : vector<32xf32> to vector<32x1xf32>
    %cst_12 = arith.constant 1.920000e+02 : f32
    %17 = vector.broadcast %cst_12 : f32 to vector<32x1xf32>
    %18 = arith.divf %16, %17 : vector<32x1xf32>
    %19 = vector.broadcast %11 : vector<32x1xf32> to vector<32x192xf32>
    %20 = arith.subf %2, %19 : vector<32x192xf32>
    %cst_13 = arith.constant 9.99999974E-6 : f32
    %21 = vector.broadcast %cst_13 : f32 to vector<32x1xf32>
    %22 = arith.addf %18, %21 : vector<32x1xf32>
    %23 = math.rsqrt %22 : vector<32x1xf32>
    %24 = vector.broadcast %23 : vector<32x1xf32> to vector<32x192xf32>
    %25 = arith.mulf %20, %24 : vector<32x192xf32>
    %26 = vector.broadcast %5 : vector<1x192xf32> to vector<32x192xf32>
    %27 = arith.mulf %25, %26 : vector<32x192xf32>
    %28 = vector.broadcast %7 : vector<1x192xf32> to vector<32x192xf32>
    %29 = arith.addf %27, %28 : vector<32x192xf32>
    %30 = arith.truncf %29 : vector<32x192xf32> to vector<32x192xbf16>
    %c0_14 = arith.constant 0 : index
    %c0_15 = arith.constant 0 : index
    %c0_16 = arith.constant 0 : index
    %31 = vector.load %arg5[%c0_14, %c0_15, %c0_16] : memref<2x192x1536xbf16, #tpu.memory_space<vmem>>, vector<1x192x1536xbf16>
    %32 = vector.shape_cast %31 : vector<1x192x1536xbf16> to vector<192x1536xbf16>
    %cst_17 = arith.constant dense<0.000000e+00> : vector<32x1536xf32>
    %33 = tpu.matmul %30, %32, %cst_17 {dimension_numbers = #tpu.dot_dimension_numbers<[1], [0], [0], [1], [0, 0, 1, 1], [], []>} : vector<32x192xbf16>, vector<192x1536xbf16>, vector<32x1536xf32> -> vector<32x1536xf32>
    %c0_18 = arith.constant 0 : index
    %c0_19 = arith.constant 0 : index
    %c0_20 = arith.constant 0 : index
    %34 = vector.load %arg6[%c0_18, %c0_19, %c0_20] : memref<2x1x1536xf32, #tpu.memory_space<vmem>>, vector<1x1x1536xf32>
    %35 = vector.shape_cast %34 : vector<1x1x1536xf32> to vector<1x1536xf32>
    %36 = vector.broadcast %35 : vector<1x1536xf32> to vector<32x1536xf32>
    %37 = arith.addf %33, %36 : vector<32x1536xf32>
    %38 = arith.truncf %37 : vector<32x1536xf32> to vector<32x1536xbf16>
    %39 = vector.extract_strided_slice %38 {offsets = [0, 0], sizes = [32, 128], strides = [1, 1]} : vector<32x1536xbf16> to vector<32x128xbf16>
    %40 = vector.shape_cast %39 : vector<32x128xbf16> to vector<2x16x128xbf16>
    %41 = vector.extract_strided_slice %38 {offsets = [0, 512], sizes = [32, 128], strides = [1, 1]} : vector<32x1536xbf16> to vector<32x128xbf16>
    %42 = vector.shape_cast %41 : vector<32x128xbf16> to vector<2x16x128xbf16>
    %43 = vector.extract_strided_slice %38 {offsets = [0, 1024], sizes = [32, 128], strides = [1, 1]} : vector<32x1536xbf16> to vector<32x128xbf16>
    %44 = vector.shape_cast %43 : vector<32x128xbf16> to vector<2x16x128xbf16>
    "tpu.trace_start"() <{level = 10 : i32, message = "btd,bsd->bts"}> : () -> ()
    %cst_21 = arith.constant dense<0.000000e+00> : vector<2x16x16xf32>
    %45 = tpu.matmul %40, %42, %cst_21 {dimension_numbers = #tpu.dot_dimension_numbers<[2], [2], [1], [1], [0, 0, 0, 1, 1, 1], [0], [0]>} : vector<2x16x128xbf16>, vector<2x16x128xbf16>, vector<2x16x16xf32> -> vector<2x16x16xf32>
    "tpu.trace_stop"() : () -> ()
    %46 = vector.shape_cast %3 : vector<16x16xf32> to vector<1x16x16xf32>
    %47 = vector.broadcast %46 : vector<1x16x16xf32> to vector<2x16x16xf32>
    %48 = arith.addf %45, %47 : vector<2x16x16xf32>
    %cst_22 = arith.constant dense<0xFF800000> : vector<2x16xf32>
    %49 = vector.multi_reduction <maximumf>, %48, %cst_22 [2] : vector<2x16x16xf32> to vector<2x16xf32>
    %50 = vector.shape_cast %49 : vector<2x16xf32> to vector<2x16x1xf32>
    %51 = vector.broadcast %50 : vector<2x16x1xf32> to vector<2x16x16xf32>
    %52 = arith.subf %48, %51 : vector<2x16x16xf32>
    %53 = math.exp %52 : vector<2x16x16xf32>
    %cst_23 = arith.constant dense<0.000000e+00> : vector<2x16xf32>
    %54 = vector.multi_reduction <add>, %53, %cst_23 [2] : vector<2x16x16xf32> to vector<2x16xf32>
    %55 = vector.shape_cast %54 : vector<2x16xf32> to vector<2x16x1xf32>
    %56 = tpu.reciprocal %55 {approx = true} : vector<2x16x1xf32> -> vector<2x16x1xf32>
    %57 = vector.broadcast %56 : vector<2x16x1xf32> to vector<2x16x16xf32>
    %58 = arith.mulf %53, %57 : vector<2x16x16xf32>
    %59 = arith.truncf %58 : vector<2x16x16xf32> to vector<2x16x16xbf16>
    "tpu.trace_start"() <{level = 10 : i32, message = "bts,bsd->btd"}> : () -> ()
    %cst_24 = arith.constant dense<0.000000e+00> : vector<2x16x128xf32>
    %60 = tpu.matmul %59, %44, %cst_24 {dimension_numbers = #tpu.dot_dimension_numbers<[2], [1], [1], [2], [0, 0, 0, 1, 1, 2], [0], [0]>} : vector<2x16x16xbf16>, vector<2x16x128xbf16>, vector<2x16x128xf32> -> vector<2x16x128xf32>
    "tpu.trace_stop"() : () -> ()
    %61 = arith.truncf %60 : vector<2x16x128xf32> to vector<2x16x128xbf16>
    %62 = vector.extract_strided_slice %38 {offsets = [0, 128], sizes = [32, 128], strides = [1, 1]} : vector<32x1536xbf16> to vector<32x128xbf16>
    %63 = vector.shape_cast %62 : vector<32x128xbf16> to vector<2x16x128xbf16>
    %64 = vector.extract_strided_slice %38 {offsets = [0, 640], sizes = [32, 128], strides = [1, 1]} : vector<32x1536xbf16> to vector<32x128xbf16>
    %65 = vector.shape_cast %64 : vector<32x128xbf16> to vector<2x16x128xbf16>
    %66 = vector.extract_strided_slice %38 {offsets = [0, 1152], sizes = [32, 128], strides = [1, 1]} : vector<32x1536xbf16> to vector<32x128xbf16>
    %67 = vector.shape_cast %66 : vector<32x128xbf16> to vector<2x16x128xbf16>
    "tpu.trace_start"() <{level = 10 : i32, message = "btd,bsd->bts"}> : () -> ()
    %cst_25 = arith.constant dense<0.000000e+00> : vector<2x16x16xf32>
    %68 = tpu.matmul %63, %65, %cst_25 {dimension_numbers = #tpu.dot_dimension_numbers<[2], [2], [1], [1], [0, 0, 0, 1, 1, 1], [0], [0]>} : vector<2x16x128xbf16>, vector<2x16x128xbf16>, vector<2x16x16xf32> -> vector<2x16x16xf32>
    "tpu.trace_stop"() : () -> ()
    %69 = vector.shape_cast %3 : vector<16x16xf32> to vector<1x16x16xf32>
    %70 = vector.broadcast %69 : vector<1x16x16xf32> to vector<2x16x16xf32>
    %71 = arith.addf %68, %70 : vector<2x16x16xf32>
    %cst_26 = arith.constant dense<0xFF800000> : vector<2x16xf32>
    %72 = vector.multi_reduction <maximumf>, %71, %cst_26 [2] : vector<2x16x16xf32> to vector<2x16xf32>
    %73 = vector.shape_cast %72 : vector<2x16xf32> to vector<2x16x1xf32>
    %74 = vector.broadcast %73 : vector<2x16x1xf32> to vector<2x16x16xf32>
    %75 = arith.subf %71, %74 : vector<2x16x16xf32>
    %76 = math.exp %75 : vector<2x16x16xf32>
    %cst_27 = arith.constant dense<0.000000e+00> : vector<2x16xf32>
    %77 = vector.multi_reduction <add>, %76, %cst_27 [2] : vector<2x16x16xf32> to vector<2x16xf32>
    %78 = vector.shape_cast %77 : vector<2x16xf32> to vector<2x16x1xf32>
    %79 = tpu.reciprocal %78 {approx = true} : vector<2x16x1xf32> -> vector<2x16x1xf32>
    %80 = vector.broadcast %79 : vector<2x16x1xf32> to vector<2x16x16xf32>
    %81 = arith.mulf %76, %80 : vector<2x16x16xf32>
    %82 = arith.truncf %81 : vector<2x16x16xf32> to vector<2x16x16xbf16>
    "tpu.trace_start"() <{level = 10 : i32, message = "bts,bsd->btd"}> : () -> ()
    %cst_28 = arith.constant dense<0.000000e+00> : vector<2x16x128xf32>
    %83 = tpu.matmul %82, %67, %cst_28 {dimension_numbers = #tpu.dot_dimension_numbers<[2], [1], [1], [2], [0, 0, 0, 1, 1, 2], [0], [0]>} : vector<2x16x16xbf16>, vector<2x16x128xbf16>, vector<2x16x128xf32> -> vector<2x16x128xf32>
    "tpu.trace_stop"() : () -> ()
    %84 = arith.truncf %83 : vector<2x16x128xf32> to vector<2x16x128xbf16>
    %85 = vector.extract_strided_slice %38 {offsets = [0, 256], sizes = [32, 128], strides = [1, 1]} : vector<32x1536xbf16> to vector<32x128xbf16>
    %86 = vector.shape_cast %85 : vector<32x128xbf16> to vector<2x16x128xbf16>
    %87 = vector.extract_strided_slice %38 {offsets = [0, 768], sizes = [32, 128], strides = [1, 1]} : vector<32x1536xbf16> to vector<32x128xbf16>
    %88 = vector.shape_cast %87 : vector<32x128xbf16> to vector<2x16x128xbf16>
    %89 = vector.extract_strided_slice %38 {offsets = [0, 1280], sizes = [32, 128], strides = [1, 1]} : vector<32x1536xbf16> to vector<32x128xbf16>
    %90 = vector.shape_cast %89 : vector<32x128xbf16> to vector<2x16x128xbf16>
    "tpu.trace_start"() <{level = 10 : i32, message = "btd,bsd->bts"}> : () -> ()
    %cst_29 = arith.constant dense<0.000000e+00> : vector<2x16x16xf32>
    %91 = tpu.matmul %86, %88, %cst_29 {dimension_numbers = #tpu.dot_dimension_numbers<[2], [2], [1], [1], [0, 0, 0, 1, 1, 1], [0], [0]>} : vector<2x16x128xbf16>, vector<2x16x128xbf16>, vector<2x16x16xf32> -> vector<2x16x16xf32>
    "tpu.trace_stop"() : () -> ()
    %92 = vector.shape_cast %3 : vector<16x16xf32> to vector<1x16x16xf32>
    %93 = vector.broadcast %92 : vector<1x16x16xf32> to vector<2x16x16xf32>
    %94 = arith.addf %91, %93 : vector<2x16x16xf32>
    %cst_30 = arith.constant dense<0xFF800000> : vector<2x16xf32>
    %95 = vector.multi_reduction <maximumf>, %94, %cst_30 [2] : vector<2x16x16xf32> to vector<2x16xf32>
    %96 = vector.shape_cast %95 : vector<2x16xf32> to vector<2x16x1xf32>
    %97 = vector.broadcast %96 : vector<2x16x1xf32> to vector<2x16x16xf32>
    %98 = arith.subf %94, %97 : vector<2x16x16xf32>
    %99 = math.exp %98 : vector<2x16x16xf32>
    %cst_31 = arith.constant dense<0.000000e+00> : vector<2x16xf32>
    %100 = vector.multi_reduction <add>, %99, %cst_31 [2] : vector<2x16x16xf32> to vector<2x16xf32>
    %101 = vector.shape_cast %100 : vector<2x16xf32> to vector<2x16x1xf32>
    %102 = tpu.reciprocal %101 {approx = true} : vector<2x16x1xf32> -> vector<2x16x1xf32>
    %103 = vector.broadcast %102 : vector<2x16x1xf32> to vector<2x16x16xf32>
    %104 = arith.mulf %99, %103 : vector<2x16x16xf32>
    %105 = arith.truncf %104 : vector<2x16x16xf32> to vector<2x16x16xbf16>
    "tpu.trace_start"() <{level = 10 : i32, message = "bts,bsd->btd"}> : () -> ()
    %cst_32 = arith.constant dense<0.000000e+00> : vector<2x16x128xf32>
    %106 = tpu.matmul %105, %90, %cst_32 {dimension_numbers = #tpu.dot_dimension_numbers<[2], [1], [1], [2], [0, 0, 0, 1, 1, 2], [0], [0]>} : vector<2x16x16xbf16>, vector<2x16x128xbf16>, vector<2x16x128xf32> -> vector<2x16x128xf32>
    "tpu.trace_stop"() : () -> ()
    %107 = arith.truncf %106 : vector<2x16x128xf32> to vector<2x16x128xbf16>
    %108 = vector.extract_strided_slice %38 {offsets = [0, 384], sizes = [32, 128], strides = [1, 1]} : vector<32x1536xbf16> to vector<32x128xbf16>
    %109 = vector.shape_cast %108 : vector<32x128xbf16> to vector<2x16x128xbf16>
    %110 = vector.extract_strided_slice %38 {offsets = [0, 896], sizes = [32, 128], strides = [1, 1]} : vector<32x1536xbf16> to vector<32x128xbf16>
    %111 = vector.shape_cast %110 : vector<32x128xbf16> to vector<2x16x128xbf16>
    %112 = vector.extract_strided_slice %38 {offsets = [0, 1408], sizes = [32, 128], strides = [1, 1]} : vector<32x1536xbf16> to vector<32x128xbf16>
    %113 = vector.shape_cast %112 : vector<32x128xbf16> to vector<2x16x128xbf16>
    "tpu.trace_start"() <{level = 10 : i32, message = "btd,bsd->bts"}> : () -> ()
    %cst_33 = arith.constant dense<0.000000e+00> : vector<2x16x16xf32>
    %114 = tpu.matmul %109, %111, %cst_33 {dimension_numbers = #tpu.dot_dimension_numbers<[2], [2], [1], [1], [0, 0, 0, 1, 1, 1], [0], [0]>} : vector<2x16x128xbf16>, vector<2x16x128xbf16>, vector<2x16x16xf32> -> vector<2x16x16xf32>
    "tpu.trace_stop"() : () -> ()
    %115 = vector.shape_cast %3 : vector<16x16xf32> to vector<1x16x16xf32>
    %116 = vector.broadcast %115 : vector<1x16x16xf32> to vector<2x16x16xf32>
    %117 = arith.addf %114, %116 : vector<2x16x16xf32>
    %cst_34 = arith.constant dense<0xFF800000> : vector<2x16xf32>
    %118 = vector.multi_reduction <maximumf>, %117, %cst_34 [2] : vector<2x16x16xf32> to vector<2x16xf32>
    %119 = vector.shape_cast %118 : vector<2x16xf32> to vector<2x16x1xf32>
    %120 = vector.broadcast %119 : vector<2x16x1xf32> to vector<2x16x16xf32>
    %121 = arith.subf %117, %120 : vector<2x16x16xf32>
    %122 = math.exp %121 : vector<2x16x16xf32>
    %cst_35 = arith.constant dense<0.000000e+00> : vector<2x16xf32>
    %123 = vector.multi_reduction <add>, %122, %cst_35 [2] : vector<2x16x16xf32> to vector<2x16xf32>
    %124 = vector.shape_cast %123 : vector<2x16xf32> to vector<2x16x1xf32>
    %125 = tpu.reciprocal %124 {approx = true} : vector<2x16x1xf32> -> vector<2x16x1xf32>
    %126 = vector.broadcast %125 : vector<2x16x1xf32> to vector<2x16x16xf32>
    %127 = arith.mulf %122, %126 : vector<2x16x16xf32>
    %128 = arith.truncf %127 : vector<2x16x16xf32> to vector<2x16x16xbf16>
    "tpu.trace_start"() <{level = 10 : i32, message = "bts,bsd->btd"}> : () -> ()
    %cst_36 = arith.constant dense<0.000000e+00> : vector<2x16x128xf32>
    %129 = tpu.matmul %128, %113, %cst_36 {dimension_numbers = #tpu.dot_dimension_numbers<[2], [1], [1], [2], [0, 0, 0, 1, 1, 2], [0], [0]>} : vector<2x16x16xbf16>, vector<2x16x128xbf16>, vector<2x16x128xf32> -> vector<2x16x128xf32>
    "tpu.trace_stop"() : () -> ()
    %130 = arith.truncf %129 : vector<2x16x128xf32> to vector<2x16x128xbf16>
    %131 = tpu.concatenate %61, %84, %107, %130 in 2 : vector<2x16x128xbf16>, vector<2x16x128xbf16>, vector<2x16x128xbf16>, vector<2x16x128xbf16> -> vector<2x16x512xbf16>
    %132 = vector.shape_cast %131 : vector<2x16x512xbf16> to vector<32x512xbf16>
    %c0_37 = arith.constant 0 : index
    %c0_38 = arith.constant 0 : index
    %c0_39 = arith.constant 0 : index
    %133 = vector.load %arg7[%c0_37, %c0_38, %c0_39] : memref<2x512x192xbf16, #tpu.memory_space<vmem>>, vector<1x512x192xbf16>
    %134 = vector.shape_cast %133 : vector<1x512x192xbf16> to vector<512x192xbf16>
    %cst_40 = arith.constant dense<0.000000e+00> : vector<32x192xf32>
    %135 = tpu.matmul %132, %134, %cst_40 {dimension_numbers = #tpu.dot_dimension_numbers<[1], [0], [0], [1], [0, 0, 1, 1], [], []>} : vector<32x512xbf16>, vector<512x192xbf16>, vector<32x192xf32> -> vector<32x192xf32>
    %c0_41 = arith.constant 0 : index
    %c0_42 = arith.constant 0 : index
    %c0_43 = arith.constant 0 : index
    %136 = vector.load %arg8[%c0_41, %c0_42, %c0_43] : memref<2x1x192xf32, #tpu.memory_space<vmem>>, vector<1x1x192xf32>
    %137 = vector.shape_cast %136 : vector<1x1x192xf32> to vector<1x192xf32>
    %138 = vector.broadcast %137 : vector<1x192xf32> to vector<32x192xf32>
    %139 = arith.addf %135, %138 : vector<32x192xf32>
    %140 = arith.addf %2, %139 : vector<32x192xf32>
    %c0_44 = arith.constant 0 : index
    %c0_45 = arith.constant 0 : index
    %c0_46 = arith.constant 0 : index
    %141 = vector.load %arg9[%c0_44, %c0_45, %c0_46] : memref<2x1x192xf32, #tpu.memory_space<vmem>>, vector<1x1x192xf32>
    %142 = vector.shape_cast %141 : vector<1x1x192xf32> to vector<1x192xf32>
    %c0_47 = arith.constant 0 : index
    %c0_48 = arith.constant 0 : index
    %c0_49 = arith.constant 0 : index
    %143 = vector.load %arg10[%c0_47, %c0_48, %c0_49] : memref<2x1x192xf32, #tpu.memory_space<vmem>>, vector<1x1x192xf32>
    %144 = vector.shape_cast %143 : vector<1x1x192xf32> to vector<1x192xf32>
    %cst_50 = arith.constant dense<0.000000e+00> : vector<32xf32>
    %145 = vector.multi_reduction <add>, %140, %cst_50 [1] : vector<32x192xf32> to vector<32xf32>
    %146 = vector.shape_cast %145 : vector<32xf32> to vector<32x1xf32>
    %cst_51 = arith.constant 1.920000e+02 : f32
    %147 = vector.broadcast %cst_51 : f32 to vector<32x1xf32>
    %148 = arith.divf %146, %147 : vector<32x1xf32>
    %149 = vector.broadcast %148 : vector<32x1xf32> to vector<32x192xf32>
    %150 = arith.subf %140, %149 : vector<32x192xf32>
    %151 = arith.mulf %150, %150 : vector<32x192xf32>
    %cst_52 = arith.constant dense<0.000000e+00> : vector<32xf32>
    %152 = vector.multi_reduction <add>, %151, %cst_52 [1] : vector<32x192xf32> to vector<32xf32>
    %153 = vector.shape_cast %152 : vector<32xf32> to vector<32x1xf32>
    %cst_53 = arith.constant 1.920000e+02 : f32
    %154 = vector.broadcast %cst_53 : f32 to vector<32x1xf32>
    %155 = arith.divf %153, %154 : vector<32x1xf32>
    %156 = vector.broadcast %148 : vector<32x1xf32> to vector<32x192xf32>
    %157 = arith.subf %140, %156 : vector<32x192xf32>
    %cst_54 = arith.constant 9.99999974E-6 : f32
    %158 = vector.broadcast %cst_54 : f32 to vector<32x1xf32>
    %159 = arith.addf %155, %158 : vector<32x1xf32>
    %160 = math.rsqrt %159 : vector<32x1xf32>
    %161 = vector.broadcast %160 : vector<32x1xf32> to vector<32x192xf32>
    %162 = arith.mulf %157, %161 : vector<32x192xf32>
    %163 = vector.broadcast %142 : vector<1x192xf32> to vector<32x192xf32>
    %164 = arith.mulf %162, %163 : vector<32x192xf32>
    %165 = vector.broadcast %144 : vector<1x192xf32> to vector<32x192xf32>
    %166 = arith.addf %164, %165 : vector<32x192xf32>
    %167 = arith.truncf %166 : vector<32x192xf32> to vector<32x192xbf16>
    %c0_55 = arith.constant 0 : index
    %c0_56 = arith.constant 0 : index
    %c0_57 = arith.constant 0 : index
    %168 = vector.load %arg11[%c0_55, %c0_56, %c0_57] : memref<2x192x768xbf16, #tpu.memory_space<vmem>>, vector<1x192x768xbf16>
    %169 = vector.shape_cast %168 : vector<1x192x768xbf16> to vector<192x768xbf16>
    %cst_58 = arith.constant dense<0.000000e+00> : vector<32x768xf32>
    %170 = tpu.matmul %167, %169, %cst_58 {dimension_numbers = #tpu.dot_dimension_numbers<[1], [0], [0], [1], [0, 0, 1, 1], [], []>} : vector<32x192xbf16>, vector<192x768xbf16>, vector<32x768xf32> -> vector<32x768xf32>
    %c0_59 = arith.constant 0 : index
    %c0_60 = arith.constant 0 : index
    %c0_61 = arith.constant 0 : index
    %171 = vector.load %arg12[%c0_59, %c0_60, %c0_61] : memref<2x1x768xf32, #tpu.memory_space<vmem>>, vector<1x1x768xf32>
    %172 = vector.shape_cast %171 : vector<1x1x768xf32> to vector<1x768xf32>
    %173 = vector.broadcast %172 : vector<1x768xf32> to vector<32x768xf32>
    %174 = arith.addf %170, %173 : vector<32x768xf32>
    %cst_62 = arith.constant 0.000000e+00 : f32
    %175 = vector.broadcast %cst_62 : f32 to vector<32x768xf32>
    %176 = arith.maximumf %174, %175 : vector<32x768xf32>
    %177 = arith.truncf %176 : vector<32x768xf32> to vector<32x768xbf16>
    %c0_63 = arith.constant 0 : index
    %c0_64 = arith.constant 0 : index
    %c0_65 = arith.constant 0 : index
    %178 = vector.load %arg13[%c0_63, %c0_64, %c0_65] : memref<2x768x192xbf16, #tpu.memory_space<vmem>>, vector<1x768x192xbf16>
    %179 = vector.shape_cast %178 : vector<1x768x192xbf16> to vector<768x192xbf16>
    %cst_66 = arith.constant dense<0.000000e+00> : vector<32x192xf32>
    %180 = tpu.matmul %177, %179, %cst_66 {dimension_numbers = #tpu.dot_dimension_numbers<[1], [0], [0], [1], [0, 0, 1, 1], [], []>} : vector<32x768xbf16>, vector<768x192xbf16>, vector<32x192xf32> -> vector<32x192xf32>
    %c0_67 = arith.constant 0 : index
    %c0_68 = arith.constant 0 : index
    %c0_69 = arith.constant 0 : index
    %181 = vector.load %arg14[%c0_67, %c0_68, %c0_69] : memref<2x1x192xf32, #tpu.memory_space<vmem>>, vector<1x1x192xf32>
    %182 = vector.shape_cast %181 : vector<1x1x192xf32> to vector<1x192xf32>
    %183 = vector.broadcast %182 : vector<1x192xf32> to vector<32x192xf32>
    %184 = arith.addf %180, %183 : vector<32x192xf32>
    %185 = arith.addf %140, %184 : vector<32x192xf32>
    %c1 = arith.constant 1 : index
    %c0_70 = arith.constant 0 : index
    %c0_71 = arith.constant 0 : index
    %186 = vector.load %arg3[%c1, %c0_70, %c0_71] : memref<2x1x192xf32, #tpu.memory_space<vmem>>, vector<1x1x192xf32>
    %187 = vector.shape_cast %186 : vector<1x1x192xf32> to vector<1x192xf32>
    %c1_72 = arith.constant 1 : index
    %c0_73 = arith.constant 0 : index
    %c0_74 = arith.constant 0 : index
    %188 = vector.load %arg4[%c1_72, %c0_73, %c0_74] : memref<2x1x192xf32, #tpu.memory_space<vmem>>, vector<1x1x192xf32>
    %189 = vector.shape_cast %188 : vector<1x1x192xf32> to vector<1x192xf32>
    %cst_75 = arith.constant dense<0.000000e+00> : vector<32xf32>
    %190 = vector.multi_reduction <add>, %185, %cst_75 [1] : vector<32x192xf32> to vector<32xf32>
    %191 = vector.shape_cast %190 : vector<32xf32> to vector<32x1xf32>
    %cst_76 = arith.constant 1.920000e+02 : f32
    %192 = vector.broadcast %cst_76 : f32 to vector<32x1xf32>
    %193 = arith.divf %191, %192 : vector<32x1xf32>
    %194 = vector.broadcast %193 : vector<32x1xf32> to vector<32x192xf32>
    %195 = arith.subf %185, %194 : vector<32x192xf32>
    %196 = arith.mulf %195, %195 : vector<32x192xf32>
    %cst_77 = arith.constant dense<0.000000e+00> : vector<32xf32>
    %197 = vector.multi_reduction <add>, %196, %cst_77 [1] : vector<32x192xf32> to vector<32xf32>
    %198 = vector.shape_cast %197 : vector<32xf32> to vector<32x1xf32>
    %cst_78 = arith.constant 1.920000e+02 : f32
    %199 = vector.broadcast %cst_78 : f32 to vector<32x1xf32>
    %200 = arith.divf %198, %199 : vector<32x1xf32>
    %201 = vector.broadcast %193 : vector<32x1xf32> to vector<32x192xf32>
    %202 = arith.subf %185, %201 : vector<32x192xf32>
    %cst_79 = arith.constant 9.99999974E-6 : f32
    %203 = vector.broadcast %cst_79 : f32 to vector<32x1xf32>
    %204 = arith.addf %200, %203 : vector<32x1xf32>
    %205 = math.rsqrt %204 : vector<32x1xf32>
    %206 = vector.broadcast %205 : vector<32x1xf32> to vector<32x192xf32>
    %207 = arith.mulf %202, %206 : vector<32x192xf32>
    %208 = vector.broadcast %187 : vector<1x192xf32> to vector<32x192xf32>
    %209 = arith.mulf %207, %208 : vector<32x192xf32>
    %210 = vector.broadcast %189 : vector<1x192xf32> to vector<32x192xf32>
    %211 = arith.addf %209, %210 : vector<32x192xf32>
    %212 = arith.truncf %211 : vector<32x192xf32> to vector<32x192xbf16>
    %c1_80 = arith.constant 1 : index
    %c0_81 = arith.constant 0 : index
    %c0_82 = arith.constant 0 : index
    %213 = vector.load %arg5[%c1_80, %c0_81, %c0_82] : memref<2x192x1536xbf16, #tpu.memory_space<vmem>>, vector<1x192x1536xbf16>
    %214 = vector.shape_cast %213 : vector<1x192x1536xbf16> to vector<192x1536xbf16>
    %cst_83 = arith.constant dense<0.000000e+00> : vector<32x1536xf32>
    %215 = tpu.matmul %212, %214, %cst_83 {dimension_numbers = #tpu.dot_dimension_numbers<[1], [0], [0], [1], [0, 0, 1, 1], [], []>} : vector<32x192xbf16>, vector<192x1536xbf16>, vector<32x1536xf32> -> vector<32x1536xf32>
    %c1_84 = arith.constant 1 : index
    %c0_85 = arith.constant 0 : index
    %c0_86 = arith.constant 0 : index
    %216 = vector.load %arg6[%c1_84, %c0_85, %c0_86] : memref<2x1x1536xf32, #tpu.memory_space<vmem>>, vector<1x1x1536xf32>
    %217 = vector.shape_cast %216 : vector<1x1x1536xf32> to vector<1x1536xf32>
    %218 = vector.broadcast %217 : vector<1x1536xf32> to vector<32x1536xf32>
    %219 = arith.addf %215, %218 : vector<32x1536xf32>
    %220 = arith.truncf %219 : vector<32x1536xf32> to vector<32x1536xbf16>
    %221 = vector.extract_strided_slice %220 {offsets = [0, 0], sizes = [32, 128], strides = [1, 1]} : vector<32x1536xbf16> to vector<32x128xbf16>
    %222 = vector.shape_cast %221 : vector<32x128xbf16> to vector<2x16x128xbf16>
    %223 = vector.extract_strided_slice %220 {offsets = [0, 512], sizes = [32, 128], strides = [1, 1]} : vector<32x1536xbf16> to vector<32x128xbf16>
    %224 = vector.shape_cast %223 : vector<32x128xbf16> to vector<2x16x128xbf16>
    %225 = vector.extract_strided_slice %220 {offsets = [0, 1024], sizes = [32, 128], strides = [1, 1]} : vector<32x1536xbf16> to vector<32x128xbf16>
    %226 = vector.shape_cast %225 : vector<32x128xbf16> to vector<2x16x128xbf16>
    "tpu.trace_start"() <{level = 10 : i32, message = "btd,bsd->bts"}> : () -> ()
    %cst_87 = arith.constant dense<0.000000e+00> : vector<2x16x16xf32>
    %227 = tpu.matmul %222, %224, %cst_87 {dimension_numbers = #tpu.dot_dimension_numbers<[2], [2], [1], [1], [0, 0, 0, 1, 1, 1], [0], [0]>} : vector<2x16x128xbf16>, vector<2x16x128xbf16>, vector<2x16x16xf32> -> vector<2x16x16xf32>
    "tpu.trace_stop"() : () -> ()
    %228 = vector.shape_cast %3 : vector<16x16xf32> to vector<1x16x16xf32>
    %229 = vector.broadcast %228 : vector<1x16x16xf32> to vector<2x16x16xf32>
    %230 = arith.addf %227, %229 : vector<2x16x16xf32>
    %cst_88 = arith.constant dense<0xFF800000> : vector<2x16xf32>
    %231 = vector.multi_reduction <maximumf>, %230, %cst_88 [2] : vector<2x16x16xf32> to vector<2x16xf32>
    %232 = vector.shape_cast %231 : vector<2x16xf32> to vector<2x16x1xf32>
    %233 = vector.broadcast %232 : vector<2x16x1xf32> to vector<2x16x16xf32>
    %234 = arith.subf %230, %233 : vector<2x16x16xf32>
    %235 = math.exp %234 : vector<2x16x16xf32>
    %cst_89 = arith.constant dense<0.000000e+00> : vector<2x16xf32>
    %236 = vector.multi_reduction <add>, %235, %cst_89 [2] : vector<2x16x16xf32> to vector<2x16xf32>
    %237 = vector.shape_cast %236 : vector<2x16xf32> to vector<2x16x1xf32>
    %238 = tpu.reciprocal %237 {approx = true} : vector<2x16x1xf32> -> vector<2x16x1xf32>
    %239 = vector.broadcast %238 : vector<2x16x1xf32> to vector<2x16x16xf32>
    %240 = arith.mulf %235, %239 : vector<2x16x16xf32>
    %241 = arith.truncf %240 : vector<2x16x16xf32> to vector<2x16x16xbf16>
    "tpu.trace_start"() <{level = 10 : i32, message = "bts,bsd->btd"}> : () -> ()
    %cst_90 = arith.constant dense<0.000000e+00> : vector<2x16x128xf32>
    %242 = tpu.matmul %241, %226, %cst_90 {dimension_numbers = #tpu.dot_dimension_numbers<[2], [1], [1], [2], [0, 0, 0, 1, 1, 2], [0], [0]>} : vector<2x16x16xbf16>, vector<2x16x128xbf16>, vector<2x16x128xf32> -> vector<2x16x128xf32>
    "tpu.trace_stop"() : () -> ()
    %243 = arith.truncf %242 : vector<2x16x128xf32> to vector<2x16x128xbf16>
    %244 = vector.extract_strided_slice %220 {offsets = [0, 128], sizes = [32, 128], strides = [1, 1]} : vector<32x1536xbf16> to vector<32x128xbf16>
    %245 = vector.shape_cast %244 : vector<32x128xbf16> to vector<2x16x128xbf16>
    %246 = vector.extract_strided_slice %220 {offsets = [0, 640], sizes = [32, 128], strides = [1, 1]} : vector<32x1536xbf16> to vector<32x128xbf16>
    %247 = vector.shape_cast %246 : vector<32x128xbf16> to vector<2x16x128xbf16>
    %248 = vector.extract_strided_slice %220 {offsets = [0, 1152], sizes = [32, 128], strides = [1, 1]} : vector<32x1536xbf16> to vector<32x128xbf16>
    %249 = vector.shape_cast %248 : vector<32x128xbf16> to vector<2x16x128xbf16>
    "tpu.trace_start"() <{level = 10 : i32, message = "btd,bsd->bts"}> : () -> ()
    %cst_91 = arith.constant dense<0.000000e+00> : vector<2x16x16xf32>
    %250 = tpu.matmul %245, %247, %cst_91 {dimension_numbers = #tpu.dot_dimension_numbers<[2], [2], [1], [1], [0, 0, 0, 1, 1, 1], [0], [0]>} : vector<2x16x128xbf16>, vector<2x16x128xbf16>, vector<2x16x16xf32> -> vector<2x16x16xf32>
    "tpu.trace_stop"() : () -> ()
    %251 = vector.shape_cast %3 : vector<16x16xf32> to vector<1x16x16xf32>
    %252 = vector.broadcast %251 : vector<1x16x16xf32> to vector<2x16x16xf32>
    %253 = arith.addf %250, %252 : vector<2x16x16xf32>
    %cst_92 = arith.constant dense<0xFF800000> : vector<2x16xf32>
    %254 = vector.multi_reduction <maximumf>, %253, %cst_92 [2] : vector<2x16x16xf32> to vector<2x16xf32>
    %255 = vector.shape_cast %254 : vector<2x16xf32> to vector<2x16x1xf32>
    %256 = vector.broadcast %255 : vector<2x16x1xf32> to vector<2x16x16xf32>
    %257 = arith.subf %253, %256 : vector<2x16x16xf32>
    %258 = math.exp %257 : vector<2x16x16xf32>
    %cst_93 = arith.constant dense<0.000000e+00> : vector<2x16xf32>
    %259 = vector.multi_reduction <add>, %258, %cst_93 [2] : vector<2x16x16xf32> to vector<2x16xf32>
    %260 = vector.shape_cast %259 : vector<2x16xf32> to vector<2x16x1xf32>
    %261 = tpu.reciprocal %260 {approx = true} : vector<2x16x1xf32> -> vector<2x16x1xf32>
    %262 = vector.broadcast %261 : vector<2x16x1xf32> to vector<2x16x16xf32>
    %263 = arith.mulf %258, %262 : vector<2x16x16xf32>
    %264 = arith.truncf %263 : vector<2x16x16xf32> to vector<2x16x16xbf16>
    "tpu.trace_start"() <{level = 10 : i32, message = "bts,bsd->btd"}> : () -> ()
    %cst_94 = arith.constant dense<0.000000e+00> : vector<2x16x128xf32>
    %265 = tpu.matmul %264, %249, %cst_94 {dimension_numbers = #tpu.dot_dimension_numbers<[2], [1], [1], [2], [0, 0, 0, 1, 1, 2], [0], [0]>} : vector<2x16x16xbf16>, vector<2x16x128xbf16>, vector<2x16x128xf32> -> vector<2x16x128xf32>
    "tpu.trace_stop"() : () -> ()
    %266 = arith.truncf %265 : vector<2x16x128xf32> to vector<2x16x128xbf16>
    %267 = vector.extract_strided_slice %220 {offsets = [0, 256], sizes = [32, 128], strides = [1, 1]} : vector<32x1536xbf16> to vector<32x128xbf16>
    %268 = vector.shape_cast %267 : vector<32x128xbf16> to vector<2x16x128xbf16>
    %269 = vector.extract_strided_slice %220 {offsets = [0, 768], sizes = [32, 128], strides = [1, 1]} : vector<32x1536xbf16> to vector<32x128xbf16>
    %270 = vector.shape_cast %269 : vector<32x128xbf16> to vector<2x16x128xbf16>
    %271 = vector.extract_strided_slice %220 {offsets = [0, 1280], sizes = [32, 128], strides = [1, 1]} : vector<32x1536xbf16> to vector<32x128xbf16>
    %272 = vector.shape_cast %271 : vector<32x128xbf16> to vector<2x16x128xbf16>
    "tpu.trace_start"() <{level = 10 : i32, message = "btd,bsd->bts"}> : () -> ()
    %cst_95 = arith.constant dense<0.000000e+00> : vector<2x16x16xf32>
    %273 = tpu.matmul %268, %270, %cst_95 {dimension_numbers = #tpu.dot_dimension_numbers<[2], [2], [1], [1], [0, 0, 0, 1, 1, 1], [0], [0]>} : vector<2x16x128xbf16>, vector<2x16x128xbf16>, vector<2x16x16xf32> -> vector<2x16x16xf32>
    "tpu.trace_stop"() : () -> ()
    %274 = vector.shape_cast %3 : vector<16x16xf32> to vector<1x16x16xf32>
    %275 = vector.broadcast %274 : vector<1x16x16xf32> to vector<2x16x16xf32>
    %276 = arith.addf %273, %275 : vector<2x16x16xf32>
    %cst_96 = arith.constant dense<0xFF800000> : vector<2x16xf32>
    %277 = vector.multi_reduction <maximumf>, %276, %cst_96 [2] : vector<2x16x16xf32> to vector<2x16xf32>
    %278 = vector.shape_cast %277 : vector<2x16xf32> to vector<2x16x1xf32>
    %279 = vector.broadcast %278 : vector<2x16x1xf32> to vector<2x16x16xf32>
    %280 = arith.subf %276, %279 : vector<2x16x16xf32>
    %281 = math.exp %280 : vector<2x16x16xf32>
    %cst_97 = arith.constant dense<0.000000e+00> : vector<2x16xf32>
    %282 = vector.multi_reduction <add>, %281, %cst_97 [2] : vector<2x16x16xf32> to vector<2x16xf32>
    %283 = vector.shape_cast %282 : vector<2x16xf32> to vector<2x16x1xf32>
    %284 = tpu.reciprocal %283 {approx = true} : vector<2x16x1xf32> -> vector<2x16x1xf32>
    %285 = vector.broadcast %284 : vector<2x16x1xf32> to vector<2x16x16xf32>
    %286 = arith.mulf %281, %285 : vector<2x16x16xf32>
    %287 = arith.truncf %286 : vector<2x16x16xf32> to vector<2x16x16xbf16>
    "tpu.trace_start"() <{level = 10 : i32, message = "bts,bsd->btd"}> : () -> ()
    %cst_98 = arith.constant dense<0.000000e+00> : vector<2x16x128xf32>
    %288 = tpu.matmul %287, %272, %cst_98 {dimension_numbers = #tpu.dot_dimension_numbers<[2], [1], [1], [2], [0, 0, 0, 1, 1, 2], [0], [0]>} : vector<2x16x16xbf16>, vector<2x16x128xbf16>, vector<2x16x128xf32> -> vector<2x16x128xf32>
    "tpu.trace_stop"() : () -> ()
    %289 = arith.truncf %288 : vector<2x16x128xf32> to vector<2x16x128xbf16>
    %290 = vector.extract_strided_slice %220 {offsets = [0, 384], sizes = [32, 128], strides = [1, 1]} : vector<32x1536xbf16> to vector<32x128xbf16>
    %291 = vector.shape_cast %290 : vector<32x128xbf16> to vector<2x16x128xbf16>
    %292 = vector.extract_strided_slice %220 {offsets = [0, 896], sizes = [32, 128], strides = [1, 1]} : vector<32x1536xbf16> to vector<32x128xbf16>
    %293 = vector.shape_cast %292 : vector<32x128xbf16> to vector<2x16x128xbf16>
    %294 = vector.extract_strided_slice %220 {offsets = [0, 1408], sizes = [32, 128], strides = [1, 1]} : vector<32x1536xbf16> to vector<32x128xbf16>
    %295 = vector.shape_cast %294 : vector<32x128xbf16> to vector<2x16x128xbf16>
    "tpu.trace_start"() <{level = 10 : i32, message = "btd,bsd->bts"}> : () -> ()
    %cst_99 = arith.constant dense<0.000000e+00> : vector<2x16x16xf32>
    %296 = tpu.matmul %291, %293, %cst_99 {dimension_numbers = #tpu.dot_dimension_numbers<[2], [2], [1], [1], [0, 0, 0, 1, 1, 1], [0], [0]>} : vector<2x16x128xbf16>, vector<2x16x128xbf16>, vector<2x16x16xf32> -> vector<2x16x16xf32>
    "tpu.trace_stop"() : () -> ()
    %297 = vector.shape_cast %3 : vector<16x16xf32> to vector<1x16x16xf32>
    %298 = vector.broadcast %297 : vector<1x16x16xf32> to vector<2x16x16xf32>
    %299 = arith.addf %296, %298 : vector<2x16x16xf32>
    %cst_100 = arith.constant dense<0xFF800000> : vector<2x16xf32>
    %300 = vector.multi_reduction <maximumf>, %299, %cst_100 [2] : vector<2x16x16xf32> to vector<2x16xf32>
    %301 = vector.shape_cast %300 : vector<2x16xf32> to vector<2x16x1xf32>
    %302 = vector.broadcast %301 : vector<2x16x1xf32> to vector<2x16x16xf32>
    %303 = arith.subf %299, %302 : vector<2x16x16xf32>
    %304 = math.exp %303 : vector<2x16x16xf32>
    %cst_101 = arith.constant dense<0.000000e+00> : vector<2x16xf32>
    %305 = vector.multi_reduction <add>, %304, %cst_101 [2] : vector<2x16x16xf32> to vector<2x16xf32>
    %306 = vector.shape_cast %305 : vector<2x16xf32> to vector<2x16x1xf32>
    %307 = tpu.reciprocal %306 {approx = true} : vector<2x16x1xf32> -> vector<2x16x1xf32>
    %308 = vector.broadcast %307 : vector<2x16x1xf32> to vector<2x16x16xf32>
    %309 = arith.mulf %304, %308 : vector<2x16x16xf32>
    %310 = arith.truncf %309 : vector<2x16x16xf32> to vector<2x16x16xbf16>
    "tpu.trace_start"() <{level = 10 : i32, message = "bts,bsd->btd"}> : () -> ()
    %cst_102 = arith.constant dense<0.000000e+00> : vector<2x16x128xf32>
    %311 = tpu.matmul %310, %295, %cst_102 {dimension_numbers = #tpu.dot_dimension_numbers<[2], [1], [1], [2], [0, 0, 0, 1, 1, 2], [0], [0]>} : vector<2x16x16xbf16>, vector<2x16x128xbf16>, vector<2x16x128xf32> -> vector<2x16x128xf32>
    "tpu.trace_stop"() : () -> ()
    %312 = arith.truncf %311 : vector<2x16x128xf32> to vector<2x16x128xbf16>
    %313 = tpu.concatenate %243, %266, %289, %312 in 2 : vector<2x16x128xbf16>, vector<2x16x128xbf16>, vector<2x16x128xbf16>, vector<2x16x128xbf16> -> vector<2x16x512xbf16>
    %314 = vector.shape_cast %313 : vector<2x16x512xbf16> to vector<32x512xbf16>
    %c1_103 = arith.constant 1 : index
    %c0_104 = arith.constant 0 : index
    %c0_105 = arith.constant 0 : index
    %315 = vector.load %arg7[%c1_103, %c0_104, %c0_105] : memref<2x512x192xbf16, #tpu.memory_space<vmem>>, vector<1x512x192xbf16>
    %316 = vector.shape_cast %315 : vector<1x512x192xbf16> to vector<512x192xbf16>
    %cst_106 = arith.constant dense<0.000000e+00> : vector<32x192xf32>
    %317 = tpu.matmul %314, %316, %cst_106 {dimension_numbers = #tpu.dot_dimension_numbers<[1], [0], [0], [1], [0, 0, 1, 1], [], []>} : vector<32x512xbf16>, vector<512x192xbf16>, vector<32x192xf32> -> vector<32x192xf32>
    %c1_107 = arith.constant 1 : index
    %c0_108 = arith.constant 0 : index
    %c0_109 = arith.constant 0 : index
    %318 = vector.load %arg8[%c1_107, %c0_108, %c0_109] : memref<2x1x192xf32, #tpu.memory_space<vmem>>, vector<1x1x192xf32>
    %319 = vector.shape_cast %318 : vector<1x1x192xf32> to vector<1x192xf32>
    %320 = vector.broadcast %319 : vector<1x192xf32> to vector<32x192xf32>
    %321 = arith.addf %317, %320 : vector<32x192xf32>
    %322 = arith.addf %185, %321 : vector<32x192xf32>
    %c1_110 = arith.constant 1 : index
    %c0_111 = arith.constant 0 : index
    %c0_112 = arith.constant 0 : index
    %323 = vector.load %arg9[%c1_110, %c0_111, %c0_112] : memref<2x1x192xf32, #tpu.memory_space<vmem>>, vector<1x1x192xf32>
    %324 = vector.shape_cast %323 : vector<1x1x192xf32> to vector<1x192xf32>
    %c1_113 = arith.constant 1 : index
    %c0_114 = arith.constant 0 : index
    %c0_115 = arith.constant 0 : index
    %325 = vector.load %arg10[%c1_113, %c0_114, %c0_115] : memref<2x1x192xf32, #tpu.memory_space<vmem>>, vector<1x1x192xf32>
    %326 = vector.shape_cast %325 : vector<1x1x192xf32> to vector<1x192xf32>
    %cst_116 = arith.constant dense<0.000000e+00> : vector<32xf32>
    %327 = vector.multi_reduction <add>, %322, %cst_116 [1] : vector<32x192xf32> to vector<32xf32>
    %328 = vector.shape_cast %327 : vector<32xf32> to vector<32x1xf32>
    %cst_117 = arith.constant 1.920000e+02 : f32
    %329 = vector.broadcast %cst_117 : f32 to vector<32x1xf32>
    %330 = arith.divf %328, %329 : vector<32x1xf32>
    %331 = vector.broadcast %330 : vector<32x1xf32> to vector<32x192xf32>
    %332 = arith.subf %322, %331 : vector<32x192xf32>
    %333 = arith.mulf %332, %332 : vector<32x192xf32>
    %cst_118 = arith.constant dense<0.000000e+00> : vector<32xf32>
    %334 = vector.multi_reduction <add>, %333, %cst_118 [1] : vector<32x192xf32> to vector<32xf32>
    %335 = vector.shape_cast %334 : vector<32xf32> to vector<32x1xf32>
    %cst_119 = arith.constant 1.920000e+02 : f32
    %336 = vector.broadcast %cst_119 : f32 to vector<32x1xf32>
    %337 = arith.divf %335, %336 : vector<32x1xf32>
    %338 = vector.broadcast %330 : vector<32x1xf32> to vector<32x192xf32>
    %339 = arith.subf %322, %338 : vector<32x192xf32>
    %cst_120 = arith.constant 9.99999974E-6 : f32
    %340 = vector.broadcast %cst_120 : f32 to vector<32x1xf32>
    %341 = arith.addf %337, %340 : vector<32x1xf32>
    %342 = math.rsqrt %341 : vector<32x1xf32>
    %343 = vector.broadcast %342 : vector<32x1xf32> to vector<32x192xf32>
    %344 = arith.mulf %339, %343 : vector<32x192xf32>
    %345 = vector.broadcast %324 : vector<1x192xf32> to vector<32x192xf32>
    %346 = arith.mulf %344, %345 : vector<32x192xf32>
    %347 = vector.broadcast %326 : vector<1x192xf32> to vector<32x192xf32>
    %348 = arith.addf %346, %347 : vector<32x192xf32>
    %349 = arith.truncf %348 : vector<32x192xf32> to vector<32x192xbf16>
    %c1_121 = arith.constant 1 : index
    %c0_122 = arith.constant 0 : index
    %c0_123 = arith.constant 0 : index
    %350 = vector.load %arg11[%c1_121, %c0_122, %c0_123] : memref<2x192x768xbf16, #tpu.memory_space<vmem>>, vector<1x192x768xbf16>
    %351 = vector.shape_cast %350 : vector<1x192x768xbf16> to vector<192x768xbf16>
    %cst_124 = arith.constant dense<0.000000e+00> : vector<32x768xf32>
    %352 = tpu.matmul %349, %351, %cst_124 {dimension_numbers = #tpu.dot_dimension_numbers<[1], [0], [0], [1], [0, 0, 1, 1], [], []>} : vector<32x192xbf16>, vector<192x768xbf16>, vector<32x768xf32> -> vector<32x768xf32>
    %c1_125 = arith.constant 1 : index
    %c0_126 = arith.constant 0 : index
    %c0_127 = arith.constant 0 : index
    %353 = vector.load %arg12[%c1_125, %c0_126, %c0_127] : memref<2x1x768xf32, #tpu.memory_space<vmem>>, vector<1x1x768xf32>
    %354 = vector.shape_cast %353 : vector<1x1x768xf32> to vector<1x768xf32>
    %355 = vector.broadcast %354 : vector<1x768xf32> to vector<32x768xf32>
    %356 = arith.addf %352, %355 : vector<32x768xf32>
    %cst_128 = arith.constant 0.000000e+00 : f32
    %357 = vector.broadcast %cst_128 : f32 to vector<32x768xf32>
    %358 = arith.maximumf %356, %357 : vector<32x768xf32>
    %359 = arith.truncf %358 : vector<32x768xf32> to vector<32x768xbf16>
    %c1_129 = arith.constant 1 : index
    %c0_130 = arith.constant 0 : index
    %c0_131 = arith.constant 0 : index
    %360 = vector.load %arg13[%c1_129, %c0_130, %c0_131] : memref<2x768x192xbf16, #tpu.memory_space<vmem>>, vector<1x768x192xbf16>
    %361 = vector.shape_cast %360 : vector<1x768x192xbf16> to vector<768x192xbf16>
    %cst_132 = arith.constant dense<0.000000e+00> : vector<32x192xf32>
    %362 = tpu.matmul %359, %361, %cst_132 {dimension_numbers = #tpu.dot_dimension_numbers<[1], [0], [0], [1], [0, 0, 1, 1], [], []>} : vector<32x768xbf16>, vector<768x192xbf16>, vector<32x192xf32> -> vector<32x192xf32>
    %c1_133 = arith.constant 1 : index
    %c0_134 = arith.constant 0 : index
    %c0_135 = arith.constant 0 : index
    %363 = vector.load %arg14[%c1_133, %c0_134, %c0_135] : memref<2x1x192xf32, #tpu.memory_space<vmem>>, vector<1x1x192xf32>
    %364 = vector.shape_cast %363 : vector<1x1x192xf32> to vector<1x192xf32>
    %365 = vector.broadcast %364 : vector<1x192xf32> to vector<32x192xf32>
    %366 = arith.addf %362, %365 : vector<32x192xf32>
    %367 = arith.addf %322, %366 : vector<32x192xf32>
    %c0_136 = arith.constant 0 : index
    %c0_137 = arith.constant 0 : index
    %368 = vector.load %arg15[%c0_136, %c0_137] : memref<1x192xf32, #tpu.memory_space<vmem>>, vector<1x192xf32>
    %c0_138 = arith.constant 0 : index
    %c0_139 = arith.constant 0 : index
    %369 = vector.load %arg16[%c0_138, %c0_139] : memref<1x192xf32, #tpu.memory_space<vmem>>, vector<1x192xf32>
    %cst_140 = arith.constant dense<0.000000e+00> : vector<32xf32>
    %370 = vector.multi_reduction <add>, %367, %cst_140 [1] : vector<32x192xf32> to vector<32xf32>
    %371 = vector.shape_cast %370 : vector<32xf32> to vector<32x1xf32>
    %cst_141 = arith.constant 1.920000e+02 : f32
    %372 = vector.broadcast %cst_141 : f32 to vector<32x1xf32>
    %373 = arith.divf %371, %372 : vector<32x1xf32>
    %374 = vector.broadcast %373 : vector<32x1xf32> to vector<32x192xf32>
    %375 = arith.subf %367, %374 : vector<32x192xf32>
    %376 = arith.mulf %375, %375 : vector<32x192xf32>
    %cst_142 = arith.constant dense<0.000000e+00> : vector<32xf32>
    %377 = vector.multi_reduction <add>, %376, %cst_142 [1] : vector<32x192xf32> to vector<32xf32>
    %378 = vector.shape_cast %377 : vector<32xf32> to vector<32x1xf32>
    %cst_143 = arith.constant 1.920000e+02 : f32
    %379 = vector.broadcast %cst_143 : f32 to vector<32x1xf32>
    %380 = arith.divf %378, %379 : vector<32x1xf32>
    %381 = vector.broadcast %373 : vector<32x1xf32> to vector<32x192xf32>
    %382 = arith.subf %367, %381 : vector<32x192xf32>
    %cst_144 = arith.constant 9.99999974E-6 : f32
    %383 = vector.broadcast %cst_144 : f32 to vector<32x1xf32>
    %384 = arith.addf %380, %383 : vector<32x1xf32>
    %385 = math.rsqrt %384 : vector<32x1xf32>
    %386 = vector.broadcast %385 : vector<32x1xf32> to vector<32x192xf32>
    %387 = arith.mulf %382, %386 : vector<32x192xf32>
    %388 = vector.broadcast %368 : vector<1x192xf32> to vector<32x192xf32>
    %389 = arith.mulf %387, %388 : vector<32x192xf32>
    %390 = vector.broadcast %369 : vector<1x192xf32> to vector<32x192xf32>
    %391 = arith.addf %389, %390 : vector<32x192xf32>
    %392 = arith.truncf %391 : vector<32x192xf32> to vector<32x192xbf16>
    %c0_145 = arith.constant 0 : index
    %c0_146 = arith.constant 0 : index
    %393 = vector.load %arg17[%c0_145, %c0_146] : memref<192x128xbf16, #tpu.memory_space<vmem>>, vector<192x128xbf16>
    %cst_147 = arith.constant dense<0.000000e+00> : vector<32x128xf32>
    %394 = tpu.matmul %392, %393, %cst_147 {dimension_numbers = #tpu.dot_dimension_numbers<[1], [0], [0], [1], [0, 0, 1, 1], [], []>} : vector<32x192xbf16>, vector<192x128xbf16>, vector<32x128xf32> -> vector<32x128xf32>
    %c0_148 = arith.constant 0 : index
    %c0_149 = arith.constant 0 : index
    %395 = vector.load %arg18[%c0_148, %c0_149] : memref<1x128xf32, #tpu.memory_space<vmem>>, vector<1x128xf32>
    %396 = vector.broadcast %395 : vector<1x128xf32> to vector<32x128xf32>
    %397 = arith.addf %394, %396 : vector<32x128xf32>
    %398 = vector.shape_cast %397 : vector<32x128xf32> to vector<2x16x128xf32>
    %c0_150 = arith.constant 0 : index
    %c0_151 = arith.constant 0 : index
    %c0_152 = arith.constant 0 : index
    %399 = vector.load %arg19[%c0_150, %c0_151, %c0_152] : memref<2x16x128xf32, #tpu.memory_space<vmem>>, vector<2x16x128xf32>
    tpu.vector_store %arg19[%c0_150, %c0_151, %c0_152], %398 {strides = array<i32>} : memref<2x16x128xf32, #tpu.memory_space<vmem>>, vector<2x16x128xf32>,
    return
  }
  func.func @transform_0(%arg0: i32) -> (i32, i32) {
    %c0_i32 = arith.constant 0 : i32
    %c0_i32_0 = arith.constant 0 : i32
    %c0_i32_1 = arith.constant 0 : i32
    return %c0_i32, %c0_i32_0 : i32, i32
  }
  func.func @transform_1(%arg0: i32) -> (i32, i32, i32) {
    %c0_i32 = arith.constant 0 : i32
    %c0_i32_0 = arith.constant 0 : i32
    %c0_i32_1 = arith.constant 0 : i32
    return %arg0, %c0_i32, %c0_i32_0 : i32, i32, i32
  }
  func.func @transform_2(%arg0: i32) -> (i32, i32, i32) {
    %c0_i32 = arith.constant 0 : i32
    %c0_i32_0 = arith.constant 0 : i32
    %c0_i32_1 = arith.constant 0 : i32
    %c0_i32_2 = arith.constant 0 : i32
    return %c0_i32, %c0_i32_0, %c0_i32_1 : i32, i32, i32
  }
  func.func @transform_3(%arg0: i32) -> (i32, i32, i32) {
    %c0_i32 = arith.constant 0 : i32
    %c0_i32_0 = arith.constant 0 : i32
    %c0_i32_1 = arith.constant 0 : i32
    %c0_i32_2 = arith.constant 0 : i32
    return %c0_i32, %c0_i32_0, %c0_i32_1 : i32, i32, i32
  }
  func.func @transform_4(%arg0: i32) -> (i32, i32, i32) {
    %c0_i32 = arith.constant 0 : i32
    %c0_i32_0 = arith.constant 0 : i32
    %c0_i32_1 = arith.constant 0 : i32
    %c0_i32_2 = arith.constant 0 : i32
    return %c0_i32, %c0_i32_0, %c0_i32_1 : i32, i32, i32
  }
  func.func @transform_5(%arg0: i32) -> (i32, i32, i32) {
    %c0_i32 = arith.constant 0 : i32
    %c0_i32_0 = arith.constant 0 : i32
    %c0_i32_1 = arith.constant 0 : i32
    %c0_i32_2 = arith.constant 0 : i32
    return %c0_i32, %c0_i32_0, %c0_i32_1 : i32, i32, i32
  }
  func.func @transform_6(%arg0: i32) -> (i32, i32, i32) {
    %c0_i32 = arith.constant 0 : i32
    %c0_i32_0 = arith.constant 0 : i32
    %c0_i32_1 = arith.constant 0 : i32
    %c0_i32_2 = arith.constant 0 : i32
    return %c0_i32, %c0_i32_0, %c0_i32_1 : i32, i32, i32
  }
  func.func @transform_7(%arg0: i32) -> (i32, i32, i32) {
    %c0_i32 = arith.constant 0 : i32
    %c0_i32_0 = arith.constant 0 : i32
    %c0_i32_1 = arith.constant 0 : i32
    %c0_i32_2 = arith.constant 0 : i32
    return %c0_i32, %c0_i32_0, %c0_i32_1 : i32, i32, i32
  }
  func.func @transform_8(%arg0: i32) -> (i32, i32, i32) {
    %c0_i32 = arith.constant 0 : i32
    %c0_i32_0 = arith.constant 0 : i32
    %c0_i32_1 = arith.constant 0 : i32
    %c0_i32_2 = arith.constant 0 : i32
    return %c0_i32, %c0_i32_0, %c0_i32_1 : i32, i32, i32
  }
  func.func @transform_9(%arg0: i32) -> (i32, i32, i32) {
    %c0_i32 = arith.constant 0 : i32
    %c0_i32_0 = arith.constant 0 : i32
    %c0_i32_1 = arith.constant 0 : i32
    %c0_i32_2 = arith.constant 0 : i32
    return %c0_i32, %c0_i32_0, %c0_i32_1 : i32, i32, i32
  }
  func.func @transform_10(%arg0: i32) -> (i32, i32, i32) {
    %c0_i32 = arith.constant 0 : i32
    %c0_i32_0 = arith.constant 0 : i32
    %c0_i32_1 = arith.constant 0 : i32
    %c0_i32_2 = arith.constant 0 : i32
    return %c0_i32, %c0_i32_0, %c0_i32_1 : i32, i32, i32
  }
  func.func @transform_11(%arg0: i32) -> (i32, i32, i32) {
    %c0_i32 = arith.constant 0 : i32
    %c0_i32_0 = arith.constant 0 : i32
    %c0_i32_1 = arith.constant 0 : i32
    %c0_i32_2 = arith.constant 0 : i32
    return %c0_i32, %c0_i32_0, %c0_i32_1 : i32, i32, i32
  }
  func.func @transform_12(%arg0: i32) -> (i32, i32, i32) {
    %c0_i32 = arith.constant 0 : i32
    %c0_i32_0 = arith.constant 0 : i32
    %c0_i32_1 = arith.constant 0 : i32
    %c0_i32_2 = arith.constant 0 : i32
    return %c0_i32, %c0_i32_0, %c0_i32_1 : i32, i32, i32
  }
  func.func @transform_13(%arg0: i32) -> (i32, i32, i32) {
    %c0_i32 = arith.constant 0 : i32
    %c0_i32_0 = arith.constant 0 : i32
    %c0_i32_1 = arith.constant 0 : i32
    %c0_i32_2 = arith.constant 0 : i32
    return %c0_i32, %c0_i32_0, %c0_i32_1 : i32, i32, i32
  }
  func.func @transform_14(%arg0: i32) -> (i32, i32) {
    %c0_i32 = arith.constant 0 : i32
    %c0_i32_0 = arith.constant 0 : i32
    %c0_i32_1 = arith.constant 0 : i32
    return %c0_i32, %c0_i32_0 : i32, i32
  }
  func.func @transform_15(%arg0: i32) -> (i32, i32) {
    %c0_i32 = arith.constant 0 : i32
    %c0_i32_0 = arith.constant 0 : i32
    %c0_i32_1 = arith.constant 0 : i32
    return %c0_i32, %c0_i32_0 : i32, i32
  }
  func.func @transform_16(%arg0: i32) -> (i32, i32) {
    %c0_i32 = arith.constant 0 : i32
    %c0_i32_0 = arith.constant 0 : i32
    %c0_i32_1 = arith.constant 0 : i32
    return %c0_i32, %c0_i32_0 : i32, i32
  }
  func.func @transform_17(%arg0: i32) -> (i32, i32) {
    %c0_i32 = arith.constant 0 : i32
    %c0_i32_0 = arith.constant 0 : i32
    %c0_i32_1 = arith.constant 0 : i32
    return %c0_i32, %c0_i32_0 : i32, i32
  }
  func.func @transform_18(%arg0: i32) -> (i32, i32, i32) {
    %c0_i32 = arith.constant 0 : i32
    %c0_i32_0 = arith.constant 0 : i32
    %c0_i32_1 = arith.constant 0 : i32
    return %arg0, %c0_i32, %c0_i32_0 : i32, i32, i32
  }
}

</mosaic_0001>

<bundles_post_ra>
// kernel: tpu_custom_call.1
= control target key start
LH: loop header
LB: loop body
LE: loop exit
PB: predicated region body
PF: predicated region fallthrough
CT: control target
= control target key end

     0   :  { %s15185_s0 = inlined_call_operand.vmem [shape: f32[16,16], index: 0, kind: input, shape index: {}]   ;;  %s15186_s1 = inlined_call_operand.vmem [shape: bf16[2,16,192], index: 1, kind: input, shape index: {}]   ;;  %s15187_s2 = inlined_call_operand.vmem [shape: f32[2,1,192], index: 2, kind: input, shape index: {}]   ;;  %s15188_s3 = inlined_call_operand.vmem [shape: f32[2,1,192], index: 3, kind: input, shape index: {}]   ;;  %s15189_s4 = inlined_call_operand.vmem [shape: bf16[2,192,1536], index: 4, kind: input, shape index: {}]   ;;  %s15190_s5 = inlined_call_operand.vmem [shape: f32[2,1,1536], index: 5, kind: input, shape index: {}]   ;;  %s15191_s6 = inlined_call_operand.vmem [shape: bf16[2,512,192], index: 6, kind: input, shape index: {}]   ;;  %s15192_s7 = inlined_call_operand.vmem [shape: f32[2,1,192], index: 7, kind: input, shape index: {}]   ;;  %s15193_s8 = inlined_call_operand.vmem [shape: f32[2,1,192], index: 8, kind: input, shape index: {}]   ;;  %s15194_s9 = inlined_call_operand.vmem [shape: f32[2,1,192], index: 9, kind: input, shape index: {}]   ;;  %s15195_s10 = inlined_call_operand.hbm [shape: bf16[2,192,768], index: 10, kind: input, shape index: {}]   ;;  %s15196_s11 = inlined_call_operand.vmem [shape: f32[2,1,768], index: 11, kind: input, shape index: {}]   ;;  %s15197_s12 = inlined_call_operand.vmem [shape: bf16[2,768,192], index: 12, kind: input, shape index: {}]   ;;  %s15198_s13 = inlined_call_operand.vmem [shape: f32[2,1,192], index: 13, kind: input, shape index: {}]   ;;  %s15199_s14 = inlined_call_operand.vmem [shape: f32[1,192], index: 14, kind: input, shape index: {}]   ;;  %s15200_s15 = inlined_call_operand.vmem [shape: f32[1,192], index: 15, kind: input, shape index: {}]   ;;  %s15201_s16 = inlined_call_operand.vmem [shape: bf16[192,128], index: 16, kind: input, shape index: {}]   ;;  %s15202_s17 = inlined_call_operand.vmem [shape: f32[1,128], index: 17, kind: input, shape index: {}]   ;;  %s15203_s18 = inlined_call_operand.hbm [shape: f32[2,16,128], index: 18, kind: output, shape index: {}]  }
   0x1   :  { %15232 = sst [smem:[#allocation17_spill]] %s15185_s0 }
   0x2   :  { %15233 = sst [smem:[#allocation18_spill]] %s15186_s1 }
   0x3   :  { %15234 = sst [smem:[#allocation19_spill]] %s15187_s2 }
   0x4   :  { %23 = vsyncpa [#allocation3], 0 }
   0x5   :  { %24 = vsyncpa [#allocation4], 0  ;;  %s11770_s27 = smov [#allocation2]  }
   0x6   :  { %s50_s28 = sshll.u32 %s11770_s27, 4  ;;  %s51_s28 = int_to_ptr.vmem [resolvable:$true] %s50_s28 }
   0x7   :  { %s11734_s29 = scalar_lea.vmem %s51_s28, 18432  ;;  %p11739_p1 = scmp.lt.s32.totalorder %s51_s28, %s51_s28 }
   0x8   :  { %p11735_p0 = scmp.ne.s32.totalorder %s51_s28, %s11734_s29  ;;  %p11740_p2 = scmp.lt.s32.totalorder %s11734_s29, %s11734_s29 }
   0xa   :  { %p11741_p3 = por %p11740_p2, %p11739_p1 }
   0xc   :  { %p11742_p4 = pnand %p11741_p3, %p11735_p0 }
   0xe   :  { %11745 = shalt.err (!%p11742_p4)
}
   0xf   :  { %s11771_s30 = smov 384   ;;  %s11772_s0 = smov 24  }
  0x10   :  { %56 = dma.hbm_to_vmem [thread:$0]  %s15195_s10, 18432, %s51_s28, [#allocation3], %s11771_s30, %s11771_s30, %s11772_s0  }
  0x11   :  { %11766 = dma.done.wait [#allocation3], 18432  }
  0x12   :  { %11767 = vsyncadd [#allocation3], 4294948864  ;;  %s15235_s22 = sld [smem:[#allocation18_spill]]  ;;  %vm91_vm0 = vcmask 523264   ;;  %v10416_v20 = vld [vmem:[%s15189_s4 + $0x2a4] ss:$48 sps:$4 sm:$0xff]  }
  0x13   :  { %v10418_v21 = vld [vmem:[%s15189_s4 + $0x2ac] ss:$48 sps:$4 sm:$0xff]   ;;  %v10420_v22 = vld [vmem:[%s15189_s4 + $0x2a0] ss:$48 sps:$4 sm:$0xff]   ;;  %v10421_v23 = vld [vmem:[%s15189_s4 + $0x2a8] ss:$48 sps:$4 sm:$0xff]   ;;  %1141 = vmatprep.subr.bf16.mxu0 %v10416_v20 }
  0x14   :  { %v10422_v24 = vld [vmem:[%s15189_s4 + $0x244] ss:$48 sps:$4 sm:$0xff]   ;;  %v10424_v25 = vld [vmem:[%s15189_s4 + $0x24c] ss:$48 sps:$4 sm:$0xff]   ;;  %1194 = vmatprep.subr.bf16.mxu1 %v10418_v21  ;;  %1142 = vmatpush1.bf16.msra.mxu0 %v10420_v22  ;;  %v10426_v26 = vld [vmem:[%s15189_s4 + $0x240] ss:$48 sps:$4 sm:$0xff]  }
  0x15   :  { %1195 = vmatpush1.bf16.msra.mxu1 %v10421_v23  ;;  %v10427_v27 = vld [vmem:[%s15189_s4 + $0x248] ss:$48 sps:$4 sm:$0xff]   ;;  %1143 = vmatprep.subr.bf16.mxu0 %v10422_v24  ;;  %v10428_v28 = vld [vmem:[%s15189_s4 + $0x1e4] ss:$48 sps:$4 sm:$0xff]   ;;  %v10430_v29 = vld [vmem:[%s15189_s4 + $0x1ec] ss:$48 sps:$4 sm:$0xff]  }
  0x16   :  { %1196 = vmatprep.subr.bf16.mxu1 %v10424_v25  ;;  %v10432_v30 = vld [vmem:[%s15189_s4 + $0x1e0] ss:$48 sps:$4 sm:$0xff]   ;;  %v10433_v31 = vld [vmem:[%s15189_s4 + $0x1e8] ss:$48 sps:$4 sm:$0xff]   ;;  %v10434_v32 = vld [vmem:[%s15189_s4 + $0x184] ss:$48 sps:$4 sm:$0xff]  }
  0x17   :  { %v10436_v33 = vld [vmem:[%s15189_s4 + $0x18c] ss:$48 sps:$4 sm:$0xff]   ;;  %v10438_v34 = vld [vmem:[%s15189_s4 + $0x180] ss:$48 sps:$4 sm:$0xff]   ;;  %v10439_v35 = vld [vmem:[%s15189_s4 + $0x188] ss:$48 sps:$4 sm:$0xff]  }
  0x18   :  { %v75_v0 = vld [vmem:[%s15235_s22] sm:$0xff]  ;;  %v77_v1 = vld [vmem:[%s15235_s22 + $0x10] sm:$0xff]  ;;  %v76_v2 = vld [vmem:[%s15235_s22 + $0x8] sm:$0xff]  ;;  %1144 = vmatpush1.bf16.msra.mxu0 %v10426_v26  ;;  %s15240_s1 = sld [smem:[#allocation19_spill]]  ;;  %vm11774_vm1 = vmmov 0   ;;  %vm1565_vm2 = vcmask 130048  }
  0x19   :  { %v11886_v3 = vunpack.c.l.bf16 %v75_v0  ;;  %v11888_v4 = vunpack.c.h.bf16 %v75_v0  ;;  %v11890_v5 = vunpack.c.l.bf16 %v77_v1  ;;  %v11892_v6 = vunpack.c.h.bf16 %v77_v1  ;;  %v78_v7 = vld [vmem:[%s15235_s22 + $0x18] sm:$0xff]  ;;  %1197 = vmatpush1.bf16.msra.mxu1 %v10427_v27  ;;  %1145 = vmatprep.subr.bf16.mxu0 %v10428_v28  ;;  %v10440_v36 = vld [vmem:[%s15189_s4 + $0x124] ss:$48 sps:$4 sm:$0xff]   ;;  %v10444_v38 = vld [vmem:[%s15189_s4 + $0x120] ss:$48 sps:$4 sm:$0xff]   ;;  %s15245_s21 = sld [smem:[#allocation17_spill]] }
  0x1a   :  { %v11897_v8 = vunpack.c.l.bf16 %v76_v2  ;;  %v11899_v9 = vunpack.c.h.bf16 %v76_v2  ;;  %v11901_v10 = vunpack.c.l.bf16 %v78_v7  ;;  %v11903_v11 = vunpack.c.h.bf16 %v78_v7  ;;  %1198 = vmatprep.subr.bf16.mxu1 %v10430_v29  ;;  %v10442_v37 = vld [vmem:[%s15189_s4 + $0x12c] ss:$48 sps:$4 sm:$0xff]   ;;  %v10445_v39 = vld [vmem:[%s15189_s4 + $0x128] ss:$48 sps:$4 sm:$0xff]   ;;  %v10452_v20 = vld [vmem:[%s15189_s4 + $0x64] ss:$48 sps:$4 sm:$0xff]  }
  0x1b   :  { %15236 = vst [vmem:[#allocation8_spill] sm:$0xff] %v11890_v5  ;;  %v92_v12 = vsel %vm91_vm0, %v11888_v4, 0.0  ;;  %v100_v13 = vsel %vm91_vm0, %v11892_v6, 0.0  ;;  %v10454_v21 = vld [vmem:[%s15189_s4 + $0x6c] ss:$48 sps:$4 sm:$0xff]   ;;  %s11776_s26 = smov [#allocation5]  }
  0x1c   :  { %15237 = vst [vmem:[#allocation9_spill] sm:$0xff] %v11901_v10  ;;  %15238 = vst [vmem:[#allocation10_spill] sm:$0xff] %v11903_v11  ;;  %v93_v14 = vadd.f32 %v92_v12, %v11886_v3  ;;  %v101_v15 = vadd.f32 %v100_v13, %v11890_v5  ;;  %v96_v16 = vsel %vm91_vm0, %v11899_v9, 0.0  ;;  %v104_v17 = vsel %vm91_vm0, %v11903_v11, 0.0  ;;  %1146 = vmatpush1.bf16.msra.mxu0 %v10432_v30  ;;  %v10456_v22 = vld [vmem:[%s15189_s4 + $0x60] ss:$48 sps:$4 sm:$0xff]  }
  0x1d   :  { %v97_v18 = vadd.f32 %v96_v16, %v11897_v8  ;;  %v105_v19 = vadd.f32 %v104_v17, %v11901_v10  ;;  %1199 = vmatpush1.bf16.msra.mxu1 %v10433_v31  ;;  %1147 = vmatprep.subr.bf16.mxu0 %v10434_v32  ;;  %v10446_v16 = vld [vmem:[%s15189_s4 + $0xc4] ss:$48 sps:$4 sm:$0xff]   ;;  %v10448_v17 = vld [vmem:[%s15189_s4 + $0xcc] ss:$48 sps:$4 sm:$0xff]   ;;  %v10457_v23 = vld [vmem:[%s15189_s4 + $0x68] ss:$48 sps:$4 sm:$0xff]  }
  0x1e   :  { %94 = vadd.xlane.f32.xlu0 %v93_v14  ;;  %102 = vadd.xlane.f32.xlu1 %v101_v15  ;;  %v10458_v24 = vld [vmem:[%s15189_s4 + $0x4] ss:$48 sps:$4 sm:$0xff]   ;;  %v10460_v25 = vld [vmem:[%s15189_s4 + $0xc] ss:$48 sps:$4 sm:$0xff]   ;;  %v10462_v26 = vld [vmem:[%s15189_s4] ss:$48 sps:$4 sm:$0xff]  }
  0x1f   :  { %1200 = vmatprep.subr.bf16.mxu1 %v10436_v33  ;;  %v10463_v27 = vld [vmem:[%s15189_s4 + $0x8] ss:$48 sps:$4 sm:$0xff]   ;;  %v10464_v28 = vld [vmem:[%s15189_s4 + $0x424] ss:$48 sps:$4 sm:$0xff]   ;;  %v10466_v29 = vld [vmem:[%s15189_s4 + $0x42c] ss:$48 sps:$4 sm:$0xff]  }
  0x20   :  { %1148 = vmatpush1.bf16.msra.mxu0 %v10438_v34  ;;  %v10468_v30 = vld [vmem:[%s15189_s4 + $0x420] ss:$48 sps:$4 sm:$0xff]   ;;  %v10469_v31 = vld [vmem:[%s15189_s4 + $0x428] ss:$48 sps:$4 sm:$0xff]   ;;  %v10470_v32 = vld [vmem:[%s15189_s4 + $0x3c4] ss:$48 sps:$4 sm:$0xff]  }
  0x21   :  { %1201 = vmatpush1.bf16.msra.mxu1 %v10439_v35  ;;  %1149 = vmatprep.subr.bf16.mxu0 %v10440_v36  ;;  %v10472_v33 = vld [vmem:[%s15189_s4 + $0x3cc] ss:$48 sps:$4 sm:$0xff]   ;;  %v10474_v34 = vld [vmem:[%s15189_s4 + $0x3c0] ss:$48 sps:$4 sm:$0xff]   ;;  %v10475_v35 = vld [vmem:[%s15189_s4 + $0x3c8] ss:$48 sps:$4 sm:$0xff]  }
  0x22   :  { %98 = vadd.xlane.f32.xlu0 %v97_v18  ;;  %106 = vadd.xlane.f32.xlu1 %v105_v19  ;;  %v10450_v18 = vld [vmem:[%s15189_s4 + $0xc0] ss:$48 sps:$4 sm:$0xff]   ;;  %v10451_v19 = vld [vmem:[%s15189_s4 + $0xc8] ss:$48 sps:$4 sm:$0xff]   ;;  %v10476_v36 = vld [vmem:[%s15189_s4 + $0x364] ss:$48 sps:$4 sm:$0xff]  }
  0x23   :  { %1202 = vmatprep.subr.bf16.mxu1 %v10442_v37  ;;  %v10478_v37 = vld [vmem:[%s15189_s4 + $0x36c] ss:$48 sps:$4 sm:$0xff]   ;;  %s9007_s27 = sshll.u32 %s11776_s26, 4  ;;  %s9008_s27 = int_to_ptr.vmem [resolvable:$true] %s9007_s27 }
  0x24   :  { %1150 = vmatpush1.bf16.msra.mxu0 %v10444_v38  ;;  %v10480_v38 = vld [vmem:[%s15189_s4 + $0x360] ss:$48 sps:$4 sm:$0xff]   ;;  %p11751_p6 = scmp.lt.s32.totalorder %s9008_s27, %s9008_s27 }
  0x25   :  { %1203 = vmatpush1.bf16.msra.mxu1 %v10445_v39  ;;  %1151 = vmatprep.subr.bf16.mxu0 %v10446_v16  ;;  %v10481_v39 = vld [vmem:[%s15189_s4 + $0x368] ss:$48 sps:$4 sm:$0xff]  }
  0x26   :  { %1204 = vmatprep.subr.bf16.mxu1 %v10448_v17 }
  0x28   :  { %1152 = vmatpush1.bf16.msra.mxu0 %v10450_v18  ;;  %v90_v18 = vld [vmem:[%s15188_s3] sm:$0x3] }
  0x29   :  { %1205 = vmatpush1.bf16.msra.mxu1 %v10451_v19  ;;  %1153 = vmatprep.subr.bf16.mxu0 %v10452_v20 }
  0x2a   :  { %1206 = vmatprep.subr.bf16.mxu1 %v10454_v21 }
  0x2c   :  { %1154 = vmatpush1.bf16.msra.mxu0 %v10456_v22 }
  0x2d   :  { %1207 = vmatpush1.bf16.msra.mxu1 %v10457_v23  ;;  %1155 = vmatprep.subr.bf16.mxu0 %v10458_v24 }
  0x2e   :  { %1208 = vmatprep.subr.bf16.mxu1 %v10460_v25 }
  0x30   :  { %1156 = vmatpush1.bf16.msra.mxu0 %v10462_v26 }
  0x31   :  { %1209 = vmatpush1.bf16.msra.mxu1 %v10463_v27  ;;  %1165 = vmatprep.subr.bf16.mxu0 %v10464_v28 }
  0x32   :  { %1218 = vmatprep.subr.bf16.mxu1 %v10466_v29 }
  0x34   :  { %1166 = vmatpush2.bf16.msra.mxu0 %v10468_v30 }
  0x35   :  { %1219 = vmatpush2.bf16.msra.mxu1 %v10469_v31  ;;  %1167 = vmatprep.subr.bf16.mxu0 %v10470_v32 }
  0x36   :  { %1220 = vmatprep.subr.bf16.mxu1 %v10472_v33 }
  0x38   :  { %1168 = vmatpush2.bf16.msra.mxu0 %v10474_v34 }
  0x39   :  { %1221 = vmatpush2.bf16.msra.mxu1 %v10475_v35  ;;  %1169 = vmatprep.subr.bf16.mxu0 %v10476_v36 }
  0x3a   :  { %1222 = vmatprep.subr.bf16.mxu1 %v10478_v37 }
  0x3c   :  { %1170 = vmatpush2.bf16.msra.mxu0 %v10480_v38 }
  0x3d   :  { %1223 = vmatpush2.bf16.msra.mxu1 %v10481_v39 }
  0xa7   :  { %v95_v40 = vpop.xlane.xlu0 %94  ;;  %v103_v41 = vpop.xlane.xlu1 %102 }
  0xa8   :  { %v109_v42 = vmul.f32 0.0052083335, %v95_v40  ;;  %v111_v43 = vmul.f32 0.0052083335, %v103_v41  ;;  %v10482_v40 = vld [vmem:[%s15189_s4 + $0x304] ss:$48 sps:$4 sm:$0xff]  }
  0xa9   :  { %v10484_v41 = vld [vmem:[%s15189_s4 + $0x30c] ss:$48 sps:$4 sm:$0xff]   ;;  %1171 = vmatprep.subr.bf16.mxu0 %v10482_v40 }
  0xaa   :  { %v11978_v44 = vsub.f32 %v11886_v3, %v109_v42  ;;  %v11981_v45 = vsub.f32 %v11888_v4, %v109_v42  ;;  %v11984_v46 = vsub.f32 %v11890_v5, %v111_v43  ;;  %v11987_v47 = vsub.f32 %v11892_v6, %v111_v43  ;;  %v10486_v42 = vld [vmem:[%s15189_s4 + $0x300] ss:$48 sps:$4 sm:$0xff]   ;;  %v10487_v43 = vld [vmem:[%s15189_s4 + $0x308] ss:$48 sps:$4 sm:$0xff]   ;;  %1224 = vmatprep.subr.bf16.mxu1 %v10484_v41 }
  0xab   :  { %v99_v48 = vpop.xlane.xlu0 %98  ;;  %v107_v49 = vpop.xlane.xlu1 %106  ;;  %1172 = vmatpush2.bf16.msra.mxu0 %v10486_v42  ;;  %1225 = vmatpush2.bf16.msra.mxu1 %v10487_v43 }
  0xac   :  { %v110_v50 = vmul.f32 0.0052083335, %v99_v48  ;;  %v112_v51 = vmul.f32 0.0052083335, %v107_v49  ;;  %v121_v52 = vmul.f32 %v11978_v44, %v11978_v44  ;;  %v122_v53 = vmul.f32 %v11981_v45, %v11981_v45  ;;  %v10490_v48 = vld [vmem:[%s15189_s4 + $0x2b4] ss:$48 sps:$4 sm:$0xff]  }
  0xad   :  { %v125_v54 = vmul.f32 %v11984_v46, %v11984_v46  ;;  %v126_v55 = vmul.f32 %v11987_v47, %v11987_v47  ;;  %v10493_v49 = vld [vmem:[%s15189_s4 + $0x2bc] ss:$48 sps:$4 sm:$0xff]   ;;  %1247 = vmatprep.subr.bf16.mxu0 %v10490_v48 }
  0xae   :  { %v11998_v56 = vsub.f32 %v11897_v8, %v110_v50  ;;  %v12001_v57 = vsub.f32 %v11899_v9, %v110_v50  ;;  %v12004_v58 = vsub.f32 %v11901_v10, %v112_v51  ;;  %v12007_v59 = vsub.f32 %v11903_v11, %v112_v51  ;;  %1300 = vmatprep.subr.bf16.mxu1 %v10493_v49  ;;  %v10494_v49 = vld [vmem:[%s15189_s4 + $0x250] ss:$48 sps:$4 sm:$0xff]  }
  0xaf   :  { %v129_v60 = vsel %vm91_vm0, %v122_v53, 0.0  ;;  %v137_v61 = vsel %vm91_vm0, %v126_v55, 0.0  ;;  %v166_v51 = vlaneseq }
  0xb0   :  { %v130_v62 = vadd.f32 %v129_v60, %v121_v52  ;;  %v123_v63 = vmul.f32 %v11998_v56, %v11998_v56  ;;  %v124_v0 = vmul.f32 %v12001_v57, %v12001_v57  ;;  %v127_v1 = vmul.f32 %v12004_v58, %v12004_v58 }
  0xb1   :  { %v128_v2 = vmul.f32 %v12007_v59, %v12007_v59  ;;  %v138_v7 = vadd.f32 %v137_v61, %v125_v54  ;;  %v12111_v61 = vshrl.u32 %v166_v51, 7  ;;  %v10502_v51 = vld [vmem:[%s15189_s4 + $0x1f4] ss:$48 sps:$4 sm:$0xff]  }
  0xb2   :  { %131 = vadd.xlane.f32.xlu0 %v130_v62  ;;  %v133_v12 = vsel %vm91_vm0, %v124_v0, 0.0 }
  0xb3   :  { %v134_v13 = vadd.f32 %v133_v12, %v123_v63  ;;  %v141_v14 = vsel %vm91_vm0, %v128_v2, 0.0  ;;  %15239 = vst [vmem:[#allocation11_spill] sm:$0xff] %v12111_v61  ;;  %v12117_v12 = vsub.s32 1, %v12111_v61 }
  0xb4   :  { %v142_v15 = vadd.f32 %v141_v14, %v127_v1  ;;  %v89_v14 = vld [vmem:[%s15240_s1] sm:$0x3] }
  0xb5   :  { %135 = vadd.xlane.f32.xlu1 %v134_v13  ;;  %v173_v16 = vrot.slane %v89_v14, %v12117_v12  ;;  %v192_v24 = vrot.slane %v90_v18, %v12117_v12 }
  0xb6   :  { %139 = vadd.xlane.f32.xlu0 %v138_v7  ;;  %v12114_v7 = vsub.s32 0, %v12111_v61 }
  0xb8   :  { %v188_v25 = vrot.slane %v90_v18, %v12114_v7  ;;  %v10523_v18 = vld [vmem:[%s15189_s4 + $0xdc] ss:$48 sps:$4 sm:$0xff]  }
  0xb9   :  { %143 = vadd.xlane.f32.xlu1 %v142_v15  ;;  %v169_v15 = vrot.slane %v89_v14, %v12114_v7  ;;  %v10517_v14 = vld [vmem:[%s15189_s4 + $0x13c] ss:$48 sps:$4 sm:$0xff]  }
 0x13b   :  { %v132_v50 = vpop.xlane.xlu0 %131 }
 0x13c   :  { %v145_v52 = vmul.f32 0.0052083335, %v132_v50  ;;  %v10497_v50 = vld [vmem:[%s15189_s4 + $0x258] ss:$48 sps:$4 sm:$0xff]  }
 0x13e   :  { %v149_v53 = vadd.f32 1e-05, %v145_v52  ;;  %v136_v54 = vpop.xlane.xlu1 %135  ;;  %v10505_v52 = vld [vmem:[%s15189_s4 + $0x1fc] ss:$48 sps:$4 sm:$0xff]  }
 0x13f   :  { %v146_v55 = vmul.f32 0.0052083335, %v136_v54  ;;  %v140_v60 = vpop.xlane.xlu0 %139 }
 0x140   :  { %11556 = vrsqrt.f32 %v149_v53  ;;  %v147_v62 = vmul.f32 0.0052083335, %v140_v60  ;;  %v10503_v60 = vld [vmem:[%s15189_s4 + $0x1f8] ss:$48 sps:$4 sm:$0xff]  }
 0x141   :  { %v150_v63 = vadd.f32 1e-05, %v146_v55  ;;  %v10500_v55 = vld [vmem:[%s15189_s4 + $0x1f0] ss:$48 sps:$4 sm:$0xff]  }
 0x142   :  { %v151_v0 = vadd.f32 1e-05, %v147_v62  ;;  %v144_v1 = vpop.xlane.xlu1 %143 }
 0x143   :  { %11558 = vrsqrt.f32 %v150_v63  ;;  %v148_v2 = vmul.f32 0.0052083335, %v144_v1  ;;  %v10508_v63 = vld [vmem:[%s15189_s4 + $0x194] ss:$48 sps:$4 sm:$0xff]   ;;  %v10506_v1 = vld [vmem:[%s15189_s4 + $0x190] ss:$48 sps:$4 sm:$0xff]  }
 0x144   :  { %11560 = vrsqrt.f32 %v151_v0  ;;  %v10511_v0 = vld [vmem:[%s15189_s4 + $0x19c] ss:$48 sps:$4 sm:$0xff]  }
 0x145   :  { %v152_v13 = vadd.f32 1e-05, %v148_v2  ;;  %v10509_v2 = vld [vmem:[%s15189_s4 + $0x198] ss:$48 sps:$4 sm:$0xff]  }
 0x147   :  { %11562 = vrsqrt.f32 %v152_v13  ;;  %v10514_v13 = vld [vmem:[%s15189_s4 + $0x134] ss:$48 sps:$4 sm:$0xff]  }
 0x14d   :  { %v11557_v17 = vpop.eup %11556 }
 0x14e   :  { %v157_v19 = vmul.f32 %v11557_v17, %v11978_v44  ;;  %v158_v20 = vmul.f32 %v11557_v17, %v11981_v45  ;;  %v10520_v17 = vld [vmem:[%s15189_s4 + $0xd4] ss:$48 sps:$4 sm:$0xff]  }
 0x150   :  { %v11559_v21 = vpop.eup %11558  ;;  %v176_v22 = vmul.f32 %v169_v15, %v157_v19  ;;  %v177_v23 = vmul.f32 %v173_v16, %v158_v20  ;;  %v10518_v19 = vld [vmem:[%s15189_s4 + $0xd0] ss:$48 sps:$4 sm:$0xff]   ;;  %v10521_v20 = vld [vmem:[%s15189_s4 + $0xd8] ss:$48 sps:$4 sm:$0xff]  }
 0x151   :  { %v11561_v26 = vpop.eup %11560  ;;  %v159_v27 = vmul.f32 %v11559_v21, %v11998_v56  ;;  %v160_v28 = vmul.f32 %v11559_v21, %v12001_v57  ;;  %v10491_v57 = vld [vmem:[%s15189_s4 + $0x2b8] ss:$48 sps:$4 sm:$0xff]   ;;  %v10526_v21 = vld [vmem:[%s15189_s4 + $0x74] ss:$48 sps:$4 sm:$0xff]  }
 0x152   :  { %v162_v29 = vmul.f32 %v11561_v26, %v11987_v47  ;;  %v196_v33 = vadd.f32 %v192_v24, %v177_v23  ;;  %v195_v45 = vadd.f32 %v188_v25, %v176_v22  ;;  %v161_v38 = vmul.f32 %v11561_v26, %v11984_v46  ;;  %v10488_v47 = vld [vmem:[%s15189_s4 + $0x2b0] ss:$48 sps:$4 sm:$0xff]   ;;  %v10499_v46 = vld [vmem:[%s15189_s4 + $0x25c] ss:$48 sps:$4 sm:$0xff]  }
 0x153   :  { %v178_v30 = vmul.f32 %v169_v15, %v159_v27  ;;  %v179_v31 = vmul.f32 %v173_v16, %v160_v28  ;;  %v10529_v22 = vld [vmem:[%s15189_s4 + $0x7c] ss:$48 sps:$4 sm:$0xff]   ;;  %v10524_v23 = vld [vmem:[%s15189_s4 + $0x70] ss:$48 sps:$4 sm:$0xff]   ;;  %v10533_v28 = vld [vmem:[%s15189_s4 + $0x18] ss:$48 sps:$4 sm:$0xff]  }
 0x154   :  { %v11563_v32 = vpop.eup %11562  ;;  %v181_v44 = vmul.f32 %v173_v16, %v162_v29  ;;  %v180_v43 = vmul.f32 %v169_v15, %v161_v38  ;;  %v10535_v26 = vld [vmem:[%s15189_s4 + $0x1c] ss:$48 sps:$4 sm:$0xff]   ;;  %v10530_v27 = vld [vmem:[%s15189_s4 + $0x10] ss:$48 sps:$4 sm:$0xff]   ;;  %v10538_v29 = vld [vmem:[%s15189_s4 + $0x434] ss:$48 sps:$4 sm:$0xff]  }
 0x155   :  { %v163_v34 = vmul.f32 %v11563_v32, %v12004_v58  ;;  %v164_v35 = vmul.f32 %v11563_v32, %v12007_v59  ;;  %v198_v36 = vadd.f32 %v192_v24, %v179_v31  ;;  %v197_v37 = vadd.f32 %v188_v25, %v178_v30  ;;  %v10496_v59 = vld [vmem:[%s15189_s4 + $0x254] ss:$48 sps:$4 sm:$0xff]   ;;  %v10541_v30 = vld [vmem:[%s15189_s4 + $0x43c] ss:$48 sps:$4 sm:$0xff]   ;;  %v10536_v31 = vld [vmem:[%s15189_s4 + $0x430] ss:$48 sps:$4 sm:$0xff]  }
 0x156   :  { %v200_v41 = vadd.f32 %v192_v24, %v181_v44  ;;  %v199_v54 = vadd.f32 %v188_v25, %v180_v43  ;;  %v10539_v32 = vld [vmem:[%s15189_s4 + $0x438] ss:$48 sps:$4 sm:$0xff]   ;;  %v10544_v44 = vld [vmem:[%s15189_s4 + $0x3d4] ss:$48 sps:$4 sm:$0xff]  }
 0x157   :  { %v183_v39 = vmul.f32 %v173_v16, %v164_v35  ;;  %v12137_v56 = vpack.c.bf16 %v198_v36, %v196_v33  ;;  %v12145_v40 = vpack.c.bf16 %v197_v37, %v195_v45  ;;  %v182_v58 = vmul.f32 %v169_v15, %v163_v34  ;;  %v10512_v15 = vld [vmem:[%s15189_s4 + $0x130] ss:$48 sps:$4 sm:$0xff]   ;;  %v10515_v16 = vld [vmem:[%s15189_s4 + $0x138] ss:$48 sps:$4 sm:$0xff]   ;;  %v10547_v33 = vld [vmem:[%s15189_s4 + $0x3dc] ss:$48 sps:$4 sm:$0xff]  }
 0x158   :  { %v10542_v45 = vld [vmem:[%s15189_s4 + $0x3d0] ss:$48 sps:$4 sm:$0xff]   ;;  %v10545_v34 = vld [vmem:[%s15189_s4 + $0x3d8] ss:$48 sps:$4 sm:$0xff]   ;;  %v10550_v35 = vld [vmem:[%s15189_s4 + $0x374] ss:$48 sps:$4 sm:$0xff]  }
 0x159   :  { %9163 = vmatprep.mubr.msk.bf16.mxu0 %vm91_vm0, %v12137_v56  ;;  %9165 = vmatprep.mubr.msk.bf16.mxu1 %vm91_vm0, %v12137_v56  ;;  %v202_v42 = vadd.f32 %v192_v24, %v183_v39  ;;  %v201_v53 = vadd.f32 %v188_v25, %v182_v58  ;;  %v10527_v24 = vld [vmem:[%s15189_s4 + $0x78] ss:$48 sps:$4 sm:$0xff]   ;;  %v10532_v25 = vld [vmem:[%s15189_s4 + $0x14] ss:$48 sps:$4 sm:$0xff]   ;;  %v10553_v36 = vld [vmem:[%s15189_s4 + $0x37c] ss:$48 sps:$4 sm:$0xff]  }
 0x15a   :  { %1174 = vmatmul.mubr.bf16.vlgmr.msra.gmra.mxu0 %v12145_v40  ;;  %1227 = vmatmul.mubr.bf16.vlgmr.msra.gmra.mxu1 %v12145_v40  ;;  %v10548_v37 = vld [vmem:[%s15189_s4 + $0x370] ss:$48 sps:$4 sm:$0xff]   ;;  %v10551_v38 = vld [vmem:[%s15189_s4 + $0x378] ss:$48 sps:$4 sm:$0xff]   ;;  %v10556_v39 = vld [vmem:[%s15189_s4 + $0x314] ss:$48 sps:$4 sm:$0xff]  }
 0x15b   :  { %1248 = vmatpush1.bf16.msra.mxu0 %v10488_v47  ;;  %1301 = vmatpush1.bf16.msra.mxu1 %v10491_v57  ;;  %v12159_v48 = vpack.c.bf16 %v202_v42, %v200_v41  ;;  %v12183_v62 = vpack.c.bf16 %v201_v53, %v199_v54  ;;  %v10559_v47 = vld [vmem:[%s15189_s4 + $0x31c] ss:$48 sps:$4 sm:$0xff]   ;;  %v10554_v57 = vld [vmem:[%s15189_s4 + $0x310] ss:$48 sps:$4 sm:$0xff]   ;;  %v10557_v58 = vld [vmem:[%s15189_s4 + $0x318] ss:$48 sps:$4 sm:$0xff]  }
 0x15c   :  { %1249 = vmatprep.subr.bf16.mxu0 %v10496_v59  ;;  %1302 = vmatprep.subr.bf16.mxu1 %v10499_v46  ;;  %v10562_v59 = vld [vmem:[%s15189_s4 + $0x2c4] ss:$48 sps:$4 sm:$0xff]   ;;  %v10565_v46 = vld [vmem:[%s15189_s4 + $0x2cc] ss:$48 sps:$4 sm:$0xff]   ;;  %v10560_v41 = vld [vmem:[%s15189_s4 + $0x2c0] ss:$48 sps:$4 sm:$0xff]  }
 0x15d   :  { %9164 = vmatprep.mubr.msk.bf16.mxu0 %vm91_vm0, %v12159_v48  ;;  %9166 = vmatprep.mubr.msk.bf16.mxu1 %vm91_vm0, %v12159_v48  ;;  %v10563_v42 = vld [vmem:[%s15189_s4 + $0x2c8] ss:$48 sps:$4 sm:$0xff]   ;;  %v10568_v43 = vld [vmem:[%s15189_s4 + $0x264] ss:$48 sps:$4 sm:$0xff]   ;;  %v10577_v53 = vld [vmem:[%s15189_s4 + $0x20c] ss:$48 sps:$4 sm:$0xff]  }
 0x15e   :  { %v10572_v54 = vld [vmem:[%s15189_s4 + $0x200] ss:$48 sps:$4 sm:$0xff]  }
 0x15f   :  { %1250 = vmatpush1.bf16.msra.mxu0 %v10494_v49  ;;  %1303 = vmatpush1.bf16.msra.mxu1 %v10497_v50  ;;  %v10571_v49 = vld [vmem:[%s15189_s4 + $0x26c] ss:$48 sps:$4 sm:$0xff]   ;;  %v10566_v50 = vld [vmem:[%s15189_s4 + $0x260] ss:$48 sps:$4 sm:$0xff]  }
 0x160   :  { %1251 = vmatprep.subr.bf16.mxu0 %v10502_v51  ;;  %1304 = vmatprep.subr.bf16.mxu1 %v10505_v52  ;;  %v10569_v51 = vld [vmem:[%s15189_s4 + $0x268] ss:$48 sps:$4 sm:$0xff]   ;;  %v10574_v52 = vld [vmem:[%s15189_s4 + $0x204] ss:$48 sps:$4 sm:$0xff]  }
 0x162   :  { %1184 = vmatmul.mubr.bf16.gmra.mxu0 %v12183_v62  ;;  %1237 = vmatmul.mubr.bf16.gmra.mxu1 %v12183_v62 }
 0x163   :  { %1252 = vmatpush1.bf16.msra.mxu0 %v10500_v55  ;;  %1305 = vmatpush1.bf16.msra.mxu1 %v10503_v60  ;;  %v10575_v55 = vld [vmem:[%s15189_s4 + $0x208] ss:$48 sps:$4 sm:$0xff]   ;;  %v10580_v60 = vld [vmem:[%s15189_s4 + $0x1a4] ss:$48 sps:$4 sm:$0xff]  }
 0x164   :  { %9167 = vmatprep.mubr.msk.bf16.mxu0 %vm91_vm0, %v12137_v56  ;;  %9169 = vmatprep.mubr.msk.bf16.mxu1 %vm91_vm0, %v12137_v56 }
 0x165   :  { %1253 = vmatprep.subr.bf16.mxu0 %v10508_v63  ;;  %1306 = vmatprep.subr.bf16.mxu1 %v10511_v0  ;;  %v10583_v63 = vld [vmem:[%s15189_s4 + $0x1ac] ss:$48 sps:$4 sm:$0xff]   ;;  %v10578_v0 = vld [vmem:[%s15189_s4 + $0x1a0] ss:$48 sps:$4 sm:$0xff]  }
 0x167   :  { %1254 = vmatpush1.bf16.msra.mxu0 %v10506_v1  ;;  %1307 = vmatpush1.bf16.msra.mxu1 %v10509_v2  ;;  %v10581_v1 = vld [vmem:[%s15189_s4 + $0x1a8] ss:$48 sps:$4 sm:$0xff]   ;;  %v10586_v2 = vld [vmem:[%s15189_s4 + $0x144] ss:$48 sps:$4 sm:$0xff]  }
 0x168   :  { %1255 = vmatprep.subr.bf16.mxu0 %v10514_v13  ;;  %1308 = vmatprep.subr.bf16.mxu1 %v10517_v14  ;;  %v10584_v13 = vld [vmem:[%s15189_s4 + $0x140] ss:$48 sps:$4 sm:$0xff]   ;;  %v10587_v14 = vld [vmem:[%s15189_s4 + $0x148] ss:$48 sps:$4 sm:$0xff]  }
 0x16b   :  { %1256 = vmatpush1.bf16.msra.mxu0 %v10512_v15  ;;  %1309 = vmatpush1.bf16.msra.mxu1 %v10515_v16  ;;  %v10592_v15 = vld [vmem:[%s15189_s4 + $0xe4] ss:$48 sps:$4 sm:$0xff]   ;;  %v10595_v16 = vld [vmem:[%s15189_s4 + $0xec] ss:$48 sps:$4 sm:$0xff]  }
 0x16c   :  { %1257 = vmatprep.subr.bf16.mxu0 %v10520_v17  ;;  %1310 = vmatprep.subr.bf16.mxu1 %v10523_v18  ;;  %v10590_v17 = vld [vmem:[%s15189_s4 + $0xe0] ss:$48 sps:$4 sm:$0xff]   ;;  %v10593_v18 = vld [vmem:[%s15189_s4 + $0xe8] ss:$48 sps:$4 sm:$0xff]  }
 0x16f   :  { %1258 = vmatpush1.bf16.msra.mxu0 %v10518_v19  ;;  %1311 = vmatpush1.bf16.msra.mxu1 %v10521_v20  ;;  %v10598_v19 = vld [vmem:[%s15189_s4 + $0x84] ss:$48 sps:$4 sm:$0xff]   ;;  %v10601_v20 = vld [vmem:[%s15189_s4 + $0x8c] ss:$48 sps:$4 sm:$0xff]  }
 0x170   :  { %1259 = vmatprep.subr.bf16.mxu0 %v10526_v21  ;;  %1312 = vmatprep.subr.bf16.mxu1 %v10529_v22  ;;  %v10596_v21 = vld [vmem:[%s15189_s4 + $0x80] ss:$48 sps:$4 sm:$0xff]   ;;  %v10599_v22 = vld [vmem:[%s15189_s4 + $0x88] ss:$48 sps:$4 sm:$0xff]  }
 0x173   :  { %1260 = vmatpush1.bf16.msra.mxu0 %v10524_v23  ;;  %1313 = vmatpush1.bf16.msra.mxu1 %v10527_v24  ;;  %v10604_v23 = vld [vmem:[%s15189_s4 + $0x24] ss:$48 sps:$4 sm:$0xff]   ;;  %v10607_v24 = vld [vmem:[%s15189_s4 + $0x2c] ss:$48 sps:$4 sm:$0xff]  }
 0x174   :  { %1261 = vmatprep.subr.bf16.mxu0 %v10532_v25  ;;  %1314 = vmatprep.subr.bf16.mxu1 %v10535_v26  ;;  %v10602_v25 = vld [vmem:[%s15189_s4 + $0x20] ss:$48 sps:$4 sm:$0xff]   ;;  %v10605_v26 = vld [vmem:[%s15189_s4 + $0x28] ss:$48 sps:$4 sm:$0xff]  }
 0x177   :  { %1262 = vmatpush1.bf16.msra.mxu0 %v10530_v27  ;;  %1315 = vmatpush1.bf16.msra.mxu1 %v10533_v28  ;;  %v10610_v27 = vld [vmem:[%s15189_s4 + $0x444] ss:$48 sps:$4 sm:$0xff]   ;;  %v10613_v28 = vld [vmem:[%s15189_s4 + $0x44c] ss:$48 sps:$4 sm:$0xff]  }
 0x178   :  { %1271 = vmatprep.subr.bf16.mxu0 %v10538_v29  ;;  %1324 = vmatprep.subr.bf16.mxu1 %v10541_v30  ;;  %v10608_v29 = vld [vmem:[%s15189_s4 + $0x440] ss:$48 sps:$4 sm:$0xff]   ;;  %v10611_v30 = vld [vmem:[%s15189_s4 + $0x448] ss:$48 sps:$4 sm:$0xff]  }
 0x17b   :  { %1272 = vmatpush2.bf16.msra.mxu0 %v10536_v31  ;;  %1325 = vmatpush2.bf16.msra.mxu1 %v10539_v32  ;;  %v10616_v31 = vld [vmem:[%s15189_s4 + $0x3e4] ss:$48 sps:$4 sm:$0xff]   ;;  %v10619_v32 = vld [vmem:[%s15189_s4 + $0x3ec] ss:$48 sps:$4 sm:$0xff]  }
 0x17c   :  { %1273 = vmatprep.subr.bf16.mxu0 %v10544_v44  ;;  %1326 = vmatprep.subr.bf16.mxu1 %v10547_v33  ;;  %v10614_v44 = vld [vmem:[%s15189_s4 + $0x3e0] ss:$48 sps:$4 sm:$0xff]   ;;  %v10617_v33 = vld [vmem:[%s15189_s4 + $0x3e8] ss:$48 sps:$4 sm:$0xff]  }
 0x17f   :  { %1274 = vmatpush2.bf16.msra.mxu0 %v10542_v45  ;;  %1327 = vmatpush2.bf16.msra.mxu1 %v10545_v34  ;;  %v10622_v45 = vld [vmem:[%s15189_s4 + $0x384] ss:$48 sps:$4 sm:$0xff]   ;;  %v10625_v34 = vld [vmem:[%s15189_s4 + $0x38c] ss:$48 sps:$4 sm:$0xff]  }
 0x180   :  { %1275 = vmatprep.subr.bf16.mxu0 %v10550_v35  ;;  %1328 = vmatprep.subr.bf16.mxu1 %v10553_v36  ;;  %v10620_v35 = vld [vmem:[%s15189_s4 + $0x380] ss:$48 sps:$4 sm:$0xff]   ;;  %v10623_v36 = vld [vmem:[%s15189_s4 + $0x388] ss:$48 sps:$4 sm:$0xff]  }
 0x183   :  { %1276 = vmatpush2.bf16.msra.mxu0 %v10548_v37  ;;  %1329 = vmatpush2.bf16.msra.mxu1 %v10551_v38  ;;  %v10628_v37 = vld [vmem:[%s15189_s4 + $0x324] ss:$48 sps:$4 sm:$0xff]   ;;  %v10631_v38 = vld [vmem:[%s15189_s4 + $0x32c] ss:$48 sps:$4 sm:$0xff]  }
 0x184   :  { %1277 = vmatprep.subr.bf16.mxu0 %v10556_v39  ;;  %1330 = vmatprep.subr.bf16.mxu1 %v10559_v47  ;;  %v10626_v39 = vld [vmem:[%s15189_s4 + $0x320] ss:$48 sps:$4 sm:$0xff]   ;;  %v10629_v47 = vld [vmem:[%s15189_s4 + $0x328] ss:$48 sps:$4 sm:$0xff]  }
 0x187   :  { %1278 = vmatpush2.bf16.msra.mxu0 %v10554_v57  ;;  %1331 = vmatpush2.bf16.msra.mxu1 %v10557_v58  ;;  %v15209_v57 = vmov 0.0  }
 0x188   :  { %1353 = vmatprep.subr.bf16.mxu0 %v10562_v59  ;;  %1406 = vmatprep.subr.bf16.mxu1 %v10565_v46 }
 0x18a   :  { %1280 = vmatmul.mubr.bf16.vlgmr.msra.gmra.mxu0 %v12145_v40  ;;  %1333 = vmatmul.mubr.bf16.vlgmr.msra.gmra.mxu1 %v12145_v40 }
 0x18b   :  { %9168 = vmatprep.mubr.msk.bf16.mxu0 %vm91_vm0, %v12159_v48  ;;  %9170 = vmatprep.mubr.msk.bf16.mxu1 %vm91_vm0, %v12159_v48 }
 0x18c   :  { %1354 = vmatpush1.bf16.msra.mxu0 %v10560_v41  ;;  %1407 = vmatpush1.bf16.msra.mxu1 %v10563_v42 }
 0x18d   :  { %1355 = vmatprep.subr.bf16.mxu0 %v10568_v43  ;;  %1408 = vmatprep.subr.bf16.mxu1 %v10571_v49 }
 0x190   :  { %1356 = vmatpush1.bf16.msra.mxu0 %v10566_v50  ;;  %1409 = vmatpush1.bf16.msra.mxu1 %v10569_v51  ;;  %v12485_v50 = vsub.s32 3, %v12111_v61 }
 0x191   :  { %1357 = vmatprep.subr.bf16.mxu0 %v10574_v52  ;;  %1410 = vmatprep.subr.bf16.mxu1 %v10577_v53 }
 0x192   :  { %1290 = vmatmul.mubr.bf16.gmra.mxu0 %v12183_v62  ;;  %1343 = vmatmul.mubr.bf16.gmra.mxu1 %v12183_v62  ;;  %15242 = vst [vmem:[#allocation13_spill] sm:$0xff] %v12485_v50 }
 0x193   :  { %9171 = vmatprep.mubr.msk.bf16.mxu0 %vm91_vm0, %v12137_v56  ;;  %9173 = vmatprep.mubr.msk.bf16.mxu1 %vm91_vm0, %v12137_v56  ;;  %v10589_v56 = vld [vmem:[%s15189_s4 + $0x14c] ss:$48 sps:$4 sm:$0xff]  }
 0x194   :  { %1358 = vmatpush1.bf16.msra.mxu0 %v10572_v54  ;;  %1411 = vmatpush1.bf16.msra.mxu1 %v10575_v55 }
 0x195   :  { %1359 = vmatprep.subr.bf16.mxu0 %v10580_v60  ;;  %1412 = vmatprep.subr.bf16.mxu1 %v10583_v63 }
 0x198   :  { %1360 = vmatpush1.bf16.msra.mxu0 %v10578_v0  ;;  %1413 = vmatpush1.bf16.msra.mxu1 %v10581_v1 }
 0x199   :  { %1361 = vmatprep.subr.bf16.mxu0 %v10586_v2  ;;  %1414 = vmatprep.subr.bf16.mxu1 %v10589_v56 }
 0x19c   :  { %1362 = vmatpush1.bf16.msra.mxu0 %v10584_v13  ;;  %1415 = vmatpush1.bf16.msra.mxu1 %v10587_v14 }
 0x19d   :  { %1363 = vmatprep.subr.bf16.mxu0 %v10592_v15  ;;  %1416 = vmatprep.subr.bf16.mxu1 %v10595_v16 }
 0x1a0   :  { %1364 = vmatpush1.bf16.msra.mxu0 %v10590_v17  ;;  %1417 = vmatpush1.bf16.msra.mxu1 %v10593_v18 }
 0x1a1   :  { %1365 = vmatprep.subr.bf16.mxu0 %v10598_v19  ;;  %1418 = vmatprep.subr.bf16.mxu1 %v10601_v20 }
 0x1a4   :  { %1366 = vmatpush1.bf16.msra.mxu0 %v10596_v21  ;;  %1419 = vmatpush1.bf16.msra.mxu1 %v10599_v22 }
 0x1a5   :  { %1367 = vmatprep.subr.bf16.mxu0 %v10604_v23  ;;  %1420 = vmatprep.subr.bf16.mxu1 %v10607_v24 }
 0x1a8   :  { %1368 = vmatpush1.bf16.msra.mxu0 %v10602_v25  ;;  %1421 = vmatpush1.bf16.msra.mxu1 %v10605_v26  ;;  %v12522_v25 = vsub.s32 4, %v12111_v61  ;;  %v15207_v26 = vsub.s32 6, %v12111_v61 }
 0x1a9   :  { %1377 = vmatprep.subr.bf16.mxu0 %v10610_v27  ;;  %1430 = vmatprep.subr.bf16.mxu1 %v10613_v28  ;;  %v12526_v27 = vsub.s32 5, %v12111_v61 }
 0x1aa   :  { %15243 = vst [vmem:[#allocation14_spill] sm:$0xff] %v12522_v25 }
 0x1ab   :  { %15244 = vst [vmem:[#allocation15_spill] sm:$0xff] %v12526_v27 }
 0x1ac   :  { %1378 = vmatpush2.bf16.msra.mxu0 %v10608_v29  ;;  %1431 = vmatpush2.bf16.msra.mxu1 %v10611_v30 }
 0x1ad   :  { %1379 = vmatprep.subr.bf16.mxu0 %v10616_v31  ;;  %1432 = vmatprep.subr.bf16.mxu1 %v10619_v32 }
 0x1b0   :  { %1380 = vmatpush2.bf16.msra.mxu0 %v10614_v44  ;;  %1433 = vmatpush2.bf16.msra.mxu1 %v10617_v33 }
 0x1b1   :  { %1381 = vmatprep.subr.bf16.mxu0 %v10622_v45  ;;  %1434 = vmatprep.subr.bf16.mxu1 %v10625_v34  ;;  %v15208_v45 = vsub.s32 7, %v12111_v61 }
 0x1b4   :  { %1382 = vmatpush2.bf16.msra.mxu0 %v10620_v35  ;;  %1435 = vmatpush2.bf16.msra.mxu1 %v10623_v36 }
 0x1b5   :  { %1383 = vmatprep.subr.bf16.mxu0 %v10628_v37  ;;  %1436 = vmatprep.subr.bf16.mxu1 %v10631_v38 }
 0x1b8   :  { %1384 = vmatpush2.bf16.msra.mxu0 %v10626_v39  ;;  %1437 = vmatpush2.bf16.msra.mxu1 %v10629_v47 }
 0x1b9   :  { %10215 = vmatprep.subr.bf16.mxu1 %v15209_v57  ;;  %10239 = vmatprep.subr.bf16.mxu0 %v15209_v57 }
 0x1bb   :  { %1386 = vmatmul.mubr.bf16.vlgmr.msra.gmra.mxu0 %v12145_v40  ;;  %1439 = vmatmul.mubr.bf16.vlgmr.msra.gmra.mxu1 %v12145_v40  ;;  %v12470_v40 = vsub.s32 2, %v12111_v61 }
 0x1bc   :  { %9172 = vmatprep.mubr.msk.bf16.mxu0 %vm91_vm0, %v12159_v48  ;;  %9174 = vmatprep.mubr.msk.bf16.mxu1 %vm91_vm0, %v12159_v48  ;;  %v351_v48 = vld [vmem:[%s15190_s5] sm:$0xff] }
 0x1bd   :  { %15241 = vst [vmem:[#allocation12_spill] sm:$0xff] %v12470_v40  ;;  %v366_v59 = vrot.slane %v351_v48, %v12470_v40  ;;  %v362_v63 = vrot.slane %v351_v48, %v12117_v12  ;;  %v12497_v0 = vrot.slane %v351_v48, %v12485_v50  ;;  %v374_v30 = vrot.slane %v351_v48, %v12522_v25 }
 0x1be   :  { %v382_v31 = vrot.slane %v351_v48, %v15207_v26  ;;  %v378_v33 = vrot.slane %v351_v48, %v12526_v27 }
 0x1c3   :  { %1396 = vmatmul.mubr.bf16.gmra.mxu0 %v12183_v62  ;;  %1449 = vmatmul.mubr.bf16.gmra.mxu1 %v12183_v62 }
 0x1c4   :  { %10217 = vmatprep.mubr.msk.bf16.mxu1 %vm11774_vm1, %v15209_v57  ;;  %10241 = vmatprep.mubr.msk.bf16.mxu0 %vm11774_vm1, %v15209_v57 }
 0x21a   :  { %v12475_v62 = vpop.f32.mrf.mxu0  ;;  %v1228_v58 = vpop.f32.mrf.mxu1 }
 0x21b   :  { %v12482_v49 = vadd.f32 %v1228_v58, %v366_v59 }
 0x21c   :  { %v12478_v46 = vpop.f32.mrf.mxu0  ;;  %v12480_v41 = vpop.f32.mrf.mxu1 }
 0x21e   :  { %v1179_v42 = vpop.f32.mrf.mxu0  ;;  %v1232_v43 = vpop.f32.mrf.mxu1 }
 0x21f   :  { %v12487_v51 = vadd.f32 %v1232_v43, %v366_v59 }
 0x220   :  { %v1181_v52 = vpop.f32.mrf.mxu0  ;;  %v12489_v53 = vpop.f32.mrf.mxu1 }
 0x221   :  { %v1182_v26 = vadd.f32 %v1181_v52, %v362_v63 }
 0x222   :  { %v12493_v55 = vpop.f32.mrf.mxu0  ;;  %v1238_v60 = vpop.f32.mrf.mxu1 }
 0x223   :  { %v12499_v1 = vadd.f32 %v1238_v60, %v366_v59 }
 0x224   :  { %v1187_v2 = vpop.f32.mrf.mxu0  ;;  %v1240_v56 = vpop.f32.mrf.mxu1 }
 0x225   :  { %v12501_v13 = vadd.f32 %v1187_v2, %v362_v63  ;;  %v12504_v14 = vadd.f32 %v1240_v56, %v12497_v0  ;;  %v358_v56 = vrot.slane %v351_v48, %v12114_v7 }
 0x226   :  { %v12506_v15 = vpop.f32.mrf.mxu0  ;;  %v1242_v16 = vpop.f32.mrf.mxu1 }
 0x227   :  { %v12508_v17 = vadd.f32 %v1242_v16, %v366_v59 }
 0x228   :  { %v1191_v18 = vpop.f32.mrf.mxu0  ;;  %v1244_v19 = vpop.f32.mrf.mxu1 }
 0x229   :  { %v12512_v21 = vadd.f32 %v1191_v18, %v362_v63  ;;  %v12515_v22 = vadd.f32 %v1244_v19, %v12497_v0  ;;  %v12546_v19 = vrot.slane %v351_v48, %v15208_v45 }
 0x24a   :  { %v1281_v28 = vpop.f32.mrf.mxu0  ;;  %v1334_v29 = vpop.f32.mrf.mxu1 }
 0x24b   :  { %v1282_v36 = vadd.f32 %v1281_v28, %v374_v30  ;;  %v12535_v37 = vadd.f32 %v1334_v29, %v382_v31 }
 0x24c   :  { %v1283_v32 = vpop.f32.mrf.mxu0  ;;  %v12531_v44 = vpop.f32.mrf.mxu1 }
 0x24d   :  { %v1284_v59 = vadd.f32 %v1283_v32, %v378_v33 }
 0x24e   :  { %v1285_v34 = vpop.f32.mrf.mxu0  ;;  %v1338_v35 = vpop.f32.mrf.mxu1 }
 0x24f   :  { %v1286_v38 = vadd.f32 %v1285_v34, %v374_v30  ;;  %v12537_v39 = vadd.f32 %v1338_v35, %v382_v31  ;;  %v1180_v34 = vadd.f32 %v1179_v42, %v358_v56 }
 0x250   :  { %v1287_v47 = vpop.f32.mrf.mxu0  ;;  %v12539_v58 = vpop.f32.mrf.mxu1 }
 0x251   :  { %v1463_v43 = vpack.c.bf16 %v1286_v38, %v1282_v36  ;;  %v1288_v2 = vadd.f32 %v1287_v47, %v378_v33  ;;  %v1176_v47 = vadd.f32 %v12475_v62, %v358_v56 }
 0x252   :  { %v1291_v16 = vpop.f32.mrf.mxu0  ;;  %v1344_v18 = vpop.f32.mrf.mxu1 }
 0x253   :  { %v1464_v28 = vpack.c.bf16 %v1288_v2, %v1284_v59  ;;  %v12548_v29 = vadd.f32 %v1344_v18, %v382_v31  ;;  %10216 = vmatpush3.bf16.xpose.msra.mxu1 %v1463_v43  ;;  %v1292_v59 = vadd.f32 %v1291_v16, %v374_v30  ;;  %v1178_v2 = vadd.f32 %v12478_v46, %v362_v63 }
 0x254   :  { %v1293_v35 = vpop.f32.mrf.mxu0  ;;  %v1346_v32 = vpop.f32.mrf.mxu1  ;;  %10221 = vmatprep.subr.bf16.mxu1 %v15209_v57  ;;  %v1459_v18 = vpack.c.bf16 %v1180_v34, %v1176_v47  ;;  %v1190_v63 = vadd.f32 %v12506_v15, %v358_v56 }
 0x255   :  { %v12551_v36 = vadd.f32 %v1293_v35, %v378_v33  ;;  %v12554_v38 = vadd.f32 %v1346_v32, %v12546_v19  ;;  %10240 = vmatpush3.bf16.xpose.msra.mxu0 %v1464_v28  ;;  %v1460_v52 = vpack.c.bf16 %v1182_v26, %v1178_v2 }
 0x256   :  { %v1295_v48 = vpop.f32.mrf.mxu0  ;;  %v1348_v45 = vpop.f32.mrf.mxu1  ;;  %10251 = vmatprep.subr.bf16.mxu0 %v15209_v57 }
 0x257   :  { %v1296_v43 = vadd.f32 %v1295_v48, %v374_v30  ;;  %v12558_v42 = vadd.f32 %v1348_v45, %v382_v31 }
 0x258   :  { %v1297_v35 = vpop.f32.mrf.mxu0  ;;  %v1350_v24 = vpop.f32.mrf.mxu1 }
 0x259   :  { %v1475_v20 = vpack.c.bf16 %v1296_v43, %v1292_v59  ;;  %v12563_v32 = vadd.f32 %v1297_v35, %v378_v33  ;;  %v12566_v62 = vadd.f32 %v1350_v24, %v12546_v19  ;;  %v1186_v24 = vadd.f32 %v12493_v55, %v358_v56 }
 0x25a   :  { %10218 = vmatmul.mubr.bf16.vlgmr.msra.gmra.mxu1 %v1459_v18 }
 0x25b   :  { %10222 = vmatpush3.bf16.xpose.msra.mxu1 %v1475_v20  ;;  %10223 = vmatprep.mubr.msk.bf16.mxu1 %vm11774_vm1, %v15209_v57  ;;  %v1471_v26 = vpack.c.bf16 %v1190_v63, %v1186_v24  ;;  %v352_v20 = vld [vmem:[%s15190_s5 + $0x8] sm:$0xf] }
 0x25c   :  { %10242 = vmatmul.mubr.bf16.vlgmr.msra.gmra.mxu0 %v1460_v52  ;;  %10227 = vmatprep.subr.bf16.mxu1 %v15209_v57  ;;  %v398_v31 = vrot.slane %v352_v20, %v12470_v40  ;;  %v402_v15 = vrot.slane %v352_v20, %v12485_v50  ;;  %v390_v16 = vrot.slane %v352_v20, %v12114_v7 }
 0x25d   :  { %10253 = vmatprep.mubr.msk.bf16.mxu0 %vm11774_vm1, %v15209_v57  ;;  %v394_v55 = vrot.slane %v352_v20, %v12117_v12 }
 0x262   :  { %10224 = vmatmul.mubr.bf16.vlgmr.msra.gmra.mxu1 %v1471_v26 }
 0x263   :  { %10229 = vmatprep.mubr.msk.bf16.mxu1 %vm11774_vm1, %v15209_v57 }
 0x27b   :  { %v1387_v33 = vpop.f32.mrf.mxu0  ;;  %v1440_v45 = vpop.f32.mrf.mxu1 }
 0x27c   :  { %v12587_v34 = vadd.f32 %v1440_v45, %v398_v31  ;;  %v1388_v2 = vadd.f32 %v1387_v33, %v390_v16 }
 0x27d   :  { %v1389_v56 = vpop.f32.mrf.mxu0  ;;  %v1442_v47 = vpop.f32.mrf.mxu1 }
 0x27e   :  { %v12590_v48 = vadd.f32 %v1442_v47, %v402_v15  ;;  %v1390_v52 = vadd.f32 %v1389_v56, %v394_v55 }
 0x27f   :  { %v1391_v59 = vpop.f32.mrf.mxu0  ;;  %v1444_v43 = vpop.f32.mrf.mxu1 }
 0x280   :  { %v1392_v18 = vadd.f32 %v1391_v59, %v390_v16  ;;  %v12592_v35 = vadd.f32 %v1444_v43, %v398_v31 }
 0x281   :  { %v1393_v63 = vpop.f32.mrf.mxu0  ;;  %v1446_v24 = vpop.f32.mrf.mxu1 }
 0x282   :  { %v1467_v26 = vpack.c.bf16 %v1392_v18, %v1388_v2  ;;  %v1394_v46 = vadd.f32 %v1393_v63, %v394_v55  ;;  %v12596_v28 = vadd.f32 %v1446_v24, %v402_v15 }
 0x283   :  { %v1397_v20 = vpop.f32.mrf.mxu0  ;;  %v1450_v54 = vpop.f32.mrf.mxu1 }
 0x284   :  { %v1468_v47 = vpack.c.bf16 %v1394_v46, %v1390_v52  ;;  %v12600_v33 = vadd.f32 %v1397_v20, %v390_v16  ;;  %v12602_v59 = vadd.f32 %v1450_v54, %v398_v31  ;;  %10228 = vmatpush3.bf16.msra.mxu1 %v1467_v26 }
 0x285   :  { %v1399_v56 = vpop.f32.mrf.mxu0  ;;  %v1452_v43 = vpop.f32.mrf.mxu1  ;;  %10233 = vmatprep.subr.bf16.mxu1 %v15209_v57 }
 0x286   :  { %v12605_v2 = vadd.f32 %v1399_v56, %v394_v55  ;;  %v12607_v18 = vadd.f32 %v1452_v43, %v402_v15  ;;  %10252 = vmatpush3.bf16.msra.mxu0 %v1468_v47 }
 0x287   :  { %v1401_v63 = vpop.f32.mrf.mxu0  ;;  %v1454_v24 = vpop.f32.mrf.mxu1  ;;  %10263 = vmatprep.subr.bf16.mxu0 %v15209_v57 }
 0x288   :  { %v12610_v46 = vadd.f32 %v1401_v63, %v390_v16  ;;  %v12612_v52 = vadd.f32 %v1454_v24, %v398_v31  ;;  %v12629_v31 = vld [vmem:[%s15245_s21] sm:$0xff] }
 0x289   :  { %v1403_v54 = vpop.f32.mrf.mxu0  ;;  %v1456_v20 = vpop.f32.mrf.mxu1 }
 0x28a   :  { %v12618_v60 = vadd.f32 %v1403_v54, %v394_v55  ;;  %v12620_v43 = vadd.f32 %v1456_v20, %v402_v15  ;;  %v12635_v15 = vld [vmem:[%s15245_s21 + $0x8] sm:$0xff] }
 0x31a   :  { %v1517_v63 = vpop.f32.mrf.mxu1 }
 0x31b   :  { %v1518_v24 = vadd.f32 %v1517_v63, %v12629_v31 }
 0x31c   :  { %v10219_v56 = vpop.f32.mrf.mxu1  ;;  %v1736_v55 = vpop.f32.mrf.mxu0 }
 0x31d   :  { %v1566_v54 = vsel %vm1565_vm2, %v1518_v24, -inf }
 0x31e   :  { %v10243_v20 = vpop.f32.mrf.mxu0  ;;  %1567 = vmax.xlane.f32.xlu0 %v1566_v54  ;;  %v1520_v16 = vpop.f32.mrf.mxu1 }
 0x31f   :  { %v1521_v45 = vadd.f32 %v1520_v16, %v12635_v15 }
 0x320   :  { %v10220_v47 = vpop.f32.mrf.mxu1  ;;  %v1739_v23 = vpop.f32.mrf.mxu0 }
 0x321   :  { %v1569_v30 = vsel %vm1565_vm2, %v1521_v45, -inf }
 0x322   :  { %v10244_v57 = vpop.f32.mrf.mxu0  ;;  %1570 = vmax.xlane.f32.xlu1 %v1569_v30  ;;  %v1558_v56 = vpop.f32.mrf.mxu1 }
 0x323   :  { %v1559_v63 = vadd.f32 %v1558_v56, %v12629_v31 }
 0x324   :  { %v10225_v26 = vpop.f32.mrf.mxu1 }
 0x325   :  { %v1572_v61 = vsel %vm1565_vm2, %v1559_v63, -inf }
 0x326   :  { %1573 = vmax.xlane.f32.xlu0 %v1572_v61  ;;  %v1561_v25 = vpop.f32.mrf.mxu1 }
 0x327   :  { %v1562_v20 = vadd.f32 %v1561_v25, %v12635_v15 }
 0x328   :  { %v10226_v54 = vpop.f32.mrf.mxu1 }
 0x329   :  { %v1575_v27 = vsel %vm1565_vm2, %v1562_v20, -inf }
 0x32a   :  { %1576 = vmax.xlane.f32.xlu1 %v1575_v27 }
 0x3a7   :  { %v1568_v47 = vpop.xlane.xlu0 %1567 }
 0x3a8   :  { %v1578_v16 = vsub.f32 %v1518_v24, %v1568_v47 }
 0x3aa   :  { %v1582_v40 = vmul.f32 1.442695, %v1578_v16 }
 0x3ab   :  { %v1571_v50 = vpop.xlane.xlu1 %1570 }
 0x3ac   :  { %11564 = vpow2.f32 %v1582_v40  ;;  %v1579_v57 = vsub.f32 %v1521_v45, %v1571_v50  ;;  %v1737_v50 = vadd.f32 %v1736_v55, %v12629_v31 }
 0x3ae   :  { %v1584_v30 = vmul.f32 1.442695, %v1579_v57 }
 0x3af   :  { %v1574_v10 = vpop.xlane.xlu0 %1573 }
 0x3b0   :  { %11566 = vpow2.f32 %v1584_v30  ;;  %v1580_v26 = vsub.f32 %v1559_v63, %v1574_v10  ;;  %v1740_v63 = vadd.f32 %v1739_v23, %v12635_v15 }
 0x3b2   :  { %v1586_v56 = vmul.f32 1.442695, %v1580_v26 }
 0x3b3   :  { %v1577_v11 = vpop.xlane.xlu1 %1576 }
 0x3b4   :  { %11568 = vpow2.f32 %v1586_v56  ;;  %v1581_v61 = vsub.f32 %v1562_v20, %v1577_v11  ;;  %v1784_v11 = vsel %vm1565_vm2, %v1737_v50, -inf  ;;  %v1787_v20 = vsel %vm1565_vm2, %v1740_v63, -inf }
 0x3b6   :  { %v1588_v5 = vmul.f32 1.442695, %v1581_v61 }
 0x3b8   :  { %11570 = vpow2.f32 %v1588_v5 }
 0x3b9   :  { %v11565_v25 = vpop.eup %11564 }
 0x3ba   :  { %v1590_v54 = vsel %vm1565_vm2, %v11565_v25, 0.0 }
 0x3bb   :  { %1591 = vadd.xlane.f32.xlu0 %v1590_v54 }
 0x3bd   :  { %v11567_v27 = vpop.eup %11566 }
 0x3be   :  { %v1593_v24 = vsel %vm1565_vm2, %v11567_v27, 0.0 }
 0x3bf   :  { %1594 = vadd.xlane.f32.xlu1 %v1593_v24  ;;  %v15246_v24 = vpack.c.bf16 %v12610_v46, %v12600_v33  ;;  %v15249_v33 = vpack.c.bf16 %v12512_v21, %v12501_v13  ;;  %v15250_v46 = vpack.c.bf16 %v12618_v60, %v12605_v2 }
 0x3c1   :  { %v11569_v40 = vpop.eup %11568 }
 0x3c2   :  { %v1596_v45 = vsel %vm1565_vm2, %v11569_v40, 0.0 }
 0x3c3   :  { %1597 = vadd.xlane.f32.xlu0 %v1596_v45  ;;  %v15247_v45 = vmov 0.0  }
 0x3c5   :  { %v11571_v10 = vpop.eup %11570 }
 0x3c6   :  { %v1599_v5 = vsel %vm1565_vm2, %v11571_v10, 0.0 }
 0x3c7   :  { %1785 = vmax.xlane.f32.xlu0 %v1784_v11  ;;  %1600 = vadd.xlane.f32.xlu1 %v1599_v5 }
 0x3cb   :  { %1788 = vmax.xlane.f32.xlu1 %v1787_v20 }
 0x444   :  { %v1592_v47 = vpop.xlane.xlu0 %1591 }
 0x445   :  { %11572 = vrcp.f32 %v1592_v47 }
 0x448   :  { %v1595_v16 = vpop.xlane.xlu1 %1594 }
 0x449   :  { %11574 = vrcp.f32 %v1595_v16 }
 0x44c   :  { %v1598_v55 = vpop.xlane.xlu0 %1597 }
 0x44d   :  { %11576 = vrcp.f32 %v1598_v55 }
 0x450   :  { %v1601_v57 = vpop.xlane.xlu1 %1600 }
 0x451   :  { %11578 = vrcp.f32 %v1601_v57 }
 0x452   :  { %v11573_v30 = vpop.eup %11572 }
 0x453   :  { %v1606_v23 = vmul.f32 %v11573_v30, %v11565_v25  ;;  %v15248_v25 = vpack.c.bf16 %v12563_v32, %v12551_v36  ;;  %v1786_v36 = vpop.xlane.xlu0 %1785 }
 0x454   :  { %v1796_v32 = vsub.f32 %v1737_v50, %v1786_v36 }
 0x456   :  { %v11575_v26 = vpop.eup %11574  ;;  %v1800_v16 = vmul.f32 1.442695, %v1796_v32 }
 0x457   :  { %v1607_v56 = vmul.f32 %v11575_v26, %v11567_v27  ;;  %v1789_v27 = vpop.xlane.xlu1 %1788 }
 0x458   :  { %v1797_v55 = vsub.f32 %v1740_v63, %v1789_v27  ;;  %11580 = vpow2.f32 %v1800_v16 }
 0x459   :  { %v1610_v61 = vpack.c.bf16 %v1607_v56, %v1606_v23 }
 0x45a   :  { %v11577_v54 = vpop.eup %11576  ;;  %v1802_v60 = vmul.f32 1.442695, %v1797_v55 }
 0x45b   :  { %10230 = vmatmul.mubr.msk.bf16.vlgmr.msra.gmra.mxu1 %vm1565_vm2, %v1610_v61  ;;  %v1608_v5 = vmul.f32 %v11577_v54, %v11569_v40 }
 0x45c   :  { %10234 = vmatpush3.bf16.msra.mxu1 %v15246_v24  ;;  %10235 = vmatprep.mubr.msk.bf16.mxu1 %vm11774_vm1, %v15247_v45  ;;  %11582 = vpow2.f32 %v1802_v60 }
 0x45d   :  { %10245 = vmatprep.subr.bf16.mxu1 %v15247_v45 }
 0x45e   :  { %v11579_v11 = vpop.eup %11578 }
 0x45f   :  { %v1609_v20 = vmul.f32 %v11579_v11, %v11571_v10 }
 0x461   :  { %v1611_v47 = vpack.c.bf16 %v1609_v20, %v1608_v5 }
 0x463   :  { %10236 = vmatmul.mubr.msk.bf16.vlgmr.msra.gmra.mxu1 %vm1565_vm2, %v1611_v47 }
 0x464   :  { %10246 = vmatpush3.bf16.xpose.msra.mxu1 %v15248_v25  ;;  %10247 = vmatprep.mubr.msk.bf16.mxu1 %vm11774_vm1, %v15247_v45 }
 0x465   :  { %10257 = vmatprep.subr.bf16.mxu1 %v15247_v45  ;;  %v11581_v24 = vpop.eup %11580 }
 0x466   :  { %v1808_v47 = vsel %vm1565_vm2, %v11581_v24, 0.0 }
 0x46b   :  { %10248 = vmatmul.mubr.bf16.vlgmr.msra.gmra.mxu1 %v15249_v33  ;;  %v11583_v33 = vpop.eup %11582 }
 0x46c   :  { %10258 = vmatpush3.bf16.msra.mxu1 %v15250_v46  ;;  %10259 = vmatprep.mubr.msk.bf16.mxu1 %vm11774_vm1, %v15247_v45  ;;  %v1811_v46 = vsel %vm1565_vm2, %v11583_v33, 0.0 }
 0x46d   :  { %10269 = vmatprep.subr.bf16.mxu1 %v15247_v45 }
 0x51b   :  { %v12675_v40 = vpop.f32.mrf.mxu1 }
 0x51d   :  { %v10231_v10 = vpop.f32.mrf.mxu1 }
 0x51f   :  { %v12677_v57 = vpop.f32.mrf.mxu1 }
 0x520   :  { %v1700_v13 = vpack.c.bf16 %v12677_v57, %v12675_v40  ;;  %v10680_v40 = vld [vmem:[%s15191_s6 + $0x170] ss:$8 sps:$4 sm:$0xff]  }
 0x521   :  { %v10232_v21 = vpop.f32.mrf.mxu1 }
 0x523   :  { %v12681_v2 = vpop.f32.mrf.mxu1 }
 0x525   :  { %v10237_v30 = vpop.f32.mrf.mxu1 }
 0x527   :  { %v12683_v26 = vpop.f32.mrf.mxu1 }
 0x528   :  { %v1701_v50 = vpack.c.bf16 %v12683_v26, %v12681_v2  ;;  %v10683_v2 = vld [vmem:[%s15191_s6 + $0x160] ss:$8 sps:$4 sm:$0xff]   ;;  %v10688_v26 = vld [vmem:[%s15191_s6 + $0x154] ss:$8 sps:$4 sm:$0xff]  }
 0x529   :  { %v10238_v23 = vpop.f32.mrf.mxu1 }
 0x52b   :  { %v1777_v56 = vpop.f32.mrf.mxu1 }
 0x52c   :  { %v1778_v63 = vadd.f32 %v1777_v56, %v12629_v31 }
 0x52d   :  { %v10249_v61 = vpop.f32.mrf.mxu1 }
 0x52e   :  { %v1790_v54 = vsel %vm1565_vm2, %v1778_v63, -inf }
 0x52f   :  { %1791 = vmax.xlane.f32.xlu0 %v1790_v54  ;;  %v1780_v11 = vpop.f32.mrf.mxu1 }
 0x530   :  { %v1781_v5 = vadd.f32 %v1780_v11, %v12635_v15 }
 0x531   :  { %v10250_v20 = vpop.f32.mrf.mxu1 }
 0x532   :  { %v1793_v25 = vsel %vm1565_vm2, %v1781_v5, -inf }
 0x533   :  { %1809 = vadd.xlane.f32.xlu0 %v1808_v47  ;;  %1794 = vmax.xlane.f32.xlu1 %v1793_v25  ;;  %v15252_v25 = vpack.c.bf16 %v12487_v51, %v12482_v49  ;;  %v15254_v49 = vpack.c.bf16 %v12558_v42, %v12548_v29  ;;  %v15255_v51 = vpack.c.bf16 %v12508_v17, %v12499_v1 }
 0x537   :  { %1812 = vadd.xlane.f32.xlu1 %v1811_v46 }
 0x5b8   :  { %v1792_v36 = vpop.xlane.xlu0 %1791 }
 0x5b9   :  { %v1798_v32 = vsub.f32 %v1778_v63, %v1792_v36 }
 0x5bb   :  { %v1804_v27 = vmul.f32 1.442695, %v1798_v32 }
 0x5bc   :  { %v1795_v10 = vpop.xlane.xlu1 %1794  ;;  %v1810_v16 = vpop.xlane.xlu0 %1809 }
 0x5bd   :  { %11584 = vpow2.f32 %v1804_v27  ;;  %v1799_v55 = vsub.f32 %v1781_v5, %v1795_v10  ;;  %v15251_v5 = vpack.c.bf16 %v12537_v39, %v12535_v37 }
 0x5be   :  { %11586 = vrcp.f32 %v1810_v16 }
 0x5bf   :  { %v1806_v21 = vmul.f32 1.442695, %v1799_v55 }
 0x5c0   :  { %v1813_v60 = vpop.xlane.xlu1 %1812 }
 0x5c1   :  { %11588 = vpow2.f32 %v1806_v21 }
 0x5c2   :  { %11590 = vrcp.f32 %v1813_v60 }
 0x5ca   :  { %v11585_v30 = vpop.eup %11584 }
 0x5cb   :  { %v1814_v23 = vsel %vm1565_vm2, %v11585_v30, 0.0  ;;  %v11587_v56 = vpop.eup %11586 }
 0x5cc   :  { %1815 = vadd.xlane.f32.xlu0 %v1814_v23  ;;  %v1824_v63 = vmul.f32 %v11587_v56, %v11581_v24  ;;  %v15253_v24 = vpack.c.bf16 %v12592_v35, %v12587_v34  ;;  %v15256_v34 = vpack.c.bf16 %v12612_v52, %v12602_v59 }
 0x5ce   :  { %v11589_v61 = vpop.eup %11588 }
 0x5cf   :  { %v11591_v54 = vpop.eup %11590  ;;  %v1817_v11 = vsel %vm1565_vm2, %v11589_v61, 0.0 }
 0x5d0   :  { %1818 = vadd.xlane.f32.xlu1 %v1817_v11  ;;  %v1825_v20 = vmul.f32 %v11591_v54, %v11583_v33 }
 0x5d2   :  { %v1828_v47 = vpack.c.bf16 %v1825_v20, %v1824_v63 }
 0x5d4   :  { %10254 = vmatmul.mubr.msk.bf16.vlgmr.msra.gmra.mxu0 %vm1565_vm2, %v1828_v47 }
 0x5d5   :  { %10264 = vmatpush3.bf16.xpose.msra.mxu0 %v15251_v5  ;;  %10265 = vmatprep.mubr.msk.bf16.mxu0 %vm11774_vm1, %v15247_v45 }
 0x5d6   :  { %10275 = vmatprep.subr.bf16.mxu0 %v15247_v45 }
 0x5dc   :  { %10266 = vmatmul.mubr.bf16.vlgmr.msra.gmra.mxu0 %v15252_v25 }
 0x5dd   :  { %10276 = vmatpush3.bf16.msra.mxu0 %v15253_v24  ;;  %10277 = vmatprep.mubr.msk.bf16.mxu0 %vm11774_vm1, %v15247_v45 }
 0x5de   :  { %10287 = vmatprep.subr.bf16.mxu0 %v15247_v45 }
 0x655   :  { %v1816_v37 = vpop.xlane.xlu0 %1815 }
 0x656   :  { %11592 = vrcp.f32 %v1816_v37 }
 0x659   :  { %v1819_v39 = vpop.xlane.xlu1 %1818 }
 0x65a   :  { %11594 = vrcp.f32 %v1819_v39 }
 0x663   :  { %v11593_v33 = vpop.eup %11592 }
 0x664   :  { %v1826_v36 = vmul.f32 %v11593_v33, %v11585_v30 }
 0x667   :  { %v11595_v46 = vpop.eup %11594 }
 0x668   :  { %v1827_v32 = vmul.f32 %v11595_v46, %v11589_v61 }
 0x66a   :  { %v1829_v27 = vpack.c.bf16 %v1827_v32, %v1826_v36 }
 0x66c   :  { %10260 = vmatmul.mubr.msk.bf16.vlgmr.msra.gmra.mxu1 %vm1565_vm2, %v1829_v27 }
 0x66d   :  { %10270 = vmatpush3.bf16.xpose.msra.mxu1 %v15254_v49  ;;  %10271 = vmatprep.mubr.msk.bf16.mxu1 %vm11774_vm1, %v15247_v45 }
 0x66e   :  { %10281 = vmatprep.subr.bf16.mxu1 %v15247_v45 }
 0x674   :  { %10272 = vmatmul.mubr.bf16.vlgmr.msra.gmra.mxu1 %v15255_v51 }
 0x675   :  { %10282 = vmatpush3.bf16.msra.mxu1 %v15256_v34  ;;  %10283 = vmatprep.mubr.msk.bf16.mxu1 %vm11774_vm1, %v15247_v45 }
 0x676   :  { %10293 = vmatprep.subr.bf16.mxu1 %v15247_v45 }
 0x694   :  { %v12727_v29 = vpop.f32.mrf.mxu0 }
 0x696   :  { %v10255_v42 = vpop.f32.mrf.mxu0 }
 0x698   :  { %v12729_v35 = vpop.f32.mrf.mxu0 }
 0x699   :  { %v1918_v10 = vpack.c.bf16 %v12729_v35, %v12727_v29  ;;  %v10643_v29 = vld [vmem:[%s15191_s6 + $0x44] ss:$8 sps:$4 sm:$0xff]   ;;  %v10682_v35 = vld [vmem:[%s15191_s6 + $0x174] ss:$8 sps:$4 sm:$0xff]  }
 0x69a   :  { %v10256_v16 = vpop.f32.mrf.mxu0 }
 0x69c   :  { %v1954_v1 = vpop.f32.mrf.mxu0 }
 0x69d   :  { %v1955_v17 = vadd.f32 %v1954_v1, %v12629_v31 }
 0x69e   :  { %v10267_v55 = vpop.f32.mrf.mxu0 }
 0x69f   :  { %v2002_v59 = vsel %vm1565_vm2, %v1955_v17, -inf }
 0x6a0   :  { %2003 = vmax.xlane.f32.xlu0 %v2002_v59  ;;  %v1957_v52 = vpop.f32.mrf.mxu0 }
 0x6a1   :  { %v1958_v21 = vadd.f32 %v1957_v52, %v12635_v15 }
 0x6a2   :  { %v10268_v60 = vpop.f32.mrf.mxu0 }
 0x6a3   :  { %v2005_v30 = vsel %vm1565_vm2, %v1958_v21, -inf }
 0x6a4   :  { %2006 = vmax.xlane.f32.xlu1 %v2005_v30 }
 0x729   :  { %v2004_v23 = vpop.xlane.xlu0 %2003 }
 0x72a   :  { %v2014_v56 = vsub.f32 %v1955_v17, %v2004_v23 }
 0x72c   :  { %v2018_v61 = vmul.f32 1.442695, %v2014_v56  ;;  %v12737_v54 = vpop.f32.mrf.mxu1 }
 0x72d   :  { %v2007_v11 = vpop.xlane.xlu1 %2006 }
 0x72e   :  { %11596 = vpow2.f32 %v2018_v61  ;;  %v2015_v63 = vsub.f32 %v1958_v21, %v2007_v11  ;;  %v10261_v20 = vpop.f32.mrf.mxu1 }
 0x72f   :  { %v1341_v20 = vadd.f32 %v12539_v58, %v12546_v19  ;;  %v1231_v58 = vadd.f32 %v12480_v41, %v12497_v0  ;;  %v15258_v41 = vpack.c.bf16 %v12566_v62, %v12554_v38 }
 0x730   :  { %v2020_v47 = vmul.f32 1.442695, %v2015_v63  ;;  %v12739_v5 = vpop.f32.mrf.mxu1 }
 0x731   :  { %v1919_v25 = vpack.c.bf16 %v12739_v5, %v12737_v54  ;;  %v10691_v54 = vld [vmem:[%s15191_s6 + $0x144] ss:$8 sps:$4 sm:$0xff]   ;;  %v10689_v5 = vld [vmem:[%s15191_s6 + $0x140] ss:$8 sps:$4 sm:$0xff]  }
 0x732   :  { %11598 = vpow2.f32 %v2020_v47  ;;  %v10262_v24 = vpop.f32.mrf.mxu1 }
 0x734   :  { %v1995_v37 = vpop.f32.mrf.mxu1 }
 0x735   :  { %v1996_v39 = vadd.f32 %v1995_v37, %v12629_v31 }
 0x736   :  { %v10273_v33 = vpop.f32.mrf.mxu1 }
 0x737   :  { %v2008_v46 = vsel %vm1565_vm2, %v1996_v39, -inf }
 0x738   :  { %2009 = vmax.xlane.f32.xlu0 %v2008_v46  ;;  %v1998_v36 = vpop.f32.mrf.mxu1 }
 0x739   :  { %v1999_v32 = vadd.f32 %v1998_v36, %v12635_v15  ;;  %v1235_v36 = vadd.f32 %v12489_v53, %v12497_v0  ;;  %v15259_v0 = vpack.c.bf16 %v12515_v22, %v12504_v14 }
 0x73a   :  { %v10274_v27 = vpop.f32.mrf.mxu1 }
 0x73b   :  { %v11597_v49 = vpop.eup %11596  ;;  %v2011_v51 = vsel %vm1565_vm2, %v1999_v32, -inf }
 0x73c   :  { %v2026_v34 = vsel %vm1565_vm2, %v11597_v49, 0.0  ;;  %2012 = vmax.xlane.f32.xlu1 %v2011_v51 }
 0x73d   :  { %2027 = vadd.xlane.f32.xlu0 %v2026_v34 }
 0x73f   :  { %v11599_v42 = vpop.eup %11598 }
 0x740   :  { %v2029_v16 = vsel %vm1565_vm2, %v11599_v42, 0.0 }
 0x741   :  { %2030 = vadd.xlane.f32.xlu1 %v2029_v16 }
 0x7c1   :  { %v2010_v1 = vpop.xlane.xlu0 %2009 }
 0x7c2   :  { %v2016_v17 = vsub.f32 %v1996_v39, %v2010_v1  ;;  %v1337_v39 = vadd.f32 %v12531_v44, %v12546_v19  ;;  %v15257_v44 = vpack.c.bf16 %v12596_v28, %v12590_v48  ;;  %v15260_v28 = vpack.c.bf16 %v12620_v43, %v12607_v18 }
 0x7c4   :  { %v2022_v55 = vmul.f32 1.442695, %v2016_v17  ;;  %v1466_v46 = vpack.c.bf16 %v1341_v20, %v1337_v39 }
 0x7c5   :  { %v2013_v59 = vpop.xlane.xlu1 %2012 }
 0x7c6   :  { %11600 = vpow2.f32 %v2022_v55  ;;  %v2028_v52 = vpop.xlane.xlu0 %2027  ;;  %v2017_v21 = vsub.f32 %v1999_v32, %v2013_v59  ;;  %v1462_v32 = vpack.c.bf16 %v1235_v36, %v1231_v58 }
 0x7c7   :  { %11602 = vrcp.f32 %v2028_v52 }
 0x7c8   :  { %v2024_v60 = vmul.f32 1.442695, %v2017_v21 }
 0x7ca   :  { %11604 = vpow2.f32 %v2024_v60  ;;  %v2031_v30 = vpop.xlane.xlu1 %2030 }
 0x7cb   :  { %11606 = vrcp.f32 %v2031_v30 }
 0x7d3   :  { %v11601_v23 = vpop.eup %11600 }
 0x7d4   :  { %v2032_v56 = vsel %vm1565_vm2, %v11601_v23, 0.0  ;;  %v11603_v61 = vpop.eup %11602 }
 0x7d5   :  { %2033 = vadd.xlane.f32.xlu0 %v2032_v56  ;;  %v2042_v24 = vmul.f32 %v11603_v61, %v11597_v49 }
 0x7d7   :  { %v11605_v11 = vpop.eup %11604 }
 0x7d8   :  { %v11607_v63 = vpop.eup %11606  ;;  %v2035_v47 = vsel %vm1565_vm2, %v11605_v11, 0.0 }
 0x7d9   :  { %2036 = vadd.xlane.f32.xlu1 %v2035_v47  ;;  %v2043_v37 = vmul.f32 %v11607_v63, %v11599_v42 }
 0x7db   :  { %v2046_v33 = vpack.c.bf16 %v2043_v37, %v2042_v24 }
 0x7dd   :  { %10278 = vmatmul.mubr.msk.bf16.vlgmr.msra.gmra.mxu0 %vm1565_vm2, %v2046_v33 }
 0x7de   :  { %10288 = vmatpush3.bf16.xpose.msra.mxu0 %v1466_v46  ;;  %10289 = vmatprep.mubr.msk.bf16.mxu0 %vm11774_vm1, %v15247_v45 }
 0x7df   :  { %10299 = vmatprep.subr.bf16.mxu0 %v15247_v45 }
 0x7e5   :  { %10290 = vmatmul.mubr.bf16.vlgmr.msra.gmra.mxu0 %v1462_v32 }
 0x7e6   :  { %10300 = vmatpush3.bf16.msra.mxu0 %v15257_v44  ;;  %10301 = vmatprep.mubr.msk.bf16.mxu0 %vm11774_vm1, %v15247_v45 }
 0x85e   :  { %v2034_v19 = vpop.xlane.xlu0 %2033 }
 0x85f   :  { %11608 = vrcp.f32 %v2034_v19 }
 0x862   :  { %v2037_v27 = vpop.xlane.xlu1 %2036 }
 0x863   :  { %11610 = vrcp.f32 %v2037_v27 }
 0x86c   :  { %v11609_v49 = vpop.eup %11608 }
 0x86d   :  { %v2044_v51 = vmul.f32 %v11609_v49, %v11601_v23 }
 0x870   :  { %v11611_v53 = vpop.eup %11610 }
 0x871   :  { %v2045_v34 = vmul.f32 %v11611_v53, %v11605_v11 }
 0x873   :  { %v2047_v42 = vpack.c.bf16 %v2045_v34, %v2044_v51 }
 0x875   :  { %10284 = vmatmul.mubr.msk.bf16.vlgmr.msra.gmra.mxu1 %vm1565_vm2, %v2047_v42 }
 0x876   :  { %10294 = vmatpush3.bf16.xpose.msra.mxu1 %v15258_v41  ;;  %10295 = vmatprep.mubr.msk.bf16.mxu1 %vm11774_vm1, %v15247_v45 }
 0x877   :  { %10305 = vmatprep.subr.bf16.mxu1 %v15247_v45 }
 0x87d   :  { %10296 = vmatmul.mubr.bf16.vlgmr.msra.gmra.mxu1 %v15259_v0 }
 0x87e   :  { %10306 = vmatpush3.bf16.msra.mxu1 %v15260_v28  ;;  %10307 = vmatprep.mubr.msk.bf16.mxu1 %vm11774_vm1, %v15247_v45 }
 0x87f   :  { %2805 = vmatprep.subr.bf16.mxu1 %v10682_v35  ;;  %v10709_v35 = vld [vmem:[%s15191_s6 + $0x1e4] ss:$8 sps:$4 sm:$0xff]  }
 0x89d   :  { %v12783_v48 = vpop.f32.mrf.mxu0 }
 0x89f   :  { %v10279_v38 = vpop.f32.mrf.mxu0 }
 0x8a1   :  { %v12785_v62 = vpop.f32.mrf.mxu0 }
 0x8a2   :  { %v2136_v16 = vpack.c.bf16 %v12785_v62, %v12783_v48 }
 0x8a3   :  { %v10280_v1 = vpop.f32.mrf.mxu0 }
 0x8a5   :  { %v2172_v17 = vpop.f32.mrf.mxu0 }
 0x8a6   :  { %v2173_v14 = vadd.f32 %v2172_v17, %v12629_v31 }
 0x8a7   :  { %v10291_v22 = vpop.f32.mrf.mxu0 }
 0x8a8   :  { %v2220_v55 = vsel %vm1565_vm2, %v2173_v14, -inf }
 0x8a9   :  { %2221 = vmax.xlane.f32.xlu0 %v2220_v55  ;;  %v2175_v18 = vpop.f32.mrf.mxu0 }
 0x8aa   :  { %v2176_v43 = vadd.f32 %v2175_v18, %v12635_v15 }
 0x8ab   :  { %v10292_v59 = vpop.f32.mrf.mxu0 }
 0x8ac   :  { %v2223_v52 = vsel %vm1565_vm2, %v2176_v43, -inf }
 0x8ad   :  { %2224 = vmax.xlane.f32.xlu1 %v2223_v52  ;;  %v10632_v52 = vld [vmem:[%s15191_s6 + $0x70] ss:$8 sps:$4 sm:$0xff]  }
 0x932   :  { %v2222_v21 = vpop.xlane.xlu0 %2221 }
 0x933   :  { %v2232_v60 = vsub.f32 %v2173_v14, %v2222_v21 }
 0x935   :  { %v2236_v30 = vmul.f32 1.442695, %v2232_v60  ;;  %v12793_v23 = vpop.f32.mrf.mxu1  ;;  %v10637_v60 = vld [vmem:[%s15191_s6 + $0x64] ss:$8 sps:$4 sm:$0xff]  }
 0x936   :  { %v2225_v56 = vpop.xlane.xlu1 %2224 }
 0x937   :  { %11612 = vpow2.f32 %v2236_v30  ;;  %v2233_v61 = vsub.f32 %v2176_v43, %v2225_v56  ;;  %v10285_v11 = vpop.f32.mrf.mxu1  ;;  %v10635_v30 = vld [vmem:[%s15191_s6 + $0x60] ss:$8 sps:$4 sm:$0xff]   ;;  %v10640_v56 = vld [vmem:[%s15191_s6 + $0x54] ss:$8 sps:$4 sm:$0xff]  }
 0x938   :  { %v10646_v11 = vld [vmem:[%s15191_s6 + $0x34] ss:$8 sps:$4 sm:$0xff]  }
 0x939   :  { %v2238_v63 = vmul.f32 1.442695, %v2233_v61  ;;  %v12795_v20 = vpop.f32.mrf.mxu1  ;;  %v10638_v61 = vld [vmem:[%s15191_s6 + $0x50] ss:$8 sps:$4 sm:$0xff]  }
 0x93a   :  { %v2137_v47 = vpack.c.bf16 %v12795_v20, %v12793_v23 }
 0x93b   :  { %11614 = vpow2.f32 %v2238_v63  ;;  %v10286_v24 = vpop.f32.mrf.mxu1  ;;  %v10644_v63 = vld [vmem:[%s15191_s6 + $0x30] ss:$8 sps:$4 sm:$0xff]  }
 0x93c   :  { %v10649_v24 = vld [vmem:[%s15191_s6 + $0x24] ss:$8 sps:$4 sm:$0xff]  }
 0x93d   :  { %v2213_v37 = vpop.f32.mrf.mxu1 }
 0x93e   :  { %v2214_v39 = vadd.f32 %v2213_v37, %v12629_v31  ;;  %v10634_v31 = vld [vmem:[%s15191_s6 + $0x74] ss:$8 sps:$4 sm:$0xff]   ;;  %v10647_v37 = vld [vmem:[%s15191_s6 + $0x20] ss:$8 sps:$4 sm:$0xff]  }
 0x93f   :  { %v10297_v33 = vpop.f32.mrf.mxu1  ;;  %2752 = vmatprep.subr.bf16.mxu0 %v10634_v31  ;;  %v10665_v31 = vld [vmem:[%s15191_s6 + $0xc0] ss:$8 sps:$4 sm:$0xff]  }
 0x940   :  { %v2226_v46 = vsel %vm1565_vm2, %v2214_v39, -inf  ;;  %v10650_v33 = vld [vmem:[%s15191_s6 + $0x10] ss:$8 sps:$4 sm:$0xff]  }
 0x941   :  { %2227 = vmax.xlane.f32.xlu0 %v2226_v46  ;;  %v2216_v36 = vpop.f32.mrf.mxu1  ;;  %v10655_v46 = vld [vmem:[%s15191_s6 + $0x4] ss:$8 sps:$4 sm:$0xff]  }
 0x942   :  { %v2217_v58 = vadd.f32 %v2216_v36, %v12635_v15  ;;  %v10653_v36 = vld [vmem:[%s15191_s6] ss:$8 sps:$4 sm:$0xff]  }
 0x943   :  { %v10298_v32 = vpop.f32.mrf.mxu1 }
 0x944   :  { %v11613_v44 = vpop.eup %11612  ;;  %v2229_v19 = vsel %vm1565_vm2, %v2217_v58, -inf  ;;  %v10656_v32 = vld [vmem:[%s15191_s6 + $0xf0] ss:$8 sps:$4 sm:$0xff]  }
 0x945   :  { %v2244_v27 = vsel %vm1565_vm2, %v11613_v44, 0.0  ;;  %2230 = vmax.xlane.f32.xlu1 %v2229_v19  ;;  %v10659_v19 = vld [vmem:[%s15191_s6 + $0xe0] ss:$8 sps:$4 sm:$0xff]  }
 0x946   :  { %2245 = vadd.xlane.f32.xlu0 %v2244_v27  ;;  %v10664_v27 = vld [vmem:[%s15191_s6 + $0xd4] ss:$8 sps:$4 sm:$0xff]  }
 0x948   :  { %v11615_v49 = vpop.eup %11614 }
 0x949   :  { %v2247_v53 = vsel %vm1565_vm2, %v11615_v49, 0.0 }
 0x94a   :  { %2248 = vadd.xlane.f32.xlu1 %v2247_v53  ;;  %v10667_v53 = vld [vmem:[%s15191_s6 + $0xc4] ss:$8 sps:$4 sm:$0xff]  }
 0x9ca   :  { %v2228_v51 = vpop.xlane.xlu0 %2227 }
 0x9cb   :  { %v2234_v34 = vsub.f32 %v2214_v39, %v2228_v51  ;;  %v10652_v39 = vld [vmem:[%s15191_s6 + $0x14] ss:$8 sps:$4 sm:$0xff]  }
 0x9cc   :  { %v10670_v51 = vld [vmem:[%s15191_s6 + $0xb4] ss:$8 sps:$4 sm:$0xff]  }
 0x9cd   :  { %v2240_v15 = vmul.f32 1.442695, %v2234_v34  ;;  %v10668_v34 = vld [vmem:[%s15191_s6 + $0xb0] ss:$8 sps:$4 sm:$0xff]  }
 0x9ce   :  { %v2231_v42 = vpop.xlane.xlu1 %2230 }
 0x9cf   :  { %11616 = vpow2.f32 %v2240_v15  ;;  %v2246_v41 = vpop.xlane.xlu0 %2245  ;;  %v2235_v0 = vsub.f32 %v2217_v58, %v2231_v42  ;;  %v10658_v58 = vld [vmem:[%s15191_s6 + $0xf4] ss:$8 sps:$4 sm:$0xff]   ;;  %v10673_v15 = vld [vmem:[%s15191_s6 + $0xa4] ss:$8 sps:$4 sm:$0xff]   ;;  %v10671_v42 = vld [vmem:[%s15191_s6 + $0xa0] ss:$8 sps:$4 sm:$0xff]  }
 0x9d0   :  { %11618 = vrcp.f32 %v2246_v41  ;;  %v10676_v41 = vld [vmem:[%s15191_s6 + $0x94] ss:$8 sps:$4 sm:$0xff]  }
 0x9d1   :  { %v2242_v28 = vmul.f32 1.442695, %v2235_v0  ;;  %v10674_v0 = vld [vmem:[%s15191_s6 + $0x90] ss:$8 sps:$4 sm:$0xff]  }
 0x9d3   :  { %11620 = vpow2.f32 %v2242_v28  ;;  %v2249_v38 = vpop.xlane.xlu1 %2248  ;;  %v10679_v28 = vld [vmem:[%s15191_s6 + $0x84] ss:$8 sps:$4 sm:$0xff]  }
 0x9d4   :  { %11622 = vrcp.f32 %v2249_v38  ;;  %v10677_v38 = vld [vmem:[%s15191_s6 + $0x80] ss:$8 sps:$4 sm:$0xff]  }
 0x9dc   :  { %v12808_v1 = vpop.eup %11616 }
 0x9dd   :  { %v2250_v17 = vsel %vm1565_vm2, %v12808_v1, 0.0  ;;  %v11619_v14 = vpop.eup %11618 }
 0x9de   :  { %2251 = vadd.xlane.f32.xlu0 %v2250_v17  ;;  %v2260_v43 = vmul.f32 %v11619_v14, %v11613_v44  ;;  %v10661_v44 = vld [vmem:[%s15191_s6 + $0xe4] ss:$8 sps:$4 sm:$0xff]  }
 0x9e0   :  { %v12812_v22 = vpop.eup %11620 }
 0x9e1   :  { %v11623_v55 = vpop.eup %11622  ;;  %v2253_v18 = vsel %vm1565_vm2, %v12812_v22, 0.0 }
 0x9e2   :  { %2254 = vadd.xlane.f32.xlu1 %v2253_v18  ;;  %v2261_v59 = vmul.f32 %v11623_v55, %v11615_v49  ;;  %v10662_v49 = vld [vmem:[%s15191_s6 + $0xd0] ss:$8 sps:$4 sm:$0xff]  }
 0x9e4   :  { %v2264_v21 = vpack.c.bf16 %v2261_v59, %v2260_v43 }
 0x9e6   :  { %10302 = vmatmul.mubr.msk.bf16.vlgmr.msra.gmra.mxu0 %vm1565_vm2, %v2264_v21  ;;  %v10700_v21 = vld [vmem:[%s15191_s6 + $0x114] ss:$8 sps:$4 sm:$0xff]  }
 0x9e7   :  { %2753 = vmatpush1.bf16.msra.mxu0 %v10632_v52  ;;  %2784 = vmatprep.mubr.bf16.mxu0 %v1918_v10  ;;  %v10641_v10 = vld [vmem:[%s15191_s6 + $0x40] ss:$8 sps:$4 sm:$0xff]  }
 0x9e8   :  { %2754 = vmatprep.subr.bf16.mxu0 %v10637_v60  ;;  %v10695_v52 = vld [vmem:[%s15191_s6 + $0x120] ss:$8 sps:$4 sm:$0xff]   ;;  %v10698_v60 = vld [vmem:[%s15191_s6 + $0x110] ss:$8 sps:$4 sm:$0xff]  }
 0x9eb   :  { %2755 = vmatpush1.bf16.msra.mxu0 %v10635_v30  ;;  %v10703_v30 = vld [vmem:[%s15191_s6 + $0x104] ss:$8 sps:$4 sm:$0xff]  }
 0x9ec   :  { %2756 = vmatprep.subr.bf16.mxu0 %v10640_v56  ;;  %v10701_v56 = vld [vmem:[%s15191_s6 + $0x100] ss:$8 sps:$4 sm:$0xff]  }
 0x9ef   :  { %2757 = vmatpush1.bf16.msra.mxu0 %v10638_v61  ;;  %v10706_v61 = vld [vmem:[%s15191_s6 + $0x1f4] ss:$8 sps:$4 sm:$0xff]  }
 0x9f0   :  { %2758 = vmatprep.subr.bf16.mxu0 %v10643_v29  ;;  %v10704_v29 = vld [vmem:[%s15191_s6 + $0x1f0] ss:$8 sps:$4 sm:$0xff]  }
 0x9f3   :  { %2759 = vmatpush1.bf16.msra.mxu0 %v10641_v10  ;;  %v10707_v10 = vld [vmem:[%s15191_s6 + $0x1e0] ss:$8 sps:$4 sm:$0xff]  }
 0x9f4   :  { %2760 = vmatprep.subr.bf16.mxu0 %v10646_v11  ;;  %v10712_v11 = vld [vmem:[%s15191_s6 + $0x1d4] ss:$8 sps:$4 sm:$0xff]  }
 0x9f7   :  { %2761 = vmatpush1.bf16.msra.mxu0 %v10644_v63  ;;  %v10710_v63 = vld [vmem:[%s15191_s6 + $0x1d0] ss:$8 sps:$4 sm:$0xff]  }
 0x9f8   :  { %2762 = vmatprep.subr.bf16.mxu0 %v10649_v24  ;;  %v10715_v24 = vld [vmem:[%s15191_s6 + $0x1c4] ss:$8 sps:$4 sm:$0xff]  }
 0x9fb   :  { %2763 = vmatpush1.bf16.msra.mxu0 %v10647_v37 }
 0x9fc   :  { %2764 = vmatprep.subr.bf16.mxu0 %v10652_v39  ;;  %v10713_v39 = vld [vmem:[%s15191_s6 + $0x1c0] ss:$8 sps:$4 sm:$0xff]  }
 0x9ff   :  { %2765 = vmatpush1.bf16.msra.mxu0 %v10650_v33 }
 0xa00   :  { %2766 = vmatprep.subr.bf16.mxu0 %v10655_v46  ;;  %v10718_v46 = vld [vmem:[%s15191_s6 + $0x1b4] ss:$8 sps:$4 sm:$0xff]  }
 0xa03   :  { %2767 = vmatpush1.bf16.msra.mxu0 %v10653_v36 }
 0xa04   :  { %2768 = vmatprep.subr.bf16.mxu0 %v10658_v58 }
 0xa07   :  { %2769 = vmatpush2.bf16.msra.mxu0 %v10656_v32  ;;  %v10716_v32 = vld [vmem:[%s15191_s6 + $0x1b0] ss:$8 sps:$4 sm:$0xff]  }
 0xa08   :  { %2770 = vmatprep.subr.bf16.mxu0 %v10661_v44 }
 0xa0b   :  { %2771 = vmatpush2.bf16.msra.mxu0 %v10659_v19  ;;  %v10721_v19 = vld [vmem:[%s15191_s6 + $0x1a4] ss:$8 sps:$4 sm:$0xff]  }
 0xa0c   :  { %2772 = vmatprep.subr.bf16.mxu0 %v10664_v27  ;;  %v10719_v27 = vld [vmem:[%s15191_s6 + $0x1a0] ss:$8 sps:$4 sm:$0xff]  }
 0xa0f   :  { %2773 = vmatpush2.bf16.msra.mxu0 %v10662_v49  ;;  %v10724_v49 = vld [vmem:[%s15191_s6 + $0x194] ss:$8 sps:$4 sm:$0xff]  }
 0xa10   :  { %2774 = vmatprep.subr.bf16.mxu0 %v10667_v53  ;;  %v10722_v53 = vld [vmem:[%s15191_s6 + $0x190] ss:$8 sps:$4 sm:$0xff]  }
 0xa13   :  { %2775 = vmatpush2.bf16.msra.mxu0 %v10665_v31  ;;  %v10727_v31 = vld [vmem:[%s15191_s6 + $0x184] ss:$8 sps:$4 sm:$0xff]  }
 0xa14   :  { %2776 = vmatprep.subr.bf16.mxu0 %v10670_v51  ;;  %v10725_v51 = vld [vmem:[%s15191_s6 + $0x180] ss:$8 sps:$4 sm:$0xff]  }
 0xa17   :  { %2777 = vmatpush2.bf16.msra.mxu0 %v10668_v34 }
 0xa18   :  { %2778 = vmatprep.subr.bf16.mxu0 %v10673_v15 }
 0xa1b   :  { %2779 = vmatpush2.bf16.msra.mxu0 %v10671_v42 }
 0xa1c   :  { %2780 = vmatprep.subr.bf16.mxu0 %v10676_v41 }
 0xa1f   :  { %2781 = vmatpush2.bf16.msra.mxu0 %v10674_v0 }
 0xa20   :  { %2782 = vmatprep.subr.bf16.mxu0 %v10679_v28 }
 0xa23   :  { %2783 = vmatpush2.bf16.msra.mxu0 %v10677_v38  ;;  %v2420_v38 = vld [vmem:[%s15192_s7] sm:$0x3] }
 0xa24   :  { %v2429_v48 = vrot.slane %v2420_v38, %v12117_v12 }
 0xa26   :  { %2785 = vmatmul.mubr.bf16.vlgmr.msra.gmra.mxu0 %v1700_v13  ;;  %v10685_v13 = vld [vmem:[%s15191_s6 + $0x164] ss:$8 sps:$4 sm:$0xff]  }
 0xa27   :  { %2794 = vmatprep.mubr.bf16.mxu0 %v1919_v25  ;;  %v10694_v25 = vld [vmem:[%s15191_s6 + $0x134] ss:$8 sps:$4 sm:$0xff]  }
 0xa2e   :  { %2795 = vmatmul.mubr.bf16.gmra.mxu0 %v1701_v50  ;;  %v10686_v50 = vld [vmem:[%s15191_s6 + $0x150] ss:$8 sps:$4 sm:$0xff]  }
 0xa67   :  { %v2252_v17 = vpop.xlane.xlu0 %2251 }
 0xa68   :  { %11624 = vrcp.f32 %v2252_v17 }
 0xa6b   :  { %v2255_v14 = vpop.xlane.xlu1 %2254 }
 0xa6c   :  { %11626 = vrcp.f32 %v2255_v14  ;;  %v2425_v14 = vrot.slane %v2420_v38, %v12114_v7 }
 0xa75   :  { %v11625_v55 = vpop.eup %11624 }
 0xa76   :  { %v2262_v43 = vmul.f32 %v11625_v55, %v12808_v1  ;;  %v10692_v1 = vld [vmem:[%s15191_s6 + $0x130] ss:$8 sps:$4 sm:$0xff]  }
 0xa79   :  { %v11627_v18 = vpop.eup %11626 }
 0xa7a   :  { %v2263_v59 = vmul.f32 %v11627_v18, %v12812_v22  ;;  %v10697_v22 = vld [vmem:[%s15191_s6 + $0x124] ss:$8 sps:$4 sm:$0xff]  }
 0xa7c   :  { %v2265_v57 = vpack.c.bf16 %v2263_v59, %v2262_v43 }
 0xa7e   :  { %10308 = vmatmul.mubr.msk.bf16.vlgmr.msra.gmra.mxu1 %vm1565_vm2, %v2265_v57 }
 0xa7f   :  { %2806 = vmatpush1.bf16.msra.mxu1 %v10680_v40 }
 0xa80   :  { %2807 = vmatprep.subr.bf16.mxu1 %v10685_v13 }
 0xa83   :  { %2808 = vmatpush1.bf16.msra.mxu1 %v10683_v2 }
 0xa84   :  { %2809 = vmatprep.subr.bf16.mxu1 %v10688_v26 }
 0xa87   :  { %2810 = vmatpush1.bf16.msra.mxu1 %v10686_v50 }
 0xa88   :  { %2811 = vmatprep.subr.bf16.mxu1 %v10691_v54 }
 0xa8b   :  { %2812 = vmatpush1.bf16.msra.mxu1 %v10689_v5 }
 0xa8c   :  { %2813 = vmatprep.subr.bf16.mxu1 %v10694_v25 }
 0xa8f   :  { %2814 = vmatpush1.bf16.msra.mxu1 %v10692_v1 }
 0xa90   :  { %2815 = vmatprep.subr.bf16.mxu1 %v10697_v22 }
 0xa93   :  { %2816 = vmatpush1.bf16.msra.mxu1 %v10695_v52  ;;  %v10728_v52 = vld [vmem:[#allocation2 + $0x150] ss:$24 sps:$4 sm:$0xff]  }
 0xa94   :  { %2817 = vmatprep.subr.bf16.mxu1 %v10700_v21  ;;  %v10730_v21 = vld [vmem:[#allocation2 + $0x154] ss:$24 sps:$4 sm:$0xff]  }
 0xa95   :  { %3452 = vmatprep.subr.bf16.mxu0 %v10730_v21  ;;  %v10749_v21 = vld [vmem:[#allocation2 + $0xc8] ss:$24 sps:$4 sm:$0xff]  }
 0xa96   :  { %3453 = vmatpush1.bf16.msra.mxu0 %v10728_v52  ;;  %v10746_v52 = vld [vmem:[#allocation2 + $0xc0] ss:$24 sps:$4 sm:$0xff]  }
 0xa97   :  { %2818 = vmatpush1.bf16.msra.mxu1 %v10698_v60  ;;  %v10731_v60 = vld [vmem:[#allocation2 + $0x158] ss:$24 sps:$4 sm:$0xff]  }
 0xa98   :  { %2819 = vmatprep.subr.bf16.mxu1 %v10703_v30  ;;  %v10733_v30 = vld [vmem:[#allocation2 + $0x15c] ss:$24 sps:$4 sm:$0xff]  }
 0xa9b   :  { %2820 = vmatpush1.bf16.msra.mxu1 %v10701_v56  ;;  %v10736_v56 = vld [vmem:[#allocation2 + $0x124] ss:$24 sps:$4 sm:$0xff]  }
 0xa9c   :  { %2821 = vmatprep.subr.bf16.mxu1 %v10706_v61  ;;  %v10739_v61 = vld [vmem:[#allocation2 + $0x12c] ss:$24 sps:$4 sm:$0xff]   ;;  %3454 = vmatprep.subr.bf16.mxu0 %v10736_v56  ;;  %v10752_v56 = vld [vmem:[#allocation2 + $0x90] ss:$24 sps:$4 sm:$0xff]  }
 0xa9f   :  { %2822 = vmatpush2.bf16.msra.mxu1 %v10704_v29 }
 0xaa0   :  { %2823 = vmatprep.subr.bf16.mxu1 %v10709_v35 }
 0xaa3   :  { %2824 = vmatpush2.bf16.msra.mxu1 %v10707_v10 }
 0xaa4   :  { %2825 = vmatprep.subr.bf16.mxu1 %v10712_v11 }
 0xaa6   :  { %v2303_v37 = vpop.f32.mrf.mxu0 }
 0xaa7   :  { %2826 = vmatpush2.bf16.msra.mxu1 %v10710_v63 }
 0xaa8   :  { %v10303_v33 = vpop.f32.mrf.mxu0  ;;  %2827 = vmatprep.subr.bf16.mxu1 %v10715_v24 }
 0xaaa   :  { %v2306_v36 = vpop.f32.mrf.mxu0 }
 0xaab   :  { %v2354_v58 = vpack.c.bf16 %v2306_v36, %v2303_v37  ;;  %2828 = vmatpush2.bf16.msra.mxu1 %v10713_v39 }
 0xaac   :  { %v10304_v44 = vpop.f32.mrf.mxu0  ;;  %2829 = vmatprep.subr.bf16.mxu1 %v10718_v46 }
 0xaad   :  { %2837 = vmatprep.mubr.bf16.mxu1 %v2354_v58 }
 0xaaf   :  { %2830 = vmatpush2.bf16.msra.mxu1 %v10716_v32 }
 0xab0   :  { %2831 = vmatprep.subr.bf16.mxu1 %v10721_v19  ;;  %v15261_v19 = vld [vmem:[#allocation8_spill] sm:$0xff] }
 0xab3   :  { %2832 = vmatpush2.bf16.msra.mxu1 %v10719_v27 }
 0xab4   :  { %2833 = vmatprep.subr.bf16.mxu1 %v10724_v49 }
 0xab7   :  { %2834 = vmatpush2.bf16.msra.mxu1 %v10722_v53 }
 0xab8   :  { %2835 = vmatprep.subr.bf16.mxu1 %v10727_v31 }
 0xabb   :  { %2836 = vmatpush2.bf16.msra.mxu1 %v10725_v51 }
 0xabc   :  { %3505 = vmatprep.subr.bf16.mxu1 %v10733_v30  ;;  %v10757_v30 = vld [vmem:[#allocation2 + $0x9c] ss:$24 sps:$4 sm:$0xff]  }
 0xabe   :  { %2838 = vmatmul.mubr.bf16.vlgmr.msra.gmra.mxu1 %v2136_v16 }
 0xabf   :  { %3506 = vmatpush1.bf16.msra.mxu1 %v10731_v60  ;;  %v10754_v60 = vld [vmem:[#allocation2 + $0x94] ss:$24 sps:$4 sm:$0xff]  }
 0xac0   :  { %3507 = vmatprep.subr.bf16.mxu1 %v10739_v61  ;;  %v10755_v61 = vld [vmem:[#allocation2 + $0x98] ss:$24 sps:$4 sm:$0xff]  }
 0xae6   :  { %v2786_v28 = vpop.f32.mrf.mxu0 }
 0xae7   :  { %v2787_v16 = vadd.f32 %v2786_v28, %v2425_v14 }
 0xae8   :  { %v2788_v17 = vpop.f32.mrf.mxu0 }
 0xae9   :  { %v2789_v18 = vadd.f32 %v2788_v17, %v2429_v48 }
 0xaea   :  { %v2790_v62 = vpop.f32.mrf.mxu0 }
 0xaeb   :  { %v2791_v23 = vadd.f32 %v2790_v62, %v2425_v14 }
 0xaec   :  { %v2792_v43 = vpop.f32.mrf.mxu0 }
 0xaee   :  { %v2796_v29 = vpop.f32.mrf.mxu0 }
 0xaef   :  { %v2797_v11 = vadd.f32 %v2796_v29, %v2425_v14  ;;  %v10758_v29 = vld [vmem:[#allocation2 + $0x60] ss:$24 sps:$4 sm:$0xff]  }
 0xaf0   :  { %v2798_v35 = vpop.f32.mrf.mxu0 }
 0xaf1   :  { %v2799_v24 = vadd.f32 %v2798_v35, %v2429_v48  ;;  %v10761_v35 = vld [vmem:[#allocation2 + $0x68] ss:$24 sps:$4 sm:$0xff]  }
 0xaf2   :  { %v2800_v10 = vpop.f32.mrf.mxu0 }
 0xaf3   :  { %v2801_v36 = vadd.f32 %v2800_v10, %v2425_v14  ;;  %v10766_v10 = vld [vmem:[#allocation2 + $0x34] ss:$24 sps:$4 sm:$0xff]  }
 0xaf4   :  { %v2802_v37 = vpop.f32.mrf.mxu0 }
 0xaf5   :  { %v2803_v32 = vadd.f32 %v2802_v37, %v2429_v48  ;;  %v10772_v37 = vld [vmem:[#allocation2 + $0x4] ss:$24 sps:$4 sm:$0xff]  }
 0xb3e   :  { %v2347_v34 = vpop.f32.mrf.mxu1 }
 0xb40   :  { %v10309_v15 = vpop.f32.mrf.mxu1 }
 0xb41   :  { %v15262_v15 = vld [vmem:[#allocation10_spill] sm:$0xff] }
 0xb42   :  { %v2350_v42 = vpop.f32.mrf.mxu1 }
 0xb43   :  { %v2355_v41 = vpack.c.bf16 %v2350_v42, %v2347_v34 }
 0xb44   :  { %v10310_v0 = vpop.f32.mrf.mxu1 }
 0xb45   :  { %2847 = vmatprep.mubr.bf16.mxu1 %v2355_v41  ;;  %v15263_v41 = vld [vmem:[#allocation9_spill] sm:$0xff] }
 0xb46   :  { %2848 = vmatmul.mubr.bf16.gmra.mxu1 %v2137_v47  ;;  %v2793_v47 = vadd.f32 %v2792_v43, %v2429_v48 }
 0xb7e   :  { %v2839_v55 = vpop.f32.mrf.mxu1 }
 0xb7f   :  { %v2840_v59 = vadd.f32 %v2839_v55, %v2787_v16 }
 0xb80   :  { %v2841_v40 = vpop.f32.mrf.mxu1 }
 0xb81   :  { %v2842_v57 = vadd.f32 %v2841_v40, %v2789_v18  ;;  %v13036_v2 = vadd.f32 %v2840_v59, %v11886_v3 }
 0xb82   :  { %v2843_v20 = vpop.f32.mrf.mxu1 }
 0xb83   :  { %v13033_v13 = vadd.f32 %v2842_v57, %v11888_v4  ;;  %v2844_v26 = vadd.f32 %v2843_v20, %v2791_v23 }
 0xb84   :  { %v2845_v50 = vpop.f32.mrf.mxu1 }
 0xb85   :  { %v2846_v54 = vadd.f32 %v2845_v50, %v2793_v47  ;;  %v2868_v5 = vsel %vm91_vm0, %v13033_v13, 0.0  ;;  %v13045_v22 = vadd.f32 %v2844_v26, %v11897_v8  ;;  %v10737_v8 = vld [vmem:[#allocation2 + $0x128] ss:$24 sps:$4 sm:$0xff]   ;;  %v10742_v47 = vld [vmem:[#allocation2 + $0xf4] ss:$24 sps:$4 sm:$0xff]  }
 0xb86   :  { %v2869_v25 = vadd.f32 %v2868_v5, %v13036_v2  ;;  %3508 = vmatpush1.bf16.msra.mxu1 %v10737_v8  ;;  %v10745_v26 = vld [vmem:[#allocation2 + $0xfc] ss:$24 sps:$4 sm:$0xff]   ;;  %v10743_v5 = vld [vmem:[#allocation2 + $0xf8] ss:$24 sps:$4 sm:$0xff]   ;;  %v10763_v8 = vld [vmem:[#allocation2 + $0x6c] ss:$24 sps:$4 sm:$0xff]  }
 0xb87   :  { %v13042_v1 = vadd.f32 %v2846_v54, %v11899_v9  ;;  %v10734_v9 = vld [vmem:[#allocation2 + $0x120] ss:$24 sps:$4 sm:$0xff]   ;;  %v10740_v54 = vld [vmem:[#allocation2 + $0xf0] ss:$24 sps:$4 sm:$0xff]   ;;  %3509 = vmatprep.subr.bf16.mxu1 %v10745_v26 }
 0xb88   :  { %2870 = vadd.xlane.f32.xlu0 %v2869_v25  ;;  %3455 = vmatpush1.bf16.msra.mxu0 %v10734_v9  ;;  %v10760_v9 = vld [vmem:[#allocation2 + $0x64] ss:$24 sps:$4 sm:$0xff]  }
 0xb89   :  { %v2872_v4 = vsel %vm91_vm0, %v13042_v1, 0.0  ;;  %3456 = vmatprep.subr.bf16.mxu0 %v10742_v47 }
 0xb8a   :  { %v2873_v3 = vadd.f32 %v2872_v4, %v13045_v22  ;;  %3510 = vmatpush1.bf16.msra.mxu1 %v10743_v5  ;;  %v10748_v4 = vld [vmem:[#allocation2 + $0xc4] ss:$24 sps:$4 sm:$0xff]  }
 0xb8c   :  { %2874 = vadd.xlane.f32.xlu1 %v2873_v3  ;;  %3457 = vmatpush1.bf16.msra.mxu0 %v10740_v54  ;;  %v10751_v3 = vld [vmem:[#allocation2 + $0xcc] ss:$24 sps:$4 sm:$0xff]  }
 0xb8d   :  { %3458 = vmatprep.subr.bf16.mxu0 %v10748_v4  ;;  %3511 = vmatprep.subr.bf16.mxu1 %v10751_v3 }
 0xb8e   :  { %3512 = vmatpush1.bf16.msra.mxu1 %v10749_v21 }
 0xb8f   :  { %3513 = vmatprep.subr.bf16.mxu1 %v10757_v30 }
 0xb90   :  { %3459 = vmatpush1.bf16.msra.mxu0 %v10746_v52 }
 0xb91   :  { %3460 = vmatprep.subr.bf16.mxu0 %v10754_v60 }
 0xb92   :  { %3514 = vmatpush1.bf16.msra.mxu1 %v10755_v61 }
 0xb93   :  { %3515 = vmatprep.subr.bf16.mxu1 %v10763_v8 }
 0xb94   :  { %3461 = vmatpush1.bf16.msra.mxu0 %v10752_v56 }
 0xb95   :  { %3462 = vmatprep.subr.bf16.mxu0 %v10760_v9 }
 0xb96   :  { %3516 = vmatpush1.bf16.msra.mxu1 %v10761_v35 }
 0xb98   :  { %3463 = vmatpush1.bf16.msra.mxu0 %v10758_v29  ;;  %v2866_v29 = vld [vmem:[%s15193_s8] sm:$0x3] }
 0xb99   :  { %3464 = vmatprep.subr.bf16.mxu0 %v10766_v10 }
 0xc06   :  { %v2849_v63 = vpop.f32.mrf.mxu1 }
 0xc07   :  { %v2850_v39 = vadd.f32 %v2849_v63, %v2797_v11  ;;  %v10769_v11 = vld [vmem:[#allocation2 + $0x3c] ss:$24 sps:$4 sm:$0xff]   ;;  %v10764_v63 = vld [vmem:[#allocation2 + $0x30] ss:$24 sps:$4 sm:$0xff]  }
 0xc08   :  { %v2851_v33 = vpop.f32.mrf.mxu1  ;;  %3517 = vmatprep.subr.bf16.mxu1 %v10769_v11  ;;  %3465 = vmatpush1.bf16.msra.mxu0 %v10764_v63  ;;  %v2867_v11 = vld [vmem:[%s15194_s9] sm:$0x3] }
 0xc09   :  { %v2852_v46 = vadd.f32 %v2851_v33, %v2799_v24  ;;  %v13054_v27 = vadd.f32 %v2850_v39, %v15261_v19  ;;  %v10767_v24 = vld [vmem:[#allocation2 + $0x38] ss:$24 sps:$4 sm:$0xff]   ;;  %v10775_v39 = vld [vmem:[#allocation2 + $0xc] ss:$24 sps:$4 sm:$0xff]   ;;  %3466 = vmatprep.subr.bf16.mxu0 %v10772_v37  ;;  %v13124_v37 = vrot.slane %v2866_v29, %v12117_v12 }
 0xc0a   :  { %v2853_v58 = vpop.f32.mrf.mxu1  ;;  %3518 = vmatpush1.bf16.msra.mxu1 %v10767_v24  ;;  %v10770_v33 = vld [vmem:[#allocation2] ss:$24 sps:$4 sm:$0xff]   ;;  %v13121_v24 = vrot.slane %v2866_v29, %v12114_v7  ;;  %v10829_v29 = vld [vmem:[#allocation2 + $0x1f4] ss:$24 sps:$4 sm:$0xff]  }
 0xc0b   :  { %v13051_v44 = vadd.f32 %v2852_v46, %v11892_v6  ;;  %v2854_v49 = vadd.f32 %v2853_v58, %v2801_v36  ;;  %v10773_v46 = vld [vmem:[#allocation2 + $0x8] ss:$24 sps:$4 sm:$0xff]   ;;  %3519 = vmatprep.subr.bf16.mxu1 %v10775_v39  ;;  %v10778_v36 = vld [vmem:[#allocation2 + $0x214] ss:$24 sps:$4 sm:$0xff]   ;;  %v10779_v19 = vld [vmem:[#allocation2 + $0x218] ss:$24 sps:$4 sm:$0xff]  }
 0xc0c   :  { %v2855_v53 = vpop.f32.mrf.mxu1  ;;  %3467 = vmatpush1.bf16.msra.mxu0 %v10770_v33  ;;  %v10781_v58 = vld [vmem:[#allocation2 + $0x21c] ss:$24 sps:$4 sm:$0xff]   ;;  %v13127_v33 = vrot.slane %v2867_v11, %v12114_v7 }
 0xc0d   :  { %v2856_v31 = vadd.f32 %v2855_v53, %v2803_v32  ;;  %v2876_v51 = vsel %vm91_vm0, %v13051_v44, 0.0  ;;  %v13063_v0 = vadd.f32 %v2854_v49, %v15263_v41  ;;  %v10776_v32 = vld [vmem:[#allocation2 + $0x210] ss:$24 sps:$4 sm:$0xff]   ;;  %3476 = vmatprep.subr.bf16.mxu0 %v10778_v36  ;;  %v10784_v49 = vld [vmem:[#allocation2 + $0x1e4] ss:$24 sps:$4 sm:$0xff]  }
 0xc0e   :  { %v2877_v34 = vadd.f32 %v2876_v51, %v13054_v27  ;;  %3520 = vmatpush1.bf16.msra.mxu1 %v10773_v46  ;;  %v10787_v53 = vld [vmem:[#allocation2 + $0x1ec] ss:$24 sps:$4 sm:$0xff]   ;;  %v10785_v51 = vld [vmem:[#allocation2 + $0x1e8] ss:$24 sps:$4 sm:$0xff]   ;;  %v10791_v41 = vld [vmem:[#allocation2 + $0x1b8] ss:$24 sps:$4 sm:$0xff]   ;;  %v13130_v46 = vrot.slane %v2867_v11, %v12117_v12 }
 0xc0f   :  { %v13060_v42 = vadd.f32 %v2856_v31, %v15262_v15  ;;  %3529 = vmatprep.subr.bf16.mxu1 %v10781_v58  ;;  %v10782_v31 = vld [vmem:[#allocation2 + $0x1e0] ss:$24 sps:$4 sm:$0xff]   ;;  %v10790_v15 = vld [vmem:[#allocation2 + $0x1b4] ss:$24 sps:$4 sm:$0xff]  }
 0xc10   :  { %2878 = vadd.xlane.f32.xlu0 %v2877_v34  ;;  %3477 = vmatpush2.bf16.msra.mxu0 %v10776_v32  ;;  %v10788_v34 = vld [vmem:[#allocation2 + $0x1b0] ss:$24 sps:$4 sm:$0xff]   ;;  %v10868_v11 = vld [vmem:[%s15197_s12 + $0x24] ss:$8 sps:$4 sm:$0xff]  }
 0xc11   :  { %v2871_v6 = vpop.xlane.xlu0 %2870  ;;  %v2880_v28 = vsel %vm91_vm0, %v13060_v42, 0.0  ;;  %3478 = vmatprep.subr.bf16.mxu0 %v10784_v49 }
 0xc12   :  { %v2884_v38 = vmul.f32 0.0052083335, %v2871_v6  ;;  %v2881_v17 = vadd.f32 %v2880_v28, %v13063_v0  ;;  %3530 = vmatpush2.bf16.msra.mxu1 %v10779_v19  ;;  %v10793_v6 = vld [vmem:[#allocation2 + $0x1bc] ss:$24 sps:$4 sm:$0xff]  }
 0xc13   :  { %3531 = vmatprep.subr.bf16.mxu1 %v10787_v53  ;;  %v10796_v28 = vld [vmem:[#allocation2 + $0x184] ss:$24 sps:$4 sm:$0xff]  }
 0xc14   :  { %v13069_v14 = vsub.f32 %v13036_v2, %v2884_v38  ;;  %v13072_v48 = vsub.f32 %v13033_v13, %v2884_v38  ;;  %2882 = vadd.xlane.f32.xlu1 %v2881_v17  ;;  %3479 = vmatpush2.bf16.msra.mxu0 %v10782_v31  ;;  %v10799_v38 = vld [vmem:[#allocation2 + $0x18c] ss:$24 sps:$4 sm:$0xff]   ;;  %v10794_v17 = vld [vmem:[#allocation2 + $0x180] ss:$24 sps:$4 sm:$0xff]  }
 0xc15   :  { %v2875_v62 = vpop.xlane.xlu1 %2874  ;;  %3480 = vmatprep.subr.bf16.mxu0 %v10790_v15  ;;  %v10805_v15 = vld [vmem:[#allocation2 + $0x134] ss:$24 sps:$4 sm:$0xff]  }
 0xc16   :  { %v2885_v16 = vmul.f32 0.0052083335, %v2875_v62  ;;  %v2896_v55 = vmul.f32 %v13069_v14, %v13069_v14  ;;  %v2897_v18 = vmul.f32 %v13072_v48, %v13072_v48  ;;  %3532 = vmatpush2.bf16.msra.mxu1 %v10785_v51  ;;  %v10797_v62 = vld [vmem:[#allocation2 + $0x188] ss:$24 sps:$4 sm:$0xff]  }
 0xc17   :  { %3533 = vmatprep.subr.bf16.mxu1 %v10793_v6  ;;  %v10808_v6 = vld [vmem:[#allocation2 + $0x104] ss:$24 sps:$4 sm:$0xff]  }
 0xc18   :  { %v13079_v43 = vsub.f32 %v13045_v22, %v2885_v16  ;;  %v13082_v59 = vsub.f32 %v13042_v1, %v2885_v16  ;;  %v2904_v40 = vsel %vm91_vm0, %v2897_v18, 0.0  ;;  %3481 = vmatpush2.bf16.msra.mxu0 %v10788_v34  ;;  %v10802_v16 = vld [vmem:[#allocation2 + $0x164] ss:$24 sps:$4 sm:$0xff]  }
 0xc19   :  { %v2905_v57 = vadd.f32 %v2904_v40, %v2896_v55  ;;  %3482 = vmatprep.subr.bf16.mxu0 %v10796_v28  ;;  %v10806_v28 = vld [vmem:[#allocation2 + $0x100] ss:$24 sps:$4 sm:$0xff]  }
 0xc1a   :  { %v2898_v23 = vmul.f32 %v13079_v43, %v13079_v43  ;;  %v2899_v20 = vmul.f32 %v13082_v59, %v13082_v59  ;;  %3534 = vmatpush2.bf16.msra.mxu1 %v10791_v41  ;;  %v10803_v41 = vld [vmem:[#allocation2 + $0x130] ss:$24 sps:$4 sm:$0xff]  }
 0xc1b   :  { %2906 = vadd.xlane.f32.xlu0 %v2905_v57  ;;  %3535 = vmatprep.subr.bf16.mxu1 %v10799_v38  ;;  %v10811_v38 = vld [vmem:[#allocation2 + $0xd4] ss:$24 sps:$4 sm:$0xff]  }
 0xc1c   :  { %v2908_v50 = vsel %vm91_vm0, %v2899_v20, 0.0  ;;  %3483 = vmatpush2.bf16.msra.mxu0 %v10794_v17  ;;  %v10809_v17 = vld [vmem:[#allocation2 + $0xd0] ss:$24 sps:$4 sm:$0xff]  }
 0xc1d   :  { %v2909_v25 = vadd.f32 %v2908_v50, %v2898_v23  ;;  %3558 = vmatprep.subr.bf16.mxu0 %v10802_v16  ;;  %v10814_v16 = vld [vmem:[#allocation2 + $0xa4] ss:$24 sps:$4 sm:$0xff]  }
 0xc1e   :  { %3536 = vmatpush2.bf16.msra.mxu1 %v10797_v62  ;;  %v10836_v62 = vld [vmem:[%s15197_s12 + $0x70] ss:$8 sps:$4 sm:$0xff]  }
 0xc1f   :  { %2910 = vadd.xlane.f32.xlu1 %v2909_v25 }
 0xc99   :  { %v2879_v55 = vpop.xlane.xlu0 %2878 }
 0xc9a   :  { %v2886_v18 = vmul.f32 0.0052083335, %v2879_v55  ;;  %v10838_v55 = vld [vmem:[%s15197_s12 + $0x74] ss:$8 sps:$4 sm:$0xff]  }
 0xc9b   :  { %4235 = vmatprep.subr.bf16.mxu1 %v10838_v55  ;;  %v10922_v55 = vld [vmem:[%s15197_s12 + $0x94] ss:$8 sps:$4 sm:$0xff]  }
 0xc9c   :  { %v13091_v40 = vsub.f32 %v13054_v27, %v2886_v18  ;;  %v13094_v57 = vsub.f32 %v13051_v44, %v2886_v18  ;;  %v10812_v18 = vld [vmem:[#allocation2 + $0xa0] ss:$24 sps:$4 sm:$0xff]  }
 0xc9d   :  { %v2883_v23 = vpop.xlane.xlu1 %2882 }
 0xc9e   :  { %v2887_v20 = vmul.f32 0.0052083335, %v2883_v23  ;;  %v2900_v47 = vmul.f32 %v13091_v40, %v13091_v40  ;;  %v2901_v26 = vmul.f32 %v13094_v57, %v13094_v57  ;;  %v10817_v23 = vld [vmem:[#allocation2 + $0x74] ss:$24 sps:$4 sm:$0xff]  }
 0xca0   :  { %v13101_v50 = vsub.f32 %v13063_v0, %v2887_v20  ;;  %v13104_v54 = vsub.f32 %v13060_v42, %v2887_v20  ;;  %v2912_v5 = vsel %vm91_vm0, %v2901_v26, 0.0  ;;  %v10815_v20 = vld [vmem:[#allocation2 + $0x70] ss:$24 sps:$4 sm:$0xff]   ;;  %v10844_v26 = vld [vmem:[%s15197_s12 + $0x64] ss:$8 sps:$4 sm:$0xff]  }
 0xca1   :  { %v2913_v25 = vadd.f32 %v2912_v5, %v2900_v47  ;;  %v10842_v47 = vld [vmem:[%s15197_s12 + $0x60] ss:$8 sps:$4 sm:$0xff]   ;;  %v10820_v5 = vld [vmem:[#allocation2 + $0x44] ss:$24 sps:$4 sm:$0xff]  }
 0xca2   :  { %v2902_v4 = vmul.f32 %v13101_v50, %v13101_v50  ;;  %v2903_v3 = vmul.f32 %v13104_v54, %v13104_v54 }
 0xca3   :  { %2914 = vadd.xlane.f32.xlu0 %v2913_v25  ;;  %v10818_v25 = vld [vmem:[#allocation2 + $0x40] ss:$24 sps:$4 sm:$0xff]  }
 0xca4   :  { %v2907_v52 = vpop.xlane.xlu0 %2906  ;;  %v2916_v21 = vsel %vm91_vm0, %v2903_v3, 0.0  ;;  %v10850_v3 = vld [vmem:[%s15197_s12 + $0x54] ss:$8 sps:$4 sm:$0xff]  }
 0xca5   :  { %v2920_v60 = vmul.f32 0.0052083335, %v2907_v52  ;;  %v2917_v30 = vadd.f32 %v2916_v21, %v2902_v4  ;;  %v10848_v4 = vld [vmem:[%s15197_s12 + $0x50] ss:$8 sps:$4 sm:$0xff]   ;;  %v10823_v52 = vld [vmem:[#allocation2 + $0x14] ss:$24 sps:$4 sm:$0xff]  }
 0xca6   :  { %v10821_v21 = vld [vmem:[#allocation2 + $0x10] ss:$24 sps:$4 sm:$0xff]  }
 0xca7   :  { %v2924_v56 = vadd.f32 1e-05, %v2920_v60  ;;  %2918 = vadd.xlane.f32.xlu1 %v2917_v30  ;;  %v10854_v60 = vld [vmem:[%s15197_s12 + $0x40] ss:$8 sps:$4 sm:$0xff]   ;;  %v10856_v30 = vld [vmem:[%s15197_s12 + $0x44] ss:$8 sps:$4 sm:$0xff]  }
 0xca8   :  { %v2911_v61 = vpop.xlane.xlu1 %2910 }
 0xca9   :  { %11628 = vrsqrt.f32 %v2924_v56  ;;  %v2921_v9 = vmul.f32 0.0052083335, %v2911_v61  ;;  %v10826_v56 = vld [vmem:[#allocation2 + $0x224] ss:$24 sps:$4 sm:$0xff]   ;;  %v10824_v61 = vld [vmem:[#allocation2 + $0x220] ss:$24 sps:$4 sm:$0xff]  }
 0xcab   :  { %v2925_v8 = vadd.f32 1e-05, %v2921_v9  ;;  %v10860_v9 = vld [vmem:[%s15197_s12 + $0x30] ss:$8 sps:$4 sm:$0xff]  }
 0xcad   :  { %11630 = vrsqrt.f32 %v2925_v8  ;;  %v10862_v8 = vld [vmem:[%s15197_s12 + $0x34] ss:$8 sps:$4 sm:$0xff]  }
 0xcb6   :  { %v11629_v35 = vpop.eup %11628 }
 0xcb7   :  { %v2932_v10 = vmul.f32 %v11629_v35, %v13069_v14  ;;  %v2933_v63 = vmul.f32 %v11629_v35, %v13072_v48  ;;  %v10827_v35 = vld [vmem:[#allocation2 + $0x1f0] ss:$24 sps:$4 sm:$0xff]  }
 0xcb9   :  { %v2952_v58 = vmul.f32 %v13124_v37, %v2933_v63  ;;  %v2951_v48 = vmul.f32 %v13121_v24, %v2932_v10  ;;  %v10866_v10 = vld [vmem:[%s15197_s12 + $0x20] ss:$8 sps:$4 sm:$0xff]   ;;  %v10832_v63 = vld [vmem:[#allocation2 + $0x1c4] ss:$24 sps:$4 sm:$0xff]  }
 0xcba   :  { %v11631_v39 = vpop.eup %11630 }
 0xcbb   :  { %v2934_v14 = vmul.f32 %v11631_v39, %v13079_v43  ;;  %v2935_v36 = vmul.f32 %v11631_v39, %v13082_v59  ;;  %v2971_v49 = vadd.f32 %v13130_v46, %v2952_v58  ;;  %v2970_v31 = vadd.f32 %v13127_v33, %v2951_v48  ;;  %v10800_v59 = vld [vmem:[#allocation2 + $0x160] ss:$24 sps:$4 sm:$0xff]   ;;  %v10835_v58 = vld [vmem:[#allocation2 + $0x194] ss:$24 sps:$4 sm:$0xff]   ;;  %v10833_v48 = vld [vmem:[#allocation2 + $0x190] ss:$24 sps:$4 sm:$0xff]  }
 0xcbc   :  { %v10830_v39 = vld [vmem:[#allocation2 + $0x1c0] ss:$24 sps:$4 sm:$0xff]  }
 0xcbd   :  { %v2954_v32 = vmul.f32 %v13124_v37, %v2935_v36  ;;  %v2953_v19 = vmul.f32 %v13121_v24, %v2934_v14  ;;  %v10872_v14 = vld [vmem:[%s15197_s12 + $0x10] ss:$8 sps:$4 sm:$0xff]   ;;  %v10874_v36 = vld [vmem:[%s15197_s12 + $0x14] ss:$8 sps:$4 sm:$0xff]  }
 0xcbf   :  { %v2973_v53 = vadd.f32 %v13130_v46, %v2954_v32  ;;  %v2972_v51 = vadd.f32 %v13127_v33, %v2953_v19  ;;  %v10878_v32 = vld [vmem:[%s15197_s12] ss:$8 sps:$4 sm:$0xff]   ;;  %v10880_v19 = vld [vmem:[%s15197_s12 + $0x4] ss:$8 sps:$4 sm:$0xff]  }
 0xcc1   :  { %v13142_v34 = vpack.c.bf16 %v2973_v53, %v2971_v49  ;;  %v13144_v43 = vpack.c.bf16 %v2972_v51, %v2970_v31  ;;  %v10841_v49 = vld [vmem:[%s15197_s12 + $0x174] ss:$8 sps:$4 sm:$0xff]   ;;  %v10884_v53 = vld [vmem:[%s15197_s12 + $0xf0] ss:$8 sps:$4 sm:$0xff]   ;;  %v10890_v51 = vld [vmem:[%s15197_s12 + $0xe0] ss:$8 sps:$4 sm:$0xff]  }
 0xcc2   :  { %v10886_v31 = vld [vmem:[%s15197_s12 + $0xf4] ss:$8 sps:$4 sm:$0xff]  }
 0xcc3   :  { %9319 = vmatprep.mubr.msk.bf16.mxu0 %vm91_vm0, %v13142_v34  ;;  %9321 = vmatprep.mubr.msk.bf16.mxu1 %vm91_vm0, %v13142_v34 }
 0xcc4   :  { %3485 = vmatmul.mubr.bf16.vlgmr.msra.gmra.mxu0 %v13144_v43  ;;  %3538 = vmatmul.mubr.bf16.vlgmr.msra.gmra.mxu1 %v13144_v43 }
 0xcc5   :  { %3559 = vmatpush1.bf16.msra.mxu0 %v10800_v59  ;;  %4236 = vmatpush1.bf16.msra.mxu1 %v10836_v62  ;;  %v10892_v59 = vld [vmem:[%s15197_s12 + $0xe4] ss:$8 sps:$4 sm:$0xff]  }
 0xcc6   :  { %3560 = vmatprep.subr.bf16.mxu0 %v10805_v15  ;;  %4237 = vmatprep.subr.bf16.mxu1 %v10844_v26  ;;  %v10896_v15 = vld [vmem:[%s15197_s12 + $0xd0] ss:$8 sps:$4 sm:$0xff]   ;;  %v10916_v62 = vld [vmem:[%s15197_s12 + $0xa4] ss:$8 sps:$4 sm:$0xff]  }
 0xcc9   :  { %3561 = vmatpush1.bf16.msra.mxu0 %v10803_v41  ;;  %4238 = vmatpush1.bf16.msra.mxu1 %v10842_v47  ;;  %v10898_v41 = vld [vmem:[%s15197_s12 + $0xd4] ss:$8 sps:$4 sm:$0xff]  }
 0xcca   :  { %3562 = vmatprep.subr.bf16.mxu0 %v10808_v6  ;;  %4239 = vmatprep.subr.bf16.mxu1 %v10850_v3  ;;  %v10902_v6 = vld [vmem:[%s15197_s12 + $0xc0] ss:$8 sps:$4 sm:$0xff]   ;;  %v10934_v47 = vld [vmem:[%s15197_s12 + $0x274] ss:$8 sps:$4 sm:$0xff]  }
 0xccd   :  { %3563 = vmatpush1.bf16.msra.mxu0 %v10806_v28  ;;  %4240 = vmatpush1.bf16.msra.mxu1 %v10848_v4  ;;  %v10904_v28 = vld [vmem:[%s15197_s12 + $0xc4] ss:$8 sps:$4 sm:$0xff]  }
 0xcce   :  { %3564 = vmatprep.subr.bf16.mxu0 %v10811_v38  ;;  %4241 = vmatprep.subr.bf16.mxu1 %v10856_v30  ;;  %v10908_v38 = vld [vmem:[%s15197_s12 + $0xb0] ss:$8 sps:$4 sm:$0xff]  }
 0xcd1   :  { %3565 = vmatpush1.bf16.msra.mxu0 %v10809_v17  ;;  %4242 = vmatpush1.bf16.msra.mxu1 %v10854_v60  ;;  %v10910_v17 = vld [vmem:[%s15197_s12 + $0xb4] ss:$8 sps:$4 sm:$0xff]  }
 0xcd2   :  { %3566 = vmatprep.subr.bf16.mxu0 %v10814_v16  ;;  %4243 = vmatprep.subr.bf16.mxu1 %v10862_v8  ;;  %v10914_v16 = vld [vmem:[%s15197_s12 + $0xa0] ss:$8 sps:$4 sm:$0xff]  }
 0xcd5   :  { %3567 = vmatpush1.bf16.msra.mxu0 %v10812_v18  ;;  %4244 = vmatpush1.bf16.msra.mxu1 %v10860_v9  ;;  %v10920_v18 = vld [vmem:[%s15197_s12 + $0x90] ss:$8 sps:$4 sm:$0xff]  }
 0xcd6   :  { %3568 = vmatprep.subr.bf16.mxu0 %v10817_v23  ;;  %4245 = vmatprep.subr.bf16.mxu1 %v10868_v11  ;;  %v10928_v23 = vld [vmem:[%s15197_s12 + $0x84] ss:$8 sps:$4 sm:$0xff]  }
 0xcd9   :  { %3569 = vmatpush1.bf16.msra.mxu0 %v10815_v20  ;;  %4246 = vmatpush1.bf16.msra.mxu1 %v10866_v10  ;;  %v10926_v20 = vld [vmem:[%s15197_s12 + $0x80] ss:$8 sps:$4 sm:$0xff]  }
 0xcda   :  { %3570 = vmatprep.subr.bf16.mxu0 %v10820_v5  ;;  %4247 = vmatprep.subr.bf16.mxu1 %v10874_v36  ;;  %v10863_v36 = vld [vmem:[%s15197_s12 + $0x130] ss:$8 sps:$4 sm:$0xff]  }
 0xcdd   :  { %3571 = vmatpush1.bf16.msra.mxu0 %v10818_v25  ;;  %4248 = vmatpush1.bf16.msra.mxu1 %v10872_v14  ;;  %v10865_v14 = vld [vmem:[%s15197_s12 + $0x134] ss:$8 sps:$4 sm:$0xff]  }
 0xcde   :  { %3572 = vmatprep.subr.bf16.mxu0 %v10823_v52  ;;  %4249 = vmatprep.subr.bf16.mxu1 %v10880_v19  ;;  %v10875_v19 = vld [vmem:[%s15197_s12 + $0x110] ss:$8 sps:$4 sm:$0xff]  }
 0xce1   :  { %3573 = vmatpush1.bf16.msra.mxu0 %v10821_v21  ;;  %4250 = vmatpush1.bf16.msra.mxu1 %v10878_v32  ;;  %v10877_v32 = vld [vmem:[%s15197_s12 + $0x114] ss:$8 sps:$4 sm:$0xff]  }
 0xce2   :  { %3582 = vmatprep.subr.bf16.mxu0 %v10826_v56  ;;  %4251 = vmatprep.subr.bf16.mxu1 %v10886_v31  ;;  %v10889_v31 = vld [vmem:[%s15197_s12 + $0x1f4] ss:$8 sps:$4 sm:$0xff]  }
 0xce5   :  { %3583 = vmatpush2.bf16.msra.mxu0 %v10824_v61  ;;  %4252 = vmatpush2.bf16.msra.mxu1 %v10884_v53  ;;  %v10881_v53 = vld [vmem:[%s15197_s12 + $0x100] ss:$8 sps:$4 sm:$0xff]  }
 0xce6   :  { %3584 = vmatprep.subr.bf16.mxu0 %v10829_v29  ;;  %4253 = vmatprep.subr.bf16.mxu1 %v10892_v59  ;;  %v10895_v59 = vld [vmem:[%s15197_s12 + $0x1e4] ss:$8 sps:$4 sm:$0xff]  }
 0xce9   :  { %3585 = vmatpush2.bf16.msra.mxu0 %v10827_v35  ;;  %4254 = vmatpush2.bf16.msra.mxu1 %v10890_v51  ;;  %v10887_v51 = vld [vmem:[%s15197_s12 + $0x1f0] ss:$8 sps:$4 sm:$0xff]  }
 0xcea   :  { %3586 = vmatprep.subr.bf16.mxu0 %v10832_v63  ;;  %4255 = vmatprep.subr.bf16.mxu1 %v10898_v41  ;;  %v10901_v41 = vld [vmem:[%s15197_s12 + $0x1d4] ss:$8 sps:$4 sm:$0xff]  }
 0xced   :  { %3587 = vmatpush2.bf16.msra.mxu0 %v10830_v39  ;;  %4256 = vmatpush2.bf16.msra.mxu1 %v10896_v15  ;;  %v10893_v15 = vld [vmem:[%s15197_s12 + $0x1e0] ss:$8 sps:$4 sm:$0xff]  }
 0xcee   :  { %3588 = vmatprep.subr.bf16.mxu0 %v10835_v58  ;;  %4257 = vmatprep.subr.bf16.mxu1 %v10904_v28  ;;  %v10871_v58 = vld [vmem:[%s15197_s12 + $0x124] ss:$8 sps:$4 sm:$0xff]  }
 0xcef   :  { %v10907_v28 = vld [vmem:[%s15197_s12 + $0x1c4] ss:$8 sps:$4 sm:$0xff]  }
 0xcf1   :  { %3589 = vmatpush2.bf16.msra.mxu0 %v10833_v48  ;;  %4258 = vmatpush2.bf16.msra.mxu1 %v10902_v6  ;;  %v10869_v48 = vld [vmem:[%s15197_s12 + $0x120] ss:$8 sps:$4 sm:$0xff]   ;;  %v10899_v6 = vld [vmem:[%s15197_s12 + $0x1d0] ss:$8 sps:$4 sm:$0xff]  }
 0xcf2   :  { %4288 = vmatprep.subr.bf16.mxu0 %v10841_v49  ;;  %4259 = vmatprep.subr.bf16.mxu1 %v10910_v17  ;;  %v10883_v49 = vld [vmem:[%s15197_s12 + $0x104] ss:$8 sps:$4 sm:$0xff]   ;;  %v10913_v17 = vld [vmem:[%s15197_s12 + $0x1b4] ss:$8 sps:$4 sm:$0xff]  }
 0xcf5   :  { %4260 = vmatpush2.bf16.msra.mxu1 %v10908_v38  ;;  %v10905_v38 = vld [vmem:[%s15197_s12 + $0x1c0] ss:$8 sps:$4 sm:$0xff]  }
 0xcf6   :  { %4261 = vmatprep.subr.bf16.mxu1 %v10916_v62  ;;  %v10911_v62 = vld [vmem:[%s15197_s12 + $0x1b0] ss:$8 sps:$4 sm:$0xff]  }
 0xcf9   :  { %4262 = vmatpush2.bf16.msra.mxu1 %v10914_v16  ;;  %v10919_v16 = vld [vmem:[%s15197_s12 + $0x1a4] ss:$8 sps:$4 sm:$0xff]  }
 0xcfa   :  { %4263 = vmatprep.subr.bf16.mxu1 %v10922_v55  ;;  %v13353_v55 = vld [vmem:[%s15196_s11] sm:$0x3f] }
 0xcfd   :  { %4264 = vmatpush2.bf16.msra.mxu1 %v10920_v18 }
 0xcfe   :  { %4265 = vmatprep.subr.bf16.mxu1 %v10928_v23 }
 0xd01   :  { %4266 = vmatpush2.bf16.msra.mxu1 %v10926_v20  ;;  %v13357_v20 = vrot.slane %v13353_v55, %v12117_v12 }
 0xd02   :  { %4341 = vmatprep.subr.bf16.mxu1 %v10934_v47  ;;  %v15264_v47 = vld [vmem:[#allocation13_spill] sm:$0xff] }
 0xd2c   :  { %v2915_v26 = vpop.xlane.xlu0 %2914 }
 0xd2d   :  { %v2922_v5 = vmul.f32 0.0052083335, %v2915_v26  ;;  %v13361_v26 = vrot.slane %v13353_v55, %v15264_v47 }
 0xd2f   :  { %v2926_v25 = vadd.f32 1e-05, %v2922_v5  ;;  %v10917_v5 = vld [vmem:[%s15197_s12 + $0x1a0] ss:$8 sps:$4 sm:$0xff]  }
 0xd30   :  { %v2919_v4 = vpop.xlane.xlu1 %2918 }
 0xd31   :  { %11632 = vrsqrt.f32 %v2926_v25  ;;  %v2923_v3 = vmul.f32 0.0052083335, %v2919_v4  ;;  %v13368_v25 = vrot.slane %v13353_v55, %v12114_v7 }
 0xd33   :  { %v2927_v52 = vadd.f32 1e-05, %v2923_v3 }
 0xd35   :  { %11634 = vrsqrt.f32 %v2927_v52  ;;  %v10925_v52 = vld [vmem:[%s15197_s12 + $0x194] ss:$8 sps:$4 sm:$0xff]  }
 0xd3e   :  { %v11633_v21 = vpop.eup %11632 }
 0xd3f   :  { %v2937_v60 = vmul.f32 %v11633_v21, %v13094_v57  ;;  %v2936_v30 = vmul.f32 %v11633_v21, %v13091_v40  ;;  %v15265_v21 = vld [vmem:[#allocation12_spill] sm:$0xff] }
 0xd41   :  { %v2956_v9 = vmul.f32 %v13124_v37, %v2937_v60  ;;  %v2955_v29 = vmul.f32 %v13121_v24, %v2936_v30  ;;  %v13375_v60 = vrot.slane %v13353_v55, %v15265_v21 }
 0xd42   :  { %v11635_v56 = vpop.eup %11634 }
 0xd43   :  { %v2939_v61 = vmul.f32 %v11635_v56, %v13104_v54  ;;  %v2938_v8 = vmul.f32 %v11635_v56, %v13101_v50  ;;  %v2975_v11 = vadd.f32 %v13130_v46, %v2956_v9  ;;  %v2974_v57 = vadd.f32 %v13127_v33, %v2955_v29  ;;  %v10839_v50 = vld [vmem:[%s15197_s12 + $0x170] ss:$8 sps:$4 sm:$0xff]  }
 0xd44   :  { %v10923_v29 = vld [vmem:[%s15197_s12 + $0x190] ss:$8 sps:$4 sm:$0xff]  }
 0xd45   :  { %v2958_v35 = vmul.f32 %v13124_v37, %v2939_v61  ;;  %v2957_v10 = vmul.f32 %v13121_v24, %v2938_v8  ;;  %v10847_v24 = vld [vmem:[%s15197_s12 + $0x164] ss:$8 sps:$4 sm:$0xff]   ;;  %v10845_v37 = vld [vmem:[%s15197_s12 + $0x160] ss:$8 sps:$4 sm:$0xff]  }
 0xd47   :  { %v2977_v63 = vadd.f32 %v13130_v46, %v2958_v35  ;;  %v2976_v40 = vadd.f32 %v13127_v33, %v2957_v10  ;;  %v10853_v33 = vld [vmem:[%s15197_s12 + $0x154] ss:$8 sps:$4 sm:$0xff]   ;;  %v10851_v46 = vld [vmem:[%s15197_s12 + $0x150] ss:$8 sps:$4 sm:$0xff]  }
 0xd49   :  { %v2981_v39 = vpack.c.bf16 %v2977_v63, %v2975_v11  ;;  %v2980_v54 = vpack.c.bf16 %v2976_v40, %v2974_v57  ;;  %v10931_v57 = vld [vmem:[%s15197_s12 + $0x184] ss:$8 sps:$4 sm:$0xff]  }
 0xd4b   :  { %9320 = vmatprep.mubr.msk.bf16.mxu0 %vm91_vm0, %v2981_v39  ;;  %9322 = vmatprep.mubr.msk.bf16.mxu1 %vm91_vm0, %v2981_v39 }
 0xd4c   :  { %3495 = vmatmul.mubr.bf16.gmra.mxu0 %v2980_v54  ;;  %3548 = vmatmul.mubr.bf16.gmra.mxu1 %v2980_v54 }
 0xd4d   :  { %9323 = vmatprep.mubr.msk.bf16.mxu0 %vm91_vm0, %v13142_v34  ;;  %v10859_v34 = vld [vmem:[%s15197_s12 + $0x144] ss:$8 sps:$4 sm:$0xff]  }
 0xd54   :  { %3591 = vmatmul.mubr.bf16.vlgmr.msra.gmra.mxu0 %v13144_v43  ;;  %v10857_v43 = vld [vmem:[%s15197_s12 + $0x140] ss:$8 sps:$4 sm:$0xff]  }
 0xd55   :  { %4289 = vmatpush1.bf16.msra.mxu0 %v10839_v50  ;;  %9324 = vmatprep.mubr.msk.bf16.mxu0 %vm91_vm0, %v2981_v39 }
 0xd56   :  { %4290 = vmatprep.subr.bf16.mxu0 %v10847_v24 }
 0xd59   :  { %4291 = vmatpush1.bf16.msra.mxu0 %v10845_v37 }
 0xd5a   :  { %4292 = vmatprep.subr.bf16.mxu0 %v10853_v33 }
 0xd5c   :  { %3601 = vmatmul.mubr.bf16.gmra.mxu0 %v2980_v54 }
 0xd5d   :  { %4293 = vmatpush1.bf16.msra.mxu0 %v10851_v46 }
 0xd5e   :  { %4294 = vmatprep.subr.bf16.mxu0 %v10859_v34  ;;  %v10929_v34 = vld [vmem:[%s15197_s12 + $0x180] ss:$8 sps:$4 sm:$0xff]  }
 0xd61   :  { %4295 = vmatpush1.bf16.msra.mxu0 %v10857_v43 }
 0xd62   :  { %4296 = vmatprep.subr.bf16.mxu0 %v10865_v14 }
 0xd65   :  { %4297 = vmatpush1.bf16.msra.mxu0 %v10863_v36 }
 0xd66   :  { %4298 = vmatprep.subr.bf16.mxu0 %v10871_v58 }
 0xd69   :  { %4299 = vmatpush1.bf16.msra.mxu0 %v10869_v48  ;;  %v10932_v48 = vld [vmem:[%s15197_s12 + $0x270] ss:$8 sps:$4 sm:$0xff]  }
 0xd6a   :  { %4300 = vmatprep.subr.bf16.mxu0 %v10877_v32 }
 0xd6d   :  { %4301 = vmatpush1.bf16.msra.mxu0 %v10875_v19 }
 0xd6e   :  { %4302 = vmatprep.subr.bf16.mxu0 %v10883_v49  ;;  %v10937_v49 = vld [vmem:[%s15197_s12 + $0x264] ss:$8 sps:$4 sm:$0xff]  }
 0xd71   :  { %4303 = vmatpush1.bf16.msra.mxu0 %v10881_v53 }
 0xd72   :  { %4304 = vmatprep.subr.bf16.mxu0 %v10889_v31  ;;  %v10935_v31 = vld [vmem:[%s15197_s12 + $0x260] ss:$8 sps:$4 sm:$0xff]  }
 0xd75   :  { %4305 = vmatpush2.bf16.msra.mxu0 %v10887_v51  ;;  %v10940_v51 = vld [vmem:[%s15197_s12 + $0x254] ss:$8 sps:$4 sm:$0xff]  }
 0xd76   :  { %4306 = vmatprep.subr.bf16.mxu0 %v10895_v59  ;;  %v10938_v59 = vld [vmem:[%s15197_s12 + $0x250] ss:$8 sps:$4 sm:$0xff]  }
 0xd79   :  { %4307 = vmatpush2.bf16.msra.mxu0 %v10893_v15  ;;  %v10943_v15 = vld [vmem:[%s15197_s12 + $0x244] ss:$8 sps:$4 sm:$0xff]  }
 0xd7a   :  { %4308 = vmatprep.subr.bf16.mxu0 %v10901_v41  ;;  %v10941_v41 = vld [vmem:[%s15197_s12 + $0x240] ss:$8 sps:$4 sm:$0xff]  }
 0xd7d   :  { %4309 = vmatpush2.bf16.msra.mxu0 %v10899_v6  ;;  %v10946_v6 = vld [vmem:[%s15197_s12 + $0x234] ss:$8 sps:$4 sm:$0xff]  }
 0xd7e   :  { %4310 = vmatprep.subr.bf16.mxu0 %v10907_v28  ;;  %v10944_v28 = vld [vmem:[%s15197_s12 + $0x230] ss:$8 sps:$4 sm:$0xff]  }
 0xd81   :  { %4311 = vmatpush2.bf16.msra.mxu0 %v10905_v38  ;;  %v10949_v38 = vld [vmem:[%s15197_s12 + $0x224] ss:$8 sps:$4 sm:$0xff]  }
 0xd82   :  { %4312 = vmatprep.subr.bf16.mxu0 %v10913_v17  ;;  %v10947_v17 = vld [vmem:[%s15197_s12 + $0x220] ss:$8 sps:$4 sm:$0xff]  }
 0xd84   :  { %v3486_v18 = vpop.f32.mrf.mxu0  ;;  %v3539_v23 = vpop.f32.mrf.mxu1 }
 0xd85   :  { %4313 = vmatpush2.bf16.msra.mxu0 %v10911_v62  ;;  %v3487_v35 = vadd.f32 %v3486_v18, %v13368_v25  ;;  %v3540_v54 = vadd.f32 %v3539_v23, %v13375_v60  ;;  %v10952_v62 = vld [vmem:[%s15197_s12 + $0x214] ss:$8 sps:$4 sm:$0xff]   ;;  %v10955_v18 = vld [vmem:[%s15197_s12 + $0x204] ss:$8 sps:$4 sm:$0xff]   ;;  %v10953_v23 = vld [vmem:[%s15197_s12 + $0x200] ss:$8 sps:$4 sm:$0xff]  }
 0xd86   :  { %v3488_v4 = vpop.f32.mrf.mxu0  ;;  %v3541_v3 = vpop.f32.mrf.mxu1  ;;  %4314 = vmatprep.subr.bf16.mxu0 %v10919_v16  ;;  %v10950_v16 = vld [vmem:[%s15197_s12 + $0x210] ss:$8 sps:$4 sm:$0xff]  }
 0xd87   :  { %v3489_v61 = vadd.f32 %v3488_v4, %v13357_v20  ;;  %v3542_v9 = vadd.f32 %v3541_v3, %v13361_v26  ;;  %v3611_v43 = vmax.f32 %v3487_v35, 0.0  ;;  %v3613_v32 = vmax.f32 %v3540_v54, 0.0  ;;  %v10956_v4 = vld [vmem:[%s15197_s12 + $0x2f0] ss:$8 sps:$4 sm:$0xff]   ;;  %v10961_v3 = vld [vmem:[%s15197_s12 + $0x2e4] ss:$8 sps:$4 sm:$0xff]  }
 0xd88   :  { %v3490_v30 = vpop.f32.mrf.mxu0  ;;  %v3543_v56 = vpop.f32.mrf.mxu1  ;;  %v10973_v35 = vld [vmem:[%s15197_s12 + $0x2a4] ss:$8 sps:$4 sm:$0xff]  }
 0xd89   :  { %v3491_v8 = vadd.f32 %v3490_v30, %v13368_v25  ;;  %4315 = vmatpush2.bf16.msra.mxu0 %v10917_v5  ;;  %v3544_v10 = vadd.f32 %v3543_v56, %v13375_v60  ;;  %v3612_v24 = vmax.f32 %v3489_v61, 0.0  ;;  %v3614_v37 = vmax.f32 %v3542_v9, 0.0  ;;  %v10958_v5 = vld [vmem:[%s15197_s12 + $0x2f4] ss:$8 sps:$4 sm:$0xff]   ;;  %v10962_v56 = vld [vmem:[%s15197_s12 + $0x2d0] ss:$8 sps:$4 sm:$0xff]  }
 0xd8a   :  { %v3492_v11 = vpop.f32.mrf.mxu0  ;;  %v3545_v63 = vpop.f32.mrf.mxu1  ;;  %4316 = vmatprep.subr.bf16.mxu0 %v10925_v52  ;;  %v10959_v52 = vld [vmem:[%s15197_s12 + $0x2e0] ss:$8 sps:$4 sm:$0xff]   ;;  %v10964_v30 = vld [vmem:[%s15197_s12 + $0x2d4] ss:$8 sps:$4 sm:$0xff]   ;;  %v10967_v61 = vld [vmem:[%s15197_s12 + $0x2c4] ss:$8 sps:$4 sm:$0xff]  }
 0xd8b   :  { %v3493_v40 = vadd.f32 %v3492_v11, %v13357_v20  ;;  %v3546_v39 = vadd.f32 %v3545_v63, %v13361_v26  ;;  %v3617_v50 = vmax.f32 %v3491_v8, 0.0  ;;  %v3619_v14 = vmax.f32 %v3544_v10, 0.0  ;;  %v10965_v9 = vld [vmem:[%s15197_s12 + $0x2c0] ss:$8 sps:$4 sm:$0xff]   ;;  %v10970_v8 = vld [vmem:[%s15197_s12 + $0x2b4] ss:$8 sps:$4 sm:$0xff]  }
 0xd8c   :  { %v10971_v10 = vld [vmem:[%s15197_s12 + $0x2a0] ss:$8 sps:$4 sm:$0xff]   ;;  %v10976_v11 = vld [vmem:[%s15197_s12 + $0x294] ss:$8 sps:$4 sm:$0xff]   ;;  %v10974_v63 = vld [vmem:[%s15197_s12 + $0x290] ss:$8 sps:$4 sm:$0xff]  }
 0xd8d   :  { %v3618_v33 = vmax.f32 %v3493_v40, 0.0  ;;  %v3620_v46 = vmax.f32 %v3546_v39, 0.0  ;;  %4317 = vmatpush2.bf16.msra.mxu0 %v10923_v29  ;;  %v3635_v19 = vpack.c.bf16 %v3617_v50, %v3611_v43  ;;  %v3637_v53 = vpack.c.bf16 %v3619_v14, %v3613_v32  ;;  %v10968_v29 = vld [vmem:[%s15197_s12 + $0x2b0] ss:$8 sps:$4 sm:$0xff]   ;;  %v10977_v40 = vld [vmem:[%s15197_s12 + $0x280] ss:$8 sps:$4 sm:$0xff]  }
 0xd8e   :  { %4318 = vmatprep.subr.bf16.mxu0 %v10931_v57  ;;  %v10979_v57 = vld [vmem:[%s15197_s12 + $0x284] ss:$8 sps:$4 sm:$0xff]  }
 0xd8f   :  { %v3638_v36 = vpack.c.bf16 %v3620_v46, %v3614_v37  ;;  %v3636_v58 = vpack.c.bf16 %v3618_v33, %v3612_v24 }
 0xd91   :  { %4267 = vmatprep.mubr.bf16.mxu1 %v3636_v58  ;;  %4319 = vmatpush2.bf16.msra.mxu0 %v10929_v34 }
 0xd92   :  { %4320 = vmatprep.mubr.bf16.mxu0 %v3638_v36  ;;  %4268 = vmatmul.mubr.bf16.vlgmr.msra.gmra.mxu1 %v3635_v19 }
 0xd93   :  { %4342 = vmatpush1.bf16.msra.mxu1 %v10932_v48 }
 0xd94   :  { %4321 = vmatmul.mubr.bf16.vlgmr.msra.gmra.mxu0 %v3637_v53  ;;  %4343 = vmatprep.subr.bf16.mxu1 %v10937_v49 }
 0xd97   :  { %4344 = vmatpush1.bf16.msra.mxu1 %v10935_v31 }
 0xd98   :  { %4345 = vmatprep.subr.bf16.mxu1 %v10940_v51 }
 0xd9b   :  { %4346 = vmatpush1.bf16.msra.mxu1 %v10938_v59  ;;  %v15266_v59 = vld [vmem:[#allocation15_spill] sm:$0xff] }
 0xd9c   :  { %4347 = vmatprep.subr.bf16.mxu1 %v10943_v15  ;;  %v3079_v15 = vrot.slane %v13353_v55, %v15266_v59 }
 0xd9f   :  { %4348 = vmatpush1.bf16.msra.mxu1 %v10941_v41 }
 0xda0   :  { %4349 = vmatprep.subr.bf16.mxu1 %v10946_v6 }
 0xda3   :  { %4350 = vmatpush1.bf16.msra.mxu1 %v10944_v28 }
 0xda4   :  { %4351 = vmatprep.subr.bf16.mxu1 %v10949_v38 }
 0xda7   :  { %4352 = vmatpush1.bf16.msra.mxu1 %v10947_v17 }
 0xda8   :  { %4353 = vmatprep.subr.bf16.mxu1 %v10952_v62  ;;  %v15267_v62 = vld [vmem:[#allocation14_spill] sm:$0xff] }
 0xdab   :  { %4354 = vmatpush1.bf16.msra.mxu1 %v10950_v16 }
 0xdac   :  { %4355 = vmatprep.subr.bf16.mxu1 %v10955_v18 }
 0xdaf   :  { %4356 = vmatpush1.bf16.msra.mxu1 %v10953_v23 }
 0xdb0   :  { %4357 = vmatprep.subr.bf16.mxu1 %v10958_v5 }
 0xdb3   :  { %4358 = vmatpush2.bf16.msra.mxu1 %v10956_v4 }
 0xdb4   :  { %4359 = vmatprep.subr.bf16.mxu1 %v10961_v3 }
 0xdb7   :  { %4360 = vmatpush2.bf16.msra.mxu1 %v10959_v52 }
 0xdb8   :  { %4361 = vmatprep.subr.bf16.mxu1 %v10964_v30 }
 0xdbb   :  { %4362 = vmatpush2.bf16.msra.mxu1 %v10962_v56 }
 0xdbc   :  { %4363 = vmatprep.subr.bf16.mxu1 %v10967_v61 }
 0xdbf   :  { %4364 = vmatpush2.bf16.msra.mxu1 %v10965_v9 }
 0xdc0   :  { %4365 = vmatprep.subr.bf16.mxu1 %v10970_v8 }
 0xdc3   :  { %4366 = vmatpush2.bf16.msra.mxu1 %v10968_v29 }
 0xdc4   :  { %4367 = vmatprep.subr.bf16.mxu1 %v10973_v35 }
 0xdc7   :  { %4368 = vmatpush2.bf16.msra.mxu1 %v10971_v10 }
 0xdc8   :  { %4369 = vmatprep.subr.bf16.mxu1 %v10976_v11 }
 0xdcb   :  { %4370 = vmatpush2.bf16.msra.mxu1 %v10974_v63 }
 0xdcc   :  { %4371 = vmatprep.subr.bf16.mxu1 %v10979_v57 }
 0xdcf   :  { %4372 = vmatpush2.bf16.msra.mxu1 %v10977_v40 }
 0xe0c   :  { %v3496_v39 = vpop.f32.mrf.mxu0  ;;  %v3549_v54 = vpop.f32.mrf.mxu1 }
 0xe0d   :  { %v3497_v36 = vadd.f32 %v3496_v39, %v13368_v25  ;;  %v3550_v58 = vadd.f32 %v3549_v54, %v13375_v60 }
 0xe0e   :  { %v3498_v50 = vpop.f32.mrf.mxu0  ;;  %v3551_v24 = vpop.f32.mrf.mxu1 }
 0xe0f   :  { %v3499_v46 = vadd.f32 %v3498_v50, %v13357_v20  ;;  %v3552_v34 = vadd.f32 %v3551_v24, %v13361_v26  ;;  %v3623_v17 = vmax.f32 %v3497_v36, 0.0 }
 0xe10   :  { %v3500_v37 = vpop.f32.mrf.mxu0  ;;  %v3553_v33 = vpop.f32.mrf.mxu1 }
 0xe11   :  { %v3501_v43 = vadd.f32 %v3500_v37, %v13368_v25  ;;  %v3554_v14 = vadd.f32 %v3553_v33, %v13375_v60  ;;  %v3624_v41 = vmax.f32 %v3499_v46, 0.0  ;;  %v3626_v6 = vmax.f32 %v3552_v34, 0.0 }
 0xe12   :  { %v3502_v48 = vpop.f32.mrf.mxu0  ;;  %v3555_v32 = vpop.f32.mrf.mxu1  ;;  %v3625_v25 = vmax.f32 %v3550_v58, 0.0  ;;  %v3075_v60 = vrot.slane %v13353_v55, %v15267_v62 }
 0xe13   :  { %v3503_v19 = vadd.f32 %v3502_v48, %v13357_v20  ;;  %v3556_v49 = vadd.f32 %v3555_v32, %v13361_v26  ;;  %v3629_v53 = vmax.f32 %v3501_v43, 0.0  ;;  %v3631_v31 = vmax.f32 %v3554_v14, 0.0  ;;  %v3743_v32 = vld [vmem:[%s15198_s13] sm:$0x3] }
 0xe14   :  { %v3592_v51 = vpop.f32.mrf.mxu0 }
 0xe15   :  { %v3630_v28 = vmax.f32 %v3503_v19, 0.0  ;;  %v3632_v38 = vmax.f32 %v3556_v49, 0.0  ;;  %v3641_v23 = vpack.c.bf16 %v3629_v53, %v3623_v17  ;;  %v3643_v26 = vpack.c.bf16 %v3631_v31, %v3625_v25 }
 0xe16   :  { %v3594_v16 = vpop.f32.mrf.mxu0  ;;  %v3593_v52 = vadd.f32 %v3592_v51, %v3075_v60  ;;  %v3748_v53 = vrot.slane %v3743_v32, %v12114_v7  ;;  %v3752_v51 = vrot.slane %v3743_v32, %v12117_v12 }
 0xe17   :  { %v3644_v18 = vpack.c.bf16 %v3632_v38, %v3626_v6  ;;  %v3642_v20 = vpack.c.bf16 %v3630_v28, %v3624_v41  ;;  %v3595_v4 = vadd.f32 %v3594_v16, %v3079_v15 }
 0xe18   :  { %v3596_v5 = vpop.f32.mrf.mxu0  ;;  %v3615_v55 = vmax.f32 %v3593_v52, 0.0 }
 0xe19   :  { %v3597_v3 = vadd.f32 %v3596_v5, %v3075_v60  ;;  %4277 = vmatprep.mubr.bf16.mxu1 %v3642_v20  ;;  %4330 = vmatprep.mubr.bf16.mxu0 %v3644_v18  ;;  %v3616_v8 = vmax.f32 %v3595_v4, 0.0 }
 0xe1a   :  { %v3598_v30 = vpop.f32.mrf.mxu0  ;;  %4278 = vmatmul.mubr.bf16.gmra.mxu1 %v3641_v23  ;;  %4331 = vmatmul.mubr.bf16.gmra.mxu0 %v3643_v26 }
 0xe1b   :  { %v3599_v56 = vadd.f32 %v3598_v30, %v3079_v15  ;;  %v3621_v61 = vmax.f32 %v3597_v3, 0.0 }
 0xe1c   :  { %v3602_v9 = vpop.f32.mrf.mxu0 }
 0xe1d   :  { %v3622_v29 = vmax.f32 %v3599_v56, 0.0  ;;  %v3639_v11 = vpack.c.bf16 %v3621_v61, %v3615_v55  ;;  %v3603_v39 = vadd.f32 %v3602_v9, %v3075_v60 }
 0xe1e   :  { %v3604_v35 = vpop.f32.mrf.mxu0 }
 0xe1f   :  { %v3640_v10 = vpack.c.bf16 %v3622_v29, %v3616_v8  ;;  %v3605_v57 = vadd.f32 %v3604_v35, %v3079_v15  ;;  %v3627_v46 = vmax.f32 %v3603_v39, 0.0 }
 0xe20   :  { %v3606_v63 = vpop.f32.mrf.mxu0 }
 0xe21   :  { %v3607_v40 = vadd.f32 %v3606_v63, %v3075_v60  ;;  %4373 = vmatprep.mubr.bf16.mxu1 %v3640_v10  ;;  %v3628_v37 = vmax.f32 %v3605_v57, 0.0 }
 0xe22   :  { %v3608_v54 = vpop.f32.mrf.mxu0  ;;  %4374 = vmatmul.mubr.bf16.vlgmr.msra.gmra.mxu1 %v3639_v11 }
 0xe23   :  { %v3609_v50 = vadd.f32 %v3608_v54, %v3079_v15  ;;  %v3633_v24 = vmax.f32 %v3607_v40, 0.0 }
 0xe25   :  { %v3634_v33 = vmax.f32 %v3609_v50, 0.0  ;;  %v3645_v43 = vpack.c.bf16 %v3633_v24, %v3627_v46 }
 0xe27   :  { %v3646_v34 = vpack.c.bf16 %v3634_v33, %v3628_v37 }
 0xe29   :  { %4383 = vmatprep.mubr.bf16.mxu1 %v3646_v34 }
 0xe2a   :  { %4384 = vmatmul.mubr.bf16.gmra.mxu1 %v3645_v43 }
 0xe52   :  { %v4269_v14 = vpop.f32.mrf.mxu1 }
 0xe53   :  { %v4270_v6 = vadd.f32 %v4269_v14, %v3748_v53 }
 0xe54   :  { %v4271_v36 = vpop.f32.mrf.mxu1  ;;  %v4322_v58 = vpop.f32.mrf.mxu0 }
 0xe55   :  { %v4272_v38 = vadd.f32 %v4271_v36, %v3752_v51  ;;  %v4323_v60 = vadd.f32 %v4322_v58, %v4270_v6  ;;  %v10980_v6 = vld [vmem:[%s15189_s4 + $0x720] ss:$48 sps:$4 sm:$0xff]  }
 0xe56   :  { %v4273_v48 = vpop.f32.mrf.mxu1  ;;  %v4324_v19 = vpop.f32.mrf.mxu0 }
 0xe57   :  { %v4274_v16 = vadd.f32 %v4273_v48, %v3748_v53  ;;  %v4325_v23 = vadd.f32 %v4324_v19, %v4272_v38  ;;  %v10988_v38 = vld [vmem:[%s15189_s4 + $0x6c4] ss:$48 sps:$4 sm:$0xff]  }
 0xe58   :  { %v4275_v49 = vpop.f32.mrf.mxu1  ;;  %v4326_v15 = vpop.f32.mrf.mxu0 }
 0xe59   :  { %v4276_v26 = vadd.f32 %v4275_v49, %v3752_v51  ;;  %v4327_v52 = vadd.f32 %v4326_v15, %v4274_v16  ;;  %v10994_v16 = vld [vmem:[%s15189_s4 + $0x664] ss:$48 sps:$4 sm:$0xff]  }
 0xe5a   :  { %v4328_v17 = vpop.f32.mrf.mxu0 }
 0xe5b   :  { %v4329_v9 = vadd.f32 %v4328_v17, %v4276_v26  ;;  %v10991_v17 = vld [vmem:[%s15189_s4 + $0x6cc] ss:$48 sps:$4 sm:$0xff]   ;;  %v11000_v26 = vld [vmem:[%s15189_s4 + $0x604] ss:$48 sps:$4 sm:$0xff]  }
 0xeda   :  { %v4279_v31 = vpop.f32.mrf.mxu1  ;;  %v4332_v18 = vpop.f32.mrf.mxu0 }
 0xedb   :  { %v4280_v30 = vadd.f32 %v4279_v31, %v3748_v53 }
 0xedc   :  { %v4281_v41 = vpop.f32.mrf.mxu1  ;;  %v4334_v56 = vpop.f32.mrf.mxu0 }
 0xedd   :  { %v4282_v8 = vadd.f32 %v4281_v41, %v3752_v51  ;;  %v4333_v57 = vadd.f32 %v4332_v18, %v4280_v30  ;;  %v10997_v18 = vld [vmem:[%s15189_s4 + $0x66c] ss:$48 sps:$4 sm:$0xff]  }
 0xede   :  { %v4283_v28 = vpop.f32.mrf.mxu1  ;;  %v4336_v39 = vpop.f32.mrf.mxu0  ;;  %v11009_v30 = vld [vmem:[%s15189_s4 + $0x5ac] ss:$48 sps:$4 sm:$0xff]  }
 0xedf   :  { %v4284_v40 = vadd.f32 %v4283_v28, %v3748_v53  ;;  %v4335_v24 = vadd.f32 %v4334_v56, %v4282_v8  ;;  %v10982_v28 = vld [vmem:[%s15189_s4 + $0x724] ss:$48 sps:$4 sm:$0xff]   ;;  %v11004_v56 = vld [vmem:[%s15189_s4 + $0x5a0] ss:$48 sps:$4 sm:$0xff]  }
 0xee0   :  { %v4285_v25 = vpop.f32.mrf.mxu1  ;;  %v4338_v36 = vpop.f32.mrf.mxu0  ;;  %5456 = vmatprep.subr.bf16.mxu0 %v10982_v28 }
 0xee1   :  { %v4286_v37 = vadd.f32 %v4285_v25, %v3752_v51  ;;  %v4337_v14 = vadd.f32 %v4336_v39, %v4284_v40  ;;  %5457 = vmatpush1.bf16.msra.mxu0 %v10980_v6  ;;  %v10986_v25 = vld [vmem:[%s15189_s4 + $0x6c0] ss:$48 sps:$4 sm:$0xff]  }
 0xee2   :  { %v4375_v20 = vpop.f32.mrf.mxu1  ;;  %5458 = vmatprep.subr.bf16.mxu0 %v10988_v38  ;;  %v11015_v38 = vld [vmem:[%s15189_s4 + $0x54c] ss:$48 sps:$4 sm:$0xff]  }
 0xee3   :  { %v4376_v5 = vadd.f32 %v4375_v20, %v4323_v60  ;;  %v4339_v32 = vadd.f32 %v4338_v36, %v4286_v37  ;;  %v10989_v60 = vld [vmem:[%s15189_s4 + $0x6c8] ss:$48 sps:$4 sm:$0xff]   ;;  %v10992_v20 = vld [vmem:[%s15189_s4 + $0x660] ss:$48 sps:$4 sm:$0xff]  }
 0xee4   :  { %v4377_v4 = vpop.f32.mrf.mxu1 }
 0xee5   :  { %v4378_v3 = vadd.f32 %v4377_v4, %v4325_v23  ;;  %v13508_v55 = vadd.f32 %v4376_v5, %v13036_v2  ;;  %5459 = vmatpush1.bf16.msra.mxu0 %v10986_v25  ;;  %v10995_v23 = vld [vmem:[%s15189_s4 + $0x668] ss:$48 sps:$4 sm:$0xff]   ;;  %v11003_v5 = vld [vmem:[%s15189_s4 + $0x60c] ss:$48 sps:$4 sm:$0xff]   ;;  %v10998_v4 = vld [vmem:[%s15189_s4 + $0x600] ss:$48 sps:$4 sm:$0xff]  }
 0xee6   :  { %v4379_v61 = vpop.f32.mrf.mxu1  ;;  %5460 = vmatprep.subr.bf16.mxu0 %v10994_v16  ;;  %v11013_v25 = vld [vmem:[%s15189_s4 + $0x548] ss:$48 sps:$4 sm:$0xff]   ;;  %v11021_v16 = vld [vmem:[%s15189_s4 + $0x4ec] ss:$48 sps:$4 sm:$0xff]  }
 0xee7   :  { %v13505_v29 = vadd.f32 %v4378_v3, %v13033_v13  ;;  %v4380_v35 = vadd.f32 %v4379_v61, %v4327_v52  ;;  %v11001_v3 = vld [vmem:[%s15189_s4 + $0x608] ss:$48 sps:$4 sm:$0xff]   ;;  %v11006_v52 = vld [vmem:[%s15189_s4 + $0x5a4] ss:$48 sps:$4 sm:$0xff]  }
 0xee8   :  { %v4381_v10 = vpop.f32.mrf.mxu1  ;;  %v11007_v61 = vld [vmem:[%s15189_s4 + $0x5a8] ss:$48 sps:$4 sm:$0xff]  }
 0xee9   :  { %v4382_v11 = vadd.f32 %v4381_v10, %v4329_v9  ;;  %v4406_v63 = vsel %vm91_vm0, %v13505_v29, 0.0  ;;  %v13517_v2 = vadd.f32 %v4380_v35, %v13045_v22  ;;  %5461 = vmatpush1.bf16.msra.mxu0 %v10992_v20  ;;  %v11019_v20 = vld [vmem:[%s15189_s4 + $0x4e8] ss:$48 sps:$4 sm:$0xff]  }
 0xeea   :  { %v4385_v54 = vpop.f32.mrf.mxu1  ;;  %v4407_v50 = vadd.f32 %v4406_v63, %v13508_v55  ;;  %5462 = vmatprep.subr.bf16.mxu0 %v11000_v26  ;;  %v11027_v26 = vld [vmem:[%s15189_s4 + $0x48c] ss:$48 sps:$4 sm:$0xff]  }
 0xeeb   :  { %v13514_v13 = vadd.f32 %v4382_v11, %v13042_v1  ;;  %v4386_v33 = vadd.f32 %v4385_v54, %v4333_v57 }
 0xeec   :  { %v4387_v46 = vpop.f32.mrf.mxu1  ;;  %4408 = vadd.xlane.f32.xlu0 %v4407_v50 }
 0xeed   :  { %v4388_v34 = vadd.f32 %v4387_v46, %v4335_v24  ;;  %v4410_v43 = vsel %vm91_vm0, %v13514_v13, 0.0  ;;  %v13526_v1 = vadd.f32 %v4386_v33, %v13054_v27  ;;  %5463 = vmatpush1.bf16.msra.mxu0 %v10998_v4  ;;  %v11025_v4 = vld [vmem:[%s15189_s4 + $0x488] ss:$48 sps:$4 sm:$0xff]  }
 0xeee   :  { %v4389_v58 = vpop.f32.mrf.mxu1  ;;  %v4411_v48 = vadd.f32 %v4410_v43, %v13517_v2  ;;  %5464 = vmatprep.subr.bf16.mxu0 %v11006_v52  ;;  %v11033_v52 = vld [vmem:[%s15189_s4 + $0x8ac] ss:$48 sps:$4 sm:$0xff]  }
 0xeef   :  { %v13523_v19 = vadd.f32 %v4388_v34, %v13051_v44  ;;  %15269 = vst [vmem:[#allocation10_spill] sm:$0xff] %v13526_v1  ;;  %v4390_v22 = vadd.f32 %v4389_v58, %v4337_v14 }
 0xef0   :  { %v4391_v49 = vpop.f32.mrf.mxu1  ;;  %4412 = vadd.xlane.f32.xlu1 %v4411_v48 }
 0xef1   :  { %15268 = vst [vmem:[#allocation8_spill] sm:$0xff] %v13523_v19  ;;  %v4392_v53 = vadd.f32 %v4391_v49, %v4339_v32  ;;  %v4414_v31 = vsel %vm91_vm0, %v13523_v19, 0.0  ;;  %v13535_v41 = vadd.f32 %v4390_v22, %v13063_v0  ;;  %v10985_v0 = vld [vmem:[%s15189_s4 + $0x72c] ss:$48 sps:$4 sm:$0xff]   ;;  %5465 = vmatpush1.bf16.msra.mxu0 %v11004_v56  ;;  %v11031_v56 = vld [vmem:[%s15189_s4 + $0x8a8] ss:$48 sps:$4 sm:$0xff]  }
 0xef2   :  { %v4415_v51 = vadd.f32 %v4414_v31, %v13526_v1  ;;  %5509 = vmatprep.subr.bf16.mxu1 %v10985_v0  ;;  %v11012_v0 = vld [vmem:[%s15189_s4 + $0x544] ss:$48 sps:$4 sm:$0xff]  }
 0xef3   :  { %v13532_v15 = vadd.f32 %v4392_v53, %v13060_v42  ;;  %15271 = vst [vmem:[#allocation16_spill] sm:$0xff] %v13535_v41  ;;  %v10983_v42 = vld [vmem:[%s15189_s4 + $0x728] ss:$48 sps:$4 sm:$0xff]   ;;  %5466 = vmatprep.subr.bf16.mxu0 %v11012_v0  ;;  %v9421_v0 = vld [vmem:[%s15240_s1 + $0x2] sm:$0x3] }
 0xef4   :  { %4416 = vadd.xlane.f32.xlu0 %v4415_v51  ;;  %5510 = vmatpush1.bf16.msra.mxu1 %v10983_v42 }
 0xef5   :  { %15270 = vst [vmem:[#allocation9_spill] sm:$0xff] %v13532_v15  ;;  %v4418_v44 = vsel %vm91_vm0, %v13532_v15, 0.0  ;;  %5511 = vmatprep.subr.bf16.mxu1 %v10991_v17  ;;  %v11010_v17 = vld [vmem:[%s15189_s4 + $0x540] ss:$48 sps:$4 sm:$0xff]  }
 0xef6   :  { %v4419_v27 = vadd.f32 %v4418_v44, %v13535_v41  ;;  %5467 = vmatpush1.bf16.msra.mxu0 %v11010_v17 }
 0xef8   :  { %4420 = vadd.xlane.f32.xlu1 %v4419_v27  ;;  %5512 = vmatpush1.bf16.msra.mxu1 %v10989_v60  ;;  %v11018_v60 = vld [vmem:[%s15189_s4 + $0x4e4] ss:$48 sps:$4 sm:$0xff]  }
 0xef9   :  { %5513 = vmatprep.subr.bf16.mxu1 %v10997_v18  ;;  %v11016_v18 = vld [vmem:[%s15189_s4 + $0x4e0] ss:$48 sps:$4 sm:$0xff]   ;;  %5468 = vmatprep.subr.bf16.mxu0 %v11018_v60  ;;  %v4486_v60 = vrot.slane %v9421_v0, %v12117_v12 }
 0xefa   :  { %5469 = vmatpush1.bf16.msra.mxu0 %v11016_v18 }
 0xefc   :  { %5514 = vmatpush1.bf16.msra.mxu1 %v10995_v23  ;;  %v11024_v23 = vld [vmem:[%s15189_s4 + $0x484] ss:$48 sps:$4 sm:$0xff]  }
 0xefd   :  { %5515 = vmatprep.subr.bf16.mxu1 %v11003_v5  ;;  %v11022_v5 = vld [vmem:[%s15189_s4 + $0x480] ss:$48 sps:$4 sm:$0xff]   ;;  %5470 = vmatprep.subr.bf16.mxu0 %v11024_v23 }
 0xefe   :  { %5471 = vmatpush1.bf16.msra.mxu0 %v11022_v5 }
 0xf00   :  { %5516 = vmatpush1.bf16.msra.mxu1 %v11001_v3  ;;  %v11030_v3 = vld [vmem:[%s15189_s4 + $0x8a4] ss:$48 sps:$4 sm:$0xff]  }
 0xf01   :  { %5517 = vmatprep.subr.bf16.mxu1 %v11009_v30  ;;  %v11028_v30 = vld [vmem:[%s15189_s4 + $0x8a0] ss:$48 sps:$4 sm:$0xff]   ;;  %5480 = vmatprep.subr.bf16.mxu0 %v11030_v3 }
 0xf02   :  { %5481 = vmatpush2.bf16.msra.mxu0 %v11028_v30 }
 0xf04   :  { %5518 = vmatpush1.bf16.msra.mxu1 %v11007_v61  ;;  %v11036_v61 = vld [vmem:[%s15189_s4 + $0x844] ss:$48 sps:$4 sm:$0xff]  }
 0xf05   :  { %5519 = vmatprep.subr.bf16.mxu1 %v11015_v38  ;;  %5482 = vmatprep.subr.bf16.mxu0 %v11036_v61 }
 0xf08   :  { %5520 = vmatpush1.bf16.msra.mxu1 %v11013_v25  ;;  %v4482_v25 = vrot.slane %v9421_v0, %v12114_v7  ;;  %v11072_v0 = vld [vmem:[%s15189_s4 + $0x614] ss:$48 sps:$4 sm:$0xff]  }
 0xf09   :  { %5521 = vmatprep.subr.bf16.mxu1 %v11021_v16 }
 0xf0c   :  { %5522 = vmatpush1.bf16.msra.mxu1 %v11019_v20  ;;  %v9422_v20 = vld [vmem:[%s15188_s3 + $0x2] sm:$0x3] }
 0xf0d   :  { %5523 = vmatprep.subr.bf16.mxu1 %v11027_v26  ;;  %v4501_v3 = vrot.slane %v9422_v20, %v12114_v7 }
 0xf10   :  { %5524 = vmatpush1.bf16.msra.mxu1 %v11025_v4  ;;  %v4505_v4 = vrot.slane %v9422_v20, %v12117_v12  ;;  %v11079_v20 = vld [vmem:[%s15189_s4 + $0x5b8] ss:$48 sps:$4 sm:$0xff]  }
 0xf11   :  { %5533 = vmatprep.subr.bf16.mxu1 %v11033_v52 }
 0xf14   :  { %5534 = vmatpush2.bf16.msra.mxu1 %v11031_v56 }
 0xf75   :  { %v4409_v9 = vpop.xlane.xlu0 %4408 }
 0xf76   :  { %v4422_v8 = vmul.f32 0.0052083335, %v4409_v9  ;;  %v11039_v9 = vld [vmem:[%s15189_s4 + $0x84c] ss:$48 sps:$4 sm:$0xff]  }
 0xf77   :  { %5535 = vmatprep.subr.bf16.mxu1 %v11039_v9 }
 0xf78   :  { %v13601_v35 = vsub.f32 %v13508_v55, %v4422_v8  ;;  %v13604_v10 = vsub.f32 %v13505_v29, %v4422_v8  ;;  %v11034_v8 = vld [vmem:[%s15189_s4 + $0x840] ss:$48 sps:$4 sm:$0xff]  }
 0xf79   :  { %v4413_v11 = vpop.xlane.xlu1 %4412  ;;  %5483 = vmatpush2.bf16.msra.mxu0 %v11034_v8 }
 0xf7a   :  { %v4423_v63 = vmul.f32 0.0052083335, %v4413_v11  ;;  %v4434_v57 = vmul.f32 %v13601_v35, %v13601_v35  ;;  %v4435_v40 = vmul.f32 %v13604_v10, %v13604_v10  ;;  %v11037_v11 = vld [vmem:[%s15189_s4 + $0x848] ss:$48 sps:$4 sm:$0xff]  }
 0xf7b   :  { %5536 = vmatpush2.bf16.msra.mxu1 %v11037_v11 }
 0xf7c   :  { %v13611_v39 = vsub.f32 %v13517_v2, %v4423_v63  ;;  %v13614_v54 = vsub.f32 %v13514_v13, %v4423_v63  ;;  %v4442_v50 = vsel %vm91_vm0, %v4435_v40, 0.0  ;;  %v11042_v63 = vld [vmem:[%s15189_s4 + $0x7e4] ss:$48 sps:$4 sm:$0xff]   ;;  %v11040_v40 = vld [vmem:[%s15189_s4 + $0x7e0] ss:$48 sps:$4 sm:$0xff]  }
 0xf7d   :  { %v4417_v24 = vpop.xlane.xlu0 %4416  ;;  %v4443_v37 = vadd.f32 %v4442_v50, %v4434_v57  ;;  %v11045_v57 = vld [vmem:[%s15189_s4 + $0x7ec] ss:$48 sps:$4 sm:$0xff]   ;;  %v11043_v50 = vld [vmem:[%s15189_s4 + $0x7e8] ss:$48 sps:$4 sm:$0xff]   ;;  %5484 = vmatprep.subr.bf16.mxu0 %v11042_v63 }
 0xf7e   :  { %v4424_v33 = vmul.f32 0.0052083335, %v4417_v24  ;;  %v4436_v46 = vmul.f32 %v13611_v39, %v13611_v39  ;;  %v4437_v34 = vmul.f32 %v13614_v54, %v13614_v54  ;;  %5537 = vmatprep.subr.bf16.mxu1 %v11045_v57  ;;  %5485 = vmatpush2.bf16.msra.mxu0 %v11040_v40  ;;  %v11048_v24 = vld [vmem:[%s15189_s4 + $0x784] ss:$48 sps:$4 sm:$0xff]  }
 0xf7f   :  { %4444 = vadd.xlane.f32.xlu0 %v4443_v37  ;;  %5538 = vmatpush2.bf16.msra.mxu1 %v11043_v50  ;;  %v11051_v37 = vld [vmem:[%s15189_s4 + $0x78c] ss:$48 sps:$4 sm:$0xff]   ;;  %v11052_v50 = vld [vmem:[%s15189_s4 + $0x730] ss:$48 sps:$4 sm:$0xff]  }
 0xf80   :  { %v13622_v43 = vsub.f32 %v13526_v1, %v4424_v33  ;;  %v13625_v14 = vsub.f32 %v13523_v19, %v4424_v33  ;;  %v4446_v36 = vsel %vm91_vm0, %v4437_v34, 0.0  ;;  %v11046_v33 = vld [vmem:[%s15189_s4 + $0x780] ss:$48 sps:$4 sm:$0xff]   ;;  %5486 = vmatprep.subr.bf16.mxu0 %v11048_v24  ;;  %5539 = vmatprep.subr.bf16.mxu1 %v11051_v37  ;;  %v11054_v34 = vld [vmem:[%s15189_s4 + $0x734] ss:$48 sps:$4 sm:$0xff]  }
 0xf81   :  { %v4421_v58 = vpop.xlane.xlu1 %4420  ;;  %v4447_v48 = vadd.f32 %v4446_v36, %v4436_v46  ;;  %v11049_v46 = vld [vmem:[%s15189_s4 + $0x788] ss:$48 sps:$4 sm:$0xff]   ;;  %v11057_v36 = vld [vmem:[%s15189_s4 + $0x73c] ss:$48 sps:$4 sm:$0xff]  }
 0xf82   :  { %v4425_v32 = vmul.f32 0.0052083335, %v4421_v58  ;;  %v4438_v22 = vmul.f32 %v13622_v43, %v13622_v43  ;;  %v4439_v49 = vmul.f32 %v13625_v14, %v13625_v14  ;;  %5487 = vmatpush2.bf16.msra.mxu0 %v11046_v33 }
 0xf83   :  { %4448 = vadd.xlane.f32.xlu1 %v4447_v48  ;;  %5540 = vmatpush2.bf16.msra.mxu1 %v11049_v46 }
 0xf84   :  { %v13633_v53 = vsub.f32 %v13535_v41, %v4425_v32  ;;  %v13636_v31 = vsub.f32 %v13532_v15, %v4425_v32  ;;  %v4450_v51 = vsel %vm91_vm0, %v4439_v49, 0.0  ;;  %5562 = vmatprep.subr.bf16.mxu0 %v11054_v34  ;;  %5615 = vmatprep.subr.bf16.mxu1 %v11057_v36 }
 0xf85   :  { %v4451_v44 = vadd.f32 %v4450_v51, %v4438_v22 }
 0xf86   :  { %v4440_v27 = vmul.f32 %v13633_v53, %v13633_v53  ;;  %v4441_v6 = vmul.f32 %v13636_v31, %v13636_v31 }
 0xf87   :  { %4452 = vadd.xlane.f32.xlu0 %v4451_v44 }
 0xf88   :  { %v4454_v28 = vsel %vm91_vm0, %v4441_v6, 0.0 }
 0xf89   :  { %v4455_v42 = vadd.f32 %v4454_v28, %v4440_v27 }
 0xf8b   :  { %4456 = vadd.xlane.f32.xlu1 %v4455_v42 }
0x1008   :  { %v4445_v58 = vpop.xlane.xlu0 %4444 }
0x1009   :  { %v4458_v48 = vmul.f32 0.0052083335, %v4445_v58 }
0x100b   :  { %v4462_v32 = vadd.f32 1e-05, %v4458_v48  ;;  %v11066_v48 = vld [vmem:[%s15189_s4 + $0x674] ss:$48 sps:$4 sm:$0xff]  }
0x100c   :  { %v4449_v22 = vpop.xlane.xlu1 %4448 }
0x100d   :  { %11636 = vrsqrt.f32 %v4462_v32  ;;  %v4459_v49 = vmul.f32 0.0052083335, %v4449_v22  ;;  %v11069_v32 = vld [vmem:[%s15189_s4 + $0x67c] ss:$48 sps:$4 sm:$0xff]  }
0x100f   :  { %v4463_v51 = vadd.f32 1e-05, %v4459_v49 }
0x1010   :  { %v4453_v44 = vpop.xlane.xlu0 %4452 }
0x1011   :  { %11638 = vrsqrt.f32 %v4463_v51  ;;  %v4460_v27 = vmul.f32 0.0052083335, %v4453_v44 }
0x1013   :  { %v4464_v6 = vadd.f32 1e-05, %v4460_v27 }
0x1014   :  { %v4457_v28 = vpop.xlane.xlu1 %4456 }
0x1015   :  { %11640 = vrsqrt.f32 %v4464_v6  ;;  %v4461_v42 = vmul.f32 0.0052083335, %v4457_v28  ;;  %v11064_v6 = vld [vmem:[%s15189_s4 + $0x670] ss:$48 sps:$4 sm:$0xff]   ;;  %v11067_v28 = vld [vmem:[%s15189_s4 + $0x678] ss:$48 sps:$4 sm:$0xff]  }
0x1017   :  { %v4465_v38 = vadd.f32 1e-05, %v4461_v42 }
0x1019   :  { %11642 = vrsqrt.f32 %v4465_v38  ;;  %v11075_v38 = vld [vmem:[%s15189_s4 + $0x61c] ss:$48 sps:$4 sm:$0xff]  }
0x101a   :  { %v11637_v17 = vpop.eup %11636 }
0x101b   :  { %v4470_v16 = vmul.f32 %v11637_v17, %v13601_v35  ;;  %v4471_v18 = vmul.f32 %v11637_v17, %v13604_v10  ;;  %v11070_v17 = vld [vmem:[%s15189_s4 + $0x610] ss:$48 sps:$4 sm:$0xff]  }
0x101d   :  { %v4489_v26 = vmul.f32 %v4482_v25, %v4470_v16  ;;  %v4490_v5 = vmul.f32 %v4486_v60, %v4471_v18  ;;  %v11081_v16 = vld [vmem:[%s15189_s4 + $0x5bc] ss:$48 sps:$4 sm:$0xff]   ;;  %v11076_v18 = vld [vmem:[%s15189_s4 + $0x5b0] ss:$48 sps:$4 sm:$0xff]  }
0x101e   :  { %v11639_v23 = vpop.eup %11638 }
0x101f   :  { %v4472_v52 = vmul.f32 %v11639_v23, %v13611_v39  ;;  %v4473_v30 = vmul.f32 %v11639_v23, %v13614_v54  ;;  %v4509_v9 = vadd.f32 %v4505_v4, %v4490_v5  ;;  %v4508_v10 = vadd.f32 %v4501_v3, %v4489_v26  ;;  %v11055_v39 = vld [vmem:[%s15189_s4 + $0x738] ss:$48 sps:$4 sm:$0xff]   ;;  %v11084_v23 = vld [vmem:[%s15189_s4 + $0x554] ss:$48 sps:$4 sm:$0xff]   ;;  %v11087_v26 = vld [vmem:[%s15189_s4 + $0x55c] ss:$48 sps:$4 sm:$0xff]  }
0x1020   :  { %v11082_v5 = vld [vmem:[%s15189_s4 + $0x550] ss:$48 sps:$4 sm:$0xff]  }
0x1021   :  { %v4491_v56 = vmul.f32 %v4482_v25, %v4472_v52  ;;  %v4492_v61 = vmul.f32 %v4486_v60, %v4473_v30  ;;  %v11093_v52 = vld [vmem:[%s15189_s4 + $0x4fc] ss:$48 sps:$4 sm:$0xff]   ;;  %v11088_v30 = vld [vmem:[%s15189_s4 + $0x4f0] ss:$48 sps:$4 sm:$0xff]  }
0x1022   :  { %v11641_v35 = vpop.eup %11640 }
0x1023   :  { %v4474_v8 = vmul.f32 %v11641_v35, %v13622_v43  ;;  %v4475_v11 = vmul.f32 %v11641_v35, %v13625_v14  ;;  %v4511_v63 = vadd.f32 %v4505_v4, %v4492_v61  ;;  %v4510_v57 = vadd.f32 %v4501_v3, %v4491_v56  ;;  %v11060_v43 = vld [vmem:[%s15189_s4 + $0x6d4] ss:$48 sps:$4 sm:$0xff]   ;;  %v11063_v14 = vld [vmem:[%s15189_s4 + $0x6dc] ss:$48 sps:$4 sm:$0xff]   ;;  %v11091_v56 = vld [vmem:[%s15189_s4 + $0x4f8] ss:$48 sps:$4 sm:$0xff]  }
0x1024   :  { %v11096_v61 = vld [vmem:[%s15189_s4 + $0x494] ss:$48 sps:$4 sm:$0xff]   ;;  %v11099_v35 = vld [vmem:[%s15189_s4 + $0x49c] ss:$48 sps:$4 sm:$0xff]  }
0x1025   :  { %v13750_v40 = vpack.c.bf16 %v4511_v63, %v4509_v9  ;;  %v13758_v54 = vpack.c.bf16 %v4510_v57, %v4508_v10  ;;  %v4493_v37 = vmul.f32 %v4482_v25, %v4474_v8  ;;  %v4494_v33 = vmul.f32 %v4486_v60, %v4475_v11  ;;  %v11094_v9 = vld [vmem:[%s15189_s4 + $0x490] ss:$48 sps:$4 sm:$0xff]   ;;  %v11097_v10 = vld [vmem:[%s15189_s4 + $0x498] ss:$48 sps:$4 sm:$0xff]   ;;  %v11102_v8 = vld [vmem:[%s15189_s4 + $0x8b4] ss:$48 sps:$4 sm:$0xff]  }
0x1026   :  { %v11643_v24 = vpop.eup %11642  ;;  %v11105_v11 = vld [vmem:[%s15189_s4 + $0x8bc] ss:$48 sps:$4 sm:$0xff]   ;;  %v11100_v63 = vld [vmem:[%s15189_s4 + $0x8b0] ss:$48 sps:$4 sm:$0xff]   ;;  %v11103_v57 = vld [vmem:[%s15189_s4 + $0x8b8] ss:$48 sps:$4 sm:$0xff]  }
0x1027   :  { %v4476_v46 = vmul.f32 %v11643_v24, %v13633_v53  ;;  %v4477_v34 = vmul.f32 %v11643_v24, %v13636_v31  ;;  %9713 = vmatprep.mubr.msk.bf16.mxu0 %vm91_vm0, %v13750_v40  ;;  %9715 = vmatprep.mubr.msk.bf16.mxu1 %vm91_vm0, %v13750_v40  ;;  %v11058_v53 = vld [vmem:[%s15189_s4 + $0x6d0] ss:$48 sps:$4 sm:$0xff]   ;;  %v11061_v31 = vld [vmem:[%s15189_s4 + $0x6d8] ss:$48 sps:$4 sm:$0xff]   ;;  %v4513_v22 = vadd.f32 %v4505_v4, %v4494_v33 }
0x1028   :  { %5489 = vmatmul.mubr.bf16.vlgmr.msra.gmra.mxu0 %v13758_v54  ;;  %5542 = vmatmul.mubr.bf16.vlgmr.msra.gmra.mxu1 %v13758_v54  ;;  %v4512_v51 = vadd.f32 %v4501_v3, %v4493_v37  ;;  %v11106_v24 = vld [vmem:[%s15189_s4 + $0x850] ss:$48 sps:$4 sm:$0xff]   ;;  %v11109_v37 = vld [vmem:[%s15189_s4 + $0x858] ss:$48 sps:$4 sm:$0xff]  }
0x1029   :  { %v4495_v36 = vmul.f32 %v4482_v25, %v4476_v46  ;;  %v4496_v58 = vmul.f32 %v4486_v60, %v4477_v34  ;;  %5563 = vmatpush1.bf16.msra.mxu0 %v11052_v50  ;;  %5616 = vmatpush1.bf16.msra.mxu1 %v11055_v39  ;;  %v11073_v25 = vld [vmem:[%s15189_s4 + $0x618] ss:$48 sps:$4 sm:$0xff]   ;;  %v11078_v60 = vld [vmem:[%s15189_s4 + $0x5b4] ss:$48 sps:$4 sm:$0xff]   ;;  %v11111_v39 = vld [vmem:[%s15189_s4 + $0x85c] ss:$48 sps:$4 sm:$0xff]  }
0x102a   :  { %5564 = vmatprep.subr.bf16.mxu0 %v11060_v43  ;;  %5617 = vmatprep.subr.bf16.mxu1 %v11063_v14  ;;  %v11108_v50 = vld [vmem:[%s15189_s4 + $0x854] ss:$48 sps:$4 sm:$0xff]   ;;  %v11117_v14 = vld [vmem:[%s15189_s4 + $0x7fc] ss:$48 sps:$4 sm:$0xff]   ;;  %v11112_v33 = vld [vmem:[%s15189_s4 + $0x7f0] ss:$48 sps:$4 sm:$0xff]  }
0x102b   :  { %v4515_v49 = vadd.f32 %v4505_v4, %v4496_v58  ;;  %v4514_v44 = vadd.f32 %v4501_v3, %v4495_v36  ;;  %v11085_v4 = vld [vmem:[%s15189_s4 + $0x558] ss:$48 sps:$4 sm:$0xff]   ;;  %v11090_v3 = vld [vmem:[%s15189_s4 + $0x4f4] ss:$48 sps:$4 sm:$0xff]   ;;  %v11123_v36 = vld [vmem:[%s15189_s4 + $0x79c] ss:$48 sps:$4 sm:$0xff]  }
0x102c   :  { %v11114_v43 = vld [vmem:[%s15189_s4 + $0x7f4] ss:$48 sps:$4 sm:$0xff]   ;;  %v11115_v46 = vld [vmem:[%s15189_s4 + $0x7f8] ss:$48 sps:$4 sm:$0xff]   ;;  %v11118_v58 = vld [vmem:[%s15189_s4 + $0x790] ss:$48 sps:$4 sm:$0xff]  }
0x102d   :  { %5565 = vmatpush1.bf16.msra.mxu0 %v11058_v53  ;;  %5618 = vmatpush1.bf16.msra.mxu1 %v11061_v31  ;;  %v13786_v27 = vpack.c.bf16 %v4515_v49, %v4513_v22  ;;  %v13794_v42 = vpack.c.bf16 %v4514_v44, %v4512_v51  ;;  %v11120_v34 = vld [vmem:[%s15189_s4 + $0x794] ss:$48 sps:$4 sm:$0xff]   ;;  %v11121_v53 = vld [vmem:[%s15189_s4 + $0x798] ss:$48 sps:$4 sm:$0xff]   ;;  %v11135_v51 = vld [vmem:[%s15189_s4 + $0x6ec] ss:$48 sps:$4 sm:$0xff]  }
0x102e   :  { %5566 = vmatprep.subr.bf16.mxu0 %v11066_v48  ;;  %5619 = vmatprep.subr.bf16.mxu1 %v11069_v32  ;;  %v11126_v31 = vld [vmem:[%s15189_s4 + $0x744] ss:$48 sps:$4 sm:$0xff]   ;;  %v11129_v48 = vld [vmem:[%s15189_s4 + $0x74c] ss:$48 sps:$4 sm:$0xff]   ;;  %v11124_v32 = vld [vmem:[%s15189_s4 + $0x740] ss:$48 sps:$4 sm:$0xff]  }
0x102f   :  { %9714 = vmatprep.mubr.msk.bf16.mxu0 %vm91_vm0, %v13786_v27  ;;  %9716 = vmatprep.mubr.msk.bf16.mxu1 %vm91_vm0, %v13786_v27  ;;  %v11127_v22 = vld [vmem:[%s15189_s4 + $0x748] ss:$48 sps:$4 sm:$0xff]   ;;  %v11132_v49 = vld [vmem:[%s15189_s4 + $0x6e4] ss:$48 sps:$4 sm:$0xff]   ;;  %v11130_v44 = vld [vmem:[%s15189_s4 + $0x6e0] ss:$48 sps:$4 sm:$0xff]  }
0x1030   :  { %5499 = vmatmul.mubr.bf16.gmra.mxu0 %v13794_v42  ;;  %5552 = vmatmul.mubr.bf16.gmra.mxu1 %v13794_v42 }
0x1031   :  { %5567 = vmatpush1.bf16.msra.mxu0 %v11064_v6  ;;  %5620 = vmatpush1.bf16.msra.mxu1 %v11067_v28  ;;  %v11133_v6 = vld [vmem:[%s15189_s4 + $0x6e8] ss:$48 sps:$4 sm:$0xff]   ;;  %v11138_v28 = vld [vmem:[%s15189_s4 + $0x684] ss:$48 sps:$4 sm:$0xff]  }
0x1032   :  { %9717 = vmatprep.mubr.msk.bf16.mxu0 %vm91_vm0, %v13750_v40  ;;  %9719 = vmatprep.mubr.msk.bf16.mxu1 %vm91_vm0, %v13750_v40 }
0x1033   :  { %5568 = vmatprep.subr.bf16.mxu0 %v11072_v0  ;;  %5621 = vmatprep.subr.bf16.mxu1 %v11075_v38  ;;  %v11141_v0 = vld [vmem:[%s15189_s4 + $0x68c] ss:$48 sps:$4 sm:$0xff]   ;;  %v11136_v38 = vld [vmem:[%s15189_s4 + $0x680] ss:$48 sps:$4 sm:$0xff]  }
0x1035   :  { %5569 = vmatpush1.bf16.msra.mxu0 %v11070_v17  ;;  %5622 = vmatpush1.bf16.msra.mxu1 %v11073_v25  ;;  %v11139_v17 = vld [vmem:[%s15189_s4 + $0x688] ss:$48 sps:$4 sm:$0xff]   ;;  %v11144_v25 = vld [vmem:[%s15189_s4 + $0x624] ss:$48 sps:$4 sm:$0xff]  }
0x1036   :  { %5570 = vmatprep.subr.bf16.mxu0 %v11078_v60  ;;  %5623 = vmatprep.subr.bf16.mxu1 %v11081_v16  ;;  %v11147_v60 = vld [vmem:[%s15189_s4 + $0x62c] ss:$48 sps:$4 sm:$0xff]   ;;  %v11142_v16 = vld [vmem:[%s15189_s4 + $0x620] ss:$48 sps:$4 sm:$0xff]  }
0x1039   :  { %5571 = vmatpush1.bf16.msra.mxu0 %v11076_v18  ;;  %5624 = vmatpush1.bf16.msra.mxu1 %v11079_v20  ;;  %v11145_v18 = vld [vmem:[%s15189_s4 + $0x628] ss:$48 sps:$4 sm:$0xff]   ;;  %v11150_v20 = vld [vmem:[%s15189_s4 + $0x5c4] ss:$48 sps:$4 sm:$0xff]  }
0x103a   :  { %5572 = vmatprep.subr.bf16.mxu0 %v11084_v23  ;;  %5625 = vmatprep.subr.bf16.mxu1 %v11087_v26  ;;  %v11148_v23 = vld [vmem:[%s15189_s4 + $0x5c0] ss:$48 sps:$4 sm:$0xff]   ;;  %v11151_v26 = vld [vmem:[%s15189_s4 + $0x5c8] ss:$48 sps:$4 sm:$0xff]  }
0x103d   :  { %5573 = vmatpush1.bf16.msra.mxu0 %v11082_v5  ;;  %5626 = vmatpush1.bf16.msra.mxu1 %v11085_v4  ;;  %v11156_v5 = vld [vmem:[%s15189_s4 + $0x564] ss:$48 sps:$4 sm:$0xff]   ;;  %v11159_v4 = vld [vmem:[%s15189_s4 + $0x56c] ss:$48 sps:$4 sm:$0xff]  }
0x103e   :  { %5574 = vmatprep.subr.bf16.mxu0 %v11090_v3  ;;  %5627 = vmatprep.subr.bf16.mxu1 %v11093_v52  ;;  %v11154_v3 = vld [vmem:[%s15189_s4 + $0x560] ss:$48 sps:$4 sm:$0xff]   ;;  %v11157_v52 = vld [vmem:[%s15189_s4 + $0x568] ss:$48 sps:$4 sm:$0xff]  }
0x1041   :  { %5575 = vmatpush1.bf16.msra.mxu0 %v11088_v30  ;;  %5628 = vmatpush1.bf16.msra.mxu1 %v11091_v56  ;;  %v11162_v30 = vld [vmem:[%s15189_s4 + $0x504] ss:$48 sps:$4 sm:$0xff]   ;;  %v11165_v56 = vld [vmem:[%s15189_s4 + $0x50c] ss:$48 sps:$4 sm:$0xff]  }
0x1042   :  { %5576 = vmatprep.subr.bf16.mxu0 %v11096_v61  ;;  %5629 = vmatprep.subr.bf16.mxu1 %v11099_v35  ;;  %v11160_v61 = vld [vmem:[%s15189_s4 + $0x500] ss:$48 sps:$4 sm:$0xff]   ;;  %v11163_v35 = vld [vmem:[%s15189_s4 + $0x508] ss:$48 sps:$4 sm:$0xff]  }
0x1045   :  { %5577 = vmatpush1.bf16.msra.mxu0 %v11094_v9  ;;  %5630 = vmatpush1.bf16.msra.mxu1 %v11097_v10  ;;  %v11168_v9 = vld [vmem:[%s15189_s4 + $0x4a4] ss:$48 sps:$4 sm:$0xff]   ;;  %v11171_v10 = vld [vmem:[%s15189_s4 + $0x4ac] ss:$48 sps:$4 sm:$0xff]  }
0x1046   :  { %5586 = vmatprep.subr.bf16.mxu0 %v11102_v8  ;;  %5639 = vmatprep.subr.bf16.mxu1 %v11105_v11  ;;  %v11166_v8 = vld [vmem:[%s15189_s4 + $0x4a0] ss:$48 sps:$4 sm:$0xff]   ;;  %v11169_v11 = vld [vmem:[%s15189_s4 + $0x4a8] ss:$48 sps:$4 sm:$0xff]  }
0x1049   :  { %5587 = vmatpush2.bf16.msra.mxu0 %v11100_v63  ;;  %5640 = vmatpush2.bf16.msra.mxu1 %v11103_v57  ;;  %v11174_v63 = vld [vmem:[%s15189_s4 + $0x8c4] ss:$48 sps:$4 sm:$0xff]   ;;  %v11177_v57 = vld [vmem:[%s15189_s4 + $0x8cc] ss:$48 sps:$4 sm:$0xff]  }
0x104a   :  { %5588 = vmatprep.subr.bf16.mxu0 %v11108_v50  ;;  %5641 = vmatprep.subr.bf16.mxu1 %v11111_v39  ;;  %v11172_v50 = vld [vmem:[%s15189_s4 + $0x8c0] ss:$48 sps:$4 sm:$0xff]   ;;  %v11175_v39 = vld [vmem:[%s15189_s4 + $0x8c8] ss:$48 sps:$4 sm:$0xff]  }
0x104d   :  { %5589 = vmatpush2.bf16.msra.mxu0 %v11106_v24  ;;  %5642 = vmatpush2.bf16.msra.mxu1 %v11109_v37  ;;  %v11180_v24 = vld [vmem:[%s15189_s4 + $0x864] ss:$48 sps:$4 sm:$0xff]   ;;  %v11183_v37 = vld [vmem:[%s15189_s4 + $0x86c] ss:$48 sps:$4 sm:$0xff]  }
0x104e   :  { %5590 = vmatprep.subr.bf16.mxu0 %v11114_v43  ;;  %5643 = vmatprep.subr.bf16.mxu1 %v11117_v14  ;;  %v11178_v43 = vld [vmem:[%s15189_s4 + $0x860] ss:$48 sps:$4 sm:$0xff]   ;;  %v11181_v14 = vld [vmem:[%s15189_s4 + $0x868] ss:$48 sps:$4 sm:$0xff]  }
0x1051   :  { %5591 = vmatpush2.bf16.msra.mxu0 %v11112_v33  ;;  %5644 = vmatpush2.bf16.msra.mxu1 %v11115_v46  ;;  %v11186_v33 = vld [vmem:[%s15189_s4 + $0x804] ss:$48 sps:$4 sm:$0xff]   ;;  %v11189_v46 = vld [vmem:[%s15189_s4 + $0x80c] ss:$48 sps:$4 sm:$0xff]  }
0x1052   :  { %5592 = vmatprep.subr.bf16.mxu0 %v11120_v34  ;;  %5645 = vmatprep.subr.bf16.mxu1 %v11123_v36  ;;  %v11184_v34 = vld [vmem:[%s15189_s4 + $0x800] ss:$48 sps:$4 sm:$0xff]   ;;  %v11187_v36 = vld [vmem:[%s15189_s4 + $0x808] ss:$48 sps:$4 sm:$0xff]  }
0x1055   :  { %5593 = vmatpush2.bf16.msra.mxu0 %v11118_v58  ;;  %5646 = vmatpush2.bf16.msra.mxu1 %v11121_v53  ;;  %v11192_v58 = vld [vmem:[%s15189_s4 + $0x7a4] ss:$48 sps:$4 sm:$0xff]   ;;  %v11195_v53 = vld [vmem:[%s15189_s4 + $0x7ac] ss:$48 sps:$4 sm:$0xff]  }
0x1056   :  { %5668 = vmatprep.subr.bf16.mxu0 %v11126_v31  ;;  %5721 = vmatprep.subr.bf16.mxu1 %v11129_v48  ;;  %v11190_v31 = vld [vmem:[%s15189_s4 + $0x7a0] ss:$48 sps:$4 sm:$0xff]   ;;  %v11193_v48 = vld [vmem:[%s15189_s4 + $0x7a8] ss:$48 sps:$4 sm:$0xff]  }
0x1058   :  { %5595 = vmatmul.mubr.bf16.vlgmr.msra.gmra.mxu0 %v13758_v54  ;;  %5648 = vmatmul.mubr.bf16.vlgmr.msra.gmra.mxu1 %v13758_v54 }
0x1059   :  { %9718 = vmatprep.mubr.msk.bf16.mxu0 %vm91_vm0, %v13786_v27  ;;  %9720 = vmatprep.mubr.msk.bf16.mxu1 %vm91_vm0, %v13786_v27 }
0x105a   :  { %5669 = vmatpush1.bf16.msra.mxu0 %v11124_v32  ;;  %5722 = vmatpush1.bf16.msra.mxu1 %v11127_v22 }
0x105b   :  { %5670 = vmatprep.subr.bf16.mxu0 %v11132_v49  ;;  %5723 = vmatprep.subr.bf16.mxu1 %v11135_v51 }
0x105e   :  { %5671 = vmatpush1.bf16.msra.mxu0 %v11130_v44  ;;  %5724 = vmatpush1.bf16.msra.mxu1 %v11133_v6 }
0x105f   :  { %5672 = vmatprep.subr.bf16.mxu0 %v11138_v28  ;;  %5725 = vmatprep.subr.bf16.mxu1 %v11141_v0 }
0x1060   :  { %5605 = vmatmul.mubr.bf16.gmra.mxu0 %v13794_v42  ;;  %5658 = vmatmul.mubr.bf16.gmra.mxu1 %v13794_v42 }
0x1061   :  { %9721 = vmatprep.mubr.msk.bf16.mxu0 %vm91_vm0, %v13750_v40  ;;  %9723 = vmatprep.mubr.msk.bf16.mxu1 %vm91_vm0, %v13750_v40  ;;  %v11153_v40 = vld [vmem:[%s15189_s4 + $0x5cc] ss:$48 sps:$4 sm:$0xff]  }
0x1062   :  { %5673 = vmatpush1.bf16.msra.mxu0 %v11136_v38  ;;  %5726 = vmatpush1.bf16.msra.mxu1 %v11139_v17 }
0x1063   :  { %5674 = vmatprep.subr.bf16.mxu0 %v11144_v25  ;;  %5727 = vmatprep.subr.bf16.mxu1 %v11147_v60 }
0x1066   :  { %5675 = vmatpush1.bf16.msra.mxu0 %v11142_v16  ;;  %5728 = vmatpush1.bf16.msra.mxu1 %v11145_v18 }
0x1067   :  { %5676 = vmatprep.subr.bf16.mxu0 %v11150_v20  ;;  %5729 = vmatprep.subr.bf16.mxu1 %v11153_v40 }
0x106a   :  { %5677 = vmatpush1.bf16.msra.mxu0 %v11148_v23  ;;  %5730 = vmatpush1.bf16.msra.mxu1 %v11151_v26 }
0x106b   :  { %5678 = vmatprep.subr.bf16.mxu0 %v11156_v5  ;;  %5731 = vmatprep.subr.bf16.mxu1 %v11159_v4 }
0x106e   :  { %5679 = vmatpush1.bf16.msra.mxu0 %v11154_v3  ;;  %5732 = vmatpush1.bf16.msra.mxu1 %v11157_v52 }
0x106f   :  { %5680 = vmatprep.subr.bf16.mxu0 %v11162_v30  ;;  %5733 = vmatprep.subr.bf16.mxu1 %v11165_v56 }
0x1072   :  { %5681 = vmatpush1.bf16.msra.mxu0 %v11160_v61  ;;  %5734 = vmatpush1.bf16.msra.mxu1 %v11163_v35 }
0x1073   :  { %5682 = vmatprep.subr.bf16.mxu0 %v11168_v9  ;;  %5735 = vmatprep.subr.bf16.mxu1 %v11171_v10 }
0x1076   :  { %5683 = vmatpush1.bf16.msra.mxu0 %v11166_v8  ;;  %5736 = vmatpush1.bf16.msra.mxu1 %v11169_v11 }
0x1077   :  { %5692 = vmatprep.subr.bf16.mxu0 %v11174_v63  ;;  %5745 = vmatprep.subr.bf16.mxu1 %v11177_v57 }
0x107a   :  { %5693 = vmatpush2.bf16.msra.mxu0 %v11172_v50  ;;  %5746 = vmatpush2.bf16.msra.mxu1 %v11175_v39 }
0x107b   :  { %5694 = vmatprep.subr.bf16.mxu0 %v11180_v24  ;;  %5747 = vmatprep.subr.bf16.mxu1 %v11183_v37 }
0x107e   :  { %5695 = vmatpush2.bf16.msra.mxu0 %v11178_v43  ;;  %5748 = vmatpush2.bf16.msra.mxu1 %v11181_v14 }
0x107f   :  { %5696 = vmatprep.subr.bf16.mxu0 %v11186_v33  ;;  %5749 = vmatprep.subr.bf16.mxu1 %v11189_v46  ;;  %v15272_v33 = vld [vmem:[#allocation11_spill] sm:$0xff] }
0x1080   :  { %v15273_v46 = vsub.s32 6, %v15272_v33 }
0x1082   :  { %5697 = vmatpush2.bf16.msra.mxu0 %v11184_v34  ;;  %5750 = vmatpush2.bf16.msra.mxu1 %v11187_v36 }
0x1083   :  { %5698 = vmatprep.subr.bf16.mxu0 %v11192_v58  ;;  %5751 = vmatprep.subr.bf16.mxu1 %v11195_v53  ;;  %v15274_v53 = vsub.s32 7, %v15272_v33 }
0x1086   :  { %5699 = vmatpush2.bf16.msra.mxu0 %v11190_v31  ;;  %5752 = vmatpush2.bf16.msra.mxu1 %v11193_v48 }
0x1087   :  { %10311 = vmatprep.subr.bf16.mxu0 %v15247_v45  ;;  %10329 = vmatprep.subr.bf16.mxu1 %v15247_v45 }
0x1089   :  { %5701 = vmatmul.mubr.bf16.vlgmr.msra.gmra.mxu0 %v13758_v54  ;;  %5754 = vmatmul.mubr.bf16.vlgmr.msra.gmra.mxu1 %v13758_v54  ;;  %v9567_v54 = vld [vmem:[%s15190_s5 + $0xc] sm:$0xff] }
0x108a   :  { %9722 = vmatprep.mubr.msk.bf16.mxu0 %vm91_vm0, %v13786_v27  ;;  %9724 = vmatprep.mubr.msk.bf16.mxu1 %vm91_vm0, %v13786_v27  ;;  %v4681_v49 = vrot.slane %v9567_v54, %v15265_v21  ;;  %v4677_v27 = vrot.slane %v9567_v54, %v12117_v12  ;;  %v4689_v14 = vrot.slane %v9567_v54, %v15267_v62 }
0x108b   :  { %v4697_v34 = vrot.slane %v9567_v54, %v15273_v46  ;;  %v4693_v36 = vrot.slane %v9567_v54, %v15266_v59  ;;  %v4701_v31 = vrot.slane %v9567_v54, %v15274_v53 }
0x1091   :  { %5711 = vmatmul.mubr.bf16.gmra.mxu0 %v13794_v42  ;;  %5764 = vmatmul.mubr.bf16.gmra.mxu1 %v13794_v42  ;;  %v4685_v42 = vrot.slane %v9567_v54, %v15264_v47 }
0x1092   :  { %10313 = vmatprep.mubr.msk.bf16.mxu0 %vm11774_vm1, %v15247_v45  ;;  %10331 = vmatprep.mubr.msk.bf16.mxu1 %vm11774_vm1, %v15247_v45 }
0x10e8   :  { %v14087_v32 = vpop.f32.mrf.mxu0  ;;  %v5543_v22 = vpop.f32.mrf.mxu1 }
0x10e9   :  { %v14092_v0 = vadd.f32 %v5543_v22, %v4681_v49 }
0x10ea   :  { %v5492_v51 = vpop.f32.mrf.mxu0  ;;  %v5545_v44 = vpop.f32.mrf.mxu1 }
0x10eb   :  { %v14096_v17 = vadd.f32 %v5492_v51, %v4677_v27  ;;  %v14098_v16 = vadd.f32 %v5545_v44, %v4685_v42 }
0x10ec   :  { %v5494_v6 = vpop.f32.mrf.mxu0  ;;  %v5547_v28 = vpop.f32.mrf.mxu1 }
0x10ed   :  { %v14094_v38 = vadd.f32 %v5547_v28, %v4681_v49 }
0x10ee   :  { %v5496_v25 = vpop.f32.mrf.mxu0  ;;  %v5549_v60 = vpop.f32.mrf.mxu1 }
0x10ef   :  { %v14102_v20 = vadd.f32 %v5496_v25, %v4677_v27  ;;  %v14104_v40 = vadd.f32 %v5549_v60, %v4685_v42 }
0x10f0   :  { %v14106_v23 = vpop.f32.mrf.mxu0  ;;  %v5553_v26 = vpop.f32.mrf.mxu1 }
0x10f1   :  { %v14114_v61 = vadd.f32 %v5553_v26, %v4681_v49 }
0x10f2   :  { %v5502_v3 = vpop.f32.mrf.mxu0  ;;  %v5555_v52 = vpop.f32.mrf.mxu1 }
0x10f3   :  { %v14118_v9 = vadd.f32 %v5502_v3, %v4677_v27  ;;  %v14120_v11 = vadd.f32 %v5555_v52, %v4685_v42 }
0x10f4   :  { %v14112_v30 = vpop.f32.mrf.mxu0  ;;  %v5557_v56 = vpop.f32.mrf.mxu1 }
0x10f5   :  { %v14116_v35 = vadd.f32 %v5557_v56, %v4681_v49 }
0x10f6   :  { %v5506_v10 = vpop.f32.mrf.mxu0  ;;  %v5559_v8 = vpop.f32.mrf.mxu1 }
0x10f7   :  { %v14124_v57 = vadd.f32 %v5506_v10, %v4677_v27  ;;  %v14126_v50 = vadd.f32 %v5559_v8, %v4685_v42  ;;  %v4673_v8 = vrot.slane %v9567_v54, %v12114_v7 }
0x1118   :  { %v5596_v37 = vpop.f32.mrf.mxu0  ;;  %v5649_v43 = vpop.f32.mrf.mxu1 }
0x1119   :  { %v5597_v27 = vadd.f32 %v5596_v37, %v4689_v14  ;;  %v14138_v51 = vadd.f32 %v5649_v43, %v4697_v34 }
0x111a   :  { %v5598_v58 = vpop.f32.mrf.mxu0  ;;  %v5651_v48 = vpop.f32.mrf.mxu1 }
0x111b   :  { %v14142_v28 = vadd.f32 %v5598_v58, %v4693_v36  ;;  %v14144_v25 = vadd.f32 %v5651_v48, %v4701_v31  ;;  %v5495_v58 = vadd.f32 %v5494_v6, %v4673_v8 }
0x111c   :  { %v5600_v22 = vpop.f32.mrf.mxu0  ;;  %v5653_v49 = vpop.f32.mrf.mxu1 }
0x111d   :  { %v5601_v44 = vadd.f32 %v5600_v22, %v4689_v14  ;;  %v14140_v42 = vadd.f32 %v5653_v49, %v4697_v34  ;;  %v5491_v22 = vadd.f32 %v14087_v32, %v4673_v8 }
0x111e   :  { %v5602_v60 = vpop.f32.mrf.mxu0  ;;  %v5655_v26 = vpop.f32.mrf.mxu1 }
0x111f   :  { %v5778_v3 = vpack.c.bf16 %v5601_v44, %v5597_v27  ;;  %v14148_v56 = vadd.f32 %v5602_v60, %v4693_v36  ;;  %v14150_v10 = vadd.f32 %v5655_v26, %v4701_v31  ;;  %v5774_v24 = vpack.c.bf16 %v5495_v58, %v5491_v22 }
0x1120   :  { %v5606_v37 = vpop.f32.mrf.mxu0  ;;  %v5659_v43 = vpop.f32.mrf.mxu1 }
0x1121   :  { %10312 = vmatpush3.bf16.xpose.msra.mxu0 %v5778_v3  ;;  %v5607_v44 = vadd.f32 %v5606_v37, %v4689_v14  ;;  %v14159_v54 = vadd.f32 %v5659_v43, %v4697_v34  ;;  %v5505_v37 = vadd.f32 %v14112_v30, %v4673_v8 }
0x1122   :  { %v5608_v53 = vpop.f32.mrf.mxu0  ;;  %v5661_v48 = vpop.f32.mrf.mxu1  ;;  %10317 = vmatprep.subr.bf16.mxu0 %v15247_v45 }
0x1123   :  { %v14163_v4 = vadd.f32 %v5608_v53, %v4693_v36  ;;  %v14165_v46 = vadd.f32 %v5661_v48, %v4701_v31 }
0x1124   :  { %v5610_v49 = vpop.f32.mrf.mxu0  ;;  %v5663_v27 = vpop.f32.mrf.mxu1 }
0x1125   :  { %v5611_v60 = vadd.f32 %v5610_v49, %v4689_v14  ;;  %v14161_v26 = vadd.f32 %v5663_v27, %v4697_v34 }
0x1126   :  { %v5612_v6 = vpop.f32.mrf.mxu0  ;;  %v5665_v3 = vpop.f32.mrf.mxu1 }
0x1127   :  { %v5790_v63 = vpack.c.bf16 %v5611_v60, %v5607_v44  ;;  %v14169_v32 = vadd.f32 %v5612_v6, %v4693_v36  ;;  %v14171_v52 = vadd.f32 %v5665_v3, %v4701_v31  ;;  %v5501_v36 = vadd.f32 %v14106_v23, %v4673_v8 }
0x1128   :  { %10314 = vmatmul.mubr.bf16.vlgmr.msra.gmra.mxu0 %v5774_v24  ;;  %v9568_v24 = vld [vmem:[%s15190_s5 + $0x14] sm:$0xf] }
0x1129   :  { %10318 = vmatpush3.bf16.xpose.msra.mxu0 %v5790_v63  ;;  %10319 = vmatprep.mubr.msk.bf16.mxu0 %vm11774_vm1, %v15247_v45  ;;  %v5786_v43 = vpack.c.bf16 %v5505_v37, %v5501_v36  ;;  %v4713_v63 = vrot.slane %v9568_v24, %v15265_v21  ;;  %v4709_v31 = vrot.slane %v9568_v24, %v12117_v12 }
0x112a   :  { %10323 = vmatprep.subr.bf16.mxu0 %v15247_v45  ;;  %v4717_v58 = vrot.slane %v9568_v24, %v15264_v47  ;;  %v4705_v48 = vrot.slane %v9568_v24, %v12114_v7 }
0x1130   :  { %10320 = vmatmul.mubr.bf16.vlgmr.msra.gmra.mxu0 %v5786_v43 }
0x1131   :  { %10325 = vmatprep.mubr.msk.bf16.mxu0 %vm11774_vm1, %v15247_v45 }
0x1149   :  { %v5702_v30 = vpop.f32.mrf.mxu0  ;;  %v5755_v53 = vpop.f32.mrf.mxu1 }
0x114a   :  { %v14191_v23 = vadd.f32 %v5755_v53, %v4713_v63  ;;  %v5703_v6 = vadd.f32 %v5702_v30, %v4705_v48 }
0x114b   :  { %v5704_v8 = vpop.f32.mrf.mxu0  ;;  %v5757_v22 = vpop.f32.mrf.mxu1 }
0x114c   :  { %v14193_v49 = vadd.f32 %v5704_v8, %v4709_v31  ;;  %v14195_v27 = vadd.f32 %v5757_v22, %v4717_v58 }
0x114d   :  { %v5706_v44 = vpop.f32.mrf.mxu0  ;;  %v5759_v60 = vpop.f32.mrf.mxu1 }
0x114e   :  { %v5707_v3 = vadd.f32 %v5706_v44, %v4705_v48  ;;  %v14197_v37 = vadd.f32 %v5759_v60, %v4713_v63 }
0x114f   :  { %v5708_v36 = vpop.f32.mrf.mxu0  ;;  %v5761_v43 = vpop.f32.mrf.mxu1 }
0x1150   :  { %v5782_v34 = vpack.c.bf16 %v5707_v3, %v5703_v6  ;;  %v14201_v53 = vadd.f32 %v5708_v36, %v4709_v31  ;;  %v14203_v18 = vadd.f32 %v5761_v43, %v4717_v58 }
0x1151   :  { %v5712_v8 = vpop.f32.mrf.mxu0  ;;  %v5765_v39 = vpop.f32.mrf.mxu1 }
0x1152   :  { %v14209_v44 = vadd.f32 %v5765_v39, %v4713_v63  ;;  %10324 = vmatpush3.bf16.msra.mxu0 %v5782_v34  ;;  %v5713_v14 = vadd.f32 %v5712_v8, %v4705_v48 }
0x1153   :  { %v5714_v60 = vpop.f32.mrf.mxu0  ;;  %v5767_v6 = vpop.f32.mrf.mxu1  ;;  %10335 = vmatprep.subr.bf16.mxu0 %v15247_v45 }
0x1154   :  { %v14212_v3 = vadd.f32 %v5714_v60, %v4709_v31  ;;  %v14214_v36 = vadd.f32 %v5767_v6, %v4717_v58 }
0x1155   :  { %v5716_v43 = vpop.f32.mrf.mxu0  ;;  %v5769_v24 = vpop.f32.mrf.mxu1 }
0x1156   :  { %v5717_v5 = vadd.f32 %v5716_v43, %v4705_v48  ;;  %v14216_v33 = vadd.f32 %v5769_v24, %v4713_v63  ;;  %v14239_v48 = vld [vmem:[%s15245_s21 + $0x8] sm:$0xff] }
0x1157   :  { %v5718_v22 = vpop.f32.mrf.mxu0  ;;  %v5771_v62 = vpop.f32.mrf.mxu1 }
0x1158   :  { %v5794_v30 = vpack.c.bf16 %v5717_v5, %v5713_v14  ;;  %v14220_v34 = vadd.f32 %v5718_v22, %v4709_v31  ;;  %v14222_v59 = vadd.f32 %v5771_v62, %v4717_v58  ;;  %v14232_v5 = vld [vmem:[%s15245_s21] sm:$0xff] }
0x115a   :  { %10330 = vmatpush3.bf16.msra.mxu1 %v5794_v30 }
0x115b   :  { %10341 = vmatprep.subr.bf16.mxu1 %v15247_v45 }
0x11e8   :  { %v5832_v63 = vpop.f32.mrf.mxu0 }
0x11e9   :  { %v5833_v14 = vadd.f32 %v14232_v5, %v5832_v63 }
0x11ea   :  { %v10315_v31 = vpop.f32.mrf.mxu0 }
0x11eb   :  { %v5880_v62 = vsel %vm1565_vm2, %v5833_v14, -inf }
0x11ec   :  { %5881 = vmax.xlane.f32.xlu0 %v5880_v62  ;;  %v5835_v58 = vpop.f32.mrf.mxu0 }
0x11ed   :  { %v5836_v24 = vadd.f32 %v14239_v48, %v5835_v58 }
0x11ee   :  { %v10316_v8 = vpop.f32.mrf.mxu0 }
0x11ef   :  { %v5883_v22 = vsel %vm1565_vm2, %v5836_v24, -inf }
0x11f0   :  { %5884 = vmax.xlane.f32.xlu1 %v5883_v22  ;;  %v5873_v30 = vpop.f32.mrf.mxu0 }
0x11f1   :  { %v5874_v43 = vadd.f32 %v14232_v5, %v5873_v30 }
0x11f2   :  { %v10321_v63 = vpop.f32.mrf.mxu0 }
0x11f3   :  { %v5886_v31 = vsel %vm1565_vm2, %v5874_v43, -inf }
0x11f4   :  { %5887 = vmax.xlane.f32.xlu0 %v5886_v31  ;;  %v5876_v62 = vpop.f32.mrf.mxu0 }
0x11f5   :  { %v5877_v6 = vadd.f32 %v14239_v48, %v5876_v62 }
0x11f6   :  { %v10322_v39 = vpop.f32.mrf.mxu0 }
0x11f7   :  { %v5889_v60 = vsel %vm1565_vm2, %v5877_v6, -inf }
0x11f8   :  { %5890 = vmax.xlane.f32.xlu1 %v5889_v60 }
0x1275   :  { %v5882_v21 = vpop.xlane.xlu0 %5881 }
0x1276   :  { %v5892_v58 = vsub.f32 %v5833_v14, %v5882_v21 }
0x1278   :  { %v5896_v8 = vmul.f32 1.442695, %v5892_v58 }
0x1279   :  { %v5885_v47 = vpop.xlane.xlu1 %5884 }
0x127a   :  { %11644 = vpow2.f32 %v5896_v8  ;;  %v5893_v22 = vsub.f32 %v5836_v24, %v5885_v47 }
0x127c   :  { %v5898_v41 = vmul.f32 1.442695, %v5893_v22 }
0x127d   :  { %v5888_v15 = vpop.xlane.xlu0 %5887 }
0x127e   :  { %11646 = vpow2.f32 %v5898_v41  ;;  %v5894_v30 = vsub.f32 %v5874_v43, %v5888_v15 }
0x1280   :  { %v5900_v63 = vmul.f32 1.442695, %v5894_v30 }
0x1281   :  { %v5891_v1 = vpop.xlane.xlu1 %5890 }
0x1282   :  { %11648 = vpow2.f32 %v5900_v63  ;;  %v5895_v31 = vsub.f32 %v5877_v6, %v5891_v1 }
0x1284   :  { %v5902_v19 = vmul.f32 1.442695, %v5895_v31  ;;  %v15275_v31 = vpack.c.bf16 %v14148_v56, %v14142_v28  ;;  %v15278_v28 = vpack.c.bf16 %v14201_v53, %v14193_v49 }
0x1286   :  { %11650 = vpow2.f32 %v5902_v19 }
0x1287   :  { %v11645_v39 = vpop.eup %11644 }
0x1288   :  { %v5904_v62 = vsel %vm1565_vm2, %v11645_v39, 0.0 }
0x1289   :  { %5905 = vadd.xlane.f32.xlu0 %v5904_v62 }
0x128b   :  { %v11647_v60 = vpop.eup %11646 }
0x128c   :  { %v5907_v21 = vsel %vm1565_vm2, %v11647_v60, 0.0 }
0x128d   :  { %5908 = vadd.xlane.f32.xlu1 %v5907_v21 }
0x128f   :  { %v11649_v14 = vpop.eup %11648 }
0x1290   :  { %v5910_v47 = vsel %vm1565_vm2, %v11649_v14, 0.0 }
0x1291   :  { %5911 = vadd.xlane.f32.xlu0 %v5910_v47 }
0x1293   :  { %v11651_v41 = vpop.eup %11650 }
0x1294   :  { %v5913_v15 = vsel %vm1565_vm2, %v11651_v41, 0.0 }
0x1295   :  { %5914 = vadd.xlane.f32.xlu1 %v5913_v15 }
0x1312   :  { %v5906_v24 = vpop.xlane.xlu0 %5905 }
0x1313   :  { %11652 = vrcp.f32 %v5906_v24 }
0x1316   :  { %v5909_v1 = vpop.xlane.xlu1 %5908 }
0x1317   :  { %11654 = vrcp.f32 %v5909_v1 }
0x131a   :  { %v5912_v19 = vpop.xlane.xlu0 %5911 }
0x131b   :  { %11656 = vrcp.f32 %v5912_v19 }
0x131e   :  { %v5915_v6 = vpop.xlane.xlu1 %5914 }
0x131f   :  { %11658 = vrcp.f32 %v5915_v6 }
0x1320   :  { %v11653_v43 = vpop.eup %11652 }
0x1321   :  { %v5920_v8 = vmul.f32 %v11653_v43, %v11645_v39  ;;  %v15276_v39 = vpack.c.bf16 %v14102_v20, %v14096_v17  ;;  %v15279_v17 = vpack.c.bf16 %v14124_v57, %v14118_v9  ;;  %v15280_v20 = vpack.c.bf16 %v14220_v34, %v14212_v3 }
0x1324   :  { %v11655_v58 = vpop.eup %11654 }
0x1325   :  { %v5921_v22 = vmul.f32 %v11655_v58, %v11647_v60  ;;  %v15277_v60 = vpack.c.bf16 %v14169_v32, %v14163_v4 }
0x1327   :  { %v5924_v30 = vpack.c.bf16 %v5921_v22, %v5920_v8 }
0x1328   :  { %v11657_v63 = vpop.eup %11656 }
0x1329   :  { %10326 = vmatmul.mubr.msk.bf16.vlgmr.msra.gmra.mxu0 %vm1565_vm2, %v5924_v30  ;;  %v5922_v21 = vmul.f32 %v11657_v63, %v11649_v14 }
0x132a   :  { %10336 = vmatpush3.bf16.xpose.msra.mxu0 %v15275_v31  ;;  %10337 = vmatprep.mubr.msk.bf16.mxu0 %vm11774_vm1, %v15247_v45 }
0x132b   :  { %10347 = vmatprep.subr.bf16.mxu0 %v15247_v45 }
0x132c   :  { %v11659_v62 = vpop.eup %11658 }
0x132d   :  { %v5923_v47 = vmul.f32 %v11659_v62, %v11651_v41 }
0x132f   :  { %v5925_v15 = vpack.c.bf16 %v5923_v47, %v5922_v21 }
0x1331   :  { %10332 = vmatmul.mubr.msk.bf16.vlgmr.msra.gmra.mxu1 %vm1565_vm2, %v5925_v15  ;;  %10338 = vmatmul.mubr.bf16.vlgmr.msra.gmra.mxu0 %v15276_v39 }
0x1332   :  { %10342 = vmatpush3.bf16.xpose.msra.mxu1 %v15277_v60  ;;  %10348 = vmatpush3.bf16.msra.mxu0 %v15278_v28 }
0x1333   :  { %10343 = vmatprep.mubr.msk.bf16.mxu1 %vm11774_vm1, %v15247_v45  ;;  %10353 = vmatprep.subr.bf16.mxu1 %v15247_v45 }
0x1334   :  { %10349 = vmatprep.mubr.msk.bf16.mxu0 %vm11774_vm1, %v15247_v45  ;;  %10359 = vmatprep.subr.bf16.mxu0 %v15247_v45 }
0x1339   :  { %10344 = vmatmul.mubr.bf16.vlgmr.msra.gmra.mxu1 %v15279_v17 }
0x133a   :  { %10354 = vmatpush3.bf16.msra.mxu1 %v15280_v20  ;;  %10355 = vmatprep.mubr.msk.bf16.mxu1 %vm11774_vm1, %v15247_v45 }
0x133b   :  { %10365 = vmatprep.subr.bf16.mxu1 %v15247_v45 }
0x13e9   :  { %v14283_v4 = vpop.f32.mrf.mxu0 }
0x13eb   :  { %v10327_v56 = vpop.f32.mrf.mxu0 }
0x13ed   :  { %v14285_v32 = vpop.f32.mrf.mxu0 }
0x13ee   :  { %v6014_v49 = vpack.c.bf16 %v14285_v32, %v14283_v4 }
0x13ef   :  { %v10328_v53 = vpop.f32.mrf.mxu0 }
0x13f1   :  { %v14289_v9 = vpop.f32.mrf.mxu1  ;;  %v6050_v57 = vpop.f32.mrf.mxu0 }
0x13f2   :  { %v6051_v3 = vadd.f32 %v14232_v5, %v6050_v57 }
0x13f3   :  { %v10333_v34 = vpop.f32.mrf.mxu1  ;;  %v10339_v14 = vpop.f32.mrf.mxu0 }
0x13f4   :  { %v6098_v41 = vsel %vm1565_vm2, %v6051_v3, -inf }
0x13f5   :  { %v14293_v24 = vpop.f32.mrf.mxu1  ;;  %6099 = vmax.xlane.f32.xlu0 %v6098_v41  ;;  %v6053_v1 = vpop.f32.mrf.mxu0 }
0x13f6   :  { %v6015_v19 = vpack.c.bf16 %v14293_v24, %v14289_v9  ;;  %v6054_v6 = vadd.f32 %v14239_v48, %v6053_v1 }
0x13f7   :  { %v10334_v43 = vpop.f32.mrf.mxu1  ;;  %v10340_v58 = vpop.f32.mrf.mxu0 }
0x13f8   :  { %v6101_v8 = vsel %vm1565_vm2, %v6054_v6, -inf }
0x13f9   :  { %v6091_v22 = vpop.f32.mrf.mxu1  ;;  %6102 = vmax.xlane.f32.xlu1 %v6101_v8 }
0x13fa   :  { %v6092_v30 = vadd.f32 %v14232_v5, %v6091_v22 }
0x13fb   :  { %v10345_v63 = vpop.f32.mrf.mxu1 }
0x13fc   :  { %v6104_v31 = vsel %vm1565_vm2, %v6092_v30, -inf }
0x13fd   :  { %v6094_v62 = vpop.f32.mrf.mxu1  ;;  %6105 = vmax.xlane.f32.xlu0 %v6104_v31 }
0x13fe   :  { %v6095_v21 = vadd.f32 %v14239_v48, %v6094_v62 }
0x13ff   :  { %v10346_v47 = vpop.f32.mrf.mxu1 }
0x1400   :  { %v6107_v15 = vsel %vm1565_vm2, %v6095_v21, -inf }
0x1401   :  { %6108 = vmax.xlane.f32.xlu1 %v6107_v15 }
0x147e   :  { %v6100_v39 = vpop.xlane.xlu0 %6099 }
0x147f   :  { %v6110_v60 = vsub.f32 %v6051_v3, %v6100_v39 }
0x1481   :  { %v6114_v28 = vmul.f32 1.442695, %v6110_v60 }
0x1482   :  { %v6103_v17 = vpop.xlane.xlu1 %6102 }
0x1483   :  { %11660 = vpow2.f32 %v6114_v28  ;;  %v6111_v20 = vsub.f32 %v6054_v6, %v6103_v17 }
0x1485   :  { %v6116_v56 = vmul.f32 1.442695, %v6111_v20 }
0x1486   :  { %v6106_v53 = vpop.xlane.xlu0 %6105 }
0x1487   :  { %11662 = vpow2.f32 %v6116_v56  ;;  %v6112_v57 = vsub.f32 %v6092_v30, %v6106_v53  ;;  %v15281_v56 = vpack.c.bf16 %v14140_v42, %v14138_v51  ;;  %v15284_v51 = vpack.c.bf16 %v14197_v37, %v14191_v23 }
0x1489   :  { %v6118_v34 = vmul.f32 1.442695, %v6112_v57 }
0x148a   :  { %v6109_v14 = vpop.xlane.xlu1 %6108 }
0x148b   :  { %11664 = vpow2.f32 %v6118_v34  ;;  %v6113_v41 = vsub.f32 %v6095_v21, %v6109_v14 }
0x148d   :  { %v6120_v1 = vmul.f32 1.442695, %v6113_v41  ;;  %v15282_v41 = vpack.c.bf16 %v14094_v38, %v14092_v0  ;;  %v15285_v0 = vpack.c.bf16 %v14116_v35, %v14114_v61  ;;  %v15286_v38 = vpack.c.bf16 %v14216_v33, %v14209_v44 }
0x148f   :  { %11666 = vpow2.f32 %v6120_v1  ;;  %v15283_v1 = vpack.c.bf16 %v14161_v26, %v14159_v54 }
0x1490   :  { %v11661_v43 = vpop.eup %11660 }
0x1491   :  { %v6122_v58 = vsel %vm1565_vm2, %v11661_v43, 0.0 }
0x1492   :  { %6123 = vadd.xlane.f32.xlu0 %v6122_v58 }
0x1494   :  { %v11663_v8 = vpop.eup %11662 }
0x1495   :  { %v6125_v3 = vsel %vm1565_vm2, %v11663_v8, 0.0 }
0x1496   :  { %6126 = vadd.xlane.f32.xlu1 %v6125_v3 }
0x1498   :  { %v11665_v22 = vpop.eup %11664 }
0x1499   :  { %v6128_v6 = vsel %vm1565_vm2, %v11665_v22, 0.0 }
0x149a   :  { %6129 = vadd.xlane.f32.xlu0 %v6128_v6 }
0x149c   :  { %v11667_v63 = vpop.eup %11666 }
0x149d   :  { %v6131_v30 = vsel %vm1565_vm2, %v11667_v63, 0.0 }
0x149e   :  { %6132 = vadd.xlane.f32.xlu1 %v6131_v30 }
0x151b   :  { %v6124_v31 = vpop.xlane.xlu0 %6123 }
0x151c   :  { %11668 = vrcp.f32 %v6124_v31 }
0x151f   :  { %v6127_v62 = vpop.xlane.xlu1 %6126 }
0x1520   :  { %11670 = vrcp.f32 %v6127_v62 }
0x1523   :  { %v6130_v21 = vpop.xlane.xlu0 %6129 }
0x1524   :  { %11672 = vrcp.f32 %v6130_v21 }
0x1527   :  { %v6133_v47 = vpop.xlane.xlu1 %6132 }
0x1528   :  { %11674 = vrcp.f32 %v6133_v47 }
0x1529   :  { %v11669_v15 = vpop.eup %11668 }
0x152a   :  { %v6138_v60 = vmul.f32 %v11669_v15, %v11661_v43 }
0x152d   :  { %v11671_v39 = vpop.eup %11670 }
0x152e   :  { %v6139_v28 = vmul.f32 %v11671_v39, %v11663_v8 }
0x1530   :  { %v6142_v17 = vpack.c.bf16 %v6139_v28, %v6138_v60 }
0x1531   :  { %v11673_v20 = vpop.eup %11672 }
0x1532   :  { %10350 = vmatmul.mubr.msk.bf16.vlgmr.msra.gmra.mxu0 %vm1565_vm2, %v6142_v17  ;;  %v6140_v57 = vmul.f32 %v11673_v20, %v11665_v22 }
0x1533   :  { %10360 = vmatpush3.bf16.xpose.msra.mxu0 %v15281_v56  ;;  %10361 = vmatprep.mubr.msk.bf16.mxu0 %vm11774_vm1, %v15247_v45 }
0x1534   :  { %10371 = vmatprep.subr.bf16.mxu0 %v15247_v45 }
0x1535   :  { %v11675_v53 = vpop.eup %11674 }
0x1536   :  { %v6141_v34 = vmul.f32 %v11675_v53, %v11667_v63 }
0x1538   :  { %v6143_v14 = vpack.c.bf16 %v6141_v34, %v6140_v57 }
0x153a   :  { %10356 = vmatmul.mubr.msk.bf16.vlgmr.msra.gmra.mxu1 %vm1565_vm2, %v6143_v14  ;;  %10362 = vmatmul.mubr.bf16.vlgmr.msra.gmra.mxu0 %v15282_v41 }
0x153b   :  { %10366 = vmatpush3.bf16.xpose.msra.mxu1 %v15283_v1  ;;  %10372 = vmatpush3.bf16.msra.mxu0 %v15284_v51 }
0x153c   :  { %10367 = vmatprep.mubr.msk.bf16.mxu1 %vm11774_vm1, %v15247_v45  ;;  %10377 = vmatprep.subr.bf16.mxu1 %v15247_v45 }
0x153d   :  { %10373 = vmatprep.mubr.msk.bf16.mxu0 %vm11774_vm1, %v15247_v45  ;;  %10383 = vmatprep.subr.bf16.mxu0 %v15247_v45 }
0x1542   :  { %10368 = vmatmul.mubr.bf16.vlgmr.msra.gmra.mxu1 %v15285_v0 }
0x1543   :  { %10378 = vmatpush3.bf16.msra.mxu1 %v15286_v38  ;;  %10379 = vmatprep.mubr.msk.bf16.mxu1 %vm11774_vm1, %v15247_v45 }
0x1544   :  { %10389 = vmatprep.subr.bf16.mxu1 %v15247_v45 }
0x15f2   :  { %v14339_v42 = vpop.f32.mrf.mxu0 }
0x15f4   :  { %v10351_v54 = vpop.f32.mrf.mxu0 }
0x15f6   :  { %v14341_v26 = vpop.f32.mrf.mxu0 }
0x15f7   :  { %v6232_v23 = vpack.c.bf16 %v14341_v26, %v14339_v42  ;;  %v11244_v42 = vld [vmem:[%s15191_s6 + $0x370] ss:$8 sps:$4 sm:$0xff]  }
0x15f8   :  { %v10352_v37 = vpop.f32.mrf.mxu0 }
0x15fa   :  { %v14345_v61 = vpop.f32.mrf.mxu1  ;;  %v6268_v35 = vpop.f32.mrf.mxu0 }
0x15fb   :  { %v6269_v33 = vadd.f32 %v14232_v5, %v6268_v35 }
0x15fc   :  { %v10357_v44 = vpop.f32.mrf.mxu1  ;;  %v10363_v43 = vpop.f32.mrf.mxu0 }
0x15fd   :  { %v6316_v58 = vsel %vm1565_vm2, %v6269_v33, -inf }
0x15fe   :  { %v14349_v8 = vpop.f32.mrf.mxu1  ;;  %6317 = vmax.xlane.f32.xlu0 %v6316_v58  ;;  %v6271_v3 = vpop.f32.mrf.mxu0 }
0x15ff   :  { %v6233_v22 = vpack.c.bf16 %v14349_v8, %v14345_v61  ;;  %v6272_v6 = vadd.f32 %v14239_v48, %v6271_v3 }
0x1600   :  { %v10358_v63 = vpop.f32.mrf.mxu1  ;;  %v10364_v30 = vpop.f32.mrf.mxu0 }
0x1601   :  { %v6319_v31 = vsel %vm1565_vm2, %v6272_v6, -inf }
0x1602   :  { %v6309_v62 = vpop.f32.mrf.mxu1  ;;  %6320 = vmax.xlane.f32.xlu1 %v6319_v31 }
0x1603   :  { %v6310_v21 = vadd.f32 %v14232_v5, %v6309_v62 }
0x1604   :  { %v10369_v47 = vpop.f32.mrf.mxu1 }
0x1605   :  { %v6322_v15 = vsel %vm1565_vm2, %v6310_v21, -inf }
0x1606   :  { %v6312_v39 = vpop.f32.mrf.mxu1  ;;  %6323 = vmax.xlane.f32.xlu0 %v6322_v15 }
0x1607   :  { %v6313_v60 = vadd.f32 %v14239_v48, %v6312_v39 }
0x1608   :  { %v10370_v28 = vpop.f32.mrf.mxu1 }
0x1609   :  { %v6325_v17 = vsel %vm1565_vm2, %v6313_v60, -inf }
0x160a   :  { %6326 = vmax.xlane.f32.xlu1 %v6325_v17  ;;  %v15287_v17 = vpack.c.bf16 %v14150_v10, %v14144_v25  ;;  %v15290_v25 = vpack.c.bf16 %v14203_v18, %v14195_v27 }
0x1687   :  { %v6318_v20 = vpop.xlane.xlu0 %6317 }
0x1688   :  { %v6328_v56 = vsub.f32 %v6269_v33, %v6318_v20 }
0x168a   :  { %v6332_v53 = vmul.f32 1.442695, %v6328_v56 }
0x168b   :  { %v6321_v57 = vpop.xlane.xlu1 %6320 }
0x168c   :  { %11676 = vpow2.f32 %v6332_v53  ;;  %v6329_v34 = vsub.f32 %v6272_v6, %v6321_v57 }
0x168e   :  { %v6334_v14 = vmul.f32 1.442695, %v6329_v34  ;;  %v15288_v34 = vpack.c.bf16 %v14104_v40, %v14098_v16  ;;  %v15291_v16 = vpack.c.bf16 %v14126_v50, %v14120_v11  ;;  %v15292_v40 = vpack.c.bf16 %v14222_v59, %v14214_v36 }
0x168f   :  { %v6324_v41 = vpop.xlane.xlu0 %6323 }
0x1690   :  { %11678 = vpow2.f32 %v6334_v14  ;;  %v6330_v1 = vsub.f32 %v6310_v21, %v6324_v41  ;;  %v15289_v14 = vpack.c.bf16 %v14171_v52, %v14165_v46 }
0x1692   :  { %v6336_v51 = vmul.f32 1.442695, %v6330_v1 }
0x1693   :  { %v6327_v0 = vpop.xlane.xlu1 %6326 }
0x1694   :  { %11680 = vpow2.f32 %v6336_v51  ;;  %v6331_v38 = vsub.f32 %v6313_v60, %v6327_v0 }
0x1696   :  { %v6338_v54 = vmul.f32 1.442695, %v6331_v38 }
0x1698   :  { %11682 = vpow2.f32 %v6338_v54 }
0x1699   :  { %v11677_v37 = vpop.eup %11676 }
0x169a   :  { %v6340_v35 = vsel %vm1565_vm2, %v11677_v37, 0.0 }
0x169b   :  { %6341 = vadd.xlane.f32.xlu0 %v6340_v35 }
0x169d   :  { %v11679_v44 = vpop.eup %11678 }
0x169e   :  { %v6343_v33 = vsel %vm1565_vm2, %v11679_v44, 0.0 }
0x169f   :  { %6344 = vadd.xlane.f32.xlu1 %v6343_v33 }
0x16a1   :  { %v11681_v43 = vpop.eup %11680 }
0x16a2   :  { %v6346_v58 = vsel %vm1565_vm2, %v11681_v43, 0.0 }
0x16a3   :  { %6347 = vadd.xlane.f32.xlu0 %v6346_v58 }
0x16a5   :  { %v11683_v3 = vpop.eup %11682 }
0x16a6   :  { %v6349_v6 = vsel %vm1565_vm2, %v11683_v3, 0.0 }
0x16a7   :  { %6350 = vadd.xlane.f32.xlu1 %v6349_v6 }
0x1724   :  { %v6342_v63 = vpop.xlane.xlu0 %6341 }
0x1725   :  { %11684 = vrcp.f32 %v6342_v63 }
0x1728   :  { %v6345_v30 = vpop.xlane.xlu1 %6344 }
0x1729   :  { %11686 = vrcp.f32 %v6345_v30 }
0x172c   :  { %v6348_v31 = vpop.xlane.xlu0 %6347 }
0x172d   :  { %11688 = vrcp.f32 %v6348_v31 }
0x1730   :  { %v6351_v62 = vpop.xlane.xlu1 %6350 }
0x1731   :  { %11690 = vrcp.f32 %v6351_v62 }
0x1732   :  { %v11685_v21 = vpop.eup %11684 }
0x1733   :  { %v6356_v15 = vmul.f32 %v11685_v21, %v11677_v37 }
0x1736   :  { %v11687_v47 = vpop.eup %11686 }
0x1737   :  { %v6357_v39 = vmul.f32 %v11687_v47, %v11679_v44 }
0x1739   :  { %v6360_v60 = vpack.c.bf16 %v6357_v39, %v6356_v15 }
0x173a   :  { %v11689_v28 = vpop.eup %11688 }
0x173b   :  { %10374 = vmatmul.mubr.msk.bf16.vlgmr.msra.gmra.mxu0 %vm1565_vm2, %v6360_v60  ;;  %v6358_v56 = vmul.f32 %v11689_v28, %v11681_v43 }
0x173c   :  { %10384 = vmatpush3.bf16.xpose.msra.mxu0 %v15287_v17  ;;  %10385 = vmatprep.mubr.msk.bf16.mxu0 %vm11774_vm1, %v15247_v45 }
0x173d   :  { %10395 = vmatprep.subr.bf16.mxu0 %v15247_v45 }
0x173e   :  { %v11691_v20 = vpop.eup %11690 }
0x173f   :  { %v6359_v53 = vmul.f32 %v11691_v20, %v11683_v3 }
0x1741   :  { %v6361_v57 = vpack.c.bf16 %v6359_v53, %v6358_v56 }
0x1743   :  { %10380 = vmatmul.mubr.msk.bf16.vlgmr.msra.gmra.mxu1 %vm1565_vm2, %v6361_v57  ;;  %10386 = vmatmul.mubr.bf16.vlgmr.msra.gmra.mxu0 %v15288_v34 }
0x1744   :  { %10390 = vmatpush3.bf16.xpose.msra.mxu1 %v15289_v14  ;;  %10396 = vmatpush3.bf16.msra.mxu0 %v15290_v25 }
0x1745   :  { %10391 = vmatprep.mubr.msk.bf16.mxu1 %vm11774_vm1, %v15247_v45  ;;  %10401 = vmatprep.subr.bf16.mxu1 %v15247_v45 }
0x1746   :  { %10397 = vmatprep.mubr.msk.bf16.mxu0 %vm11774_vm1, %v15247_v45 }
0x174b   :  { %10392 = vmatmul.mubr.bf16.vlgmr.msra.gmra.mxu1 %v15291_v16 }
0x174c   :  { %10402 = vmatpush3.bf16.msra.mxu1 %v15292_v40  ;;  %10403 = vmatprep.mubr.msk.bf16.mxu1 %vm11774_vm1, %v15247_v45 }
0x17fb   :  { %v14393_v18 = vpop.f32.mrf.mxu0 }
0x17fd   :  { %v10375_v52 = vpop.f32.mrf.mxu0 }
0x17fe   :  { %v11198_v52 = vld [vmem:[%s15191_s6 + $0x274] ss:$8 sps:$4 sm:$0xff]  }
0x17ff   :  { %v14395_v10 = vpop.f32.mrf.mxu0  ;;  %7068 = vmatprep.subr.bf16.mxu0 %v11198_v52  ;;  %v11264_v52 = vld [vmem:[%s15191_s6 + $0x314] ss:$8 sps:$4 sm:$0xff]  }
0x1800   :  { %v6450_v46 = vpack.c.bf16 %v14395_v10, %v14393_v18 }
0x1801   :  { %v10376_v27 = vpop.f32.mrf.mxu0 }
0x1802   :  { %v11246_v27 = vld [vmem:[%s15191_s6 + $0x374] ss:$8 sps:$4 sm:$0xff]  }
0x1803   :  { %v14399_v41 = vpop.f32.mrf.mxu1  ;;  %v6486_v11 = vpop.f32.mrf.mxu0  ;;  %7121 = vmatprep.subr.bf16.mxu1 %v11246_v27  ;;  %v11220_v27 = vld [vmem:[%s15191_s6 + $0x2f0] ss:$8 sps:$4 sm:$0xff]  }
0x1804   :  { %v6487_v50 = vadd.f32 %v14232_v5, %v6486_v11 }
0x1805   :  { %v10381_v1 = vpop.f32.mrf.mxu1  ;;  %v10387_v59 = vpop.f32.mrf.mxu0 }
0x1806   :  { %v6534_v36 = vsel %vm1565_vm2, %v6487_v50, -inf }
0x1807   :  { %v14403_v51 = vpop.f32.mrf.mxu1  ;;  %6535 = vmax.xlane.f32.xlu0 %v6534_v36  ;;  %v6489_v45 = vpop.f32.mrf.mxu0 }
0x1808   :  { %v6451_v0 = vpack.c.bf16 %v14403_v51, %v14399_v41  ;;  %v6490_v38 = vadd.f32 %v14239_v48, %v6489_v45 }
0x1809   :  { %v10382_v54 = vpop.f32.mrf.mxu1  ;;  %v10388_v37 = vpop.f32.mrf.mxu0 }
0x180a   :  { %v6537_v35 = vsel %vm1565_vm2, %v6490_v38, -inf  ;;  %v11196_v37 = vld [vmem:[%s15191_s6 + $0x270] ss:$8 sps:$4 sm:$0xff]  }
0x180b   :  { %v6527_v44 = vpop.f32.mrf.mxu1  ;;  %6538 = vmax.xlane.f32.xlu1 %v6537_v35 }
0x180c   :  { %v6528_v33 = vadd.f32 %v14232_v5, %v6527_v44  ;;  %v11201_v44 = vld [vmem:[%s15191_s6 + $0x264] ss:$8 sps:$4 sm:$0xff]  }
0x180d   :  { %v10393_v43 = vpop.f32.mrf.mxu1 }
0x180e   :  { %v6540_v58 = vsel %vm1565_vm2, %v6528_v33, -inf  ;;  %v11199_v43 = vld [vmem:[%s15191_s6 + $0x260] ss:$8 sps:$4 sm:$0xff]  }
0x180f   :  { %v6530_v3 = vpop.f32.mrf.mxu1  ;;  %6541 = vmax.xlane.f32.xlu0 %v6540_v58  ;;  %v11204_v58 = vld [vmem:[%s15191_s6 + $0x254] ss:$8 sps:$4 sm:$0xff]  }
0x1810   :  { %v6531_v6 = vadd.f32 %v14239_v48, %v6530_v3 }
0x1811   :  { %v10394_v63 = vpop.f32.mrf.mxu1 }
0x1812   :  { %v6543_v30 = vsel %vm1565_vm2, %v6531_v6, -inf }
0x1813   :  { %6544 = vmax.xlane.f32.xlu1 %v6543_v30  ;;  %v11202_v30 = vld [vmem:[%s15191_s6 + $0x250] ss:$8 sps:$4 sm:$0xff]  }
0x1890   :  { %v6536_v31 = vpop.xlane.xlu0 %6535 }
0x1891   :  { %v6546_v62 = vsub.f32 %v6487_v50, %v6536_v31  ;;  %v11249_v31 = vld [vmem:[%s15191_s6 + $0x364] ss:$8 sps:$4 sm:$0xff]  }
0x1893   :  { %v6550_v21 = vmul.f32 1.442695, %v6546_v62  ;;  %v11205_v62 = vld [vmem:[%s15191_s6 + $0x240] ss:$8 sps:$4 sm:$0xff]  }
0x1894   :  { %v6539_v47 = vpop.xlane.xlu1 %6538 }
0x1895   :  { %11692 = vpow2.f32 %v6550_v21  ;;  %v6547_v15 = vsub.f32 %v6490_v38, %v6539_v47  ;;  %v11247_v21 = vld [vmem:[%s15191_s6 + $0x360] ss:$8 sps:$4 sm:$0xff]   ;;  %v11210_v47 = vld [vmem:[%s15191_s6 + $0x234] ss:$8 sps:$4 sm:$0xff]  }
0x1897   :  { %v6552_v39 = vmul.f32 1.442695, %v6547_v15  ;;  %v11252_v15 = vld [vmem:[%s15191_s6 + $0x354] ss:$8 sps:$4 sm:$0xff]  }
0x1898   :  { %v6542_v60 = vpop.xlane.xlu0 %6541 }
0x1899   :  { %11694 = vpow2.f32 %v6552_v39  ;;  %v6548_v5 = vsub.f32 %v6528_v33, %v6542_v60  ;;  %v11208_v39 = vld [vmem:[%s15191_s6 + $0x230] ss:$8 sps:$4 sm:$0xff]  }
0x189a   :  { %v11250_v60 = vld [vmem:[%s15191_s6 + $0x350] ss:$8 sps:$4 sm:$0xff]  }
0x189b   :  { %v6554_v28 = vmul.f32 1.442695, %v6548_v5  ;;  %v11213_v5 = vld [vmem:[%s15191_s6 + $0x224] ss:$8 sps:$4 sm:$0xff]  }
0x189c   :  { %v6545_v17 = vpop.xlane.xlu1 %6544 }
0x189d   :  { %11696 = vpow2.f32 %v6554_v28  ;;  %v6549_v20 = vsub.f32 %v6531_v6, %v6545_v17  ;;  %v11255_v28 = vld [vmem:[%s15191_s6 + $0x344] ss:$8 sps:$4 sm:$0xff]   ;;  %v11211_v17 = vld [vmem:[%s15191_s6 + $0x220] ss:$8 sps:$4 sm:$0xff]  }
0x189f   :  { %v6556_v56 = vmul.f32 1.442695, %v6549_v20  ;;  %v11253_v20 = vld [vmem:[%s15191_s6 + $0x340] ss:$8 sps:$4 sm:$0xff]  }
0x18a1   :  { %11698 = vpow2.f32 %v6556_v56  ;;  %v11216_v56 = vld [vmem:[%s15191_s6 + $0x214] ss:$8 sps:$4 sm:$0xff]  }
0x18a2   :  { %v11693_v48 = vpop.eup %11692 }
0x18a3   :  { %v6558_v53 = vsel %vm1565_vm2, %v11693_v48, 0.0 }
0x18a4   :  { %6559 = vadd.xlane.f32.xlu0 %v6558_v53  ;;  %v11214_v53 = vld [vmem:[%s15191_s6 + $0x210] ss:$8 sps:$4 sm:$0xff]  }
0x18a6   :  { %v11695_v57 = vpop.eup %11694 }
0x18a7   :  { %v6561_v34 = vsel %vm1565_vm2, %v11695_v57, 0.0 }
0x18a8   :  { %6562 = vadd.xlane.f32.xlu1 %v6561_v34  ;;  %v11219_v34 = vld [vmem:[%s15191_s6 + $0x204] ss:$8 sps:$4 sm:$0xff]  }
0x18aa   :  { %v11697_v14 = vpop.eup %11696 }
0x18ab   :  { %v6564_v25 = vsel %vm1565_vm2, %v11697_v14, 0.0 }
0x18ac   :  { %6565 = vadd.xlane.f32.xlu0 %v6564_v25  ;;  %v11217_v25 = vld [vmem:[%s15191_s6 + $0x200] ss:$8 sps:$4 sm:$0xff]  }
0x18ae   :  { %v11699_v16 = vpop.eup %11698 }
0x18af   :  { %v6567_v40 = vsel %vm1565_vm2, %v11699_v16, 0.0 }
0x18b0   :  { %6568 = vadd.xlane.f32.xlu1 %v6567_v40  ;;  %v11222_v40 = vld [vmem:[%s15191_s6 + $0x2f4] ss:$8 sps:$4 sm:$0xff]  }
0x192d   :  { %v6560_v11 = vpop.xlane.xlu0 %6559 }
0x192e   :  { %11700 = vrcp.f32 %v6560_v11  ;;  %v11262_v11 = vld [vmem:[%s15191_s6 + $0x310] ss:$8 sps:$4 sm:$0xff]  }
0x1931   :  { %v6563_v50 = vpop.xlane.xlu1 %6562 }
0x1932   :  { %11702 = vrcp.f32 %v6563_v50  ;;  %v11225_v50 = vld [vmem:[%s15191_s6 + $0x2e4] ss:$8 sps:$4 sm:$0xff]  }
0x1935   :  { %v6566_v1 = vpop.xlane.xlu0 %6565 }
0x1936   :  { %11704 = vrcp.f32 %v6566_v1  ;;  %v11267_v1 = vld [vmem:[%s15191_s6 + $0x304] ss:$8 sps:$4 sm:$0xff]  }
0x1939   :  { %v6569_v59 = vpop.xlane.xlu1 %6568 }
0x193a   :  { %11706 = vrcp.f32 %v6569_v59  ;;  %v11223_v59 = vld [vmem:[%s15191_s6 + $0x2e0] ss:$8 sps:$4 sm:$0xff]  }
0x193b   :  { %v11701_v36 = vpop.eup %11700 }
0x193c   :  { %v6574_v38 = vmul.f32 %v11701_v36, %v11693_v48  ;;  %v11258_v48 = vld [vmem:[%s15191_s6 + $0x334] ss:$8 sps:$4 sm:$0xff]   ;;  %v11265_v36 = vld [vmem:[%s15191_s6 + $0x300] ss:$8 sps:$4 sm:$0xff]  }
0x193f   :  { %v11703_v45 = vpop.eup %11702 }
0x1940   :  { %v6575_v54 = vmul.f32 %v11703_v45, %v11695_v57  ;;  %v11256_v57 = vld [vmem:[%s15191_s6 + $0x330] ss:$8 sps:$4 sm:$0xff]   ;;  %v11228_v45 = vld [vmem:[%s15191_s6 + $0x2d4] ss:$8 sps:$4 sm:$0xff]  }
0x1942   :  { %v6578_v35 = vpack.c.bf16 %v6575_v54, %v6574_v38  ;;  %v11270_v38 = vld [vmem:[%s15191_s6 + $0x3f4] ss:$8 sps:$4 sm:$0xff]   ;;  %v11226_v54 = vld [vmem:[%s15191_s6 + $0x2d0] ss:$8 sps:$4 sm:$0xff]  }
0x1943   :  { %v11705_v33 = vpop.eup %11704 }
0x1944   :  { %10398 = vmatmul.mubr.msk.bf16.vlgmr.msra.gmra.mxu0 %vm1565_vm2, %v6578_v35  ;;  %v6576_v6 = vmul.f32 %v11705_v33, %v11697_v14  ;;  %v11261_v14 = vld [vmem:[%s15191_s6 + $0x324] ss:$8 sps:$4 sm:$0xff]   ;;  %v11229_v33 = vld [vmem:[%s15191_s6 + $0x2c0] ss:$8 sps:$4 sm:$0xff]  }
0x1945   :  { %7069 = vmatpush1.bf16.msra.mxu0 %v11196_v37  ;;  %7100 = vmatprep.mubr.bf16.mxu0 %v6232_v23  ;;  %v11207_v23 = vld [vmem:[%s15191_s6 + $0x244] ss:$8 sps:$4 sm:$0xff]   ;;  %v11268_v37 = vld [vmem:[%s15191_s6 + $0x3f0] ss:$8 sps:$4 sm:$0xff]  }
0x1946   :  { %7070 = vmatprep.subr.bf16.mxu0 %v11201_v44  ;;  %v11231_v35 = vld [vmem:[%s15191_s6 + $0x2c4] ss:$8 sps:$4 sm:$0xff]  }
0x1947   :  { %v11707_v3 = vpop.eup %11706  ;;  %v11273_v44 = vld [vmem:[%s15191_s6 + $0x3e4] ss:$8 sps:$4 sm:$0xff]  }
0x1948   :  { %v6577_v63 = vmul.f32 %v11707_v3, %v11699_v16  ;;  %v11259_v16 = vld [vmem:[%s15191_s6 + $0x320] ss:$8 sps:$4 sm:$0xff]   ;;  %v11276_v3 = vld [vmem:[%s15191_s6 + $0x3d4] ss:$8 sps:$4 sm:$0xff]  }
0x1949   :  { %7071 = vmatpush1.bf16.msra.mxu0 %v11199_v43  ;;  %v11271_v43 = vld [vmem:[%s15191_s6 + $0x3e0] ss:$8 sps:$4 sm:$0xff]  }
0x194a   :  { %v6579_v26 = vpack.c.bf16 %v6577_v63, %v6576_v6  ;;  %7072 = vmatprep.subr.bf16.mxu0 %v11204_v58  ;;  %v11234_v58 = vld [vmem:[%s15191_s6 + $0x2b4] ss:$8 sps:$4 sm:$0xff]   ;;  %v11232_v6 = vld [vmem:[%s15191_s6 + $0x2b0] ss:$8 sps:$4 sm:$0xff]  }
0x194b   :  { %v11274_v63 = vld [vmem:[%s15191_s6 + $0x3d0] ss:$8 sps:$4 sm:$0xff]  }
0x194c   :  { %10404 = vmatmul.mubr.msk.bf16.vlgmr.msra.gmra.mxu1 %vm1565_vm2, %v6579_v26  ;;  %v11235_v26 = vld [vmem:[%s15191_s6 + $0x2a0] ss:$8 sps:$4 sm:$0xff]  }
0x194d   :  { %7073 = vmatpush1.bf16.msra.mxu0 %v11202_v30  ;;  %7122 = vmatpush1.bf16.msra.mxu1 %v11244_v42  ;;  %v11237_v30 = vld [vmem:[%s15191_s6 + $0x2a4] ss:$8 sps:$4 sm:$0xff]  }
0x194e   :  { %7074 = vmatprep.subr.bf16.mxu0 %v11207_v23  ;;  %7123 = vmatprep.subr.bf16.mxu1 %v11249_v31  ;;  %v11279_v42 = vld [vmem:[%s15191_s6 + $0x3c4] ss:$8 sps:$4 sm:$0xff]   ;;  %v11277_v23 = vld [vmem:[%s15191_s6 + $0x3c0] ss:$8 sps:$4 sm:$0xff]   ;;  %v11240_v31 = vld [vmem:[%s15191_s6 + $0x294] ss:$8 sps:$4 sm:$0xff]  }
0x1951   :  { %7075 = vmatpush1.bf16.msra.mxu0 %v11205_v62  ;;  %7124 = vmatpush1.bf16.msra.mxu1 %v11247_v21  ;;  %v11282_v62 = vld [vmem:[%s15191_s6 + $0x3b4] ss:$8 sps:$4 sm:$0xff]   ;;  %v11238_v21 = vld [vmem:[%s15191_s6 + $0x290] ss:$8 sps:$4 sm:$0xff]  }
0x1952   :  { %7076 = vmatprep.subr.bf16.mxu0 %v11210_v47  ;;  %7125 = vmatprep.subr.bf16.mxu1 %v11252_v15  ;;  %v11280_v47 = vld [vmem:[%s15191_s6 + $0x3b0] ss:$8 sps:$4 sm:$0xff]   ;;  %v11243_v15 = vld [vmem:[%s15191_s6 + $0x284] ss:$8 sps:$4 sm:$0xff]  }
0x1955   :  { %7077 = vmatpush1.bf16.msra.mxu0 %v11208_v39  ;;  %7126 = vmatpush1.bf16.msra.mxu1 %v11250_v60  ;;  %v11285_v39 = vld [vmem:[%s15191_s6 + $0x3a4] ss:$8 sps:$4 sm:$0xff]   ;;  %v11241_v60 = vld [vmem:[%s15191_s6 + $0x280] ss:$8 sps:$4 sm:$0xff]  }
0x1956   :  { %7078 = vmatprep.subr.bf16.mxu0 %v11213_v5  ;;  %7127 = vmatprep.subr.bf16.mxu1 %v11255_v28  ;;  %v11283_v5 = vld [vmem:[%s15191_s6 + $0x3a0] ss:$8 sps:$4 sm:$0xff]   ;;  %v11288_v28 = vld [vmem:[%s15191_s6 + $0x394] ss:$8 sps:$4 sm:$0xff]  }
0x1959   :  { %7079 = vmatpush1.bf16.msra.mxu0 %v11211_v17  ;;  %7128 = vmatpush1.bf16.msra.mxu1 %v11253_v20  ;;  %v11286_v17 = vld [vmem:[%s15191_s6 + $0x390] ss:$8 sps:$4 sm:$0xff]   ;;  %v11291_v20 = vld [vmem:[%s15191_s6 + $0x384] ss:$8 sps:$4 sm:$0xff]  }
0x195a   :  { %7080 = vmatprep.subr.bf16.mxu0 %v11216_v56  ;;  %7129 = vmatprep.subr.bf16.mxu1 %v11258_v48  ;;  %v11289_v56 = vld [vmem:[%s15191_s6 + $0x380] ss:$8 sps:$4 sm:$0xff]  }
0x195d   :  { %7081 = vmatpush1.bf16.msra.mxu0 %v11214_v53  ;;  %7130 = vmatpush1.bf16.msra.mxu1 %v11256_v57 }
0x195e   :  { %7082 = vmatprep.subr.bf16.mxu0 %v11219_v34  ;;  %7131 = vmatprep.subr.bf16.mxu1 %v11261_v14  ;;  %v9797_v14 = vld [vmem:[%s15192_s7 + $0x2] sm:$0x3] }
0x195f   :  { %v6741_v18 = vrot.slane %v9797_v14, %v12114_v7  ;;  %v6745_v10 = vrot.slane %v9797_v14, %v12117_v12  ;;  %v11304_v14 = vld [vmem:[#allocation2 + $0x330] ss:$24 sps:$4 sm:$0xff]  }
0x1961   :  { %7083 = vmatpush1.bf16.msra.mxu0 %v11217_v25  ;;  %7132 = vmatpush1.bf16.msra.mxu1 %v11259_v16 }
0x1962   :  { %7084 = vmatprep.subr.bf16.mxu0 %v11222_v40  ;;  %7133 = vmatprep.subr.bf16.mxu1 %v11264_v52 }
0x1965   :  { %7085 = vmatpush2.bf16.msra.mxu0 %v11220_v27  ;;  %7134 = vmatpush1.bf16.msra.mxu1 %v11262_v11 }
0x1966   :  { %7086 = vmatprep.subr.bf16.mxu0 %v11225_v50  ;;  %7135 = vmatprep.subr.bf16.mxu1 %v11267_v1 }
0x1969   :  { %7087 = vmatpush2.bf16.msra.mxu0 %v11223_v59  ;;  %7136 = vmatpush1.bf16.msra.mxu1 %v11265_v36 }
0x196a   :  { %7088 = vmatprep.subr.bf16.mxu0 %v11228_v45  ;;  %7137 = vmatprep.subr.bf16.mxu1 %v11270_v38 }
0x196d   :  { %7089 = vmatpush2.bf16.msra.mxu0 %v11226_v54  ;;  %7138 = vmatpush2.bf16.msra.mxu1 %v11268_v37 }
0x196e   :  { %7090 = vmatprep.subr.bf16.mxu0 %v11231_v35  ;;  %7139 = vmatprep.subr.bf16.mxu1 %v11273_v44 }
0x1971   :  { %7091 = vmatpush2.bf16.msra.mxu0 %v11229_v33  ;;  %7140 = vmatpush2.bf16.msra.mxu1 %v11271_v43 }
0x1972   :  { %7092 = vmatprep.subr.bf16.mxu0 %v11234_v58  ;;  %7141 = vmatprep.subr.bf16.mxu1 %v11276_v3 }
0x1975   :  { %7093 = vmatpush2.bf16.msra.mxu0 %v11232_v6  ;;  %7142 = vmatpush2.bf16.msra.mxu1 %v11274_v63 }
0x1976   :  { %7094 = vmatprep.subr.bf16.mxu0 %v11237_v30  ;;  %7143 = vmatprep.subr.bf16.mxu1 %v11279_v42 }
0x1979   :  { %7095 = vmatpush2.bf16.msra.mxu0 %v11235_v26  ;;  %7144 = vmatpush2.bf16.msra.mxu1 %v11277_v23 }
0x197a   :  { %7096 = vmatprep.subr.bf16.mxu0 %v11240_v31  ;;  %7145 = vmatprep.subr.bf16.mxu1 %v11282_v62 }
0x197d   :  { %7097 = vmatpush2.bf16.msra.mxu0 %v11238_v21  ;;  %7146 = vmatpush2.bf16.msra.mxu1 %v11280_v47  ;;  %v15293_v21 = vld [vmem:[#allocation8_spill] sm:$0xff] }
0x197e   :  { %7098 = vmatprep.subr.bf16.mxu0 %v11243_v15  ;;  %7147 = vmatprep.subr.bf16.mxu1 %v11285_v39 }
0x1981   :  { %7099 = vmatpush2.bf16.msra.mxu0 %v11241_v60  ;;  %7148 = vmatpush2.bf16.msra.mxu1 %v11283_v5 }
0x1982   :  { %7149 = vmatprep.subr.bf16.mxu1 %v11288_v28 }
0x1984   :  { %7101 = vmatmul.mubr.bf16.vlgmr.msra.gmra.mxu0 %v6014_v49 }
0x1985   :  { %7110 = vmatprep.mubr.bf16.mxu0 %v6233_v22  ;;  %7150 = vmatpush2.bf16.msra.mxu1 %v11286_v17  ;;  %v15295_v17 = vld [vmem:[#allocation9_spill] sm:$0xff] }
0x1986   :  { %7151 = vmatprep.subr.bf16.mxu1 %v11291_v20 }
0x1989   :  { %7152 = vmatpush2.bf16.msra.mxu1 %v11289_v56  ;;  %v15296_v56 = vld [vmem:[#allocation16_spill] sm:$0xff] }
0x198c   :  { %7111 = vmatmul.mubr.bf16.gmra.mxu0 %v6015_v19 }
0x1a04   :  { %v6617_v4 = vpop.f32.mrf.mxu0 }
0x1a06   :  { %v10399_v32 = vpop.f32.mrf.mxu0 }
0x1a08   :  { %v6620_v49 = vpop.f32.mrf.mxu0 }
0x1a09   :  { %v6668_v61 = vpack.c.bf16 %v6620_v49, %v6617_v4 }
0x1a0a   :  { %v10400_v8 = vpop.f32.mrf.mxu0 }
0x1a0b   :  { %7153 = vmatprep.mubr.bf16.mxu1 %v6668_v61  ;;  %v11292_v61 = vld [vmem:[#allocation2 + $0x390] ss:$24 sps:$4 sm:$0xff]   ;;  %v11294_v8 = vld [vmem:[#allocation2 + $0x394] ss:$24 sps:$4 sm:$0xff]  }
0x1a0c   :  { %v6661_v22 = vpop.f32.mrf.mxu1  ;;  %7154 = vmatmul.mubr.bf16.vlgmr.msra.gmra.mxu1 %v6450_v46  ;;  %7772 = vmatprep.subr.bf16.mxu0 %v11294_v8  ;;  %v11325_v8 = vld [vmem:[#allocation2 + $0x2a8] ss:$24 sps:$4 sm:$0xff]  }
0x1a0d   :  { %7773 = vmatpush1.bf16.msra.mxu0 %v11292_v61  ;;  %v11327_v61 = vld [vmem:[#allocation2 + $0x2ac] ss:$24 sps:$4 sm:$0xff]  }
0x1a0e   :  { %v10405_v48 = vpop.f32.mrf.mxu1 }
0x1a0f   :  { %v11297_v48 = vld [vmem:[#allocation2 + $0x39c] ss:$24 sps:$4 sm:$0xff]  }
0x1a10   :  { %v6664_v53 = vpop.f32.mrf.mxu1  ;;  %7825 = vmatprep.subr.bf16.mxu1 %v11297_v48  ;;  %v11328_v48 = vld [vmem:[#allocation2 + $0x270] ss:$24 sps:$4 sm:$0xff]  }
0x1a11   :  { %v6669_v57 = vpack.c.bf16 %v6664_v53, %v6661_v22  ;;  %v11295_v22 = vld [vmem:[#allocation2 + $0x398] ss:$24 sps:$4 sm:$0xff]   ;;  %v11300_v53 = vld [vmem:[#allocation2 + $0x364] ss:$24 sps:$4 sm:$0xff]  }
0x1a12   :  { %v10406_v34 = vpop.f32.mrf.mxu1  ;;  %7826 = vmatpush1.bf16.msra.mxu1 %v11295_v22  ;;  %7774 = vmatprep.subr.bf16.mxu0 %v11300_v53  ;;  %v11330_v22 = vld [vmem:[#allocation2 + $0x274] ss:$24 sps:$4 sm:$0xff]  }
0x1a13   :  { %7163 = vmatprep.mubr.bf16.mxu1 %v6669_v57  ;;  %v11303_v57 = vld [vmem:[#allocation2 + $0x36c] ss:$24 sps:$4 sm:$0xff]   ;;  %v11298_v34 = vld [vmem:[#allocation2 + $0x360] ss:$24 sps:$4 sm:$0xff]   ;;  %v11333_v53 = vld [vmem:[#allocation2 + $0x27c] ss:$24 sps:$4 sm:$0xff]  }
0x1a14   :  { %7164 = vmatmul.mubr.bf16.gmra.mxu1 %v6451_v0  ;;  %7827 = vmatprep.subr.bf16.mxu1 %v11303_v57  ;;  %v11331_v57 = vld [vmem:[#allocation2 + $0x278] ss:$24 sps:$4 sm:$0xff]  }
0x1a15   :  { %7775 = vmatpush1.bf16.msra.mxu0 %v11298_v34  ;;  %v11336_v34 = vld [vmem:[#allocation2 + $0x244] ss:$24 sps:$4 sm:$0xff]  }
0x1a44   :  { %v7102_v9 = vpop.f32.mrf.mxu0 }
0x1a45   :  { %v7103_v16 = vadd.f32 %v7102_v9, %v6741_v18  ;;  %v11301_v9 = vld [vmem:[#allocation2 + $0x368] ss:$24 sps:$4 sm:$0xff]  }
0x1a46   :  { %v7104_v24 = vpop.f32.mrf.mxu0  ;;  %7828 = vmatpush1.bf16.msra.mxu1 %v11301_v9  ;;  %v11334_v9 = vld [vmem:[#allocation2 + $0x240] ss:$24 sps:$4 sm:$0xff]  }
0x1a47   :  { %v7105_v52 = vadd.f32 %v7104_v24, %v6745_v10  ;;  %v11306_v24 = vld [vmem:[#allocation2 + $0x334] ss:$24 sps:$4 sm:$0xff]  }
0x1a48   :  { %v7106_v19 = vpop.f32.mrf.mxu0  ;;  %7776 = vmatprep.subr.bf16.mxu0 %v11306_v24  ;;  %v11339_v24 = vld [vmem:[#allocation2 + $0x24c] ss:$24 sps:$4 sm:$0xff]  }
0x1a49   :  { %v7107_v0 = vadd.f32 %v7106_v19, %v6741_v18  ;;  %v11309_v19 = vld [vmem:[#allocation2 + $0x33c] ss:$24 sps:$4 sm:$0xff]   ;;  %7777 = vmatpush1.bf16.msra.mxu0 %v11304_v14 }
0x1a4a   :  { %v7108_v25 = vpop.f32.mrf.mxu0  ;;  %7829 = vmatprep.subr.bf16.mxu1 %v11309_v19  ;;  %v11337_v19 = vld [vmem:[#allocation2 + $0x248] ss:$24 sps:$4 sm:$0xff]   ;;  %v11342_v14 = vld [vmem:[#allocation2 + $0x454] ss:$24 sps:$4 sm:$0xff]  }
0x1a4b   :  { %v7109_v1 = vadd.f32 %v7108_v25, %v6745_v10  ;;  %v11307_v25 = vld [vmem:[#allocation2 + $0x338] ss:$24 sps:$4 sm:$0xff]  }
0x1a4c   :  { %v7112_v46 = vpop.f32.mrf.mxu0  ;;  %7830 = vmatpush1.bf16.msra.mxu1 %v11307_v25  ;;  %v11340_v25 = vld [vmem:[#allocation2 + $0x450] ss:$24 sps:$4 sm:$0xff]  }
0x1a4d   :  { %v7113_v44 = vadd.f32 %v7112_v46, %v6741_v18  ;;  %v11310_v46 = vld [vmem:[#allocation2 + $0x300] ss:$24 sps:$4 sm:$0xff]  }
0x1a4e   :  { %v7114_v27 = vpop.f32.mrf.mxu0 }
0x1a4f   :  { %v7115_v58 = vadd.f32 %v7114_v27, %v6745_v10  ;;  %v11316_v27 = vld [vmem:[#allocation2 + $0x2d0] ss:$24 sps:$4 sm:$0xff]  }
0x1a50   :  { %v7116_v36 = vpop.f32.mrf.mxu0 }
0x1a51   :  { %v7117_v26 = vadd.f32 %v7116_v36, %v6741_v18  ;;  %v11312_v18 = vld [vmem:[#allocation2 + $0x304] ss:$24 sps:$4 sm:$0xff]  }
0x1a52   :  { %7778 = vmatprep.subr.bf16.mxu0 %v11312_v18  ;;  %v11345_v18 = vld [vmem:[#allocation2 + $0x45c] ss:$24 sps:$4 sm:$0xff]  }
0x1a53   :  { %7779 = vmatpush1.bf16.msra.mxu0 %v11310_v46  ;;  %v11348_v46 = vld [vmem:[#allocation2 + $0x424] ss:$24 sps:$4 sm:$0xff]  }
0x1acc   :  { %v7155_v40 = vpop.f32.mrf.mxu1 }
0x1acd   :  { %v7156_v11 = vadd.f32 %v7155_v40, %v7103_v16  ;;  %v11313_v16 = vld [vmem:[#allocation2 + $0x308] ss:$24 sps:$4 sm:$0xff]   ;;  %v11318_v40 = vld [vmem:[#allocation2 + $0x2d4] ss:$24 sps:$4 sm:$0xff]  }
0x1ace   :  { %v7157_v41 = vpop.f32.mrf.mxu1  ;;  %7780 = vmatprep.subr.bf16.mxu0 %v11318_v40  ;;  %v11351_v40 = vld [vmem:[#allocation2 + $0x42c] ss:$24 sps:$4 sm:$0xff]  }
0x1acf   :  { %v7158_v51 = vadd.f32 %v7157_v41, %v7105_v52  ;;  %v14638_v45 = vadd.f32 %v7156_v11, %v13508_v55  ;;  %v11321_v52 = vld [vmem:[#allocation2 + $0x2dc] ss:$24 sps:$4 sm:$0xff]   ;;  %v11319_v11 = vld [vmem:[#allocation2 + $0x2d8] ss:$24 sps:$4 sm:$0xff]   ;;  %7781 = vmatpush1.bf16.msra.mxu0 %v11316_v27 }
0x1ad0   :  { %v7159_v50 = vpop.f32.mrf.mxu1  ;;  %v11354_v27 = vld [vmem:[#allocation2 + $0x3f4] ss:$24 sps:$4 sm:$0xff]  }
0x1ad1   :  { %v14635_v59 = vadd.f32 %v7158_v51, %v13505_v29  ;;  %v7160_v38 = vadd.f32 %v7159_v50, %v7107_v0  ;;  %v7118_v29 = vpop.f32.mrf.mxu0 }
0x1ad2   :  { %v7161_v54 = vpop.f32.mrf.mxu1  ;;  %v7119_v62 = vadd.f32 %v7118_v29, %v6745_v10  ;;  %v11315_v10 = vld [vmem:[#allocation2 + $0x30c] ss:$24 sps:$4 sm:$0xff]  }
0x1ad3   :  { %v7162_v37 = vadd.f32 %v7161_v54, %v7109_v1  ;;  %v7186_v35 = vsel %vm91_vm0, %v14635_v59, 0.0  ;;  %v14647_v6 = vadd.f32 %v7160_v38, %v13517_v2  ;;  %7831 = vmatprep.subr.bf16.mxu1 %v11315_v10  ;;  %v11343_v10 = vld [vmem:[#allocation2 + $0x458] ss:$24 sps:$4 sm:$0xff]  }
0x1ad4   :  { %v7165_v33 = vpop.f32.mrf.mxu1  ;;  %v7187_v43 = vadd.f32 %v7186_v35, %v14638_v45  ;;  %7832 = vmatpush1.bf16.msra.mxu1 %v11313_v16  ;;  %v11346_v16 = vld [vmem:[#allocation2 + $0x420] ss:$24 sps:$4 sm:$0xff]  }
0x1ad5   :  { %v14644_v3 = vadd.f32 %v7162_v37, %v13514_v13  ;;  %v7166_v55 = vadd.f32 %v7165_v33, %v7113_v44  ;;  %v15294_v13 = vld [vmem:[#allocation10_spill] sm:$0xff]  ;;  %7833 = vmatprep.subr.bf16.mxu1 %v11321_v52  ;;  %v11349_v52 = vld [vmem:[#allocation2 + $0x428] ss:$24 sps:$4 sm:$0xff]  }
0x1ad6   :  { %v7167_v63 = vpop.f32.mrf.mxu1  ;;  %7188 = vadd.xlane.f32.xlu0 %v7187_v43 }
0x1ad7   :  { %v7168_v30 = vadd.f32 %v7167_v63, %v7115_v58  ;;  %v7190_v42 = vsel %vm91_vm0, %v14644_v3, 0.0  ;;  %v14656_v15 = vadd.f32 %v7166_v55, %v15294_v13 }
0x1ad8   :  { %v7169_v23 = vpop.f32.mrf.mxu1  ;;  %v7191_v31 = vadd.f32 %v7190_v42, %v14647_v6  ;;  %7834 = vmatpush1.bf16.msra.mxu1 %v11319_v11  ;;  %v11352_v11 = vld [vmem:[#allocation2 + $0x3f0] ss:$24 sps:$4 sm:$0xff]  }
0x1ad9   :  { %v14653_v47 = vadd.f32 %v7168_v30, %v15293_v21  ;;  %v7170_v2 = vadd.f32 %v7169_v23, %v7117_v26  ;;  %7835 = vmatprep.subr.bf16.mxu1 %v11327_v61 }
0x1ada   :  { %v7171_v39 = vpop.f32.mrf.mxu1  ;;  %7192 = vadd.xlane.f32.xlu1 %v7191_v31 }
0x1adb   :  { %v7172_v60 = vadd.f32 %v7171_v39, %v7119_v62  ;;  %v7194_v5 = vsel %vm91_vm0, %v14653_v47, 0.0  ;;  %v14665_v4 = vadd.f32 %v7170_v2, %v15296_v56 }
0x1adc   :  { %v7195_v28 = vadd.f32 %v7194_v5, %v14656_v15  ;;  %7836 = vmatpush1.bf16.msra.mxu1 %v11325_v8 }
0x1add   :  { %v14662_v20 = vadd.f32 %v7172_v60, %v15295_v17  ;;  %7837 = vmatprep.subr.bf16.mxu1 %v11333_v53 }
0x1ade   :  { %7196 = vadd.xlane.f32.xlu0 %v7195_v28 }
0x1adf   :  { %v7198_v32 = vsel %vm91_vm0, %v14662_v20, 0.0 }
0x1ae0   :  { %v7199_v49 = vadd.f32 %v7198_v32, %v14665_v4  ;;  %v11324_v32 = vld [vmem:[#allocation2 + $0x2a4] ss:$24 sps:$4 sm:$0xff]   ;;  %7838 = vmatpush1.bf16.msra.mxu1 %v11331_v57 }
0x1ae1   :  { %7782 = vmatprep.subr.bf16.mxu0 %v11324_v32  ;;  %7839 = vmatprep.subr.bf16.mxu1 %v11339_v24 }
0x1ae2   :  { %7200 = vadd.xlane.f32.xlu1 %v7199_v49  ;;  %v11322_v49 = vld [vmem:[#allocation2 + $0x2a0] ss:$24 sps:$4 sm:$0xff]  }
0x1ae3   :  { %7783 = vmatpush1.bf16.msra.mxu0 %v11322_v49  ;;  %v9863_v49 = vld [vmem:[%s15194_s9 + $0x2] sm:$0x3] }
0x1ae4   :  { %7784 = vmatprep.subr.bf16.mxu0 %v11330_v22  ;;  %7840 = vmatpush1.bf16.msra.mxu1 %v11337_v19  ;;  %v7281_v53 = vrot.slane %v9863_v49, %v12114_v7  ;;  %v7285_v57 = vrot.slane %v9863_v49, %v12117_v12  ;;  %v11384_v49 = vld [vmem:[#allocation2 + $0x284] ss:$24 sps:$4 sm:$0xff]  }
0x1ae5   :  { %7849 = vmatprep.subr.bf16.mxu1 %v11345_v18 }
0x1ae7   :  { %7785 = vmatpush1.bf16.msra.mxu0 %v11328_v48 }
0x1ae8   :  { %7786 = vmatprep.subr.bf16.mxu0 %v11336_v34  ;;  %7850 = vmatpush2.bf16.msra.mxu1 %v11343_v10 }
0x1ae9   :  { %7851 = vmatprep.subr.bf16.mxu1 %v11351_v40  ;;  %v11364_v40 = vld [vmem:[#allocation2 + $0x3a0] ss:$24 sps:$4 sm:$0xff]  }
0x1aeb   :  { %7787 = vmatpush1.bf16.msra.mxu0 %v11334_v9 }
0x1aec   :  { %7796 = vmatprep.subr.bf16.mxu0 %v11342_v14  ;;  %7852 = vmatpush2.bf16.msra.mxu1 %v11349_v52 }
0x1aef   :  { %7797 = vmatpush2.bf16.msra.mxu0 %v11340_v25 }
0x1af0   :  { %7798 = vmatprep.subr.bf16.mxu0 %v11348_v46 }
0x1af3   :  { %7799 = vmatpush2.bf16.msra.mxu0 %v11346_v16 }
0x1af4   :  { %7800 = vmatprep.subr.bf16.mxu0 %v11354_v27  ;;  %v11369_v27 = vld [vmem:[#allocation2 + $0x374] ss:$24 sps:$4 sm:$0xff]  }
0x1af7   :  { %7801 = vmatpush2.bf16.msra.mxu0 %v11352_v11 }
0x1b5f   :  { %v7189_v41 = vpop.xlane.xlu0 %7188 }
0x1b60   :  { %v7202_v51 = vmul.f32 0.0052083335, %v7189_v41  ;;  %v11357_v41 = vld [vmem:[#allocation2 + $0x3fc] ss:$24 sps:$4 sm:$0xff]  }
0x1b61   :  { %7853 = vmatprep.subr.bf16.mxu1 %v11357_v41  ;;  %v11408_v41 = vld [vmem:[%s15197_s12 + $0x364] ss:$8 sps:$4 sm:$0xff]  }
0x1b62   :  { %v14671_v0 = vsub.f32 %v14638_v45, %v7202_v51  ;;  %v14674_v50 = vsub.f32 %v14635_v59, %v7202_v51  ;;  %v11355_v51 = vld [vmem:[#allocation2 + $0x3f8] ss:$24 sps:$4 sm:$0xff]  }
0x1b63   :  { %v7193_v1 = vpop.xlane.xlu1 %7192  ;;  %7854 = vmatpush2.bf16.msra.mxu1 %v11355_v51 }
0x1b64   :  { %v7203_v36 = vmul.f32 0.0052083335, %v7193_v1  ;;  %v7214_v38 = vmul.f32 %v14671_v0, %v14671_v0  ;;  %v7215_v54 = vmul.f32 %v14674_v50, %v14674_v50  ;;  %v11358_v1 = vld [vmem:[#allocation2 + $0x3c0] ss:$24 sps:$4 sm:$0xff]  }
0x1b66   :  { %v14681_v37 = vsub.f32 %v14647_v6, %v7203_v36  ;;  %v14684_v35 = vsub.f32 %v14644_v3, %v7203_v36  ;;  %v7222_v44 = vsel %vm91_vm0, %v7215_v54, 0.0  ;;  %v11360_v36 = vld [vmem:[#allocation2 + $0x3c4] ss:$24 sps:$4 sm:$0xff]  }
0x1b67   :  { %v7197_v33 = vpop.xlane.xlu0 %7196  ;;  %v7223_v43 = vadd.f32 %v7222_v44, %v7214_v38  ;;  %v11361_v38 = vld [vmem:[#allocation2 + $0x3c8] ss:$24 sps:$4 sm:$0xff]   ;;  %v11363_v54 = vld [vmem:[#allocation2 + $0x3cc] ss:$24 sps:$4 sm:$0xff]   ;;  %7802 = vmatprep.subr.bf16.mxu0 %v11360_v36 }
0x1b68   :  { %v7204_v58 = vmul.f32 0.0052083335, %v7197_v33  ;;  %v7216_v29 = vmul.f32 %v14681_v37, %v14681_v37  ;;  %v7217_v55 = vmul.f32 %v14684_v35, %v14684_v35  ;;  %7855 = vmatprep.subr.bf16.mxu1 %v11363_v54  ;;  %7803 = vmatpush2.bf16.msra.mxu0 %v11358_v1  ;;  %v11366_v44 = vld [vmem:[#allocation2 + $0x3a4] ss:$24 sps:$4 sm:$0xff]   ;;  %v11367_v1 = vld [vmem:[#allocation2 + $0x370] ss:$24 sps:$4 sm:$0xff]  }
0x1b69   :  { %7224 = vadd.xlane.f32.xlu0 %v7223_v43  ;;  %7856 = vmatpush2.bf16.msra.mxu1 %v11361_v38  ;;  %v11402_v33 = vld [vmem:[%s15197_s12 + $0x374] ss:$8 sps:$4 sm:$0xff]   ;;  %v11406_v54 = vld [vmem:[%s15197_s12 + $0x360] ss:$8 sps:$4 sm:$0xff]  }
0x1b6a   :  { %v14692_v63 = vsub.f32 %v14656_v15, %v7204_v58  ;;  %v14695_v30 = vsub.f32 %v14653_v47, %v7204_v58  ;;  %v7226_v42 = vsel %vm91_vm0, %v7217_v55, 0.0  ;;  %7878 = vmatprep.subr.bf16.mxu0 %v11366_v44  ;;  %8557 = vmatprep.subr.bf16.mxu1 %v11402_v33  ;;  %v11372_v44 = vld [vmem:[#allocation2 + $0x344] ss:$24 sps:$4 sm:$0xff]  }
0x1b6b   :  { %v7201_v26 = vpop.xlane.xlu1 %7200  ;;  %v7227_v23 = vadd.f32 %v7226_v42, %v7216_v29 }
0x1b6c   :  { %v7205_v31 = vmul.f32 0.0052083335, %v7201_v26  ;;  %v7218_v62 = vmul.f32 %v14692_v63, %v14692_v63  ;;  %v7219_v21 = vmul.f32 %v14695_v30, %v14695_v30 }
0x1b6d   :  { %7228 = vadd.xlane.f32.xlu1 %v7227_v23 }
0x1b6e   :  { %v14703_v13 = vsub.f32 %v14665_v4, %v7205_v31  ;;  %v14706_v2 = vsub.f32 %v14662_v20, %v7205_v31  ;;  %v7230_v39 = vsel %vm91_vm0, %v7219_v21, 0.0 }
0x1b6f   :  { %v7231_v60 = vadd.f32 %v7230_v39, %v7218_v62 }
0x1b70   :  { %v7220_v5 = vmul.f32 %v14703_v13, %v14703_v13  ;;  %v7221_v28 = vmul.f32 %v14706_v2, %v14706_v2 }
0x1b71   :  { %7232 = vadd.xlane.f32.xlu0 %v7231_v60  ;;  %v9862_v60 = vld [vmem:[%s15193_s8 + $0x2] sm:$0x3] }
0x1b72   :  { %v7234_v17 = vsel %vm91_vm0, %v7221_v28, 0.0 }
0x1b73   :  { %v7235_v56 = vadd.f32 %v7234_v17, %v7220_v5  ;;  %v7262_v17 = vrot.slane %v9862_v60, %v12114_v7 }
0x1b75   :  { %7236 = vadd.xlane.f32.xlu1 %v7235_v56  ;;  %v7266_v56 = vrot.slane %v9862_v60, %v12117_v12  ;;  %v11426_v60 = vld [vmem:[%s15197_s12 + $0x334] ss:$8 sps:$4 sm:$0xff]  }
0x1bf2   :  { %v7225_v43 = vpop.xlane.xlu0 %7224 }
0x1bf3   :  { %v7238_v58 = vmul.f32 0.0052083335, %v7225_v43 }
0x1bf5   :  { %v7242_v29 = vadd.f32 1e-05, %v7238_v58 }
0x1bf6   :  { %v7229_v55 = vpop.xlane.xlu1 %7228 }
0x1bf7   :  { %11708 = vrsqrt.f32 %v7242_v29  ;;  %v7239_v42 = vmul.f32 0.0052083335, %v7229_v55  ;;  %v11370_v55 = vld [vmem:[#allocation2 + $0x340] ss:$24 sps:$4 sm:$0xff]  }
0x1bf9   :  { %v7243_v26 = vadd.f32 1e-05, %v7239_v42 }
0x1bfa   :  { %v7233_v23 = vpop.xlane.xlu0 %7232 }
0x1bfb   :  { %11710 = vrsqrt.f32 %v7243_v26  ;;  %v7240_v31 = vmul.f32 0.0052083335, %v7233_v23  ;;  %v11375_v26 = vld [vmem:[#allocation2 + $0x314] ss:$24 sps:$4 sm:$0xff]   ;;  %v11412_v23 = vld [vmem:[%s15197_s12 + $0x350] ss:$8 sps:$4 sm:$0xff]  }
0x1bfd   :  { %v7244_v62 = vadd.f32 1e-05, %v7240_v31  ;;  %v11420_v31 = vld [vmem:[%s15197_s12 + $0x344] ss:$8 sps:$4 sm:$0xff]  }
0x1bfe   :  { %v7237_v21 = vpop.xlane.xlu1 %7236 }
0x1bff   :  { %11712 = vrsqrt.f32 %v7244_v62  ;;  %v7241_v39 = vmul.f32 0.0052083335, %v7237_v21  ;;  %v11373_v62 = vld [vmem:[#allocation2 + $0x310] ss:$24 sps:$4 sm:$0xff]   ;;  %v11378_v21 = vld [vmem:[#allocation2 + $0x2e4] ss:$24 sps:$4 sm:$0xff]  }
0x1c01   :  { %v7245_v5 = vadd.f32 1e-05, %v7241_v39  ;;  %v11418_v39 = vld [vmem:[%s15197_s12 + $0x340] ss:$8 sps:$4 sm:$0xff]  }
0x1c03   :  { %11714 = vrsqrt.f32 %v7245_v5  ;;  %v11376_v5 = vld [vmem:[#allocation2 + $0x2e0] ss:$24 sps:$4 sm:$0xff]  }
0x1c04   :  { %v11709_v28 = vpop.eup %11708 }
0x1c05   :  { %v7250_v32 = vmul.f32 %v11709_v28, %v14671_v0  ;;  %v7251_v61 = vmul.f32 %v11709_v28, %v14674_v50  ;;  %v11381_v28 = vld [vmem:[#allocation2 + $0x2b4] ss:$24 sps:$4 sm:$0xff]  }
0x1c07   :  { %v7269_v22 = vmul.f32 %v7262_v17, %v7250_v32  ;;  %v7270_v48 = vmul.f32 %v7266_v56, %v7251_v61  ;;  %v11379_v32 = vld [vmem:[#allocation2 + $0x2b0] ss:$24 sps:$4 sm:$0xff]  }
0x1c08   :  { %v11711_v8 = vpop.eup %11710  ;;  %v11430_v61 = vld [vmem:[%s15197_s12 + $0x320] ss:$8 sps:$4 sm:$0xff]  }
0x1c09   :  { %v7252_v34 = vmul.f32 %v11711_v8, %v14681_v37  ;;  %v7253_v9 = vmul.f32 %v11711_v8, %v14684_v35  ;;  %v7289_v14 = vadd.f32 %v7285_v57, %v7270_v48  ;;  %v7288_v25 = vadd.f32 %v7281_v53, %v7269_v22  ;;  %v11400_v37 = vld [vmem:[%s15197_s12 + $0x370] ss:$8 sps:$4 sm:$0xff]   ;;  %v11438_v8 = vld [vmem:[%s15197_s12 + $0x314] ss:$8 sps:$4 sm:$0xff]  }
0x1c0a   :  { %v11382_v22 = vld [vmem:[#allocation2 + $0x280] ss:$24 sps:$4 sm:$0xff]   ;;  %v11387_v48 = vld [vmem:[#allocation2 + $0x254] ss:$24 sps:$4 sm:$0xff]  }
0x1c0b   :  { %v7271_v24 = vmul.f32 %v7262_v17, %v7252_v34  ;;  %v7272_v19 = vmul.f32 %v7266_v56, %v7253_v9  ;;  %v11385_v34 = vld [vmem:[#allocation2 + $0x250] ss:$24 sps:$4 sm:$0xff]   ;;  %v11390_v9 = vld [vmem:[#allocation2 + $0x464] ss:$24 sps:$4 sm:$0xff]  }
0x1c0c   :  { %v11713_v0 = vpop.eup %11712 }
0x1c0d   :  { %v7291_v18 = vadd.f32 %v7285_v57, %v7272_v19  ;;  %v7290_v10 = vadd.f32 %v7281_v53, %v7271_v24  ;;  %v7255_v50 = vmul.f32 %v11713_v0, %v14695_v30  ;;  %v7254_v46 = vmul.f32 %v11713_v0, %v14692_v63  ;;  %v11442_v24 = vld [vmem:[%s15197_s12 + $0x300] ss:$8 sps:$4 sm:$0xff]   ;;  %v11450_v19 = vld [vmem:[%s15197_s12 + $0x3f4] ss:$8 sps:$4 sm:$0xff]  }
0x1c0e   :  { %v11388_v0 = vld [vmem:[#allocation2 + $0x460] ss:$24 sps:$4 sm:$0xff]  }
0x1c0f   :  { %v7297_v16 = vpack.c.bf16 %v7291_v18, %v7289_v14  ;;  %v14733_v52 = vpack.c.bf16 %v7290_v10, %v7288_v25  ;;  %v7274_v11 = vmul.f32 %v7266_v56, %v7255_v50  ;;  %v7273_v51 = vmul.f32 %v7262_v17, %v7254_v46  ;;  %v11393_v14 = vld [vmem:[#allocation2 + $0x434] ss:$24 sps:$4 sm:$0xff]   ;;  %v11448_v25 = vld [vmem:[%s15197_s12 + $0x3f0] ss:$8 sps:$4 sm:$0xff]   ;;  %v11396_v50 = vld [vmem:[#allocation2 + $0x404] ss:$24 sps:$4 sm:$0xff]  }
0x1c10   :  { %v11715_v35 = vpop.eup %11714  ;;  %v11456_v18 = vld [vmem:[%s15197_s12 + $0x3e4] ss:$8 sps:$4 sm:$0xff]   ;;  %v11391_v10 = vld [vmem:[#allocation2 + $0x430] ss:$24 sps:$4 sm:$0xff]  }
0x1c11   :  { %9937 = vmatprep.mubr.msk.bf16.mxu0 %vm91_vm0, %v7297_v16  ;;  %9939 = vmatprep.mubr.msk.bf16.mxu1 %vm91_vm0, %v7297_v16  ;;  %v7257_v63 = vmul.f32 %v11715_v35, %v14706_v2  ;;  %v7256_v30 = vmul.f32 %v11715_v35, %v14703_v13  ;;  %v11414_v13 = vld [vmem:[%s15197_s12 + $0x354] ss:$8 sps:$4 sm:$0xff]   ;;  %v7293_v2 = vadd.f32 %v7285_v57, %v7274_v11  ;;  %v11454_v46 = vld [vmem:[%s15197_s12 + $0x3e0] ss:$8 sps:$4 sm:$0xff]   ;;  %v11460_v35 = vld [vmem:[%s15197_s12 + $0x3d0] ss:$8 sps:$4 sm:$0xff]  }
0x1c12   :  { %7805 = vmatmul.mubr.bf16.vlgmr.msra.gmra.mxu0 %v14733_v52  ;;  %7858 = vmatmul.mubr.bf16.vlgmr.msra.gmra.mxu1 %v14733_v52  ;;  %v7292_v43 = vadd.f32 %v7281_v53, %v7273_v51  ;;  %v11397_v11 = vld [vmem:[#allocation2 + $0x3d0] ss:$24 sps:$4 sm:$0xff]  }
0x1c13   :  { %7879 = vmatpush1.bf16.msra.mxu0 %v11364_v40  ;;  %v7276_v36 = vmul.f32 %v7266_v56, %v7257_v63  ;;  %v7275_v38 = vmul.f32 %v7262_v17, %v7256_v30  ;;  %8558 = vmatpush1.bf16.msra.mxu1 %v11400_v37  ;;  %v11424_v17 = vld [vmem:[%s15197_s12 + $0x330] ss:$8 sps:$4 sm:$0xff]   ;;  %v11432_v56 = vld [vmem:[%s15197_s12 + $0x324] ss:$8 sps:$4 sm:$0xff]   ;;  %v11466_v63 = vld [vmem:[%s15197_s12 + $0x3c0] ss:$8 sps:$4 sm:$0xff]  }
0x1c14   :  { %7880 = vmatprep.subr.bf16.mxu0 %v11369_v27  ;;  %8559 = vmatprep.subr.bf16.mxu1 %v11408_v41  ;;  %v11394_v40 = vld [vmem:[#allocation2 + $0x400] ss:$24 sps:$4 sm:$0xff]   ;;  %v11399_v37 = vld [vmem:[#allocation2 + $0x3d4] ss:$24 sps:$4 sm:$0xff]  }
0x1c15   :  { %v7295_v33 = vadd.f32 %v7285_v57, %v7276_v36  ;;  %v7294_v58 = vadd.f32 %v7281_v53, %v7275_v38  ;;  %v11436_v53 = vld [vmem:[%s15197_s12 + $0x310] ss:$8 sps:$4 sm:$0xff]   ;;  %v11444_v57 = vld [vmem:[%s15197_s12 + $0x304] ss:$8 sps:$4 sm:$0xff]   ;;  %v11405_v41 = vld [vmem:[%s15197_s12 + $0x474] ss:$8 sps:$4 sm:$0xff]  }
0x1c16   :  { %v11468_v27 = vld [vmem:[%s15197_s12 + $0x3c4] ss:$8 sps:$4 sm:$0xff]   ;;  %v11474_v30 = vld [vmem:[%s15197_s12 + $0x3b4] ss:$8 sps:$4 sm:$0xff]   ;;  %v11403_v51 = vld [vmem:[%s15197_s12 + $0x470] ss:$8 sps:$4 sm:$0xff]  }
0x1c17   :  { %7881 = vmatpush1.bf16.msra.mxu0 %v11367_v1  ;;  %v14753_v29 = vpack.c.bf16 %v7295_v33, %v7293_v2  ;;  %v14755_v42 = vpack.c.bf16 %v7294_v58, %v7292_v43  ;;  %8560 = vmatpush1.bf16.msra.mxu1 %v11406_v54  ;;  %v11411_v1 = vld [vmem:[%s15197_s12 + $0x464] ss:$8 sps:$4 sm:$0xff]   ;;  %v11472_v36 = vld [vmem:[%s15197_s12 + $0x3b0] ss:$8 sps:$4 sm:$0xff]   ;;  %v11409_v38 = vld [vmem:[%s15197_s12 + $0x460] ss:$8 sps:$4 sm:$0xff]  }
0x1c18   :  { %7882 = vmatprep.subr.bf16.mxu0 %v11372_v44  ;;  %8561 = vmatprep.subr.bf16.mxu1 %v11414_v13  ;;  %v11417_v54 = vld [vmem:[%s15197_s12 + $0x454] ss:$8 sps:$4 sm:$0xff]   ;;  %v11415_v44 = vld [vmem:[%s15197_s12 + $0x450] ss:$8 sps:$4 sm:$0xff]   ;;  %v11421_v13 = vld [vmem:[%s15197_s12 + $0x440] ss:$8 sps:$4 sm:$0xff]  }
0x1c19   :  { %9938 = vmatprep.mubr.msk.bf16.mxu0 %vm91_vm0, %v14753_v29  ;;  %9940 = vmatprep.mubr.msk.bf16.mxu1 %vm91_vm0, %v14753_v29  ;;  %v11429_v2 = vld [vmem:[%s15197_s12 + $0x434] ss:$8 sps:$4 sm:$0xff]   ;;  %v11427_v33 = vld [vmem:[%s15197_s12 + $0x430] ss:$8 sps:$4 sm:$0xff]   ;;  %v11435_v43 = vld [vmem:[%s15197_s12 + $0x424] ss:$8 sps:$4 sm:$0xff]  }
0x1c1a   :  { %7815 = vmatmul.mubr.bf16.gmra.mxu0 %v14755_v42  ;;  %7868 = vmatmul.mubr.bf16.gmra.mxu1 %v14755_v42  ;;  %v11480_v58 = vld [vmem:[%s15197_s12 + $0x3a4] ss:$8 sps:$4 sm:$0xff]  }
0x1c1b   :  { %7883 = vmatpush1.bf16.msra.mxu0 %v11370_v55  ;;  %9941 = vmatprep.mubr.msk.bf16.mxu0 %vm91_vm0, %v7297_v16  ;;  %v11462_v16 = vld [vmem:[%s15197_s12 + $0x3d4] ss:$8 sps:$4 sm:$0xff]   ;;  %v11478_v55 = vld [vmem:[%s15197_s12 + $0x3a0] ss:$8 sps:$4 sm:$0xff]  }
0x1c1c   :  { %7884 = vmatprep.subr.bf16.mxu0 %v11375_v26  ;;  %8562 = vmatpush1.bf16.msra.mxu1 %v11412_v23  ;;  %v11486_v26 = vld [vmem:[%s15197_s12 + $0x394] ss:$8 sps:$4 sm:$0xff]   ;;  %v11439_v23 = vld [vmem:[%s15197_s12 + $0x410] ss:$8 sps:$4 sm:$0xff]  }
0x1c1d   :  { %8563 = vmatprep.subr.bf16.mxu1 %v11420_v31  ;;  %v11484_v31 = vld [vmem:[%s15197_s12 + $0x390] ss:$8 sps:$4 sm:$0xff]  }
0x1c1f   :  { %7885 = vmatpush1.bf16.msra.mxu0 %v11373_v62  ;;  %v11447_v62 = vld [vmem:[%s15197_s12 + $0x404] ss:$8 sps:$4 sm:$0xff]  }
0x1c20   :  { %7886 = vmatprep.subr.bf16.mxu0 %v11378_v21  ;;  %8564 = vmatpush1.bf16.msra.mxu1 %v11418_v39  ;;  %v11492_v21 = vld [vmem:[%s15197_s12 + $0x384] ss:$8 sps:$4 sm:$0xff]   ;;  %v11445_v39 = vld [vmem:[%s15197_s12 + $0x400] ss:$8 sps:$4 sm:$0xff]  }
0x1c21   :  { %8565 = vmatprep.subr.bf16.mxu1 %v11426_v60  ;;  %v11490_v60 = vld [vmem:[%s15197_s12 + $0x380] ss:$8 sps:$4 sm:$0xff]  }
0x1c23   :  { %7887 = vmatpush1.bf16.msra.mxu0 %v11376_v5  ;;  %v11453_v5 = vld [vmem:[%s15197_s12 + $0x4f4] ss:$8 sps:$4 sm:$0xff]  }
0x1c24   :  { %7888 = vmatprep.subr.bf16.mxu0 %v11381_v28  ;;  %8566 = vmatpush1.bf16.msra.mxu1 %v11424_v17  ;;  %v11498_v28 = vld [vmem:[%s15197_s12 + $0x574] ss:$8 sps:$4 sm:$0xff]   ;;  %v11451_v17 = vld [vmem:[%s15197_s12 + $0x4f0] ss:$8 sps:$4 sm:$0xff]  }
0x1c25   :  { %8567 = vmatprep.subr.bf16.mxu1 %v11432_v56  ;;  %v11459_v56 = vld [vmem:[%s15197_s12 + $0x4e4] ss:$8 sps:$4 sm:$0xff]  }
0x1c27   :  { %7889 = vmatpush1.bf16.msra.mxu0 %v11379_v32  ;;  %v11457_v32 = vld [vmem:[%s15197_s12 + $0x4e0] ss:$8 sps:$4 sm:$0xff]  }
0x1c28   :  { %7890 = vmatprep.subr.bf16.mxu0 %v11384_v49  ;;  %8568 = vmatpush1.bf16.msra.mxu1 %v11430_v61  ;;  %v11465_v49 = vld [vmem:[%s15197_s12 + $0x4d4] ss:$8 sps:$4 sm:$0xff]   ;;  %v11463_v61 = vld [vmem:[%s15197_s12 + $0x4d0] ss:$8 sps:$4 sm:$0xff]  }
0x1c29   :  { %8569 = vmatprep.subr.bf16.mxu1 %v11438_v8  ;;  %v11471_v8 = vld [vmem:[%s15197_s12 + $0x4c4] ss:$8 sps:$4 sm:$0xff]  }
0x1c2b   :  { %7891 = vmatpush1.bf16.msra.mxu0 %v11382_v22  ;;  %v11469_v22 = vld [vmem:[%s15197_s12 + $0x4c0] ss:$8 sps:$4 sm:$0xff]  }
0x1c2c   :  { %7892 = vmatprep.subr.bf16.mxu0 %v11387_v48  ;;  %8570 = vmatpush1.bf16.msra.mxu1 %v11436_v53  ;;  %v11477_v48 = vld [vmem:[%s15197_s12 + $0x4b4] ss:$8 sps:$4 sm:$0xff]   ;;  %v11475_v53 = vld [vmem:[%s15197_s12 + $0x4b0] ss:$8 sps:$4 sm:$0xff]  }
0x1c2d   :  { %8571 = vmatprep.subr.bf16.mxu1 %v11444_v57  ;;  %v11483_v57 = vld [vmem:[%s15197_s12 + $0x4a4] ss:$8 sps:$4 sm:$0xff]  }
0x1c2f   :  { %7893 = vmatpush1.bf16.msra.mxu0 %v11385_v34  ;;  %v11481_v34 = vld [vmem:[%s15197_s12 + $0x4a0] ss:$8 sps:$4 sm:$0xff]  }
0x1c30   :  { %7902 = vmatprep.subr.bf16.mxu0 %v11390_v9  ;;  %8572 = vmatpush1.bf16.msra.mxu1 %v11442_v24  ;;  %v11489_v9 = vld [vmem:[%s15197_s12 + $0x494] ss:$8 sps:$4 sm:$0xff]   ;;  %v11487_v24 = vld [vmem:[%s15197_s12 + $0x490] ss:$8 sps:$4 sm:$0xff]  }
0x1c31   :  { %8573 = vmatprep.subr.bf16.mxu1 %v11450_v19  ;;  %v11495_v19 = vld [vmem:[%s15197_s12 + $0x484] ss:$8 sps:$4 sm:$0xff]  }
0x1c33   :  { %7903 = vmatpush2.bf16.msra.mxu0 %v11388_v0  ;;  %v11493_v0 = vld [vmem:[%s15197_s12 + $0x480] ss:$8 sps:$4 sm:$0xff]  }
0x1c34   :  { %7904 = vmatprep.subr.bf16.mxu0 %v11393_v14  ;;  %8574 = vmatpush2.bf16.msra.mxu1 %v11448_v25  ;;  %v14951_v14 = vld [vmem:[%s15196_s11 + $0x6] sm:$0x3f] }
0x1c35   :  { %8575 = vmatprep.subr.bf16.mxu1 %v11456_v18 }
0x1c37   :  { %7905 = vmatpush2.bf16.msra.mxu0 %v11391_v10  ;;  %v7383_v10 = vrot.slane %v14951_v14, %v12117_v12 }
0x1c38   :  { %7906 = vmatprep.subr.bf16.mxu0 %v11396_v50  ;;  %8576 = vmatpush2.bf16.msra.mxu1 %v11454_v46  ;;  %v15297_v50 = vld [vmem:[#allocation13_spill] sm:$0xff] }
0x1c39   :  { %8577 = vmatprep.subr.bf16.mxu1 %v11462_v16  ;;  %v7391_v46 = vrot.slane %v14951_v14, %v15297_v50  ;;  %v7379_v16 = vrot.slane %v14951_v14, %v12114_v7  ;;  %v11504_v50 = vld [vmem:[%s15197_s12 + $0x554] ss:$8 sps:$4 sm:$0xff]  }
0x1c3b   :  { %7907 = vmatpush2.bf16.msra.mxu0 %v11394_v40  ;;  %v15298_v40 = vld [vmem:[#allocation12_spill] sm:$0xff] }
0x1c3c   :  { %7908 = vmatprep.subr.bf16.mxu0 %v11399_v37  ;;  %8578 = vmatpush2.bf16.msra.mxu1 %v11460_v35  ;;  %v7387_v37 = vrot.slane %v14951_v14, %v15298_v40 }
0x1c3d   :  { %8579 = vmatprep.subr.bf16.mxu1 %v11468_v27 }
0x1c3f   :  { %7909 = vmatpush2.bf16.msra.mxu0 %v11397_v11 }
0x1c40   :  { %8610 = vmatprep.subr.bf16.mxu0 %v11405_v41  ;;  %8580 = vmatpush2.bf16.msra.mxu1 %v11466_v63 }
0x1c41   :  { %8581 = vmatprep.subr.bf16.mxu1 %v11474_v30 }
0x1c42   :  { %7911 = vmatmul.mubr.bf16.vlgmr.msra.gmra.mxu0 %v14733_v52  ;;  %v11423_v52 = vld [vmem:[%s15197_s12 + $0x444] ss:$8 sps:$4 sm:$0xff]  }
0x1c43   :  { %9942 = vmatprep.mubr.msk.bf16.mxu0 %vm91_vm0, %v14753_v29  ;;  %8611 = vmatpush1.bf16.msra.mxu0 %v11403_v51  ;;  %v11433_v29 = vld [vmem:[%s15197_s12 + $0x420] ss:$8 sps:$4 sm:$0xff]  }
0x1c44   :  { %8612 = vmatprep.subr.bf16.mxu0 %v11411_v1  ;;  %8582 = vmatpush2.bf16.msra.mxu1 %v11472_v36 }
0x1c45   :  { %8583 = vmatprep.subr.bf16.mxu1 %v11480_v58 }
0x1c47   :  { %8613 = vmatpush1.bf16.msra.mxu0 %v11409_v38 }
0x1c48   :  { %8614 = vmatprep.subr.bf16.mxu0 %v11417_v54  ;;  %8584 = vmatpush2.bf16.msra.mxu1 %v11478_v55 }
0x1c49   :  { %8585 = vmatprep.subr.bf16.mxu1 %v11486_v26 }
0x1c4a   :  { %7921 = vmatmul.mubr.bf16.gmra.mxu0 %v14755_v42  ;;  %v11441_v42 = vld [vmem:[%s15197_s12 + $0x414] ss:$8 sps:$4 sm:$0xff]  }
0x1c4b   :  { %8615 = vmatpush1.bf16.msra.mxu0 %v11415_v44 }
0x1c4c   :  { %8616 = vmatprep.subr.bf16.mxu0 %v11423_v52  ;;  %8586 = vmatpush2.bf16.msra.mxu1 %v11484_v31 }
0x1c4d   :  { %8587 = vmatprep.subr.bf16.mxu1 %v11492_v21 }
0x1c4f   :  { %8617 = vmatpush1.bf16.msra.mxu0 %v11421_v13 }
0x1c50   :  { %8618 = vmatprep.subr.bf16.mxu0 %v11429_v2  ;;  %8588 = vmatpush2.bf16.msra.mxu1 %v11490_v60 }
0x1c51   :  { %8663 = vmatprep.subr.bf16.mxu1 %v11498_v28 }
0x1c53   :  { %8619 = vmatpush1.bf16.msra.mxu0 %v11427_v33 }
0x1c54   :  { %8620 = vmatprep.subr.bf16.mxu0 %v11435_v43 }
0x1c57   :  { %8621 = vmatpush1.bf16.msra.mxu0 %v11433_v29 }
0x1c58   :  { %8622 = vmatprep.subr.bf16.mxu0 %v11441_v42 }
0x1c5b   :  { %8623 = vmatpush1.bf16.msra.mxu0 %v11439_v23 }
0x1c5c   :  { %8624 = vmatprep.subr.bf16.mxu0 %v11447_v62 }
0x1c5f   :  { %8625 = vmatpush1.bf16.msra.mxu0 %v11445_v39 }
0x1c60   :  { %8626 = vmatprep.subr.bf16.mxu0 %v11453_v5  ;;  %v11496_v5 = vld [vmem:[%s15197_s12 + $0x570] ss:$8 sps:$4 sm:$0xff]  }
0x1c63   :  { %8627 = vmatpush2.bf16.msra.mxu0 %v11451_v17 }
0x1c64   :  { %8628 = vmatprep.subr.bf16.mxu0 %v11459_v56 }
0x1c67   :  { %8629 = vmatpush2.bf16.msra.mxu0 %v11457_v32 }
0x1c68   :  { %8630 = vmatprep.subr.bf16.mxu0 %v11465_v49 }
0x1c6b   :  { %8631 = vmatpush2.bf16.msra.mxu0 %v11463_v61  ;;  %v11501_v61 = vld [vmem:[%s15197_s12 + $0x564] ss:$8 sps:$4 sm:$0xff]  }
0x1c6c   :  { %8632 = vmatprep.subr.bf16.mxu0 %v11471_v8 }
0x1c6f   :  { %8633 = vmatpush2.bf16.msra.mxu0 %v11469_v22 }
0x1c70   :  { %8634 = vmatprep.subr.bf16.mxu0 %v11477_v48 }
0x1c73   :  { %8635 = vmatpush2.bf16.msra.mxu0 %v11475_v53 }
0x1c74   :  { %8636 = vmatprep.subr.bf16.mxu0 %v11483_v57 }
0x1c77   :  { %8637 = vmatpush2.bf16.msra.mxu0 %v11481_v34 }
0x1c78   :  { %8638 = vmatprep.subr.bf16.mxu0 %v11489_v9 }
0x1c7b   :  { %8639 = vmatpush2.bf16.msra.mxu0 %v11487_v24 }
0x1c7c   :  { %8640 = vmatprep.subr.bf16.mxu0 %v11495_v19 }
0x1c7f   :  { %8641 = vmatpush2.bf16.msra.mxu0 %v11493_v0  ;;  %v11499_v0 = vld [vmem:[%s15197_s12 + $0x560] ss:$8 sps:$4 sm:$0xff]  }
0x1cd2   :  { %v7806_v25 = vpop.f32.mrf.mxu0  ;;  %v7859_v18 = vpop.f32.mrf.mxu1 }
0x1cd3   :  { %v7807_v36 = vadd.f32 %v7806_v25, %v7379_v16  ;;  %v7860_v38 = vadd.f32 %v7859_v18, %v7387_v37 }
0x1cd4   :  { %v7808_v35 = vpop.f32.mrf.mxu0  ;;  %v7861_v27 = vpop.f32.mrf.mxu1 }
0x1cd5   :  { %v7809_v63 = vadd.f32 %v7808_v35, %v7383_v10  ;;  %v7862_v30 = vadd.f32 %v7861_v27, %v7391_v46  ;;  %v7931_v23 = vmax.f32 %v7807_v36, 0.0  ;;  %v7933_v31 = vmax.f32 %v7860_v38, 0.0  ;;  %v11510_v36 = vld [vmem:[%s15197_s12 + $0x534] ss:$8 sps:$4 sm:$0xff]   ;;  %v11508_v38 = vld [vmem:[%s15197_s12 + $0x530] ss:$8 sps:$4 sm:$0xff]  }
0x1cd6   :  { %v7810_v11 = vpop.f32.mrf.mxu0  ;;  %v7863_v41 = vpop.f32.mrf.mxu1 }
0x1cd7   :  { %v7811_v51 = vadd.f32 %v7810_v11, %v7379_v16  ;;  %v7864_v1 = vadd.f32 %v7863_v41, %v7387_v37  ;;  %v7932_v29 = vmax.f32 %v7809_v63, 0.0  ;;  %v7934_v55 = vmax.f32 %v7862_v30, 0.0  ;;  %v11502_v41 = vld [vmem:[%s15197_s12 + $0x550] ss:$8 sps:$4 sm:$0xff]  }
0x1cd8   :  { %v7812_v54 = vpop.f32.mrf.mxu0  ;;  %v7865_v44 = vpop.f32.mrf.mxu1 }
0x1cd9   :  { %v7813_v52 = vadd.f32 %v7812_v54, %v7383_v10  ;;  %v7866_v13 = vadd.f32 %v7865_v44, %v7391_v46  ;;  %v7937_v2 = vmax.f32 %v7811_v51, 0.0  ;;  %v7939_v33 = vmax.f32 %v7864_v1, 0.0  ;;  %v11507_v51 = vld [vmem:[%s15197_s12 + $0x544] ss:$8 sps:$4 sm:$0xff]   ;;  %v11505_v1 = vld [vmem:[%s15197_s12 + $0x540] ss:$8 sps:$4 sm:$0xff]  }
0x1cda   :  { %v7816_v43 = vpop.f32.mrf.mxu0  ;;  %v7869_v58 = vpop.f32.mrf.mxu1  ;;  %v11513_v54 = vld [vmem:[%s15197_s12 + $0x524] ss:$8 sps:$4 sm:$0xff]   ;;  %v11511_v44 = vld [vmem:[%s15197_s12 + $0x520] ss:$8 sps:$4 sm:$0xff]  }
0x1cdb   :  { %v7938_v42 = vmax.f32 %v7813_v52, 0.0  ;;  %v7940_v26 = vmax.f32 %v7866_v13, 0.0  ;;  %v7955_v28 = vpack.c.bf16 %v7937_v2, %v7931_v23  ;;  %v7957_v17 = vpack.c.bf16 %v7939_v33, %v7933_v31  ;;  %v11516_v52 = vld [vmem:[%s15197_s12 + $0x514] ss:$8 sps:$4 sm:$0xff]   ;;  %v11514_v13 = vld [vmem:[%s15197_s12 + $0x510] ss:$8 sps:$4 sm:$0xff]  }
0x1cdc   :  { %v7818_v62 = vpop.f32.mrf.mxu0  ;;  %v7871_v21 = vpop.f32.mrf.mxu1  ;;  %v7817_v53 = vadd.f32 %v7816_v43, %v7379_v16  ;;  %v7870_v57 = vadd.f32 %v7869_v58, %v7387_v37  ;;  %v11519_v2 = vld [vmem:[%s15197_s12 + $0x504] ss:$8 sps:$4 sm:$0xff]   ;;  %v11517_v33 = vld [vmem:[%s15197_s12 + $0x500] ss:$8 sps:$4 sm:$0xff]   ;;  %v11522_v43 = vld [vmem:[%s15197_s12 + $0x5f4] ss:$8 sps:$4 sm:$0xff]  }
0x1cdd   :  { %v7956_v39 = vpack.c.bf16 %v7938_v42, %v7932_v29  ;;  %v7958_v60 = vpack.c.bf16 %v7940_v26, %v7934_v55  ;;  %v7819_v56 = vadd.f32 %v7818_v62, %v7383_v10  ;;  %v7872_v8 = vadd.f32 %v7871_v21, %v7391_v46  ;;  %v11520_v58 = vld [vmem:[%s15197_s12 + $0x5f0] ss:$8 sps:$4 sm:$0xff]   ;;  %v11525_v29 = vld [vmem:[%s15197_s12 + $0x5e4] ss:$8 sps:$4 sm:$0xff]   ;;  %v11523_v55 = vld [vmem:[%s15197_s12 + $0x5e0] ss:$8 sps:$4 sm:$0xff]  }
0x1cde   :  { %v7820_v32 = vpop.f32.mrf.mxu0  ;;  %v7873_v49 = vpop.f32.mrf.mxu1  ;;  %v7943_v27 = vmax.f32 %v7817_v53, 0.0  ;;  %v7945_v11 = vmax.f32 %v7870_v57, 0.0  ;;  %v11528_v26 = vld [vmem:[%s15197_s12 + $0x5d4] ss:$8 sps:$4 sm:$0xff]   ;;  %v11526_v21 = vld [vmem:[%s15197_s12 + $0x5d0] ss:$8 sps:$4 sm:$0xff]  }
0x1cdf   :  { %v7821_v22 = vadd.f32 %v7820_v32, %v7379_v16  ;;  %v7874_v48 = vadd.f32 %v7873_v49, %v7387_v37  ;;  %8589 = vmatprep.mubr.bf16.mxu1 %v7956_v39  ;;  %8642 = vmatprep.mubr.bf16.mxu0 %v7958_v60  ;;  %v7944_v16 = vmax.f32 %v7819_v56, 0.0  ;;  %v7946_v40 = vmax.f32 %v7872_v8, 0.0  ;;  %v15299_v23 = vld [vmem:[#allocation15_spill] sm:$0xff]  ;;  %v11531_v60 = vld [vmem:[%s15197_s12 + $0x5c4] ss:$8 sps:$4 sm:$0xff]  }
0x1ce0   :  { %v7822_v34 = vpop.f32.mrf.mxu0  ;;  %v7875_v9 = vpop.f32.mrf.mxu1  ;;  %8590 = vmatmul.mubr.bf16.vlgmr.msra.gmra.mxu1 %v7955_v28  ;;  %8643 = vmatmul.mubr.bf16.vlgmr.msra.gmra.mxu0 %v7957_v17  ;;  %v7399_v31 = vrot.slane %v14951_v14, %v15299_v23  ;;  %v11529_v56 = vld [vmem:[%s15197_s12 + $0x5c0] ss:$8 sps:$4 sm:$0xff]   ;;  %v11534_v49 = vld [vmem:[%s15197_s12 + $0x5b4] ss:$8 sps:$4 sm:$0xff]   ;;  %v11532_v53 = vld [vmem:[%s15197_s12 + $0x5b0] ss:$8 sps:$4 sm:$0xff]  }
0x1ce1   :  { %v7823_v24 = vadd.f32 %v7822_v34, %v7383_v10  ;;  %v7876_v19 = vadd.f32 %v7875_v9, %v7391_v46  ;;  %8664 = vmatpush1.bf16.msra.mxu1 %v11496_v5  ;;  %v7949_v25 = vmax.f32 %v7821_v22, 0.0  ;;  %v7951_v18 = vmax.f32 %v7874_v48, 0.0  ;;  %v11537_v57 = vld [vmem:[%s15197_s12 + $0x5a4] ss:$8 sps:$4 sm:$0xff]   ;;  %v11535_v9 = vld [vmem:[%s15197_s12 + $0x5a0] ss:$8 sps:$4 sm:$0xff]  }
0x1ce2   :  { %8665 = vmatprep.subr.bf16.mxu1 %v11501_v61 }
0x1ce3   :  { %v7950_v37 = vmax.f32 %v7823_v24, 0.0  ;;  %v7952_v35 = vmax.f32 %v7876_v19, 0.0  ;;  %v7961_v63 = vpack.c.bf16 %v7949_v25, %v7943_v27  ;;  %v7963_v30 = vpack.c.bf16 %v7951_v18, %v7945_v11  ;;  %v11540_v24 = vld [vmem:[%s15197_s12 + $0x594] ss:$8 sps:$4 sm:$0xff]   ;;  %v11538_v18 = vld [vmem:[%s15197_s12 + $0x590] ss:$8 sps:$4 sm:$0xff]  }
0x1ce4   :  { %v15300_v19 = vld [vmem:[#allocation14_spill] sm:$0xff] }
0x1ce5   :  { %v7962_v10 = vpack.c.bf16 %v7950_v37, %v7944_v16  ;;  %v7964_v46 = vpack.c.bf16 %v7952_v35, %v7946_v40  ;;  %8666 = vmatpush1.bf16.msra.mxu1 %v11499_v0  ;;  %v7395_v0 = vrot.slane %v14951_v14, %v15300_v19  ;;  %v11543_v16 = vld [vmem:[%s15197_s12 + $0x584] ss:$8 sps:$4 sm:$0xff]   ;;  %v11541_v14 = vld [vmem:[%s15197_s12 + $0x580] ss:$8 sps:$4 sm:$0xff]  }
0x1ce6   :  { %8667 = vmatprep.subr.bf16.mxu1 %v11504_v50 }
0x1ce7   :  { %8599 = vmatprep.mubr.bf16.mxu1 %v7962_v10  ;;  %8652 = vmatprep.mubr.bf16.mxu0 %v7964_v46 }
0x1ce8   :  { %8600 = vmatmul.mubr.bf16.gmra.mxu1 %v7961_v63  ;;  %8653 = vmatmul.mubr.bf16.gmra.mxu0 %v7963_v30 }
0x1ce9   :  { %8668 = vmatpush1.bf16.msra.mxu1 %v11502_v41 }
0x1cea   :  { %8669 = vmatprep.subr.bf16.mxu1 %v11507_v51 }
0x1ced   :  { %8670 = vmatpush1.bf16.msra.mxu1 %v11505_v1 }
0x1cee   :  { %8671 = vmatprep.subr.bf16.mxu1 %v11510_v36 }
0x1cf1   :  { %8672 = vmatpush1.bf16.msra.mxu1 %v11508_v38 }
0x1cf2   :  { %8673 = vmatprep.subr.bf16.mxu1 %v11513_v54 }
0x1cf5   :  { %8674 = vmatpush1.bf16.msra.mxu1 %v11511_v44 }
0x1cf6   :  { %8675 = vmatprep.subr.bf16.mxu1 %v11516_v52 }
0x1cf9   :  { %8676 = vmatpush1.bf16.msra.mxu1 %v11514_v13 }
0x1cfa   :  { %8677 = vmatprep.subr.bf16.mxu1 %v11519_v2 }
0x1cfd   :  { %8678 = vmatpush1.bf16.msra.mxu1 %v11517_v33 }
0x1cfe   :  { %8679 = vmatprep.subr.bf16.mxu1 %v11522_v43 }
0x1d01   :  { %8680 = vmatpush2.bf16.msra.mxu1 %v11520_v58  ;;  %v10039_v58 = vld [vmem:[%s15198_s13 + $0x2] sm:$0x3] }
0x1d02   :  { %v7912_v42 = vpop.f32.mrf.mxu0  ;;  %8681 = vmatprep.subr.bf16.mxu1 %v11525_v29 }
0x1d03   :  { %v7913_v37 = vadd.f32 %v7912_v42, %v7395_v0 }
0x1d04   :  { %v7914_v62 = vpop.f32.mrf.mxu0 }
0x1d05   :  { %8682 = vmatpush2.bf16.msra.mxu1 %v11523_v55  ;;  %v7915_v5 = vadd.f32 %v7914_v62, %v7399_v31  ;;  %v7935_v10 = vmax.f32 %v7913_v37, 0.0  ;;  %v8070_v55 = vrot.slane %v10039_v58, %v12114_v7 }
0x1d06   :  { %v7916_v39 = vpop.f32.mrf.mxu0  ;;  %8683 = vmatprep.subr.bf16.mxu1 %v11528_v26  ;;  %v8074_v26 = vrot.slane %v10039_v58, %v12117_v12 }
0x1d07   :  { %v7936_v61 = vmax.f32 %v7915_v5, 0.0  ;;  %v7917_v50 = vadd.f32 %v7916_v39, %v7395_v0 }
0x1d08   :  { %v7918_v28 = vpop.f32.mrf.mxu0 }
0x1d09   :  { %v7919_v17 = vadd.f32 %v7918_v28, %v7399_v31  ;;  %8684 = vmatpush2.bf16.msra.mxu1 %v11526_v21  ;;  %v7941_v27 = vmax.f32 %v7917_v50, 0.0 }
0x1d0a   :  { %v7922_v32 = vpop.f32.mrf.mxu0  ;;  %8685 = vmatprep.subr.bf16.mxu1 %v11531_v60 }
0x1d0b   :  { %v7942_v8 = vmax.f32 %v7919_v17, 0.0  ;;  %v7959_v41 = vpack.c.bf16 %v7941_v27, %v7935_v10  ;;  %v7923_v51 = vadd.f32 %v7922_v32, %v7395_v0 }
0x1d0c   :  { %v7924_v22 = vpop.f32.mrf.mxu0 }
0x1d0d   :  { %v7960_v48 = vpack.c.bf16 %v7942_v8, %v7936_v61  ;;  %8686 = vmatpush2.bf16.msra.mxu1 %v11529_v56  ;;  %v7925_v35 = vadd.f32 %v7924_v22, %v7399_v31  ;;  %v7947_v36 = vmax.f32 %v7923_v51, 0.0 }
0x1d0e   :  { %8687 = vmatprep.subr.bf16.mxu1 %v11534_v49  ;;  %v7926_v34 = vpop.f32.mrf.mxu0 }
0x1d0f   :  { %8695 = vmatprep.mubr.bf16.mxu1 %v7960_v48  ;;  %v7948_v46 = vmax.f32 %v7925_v35, 0.0  ;;  %v7927_v63 = vadd.f32 %v7926_v34, %v7395_v0 }
0x1d10   :  { %v7928_v25 = vpop.f32.mrf.mxu0 }
0x1d11   :  { %8688 = vmatpush2.bf16.msra.mxu1 %v11532_v53  ;;  %v7929_v40 = vadd.f32 %v7928_v25, %v7399_v31  ;;  %v7953_v1 = vmax.f32 %v7927_v63, 0.0 }
0x1d12   :  { %8689 = vmatprep.subr.bf16.mxu1 %v11537_v57 }
0x1d13   :  { %v7954_v11 = vmax.f32 %v7929_v40, 0.0  ;;  %v7965_v38 = vpack.c.bf16 %v7953_v1, %v7947_v36 }
0x1d15   :  { %8690 = vmatpush2.bf16.msra.mxu1 %v11535_v9  ;;  %v7966_v30 = vpack.c.bf16 %v7954_v11, %v7948_v46 }
0x1d16   :  { %8691 = vmatprep.subr.bf16.mxu1 %v11540_v24 }
0x1d19   :  { %8692 = vmatpush2.bf16.msra.mxu1 %v11538_v18 }
0x1d1a   :  { %8693 = vmatprep.subr.bf16.mxu1 %v11543_v16 }
0x1d1d   :  { %8694 = vmatpush2.bf16.msra.mxu1 %v11541_v14 }
0x1d20   :  { %8696 = vmatmul.mubr.bf16.vlgmr.msra.gmra.mxu1 %v7959_v41 }
0x1d21   :  { %8705 = vmatprep.mubr.bf16.mxu1 %v7966_v30 }
0x1d28   :  { %8706 = vmatmul.mubr.bf16.gmra.mxu1 %v7965_v38 }
0x1da0   :  { %v8591_v54 = vpop.f32.mrf.mxu1  ;;  %v8644_v2 = vpop.f32.mrf.mxu0 }
0x1da1   :  { %v8592_v31 = vadd.f32 %v8591_v54, %v8070_v55 }
0x1da2   :  { %v8593_v44 = vpop.f32.mrf.mxu1  ;;  %v8646_v43 = vpop.f32.mrf.mxu0 }
0x1da3   :  { %v8594_v21 = vadd.f32 %v8593_v44, %v8074_v26  ;;  %v8645_v60 = vadd.f32 %v8644_v2, %v8592_v31 }
0x1da4   :  { %v8595_v52 = vpop.f32.mrf.mxu1  ;;  %v8648_v42 = vpop.f32.mrf.mxu0 }
0x1da5   :  { %v8596_v5 = vadd.f32 %v8595_v52, %v8070_v55  ;;  %v8647_v56 = vadd.f32 %v8646_v43, %v8594_v21 }
0x1da6   :  { %v8597_v13 = vpop.f32.mrf.mxu1  ;;  %v8650_v62 = vpop.f32.mrf.mxu0 }
0x1da7   :  { %v8598_v32 = vadd.f32 %v8597_v13, %v8074_v26  ;;  %v8649_v22 = vadd.f32 %v8648_v42, %v8596_v5 }
0x1da8   :  { %v8601_v33 = vpop.f32.mrf.mxu1  ;;  %v8654_v28 = vpop.f32.mrf.mxu0 }
0x1da9   :  { %v8602_v48 = vadd.f32 %v8601_v33, %v8070_v55  ;;  %v8651_v34 = vadd.f32 %v8650_v62, %v8598_v32 }
0x1daa   :  { %v8603_v29 = vpop.f32.mrf.mxu1  ;;  %v8656_v53 = vpop.f32.mrf.mxu0 }
0x1dab   :  { %v8604_v9 = vadd.f32 %v8603_v29, %v8074_v26  ;;  %v8655_v16 = vadd.f32 %v8654_v28, %v8602_v48 }
0x1dac   :  { %v8605_v23 = vpop.f32.mrf.mxu1  ;;  %v8658_v37 = vpop.f32.mrf.mxu0 }
0x1dad   :  { %v8606_v40 = vadd.f32 %v8605_v23, %v8070_v55  ;;  %v8657_v27 = vadd.f32 %v8656_v53, %v8604_v9  ;;  %v11545_v55 = vld [vmem:[%s15201_s16 + $0x30] sm:$0xff]  }
0x1dae   :  { %v8607_v39 = vpop.f32.mrf.mxu1  ;;  %v8660_v51 = vpop.f32.mrf.mxu0 }
0x1daf   :  { %v8608_v11 = vadd.f32 %v8607_v39, %v8074_v26  ;;  %v8659_v30 = vadd.f32 %v8658_v37, %v8606_v40  ;;  %v11548_v37 = vld [vmem:[%s15201_s16 + $0x18] sm:$0xff]  }
0x1db1   :  { %v8661_v38 = vadd.f32 %v8660_v51, %v8608_v11  ;;  %v11550_v11 = vld [vmem:[%s15201_s16 + $0x8] sm:$0xff]  }
0x1de0   :  { %v8697_v17 = vpop.f32.mrf.mxu1 }
0x1de1   :  { %v8698_v49 = vadd.f32 %v8697_v17, %v8645_v60 }
0x1de2   :  { %v8699_v61 = vpop.f32.mrf.mxu1 }
0x1de3   :  { %v8700_v8 = vadd.f32 %v8699_v61, %v8647_v56  ;;  %v8716_v19 = vadd.f32 %v8698_v49, %v14638_v45 }
0x1de4   :  { %v8701_v57 = vpop.f32.mrf.mxu1 }
0x1de5   :  { %v8717_v24 = vadd.f32 %v8700_v8, %v14635_v59  ;;  %v8702_v0 = vadd.f32 %v8701_v57, %v8649_v22 }
0x1de6   :  { %v8703_v25 = vpop.f32.mrf.mxu1 }
0x1de7   :  { %v8704_v18 = vadd.f32 %v8703_v25, %v8651_v34  ;;  %v8726_v50 = vsel %vm91_vm0, %v8717_v24, 0.0  ;;  %v8718_v46 = vadd.f32 %v8702_v0, %v14647_v6 }
0x1de8   :  { %v8707_v35 = vpop.f32.mrf.mxu1  ;;  %v8727_v14 = vadd.f32 %v8726_v50, %v8716_v19 }
0x1de9   :  { %v8719_v10 = vadd.f32 %v8704_v18, %v14644_v3  ;;  %v8708_v41 = vadd.f32 %v8707_v35, %v8655_v16 }
0x1dea   :  { %v8709_v59 = vpop.f32.mrf.mxu1  ;;  %8728 = vadd.xlane.f32.xlu0 %v8727_v14 }
0x1deb   :  { %v8710_v45 = vadd.f32 %v8709_v59, %v8657_v27  ;;  %v8730_v63 = vsel %vm91_vm0, %v8719_v10, 0.0  ;;  %v8720_v44 = vadd.f32 %v8708_v41, %v14656_v15  ;;  %v11775_v15 = vmov 0   ;;  %v11549_v27 = vld [vmem:[%s15201_s16 + $0x10] sm:$0xff]   ;;  %v11554_v59 = vld [vmem:[%s15201_s16 + $0x48] sm:$0xff]  }
0x1dec   :  { %v8711_v1 = vpop.f32.mrf.mxu1  ;;  %v8731_v36 = vadd.f32 %v8730_v63, %v8718_v46  ;;  %8949 = vmatprep.subr.bf16.mxu0 %v11775_v15  ;;  %v11553_v41 = vld [vmem:[%s15201_s16 + $0x50] sm:$0xff]  }
0x1ded   :  { %v8721_v54 = vadd.f32 %v8710_v45, %v14653_v47  ;;  %v8712_v52 = vadd.f32 %v8711_v1, %v8659_v30  ;;  %v11544_v47 = vld [vmem:[%s15201_s16 + $0x38] sm:$0xff]   ;;  %v11555_v45 = vld [vmem:[%s15201_s16 + $0x40] sm:$0xff]  }
0x1dee   :  { %v8713_v13 = vpop.f32.mrf.mxu1  ;;  %8732 = vadd.xlane.f32.xlu1 %v8731_v36  ;;  %8950 = vmatpush1.bf16.msra.mxu0 %v11544_v47  ;;  %v8725_v47 = vld [vmem:[%s15200_s15] sm:$0x3] }
0x1def   :  { %v8734_v3 = vsel %vm91_vm0, %v8721_v54, 0.0  ;;  %v8714_v6 = vadd.f32 %v8713_v13, %v8661_v38  ;;  %v8722_v43 = vadd.f32 %v8712_v52, %v14665_v4  ;;  %8951 = vmatprep.subr.bf16.mxu0 %v11775_v15  ;;  %v11547_v4 = vld [vmem:[%s15201_s16 + $0x20] sm:$0xff]  }
0x1df0   :  { %v8735_v2 = vadd.f32 %v8734_v3, %v8720_v44 }
0x1df1   :  { %v8723_v33 = vadd.f32 %v8714_v6, %v14662_v20  ;;  %v11546_v20 = vld [vmem:[%s15201_s16 + $0x28] sm:$0xff]   ;;  %v8724_v6 = vld [vmem:[%s15199_s14] sm:$0x3] }
0x1df2   :  { %8736 = vadd.xlane.f32.xlu0 %v8735_v2  ;;  %8952 = vmatpush1.bf16.msra.mxu0 %v11545_v55 }
0x1df3   :  { %v8738_v58 = vsel %vm91_vm0, %v8723_v33, 0.0  ;;  %8953 = vmatprep.subr.bf16.mxu0 %v11775_v15 }
0x1df4   :  { %v8739_v29 = vadd.f32 %v8738_v58, %v8722_v43  ;;  %v8806_v58 = vrot.slane %v8724_v6, %v12117_v12 }
0x1df6   :  { %8740 = vadd.xlane.f32.xlu1 %v8739_v29  ;;  %8954 = vmatpush1.bf16.msra.mxu0 %v11546_v20 }
0x1df7   :  { %8955 = vmatprep.subr.bf16.mxu0 %v11775_v15 }
0x1dfa   :  { %8956 = vmatpush1.bf16.msra.mxu0 %v11547_v4 }
0x1dfb   :  { %8957 = vmatprep.subr.bf16.mxu0 %v11775_v15 }
0x1dfe   :  { %8958 = vmatpush1.bf16.msra.mxu0 %v11548_v37 }
0x1dff   :  { %8959 = vmatprep.subr.bf16.mxu0 %v11775_v15 }
0x1e02   :  { %8960 = vmatpush1.bf16.msra.mxu0 %v11549_v27 }
0x1e03   :  { %8961 = vmatprep.subr.bf16.mxu0 %v11775_v15 }
0x1e06   :  { %8962 = vmatpush1.bf16.msra.mxu0 %v11550_v11 }
0x1e07   :  { %8963 = vmatprep.subr.bf16.mxu0 %v11775_v15 }
0x1e73   :  { %v8729_v42 = vpop.xlane.xlu0 %8728 }
0x1e74   :  { %v8742_v26 = vmul.f32 0.0052083335, %v8729_v42  ;;  %v8821_v42 = vrot.slane %v8725_v47, %v12114_v7 }
0x1e76   :  { %v15092_v23 = vsub.f32 %v8716_v19, %v8742_v26  ;;  %v15094_v31 = vsub.f32 %v8717_v24, %v8742_v26  ;;  %v8825_v26 = vrot.slane %v8725_v47, %v12117_v12 }
0x1e77   :  { %v8733_v62 = vpop.xlane.xlu1 %8732 }
0x1e78   :  { %v8754_v21 = vmul.f32 %v15092_v23, %v15092_v23  ;;  %v8755_v39 = vmul.f32 %v15094_v31, %v15094_v31  ;;  %v8743_v60 = vmul.f32 0.0052083335, %v8733_v62 }
0x1e7a   :  { %v15100_v5 = vsub.f32 %v8718_v46, %v8743_v60  ;;  %v15102_v28 = vsub.f32 %v8719_v10, %v8743_v60  ;;  %v8762_v17 = vsel %vm91_vm0, %v8755_v39, 0.0  ;;  %v11551_v10 = vld [vmem:[%s15201_s16] sm:$0xff]   ;;  %v11552_v46 = vld [vmem:[%s15201_s16 + $0x58] sm:$0xff]  }
0x1e7b   :  { %v8737_v56 = vpop.xlane.xlu0 %8736  ;;  %v8763_v32 = vadd.f32 %v8762_v17, %v8754_v21  ;;  %8964 = vmatpush1.bf16.msra.mxu0 %v11551_v10 }
0x1e7c   :  { %v8756_v49 = vmul.f32 %v15100_v5, %v15100_v5  ;;  %v8757_v61 = vmul.f32 %v15102_v28, %v15102_v28  ;;  %v8744_v8 = vmul.f32 0.0052083335, %v8737_v56  ;;  %8973 = vmatprep.subr.bf16.mxu0 %v11775_v15 }
0x1e7d   :  { %8764 = vadd.xlane.f32.xlu0 %v8763_v32 }
0x1e7e   :  { %v15109_v22 = vsub.f32 %v8720_v44, %v8744_v8  ;;  %v15111_v48 = vsub.f32 %v8721_v54, %v8744_v8  ;;  %v8766_v53 = vsel %vm91_vm0, %v8757_v61, 0.0 }
0x1e7f   :  { %v8741_v57 = vpop.xlane.xlu1 %8740  ;;  %v8767_v34 = vadd.f32 %v8766_v53, %v8756_v49  ;;  %8974 = vmatpush2.bf16.msra.mxu0 %v11552_v46 }
0x1e80   :  { %v8758_v9 = vmul.f32 %v15109_v22, %v15109_v22  ;;  %v8759_v24 = vmul.f32 %v15111_v48, %v15111_v48  ;;  %v8745_v19 = vmul.f32 0.0052083335, %v8741_v57  ;;  %8975 = vmatprep.subr.bf16.mxu0 %v11775_v15 }
0x1e81   :  { %8768 = vadd.xlane.f32.xlu1 %v8767_v34 }
0x1e82   :  { %v15118_v0 = vsub.f32 %v8722_v43, %v8745_v19  ;;  %v15120_v25 = vsub.f32 %v8723_v33, %v8745_v19  ;;  %v8770_v18 = vsel %vm91_vm0, %v8759_v24, 0.0  ;;  %v8802_v43 = vrot.slane %v8724_v6, %v12114_v7 }
0x1e83   :  { %v8771_v50 = vadd.f32 %v8770_v18, %v8758_v9  ;;  %8976 = vmatpush2.bf16.msra.mxu0 %v11553_v41 }
0x1e84   :  { %v8760_v16 = vmul.f32 %v15118_v0, %v15118_v0  ;;  %v8761_v40 = vmul.f32 %v15120_v25, %v15120_v25  ;;  %8977 = vmatprep.subr.bf16.mxu0 %v11775_v15 }
0x1e85   :  { %8772 = vadd.xlane.f32.xlu0 %v8771_v50 }
0x1e86   :  { %v8774_v35 = vsel %vm91_vm0, %v8761_v40, 0.0 }
0x1e87   :  { %v8775_v14 = vadd.f32 %v8774_v35, %v8760_v16  ;;  %8978 = vmatpush2.bf16.msra.mxu0 %v11554_v59 }
0x1e88   :  { %8979 = vmatprep.subr.bf16.mxu0 %v11775_v15 }
0x1e89   :  { %8776 = vadd.xlane.f32.xlu1 %v8775_v14 }
0x1e8b   :  { %8980 = vmatpush2.bf16.msra.mxu0 %v11555_v45 }
0x1f06   :  { %v8765_v63 = vpop.xlane.xlu0 %8764 }
0x1f07   :  { %v8778_v30 = vmul.f32 0.0052083335, %v8765_v63 }
0x1f09   :  { %v8782_v51 = vadd.f32 1e-05, %v8778_v30 }
0x1f0a   :  { %v8769_v1 = vpop.xlane.xlu1 %8768 }
0x1f0b   :  { %11716 = vrsqrt.f32 %v8782_v51  ;;  %v8779_v36 = vmul.f32 0.0052083335, %v8769_v1 }
0x1f0d   :  { %v8783_v38 = vadd.f32 1e-05, %v8779_v36 }
0x1f0e   :  { %v8773_v54 = vpop.xlane.xlu0 %8772 }
0x1f0f   :  { %11718 = vrsqrt.f32 %v8783_v38  ;;  %v8780_v44 = vmul.f32 0.0052083335, %v8773_v54 }
0x1f11   :  { %v8784_v52 = vadd.f32 1e-05, %v8780_v44 }
0x1f12   :  { %v8777_v13 = vpop.xlane.xlu1 %8776 }
0x1f13   :  { %11720 = vrsqrt.f32 %v8784_v52  ;;  %v8781_v3 = vmul.f32 0.0052083335, %v8777_v13 }
0x1f15   :  { %v8785_v2 = vadd.f32 1e-05, %v8781_v3 }
0x1f17   :  { %11722 = vrsqrt.f32 %v8785_v2 }
0x1f18   :  { %v11717_v33 = vpop.eup %11716 }
0x1f19   :  { %v8790_v29 = vmul.f32 %v11717_v33, %v15092_v23  ;;  %v8791_v15 = vmul.f32 %v11717_v33, %v15094_v31 }
0x1f1b   :  { %v8809_v20 = vmul.f32 %v8802_v43, %v8790_v29  ;;  %v8810_v4 = vmul.f32 %v8806_v58, %v8791_v15 }
0x1f1c   :  { %v11719_v55 = vpop.eup %11718 }
0x1f1d   :  { %v8792_v62 = vmul.f32 %v11719_v55, %v15100_v5  ;;  %v8793_v21 = vmul.f32 %v11719_v55, %v15102_v28  ;;  %v8829_v17 = vadd.f32 %v8825_v26, %v8810_v4  ;;  %v8828_v56 = vadd.f32 %v8821_v42, %v8809_v20 }
0x1f1f   :  { %v8811_v39 = vmul.f32 %v8802_v43, %v8792_v62  ;;  %v8812_v60 = vmul.f32 %v8806_v58, %v8793_v21 }
0x1f20   :  { %v11721_v23 = vpop.eup %11720 }
0x1f21   :  { %v8831_v32 = vadd.f32 %v8825_v26, %v8812_v60  ;;  %v8830_v49 = vadd.f32 %v8821_v42, %v8811_v39  ;;  %v8795_v31 = vmul.f32 %v11721_v23, %v15111_v48  ;;  %v8794_v61 = vmul.f32 %v11721_v23, %v15109_v22 }
0x1f23   :  { %v8837_v8 = vpack.c.bf16 %v8831_v32, %v8829_v17  ;;  %v8836_v53 = vpack.c.bf16 %v8830_v49, %v8828_v56  ;;  %v8814_v5 = vmul.f32 %v8806_v58, %v8795_v31  ;;  %v8813_v57 = vmul.f32 %v8802_v43, %v8794_v61 }
0x1f24   :  { %v11723_v7 = vpop.eup %11722 }
0x1f25   :  { %10149 = vmatprep.mubr.msk.bf16.mxu0 %vm91_vm0, %v8837_v8  ;;  %v8797_v12 = vmul.f32 %v11723_v7, %v15120_v25  ;;  %v8796_v28 = vmul.f32 %v11723_v7, %v15118_v0  ;;  %v8833_v24 = vadd.f32 %v8825_v26, %v8814_v5  ;;  %v8832_v18 = vadd.f32 %v8821_v42, %v8813_v57  ;;  %v10136_v25 = vld [vmem:[%s15202_s17] ss:$0 sm:$0xff]  ;;  %s11746_s17 = scalar_lea.vmem %s9008_s27, 512 }
0x1f26   :  { %8982 = vmatmul.mubr.bf16.vlgmr.msra.gmra.mxu0 %v8836_v53  ;;  %p11747_p5 = scmp.ne.s32.totalorder %s9008_s27, %s11746_s17  ;;  %p11752_p7 = scmp.lt.s32.totalorder %s11746_s17, %s11746_s17 }
0x1f27   :  { %v8816_v34 = vmul.f32 %v8806_v58, %v8797_v12  ;;  %v8815_v9 = vmul.f32 %v8802_v43, %v8796_v28 }
0x1f28   :  { %p11753_p8 = por %p11752_p7, %p11751_p6 }
0x1f29   :  { %v8835_v19 = vadd.f32 %v8825_v26, %v8816_v34  ;;  %v8834_v48 = vadd.f32 %v8821_v42, %v8815_v9 }
0x1f2a   :  { %p11754_p9 = pnand %p11753_p8, %p11747_p5 }
0x1f2b   :  { %v8839_v50 = vpack.c.bf16 %v8835_v19, %v8833_v24  ;;  %v8838_v22 = vpack.c.bf16 %v8834_v48, %v8832_v18 }
0x1f2d   :  { %10150 = vmatprep.mubr.msk.bf16.mxu0 %vm91_vm0, %v8839_v50 }
0x1f2e   :  { %8990 = vmatmul.mubr.bf16.gmra.mxu0 %v8838_v22 }
0x1fe6   :  { %v8983_v16 = vpop.f32.mrf.mxu0 }
0x1fe7   :  { %v8984_v40 = vadd.f32 %v10136_v25, %v8983_v16 }
0x1fe8   :  { %v8985_v0 = vpop.f32.mrf.mxu0 }
0x1fe9   :  { %8998 = vst [vmem:[#allocation5] sm:$0xff] %v8984_v40 }
0x1fea   :  { %v8986_v37 = vpop.f32.mrf.mxu0 }
0x1feb   :  { %v8987_v35 = vadd.f32 %v10136_v25, %v8986_v37 }
0x1fec   :  { %v8988_v14 = vpop.f32.mrf.mxu0 }
0x1fed   :  { %8999 = vst [vmem:[#allocation5 + $0x8] sm:$0xff] %v8987_v35 }
0x1fee   :  { %v8991_v27 = vpop.f32.mrf.mxu0 }
0x1fef   :  { %v8992_v11 = vadd.f32 %v10136_v25, %v8991_v27 }
0x1ff0   :  { %v8993_v10 = vpop.f32.mrf.mxu0 }
0x1ff1   :  { %9000 = vst [vmem:[#allocation5 + $0x10] sm:$0xff] %v8992_v11 }
0x1ff2   :  { %v8994_v46 = vpop.f32.mrf.mxu0 }
0x1ff3   :  { %v8995_v41 = vadd.f32 %v10136_v25, %v8994_v46 }
0x1ff4   :  { %v8996_v59 = vpop.f32.mrf.mxu0 }
0x1ff5   :  { %9001 = vst [vmem:[#allocation5 + $0x18] sm:$0xff] %v8995_v41 }
0x1ff6   :  { %11757 = shalt.err (!%p11754_p9)
}
0x1ff7   :  { %s11777_s28 = smov 128   ;;  %s11778_s29 = smov 8  }
0x1ff8   :  { %9013 = dma.vmem_to_hbm [thread:$0]  %s9008_s27, 512, %s15203_s18, [#allocation4], %s11777_s28, %s11777_s28, %s11778_s29  }
0x1ff9   :  { %11768 = dma.done.wait [#allocation4], 512  }
0x1ffa   :  { %11769 = vsyncadd [#allocation4], 4294966784 }
0x1ffb   :  { %9017 = vsyncpa [#allocation3], 1 }
0x1ffc   :  { %9018 = vsyncpa [#allocation4], 1 }

</bundles_post_ra>
